<compile_context>
chip_gen: v7x
topology: tpu7x:2x2x1
jax: 0.10.0
libtpu: 0.0.40
codegen_flags: <defaults>
</compile_context>

<pallas_src>
import functools
import math

import jax
import jax.numpy as jnp
from jax.experimental import pallas as pl
from jax.experimental.pallas import tpu as pltpu


# Batch axis is the only grid axis; explicit scoped-VMEM limit (safe on all
# gens, raises the 16 MiB v5e default).
_CPARAMS = pltpu.CompilerParams(
    dimension_semantics=("parallel",),
    vmem_limit_bytes=32 * 1024 * 1024)


def _full_spec(a):
    """Whole-array block with a constant index map (fetched once, revisited)."""
    nd = a.ndim
    return pl.BlockSpec(a.shape, lambda b, _nd=nd: (0,) * _nd)


# ---------------------------------------------------------------------------
# in-kernel helpers (MXU matmuls bf16 -> f32 accumulation, rest f32)
# ---------------------------------------------------------------------------
def _heads(t, offset, num_heads, d_k):
    """[S, >=offset+H*dk] f32 -> [H, S, dk] bf16, head-major, built in-register
    from static lane slices + a leading-axis stack (no HBM transpose)."""
    return jnp.stack(
        [t[:, offset + h * d_k: offset + (h + 1) * d_k]
         for h in range(num_heads)], axis=0).astype(jnp.bfloat16)


def _mha(q, k, v, woh_ref, bo_ref):
    """q: [H, TQ, dk] bf16 (1/sqrt(dk) already folded into the Q projection),
    k/v: [H, Skv, dk] bf16, woh: [H, dk, D] bf16, bo: [1, D] f32.
    Returns concat(heads) @ W_O + b_O as [TQ, D] f32; heads are contracted
    straight into one f32 accumulator (no [H, TQ, D] intermediate)."""
    s = jnp.einsum('hqd,hkd->hqk', q, k,
                   preferred_element_type=jnp.float32)             # [H,TQ,Skv]
    m = jnp.max(s, axis=-1, keepdims=True)
    e = jnp.exp(s - m)
    p = (e * pl.reciprocal(jnp.sum(e, axis=-1, keepdims=True), approx=True)
         ).astype(jnp.bfloat16)
    ctx = jnp.einsum('hqk,hkd->hqd', p, v,
                     preferred_element_type=jnp.float32).astype(jnp.bfloat16)
    out = bo_ref[...]                                               # [1, D] f32
    for h in range(q.shape[0]):                                     # static, small
        out = out + jnp.dot(ctx[h], woh_ref[h],
                            preferred_element_type=jnp.float32)     # [TQ, D]
    return out


def _layer_norm(x, g_ref, b_ref):
    mu = jnp.mean(x, axis=-1, keepdims=True)
    var = jnp.mean((x - mu) ** 2, axis=-1, keepdims=True)
    return (x - mu) * jax.lax.rsqrt(var + 1e-5) * g_ref[...] + b_ref[...]


def _ffn(x, w1_ref, b1_ref, w2_ref, b2_ref):
    h = jnp.dot(x.astype(jnp.bfloat16), w1_ref[...],
                preferred_element_type=jnp.float32) + b1_ref[...]
    h = jnp.maximum(h, 0.0)
    return jnp.dot(h.astype(jnp.bfloat16), w2_ref[...],
                   preferred_element_type=jnp.float32) + b2_ref[...]


# ---------------------------------------------------------------------------
# kernels (one per layer; grid = (batch,))
# ---------------------------------------------------------------------------
def _make_encoder_kernel(num_heads):
    def kernel(x_ref, wqkv_ref, bqkv_ref, woh_ref, bo_ref,
               g1_ref, be1_ref, w1_ref, b1_ref, w2_ref, b2_ref,
               g2_ref, be2_ref, out_ref):
        xb = x_ref[0]                                   # [S, D] bf16
        x = xb.astype(jnp.float32)
        D = xb.shape[-1]
        dk = D // num_heads
        # fused QKV projection: one [S, 3D] matmul, Q columns pre-scaled
        qkv = jnp.dot(xb, wqkv_ref[...],
                      preferred_element_type=jnp.float32) + bqkv_ref[...]
        attn = _mha(_heads(qkv, 0, num_heads, dk),
                    _heads(qkv, D, num_heads, dk),
                    _heads(qkv, 2 * D, num_heads, dk),
                    woh_ref, bo_ref)
        x1 = _layer_norm(attn + x, g1_ref, be1_ref)
        y = _ffn(x1, w1_ref, b1_ref, w2_ref, b2_ref)
        out_ref[0] = _layer_norm(y + x1, g2_ref, be2_ref).astype(out_ref.dtype)
    return kernel


def _make_decoder_kernel(num_heads):
    def kernel(x_ref, enc_ref,
               wqkv_s_ref, bqkv_s_ref, woh_s_ref, bo_s_ref, g1_ref, be1_ref,
               wq_c_ref, bq_c_ref, wkv_c_ref, bkv_c_ref, woh_c_ref, bo_c_ref,
               g2_ref, be2_ref,
               w1_ref, b1_ref, w2_ref, b2_ref, g3_ref, be3_ref, out_ref):
        xb = x_ref[0]                                   # [St, D] bf16
        x = xb.astype(jnp.float32)
        eb = enc_ref[0]                                 # [Ss, D] bf16
        D = xb.shape[-1]
        dk = D // num_heads
        # "masked" self-attention -- Transformer.forward passes no tgt_mask,
        # so no mask is applied (matches the PyTorch spec).
        qkv = jnp.dot(xb, wqkv_s_ref[...],
                      preferred_element_type=jnp.float32) + bqkv_s_ref[...]
        attn_s = _mha(_heads(qkv, 0, num_heads, dk),
                      _heads(qkv, D, num_heads, dk),
                      _heads(qkv, 2 * D, num_heads, dk),
                      woh_s_ref, bo_s_ref)
        x1 = _layer_norm(attn_s + x, g1_ref, be1_ref)
        # cross attention: Q from x1, K/V from the encoder output (fused KV)
        qc = jnp.dot(x1.astype(jnp.bfloat16), wq_c_ref[...],
                     preferred_element_type=jnp.float32) + bq_c_ref[...]
        kvc = jnp.dot(eb, wkv_c_ref[...],
                      preferred_element_type=jnp.float32) + bkv_c_ref[...]
        attn_c = _mha(_heads(qc, 0, num_heads, dk),
                      _heads(kvc, 0, num_heads, dk),
                      _heads(kvc, D, num_heads, dk),
                      woh_c_ref, bo_c_ref)
        x2 = _layer_norm(attn_c + x1, g2_ref, be2_ref)
        y = _ffn(x2, w1_ref, b1_ref, w2_ref, b2_ref)
        out_ref[0] = _layer_norm(y + x2, g3_ref, be3_ref).astype(out_ref.dtype)
    return kernel


def _linear_kernel(x_ref, w_ref, b_ref, out_ref):
    y = jnp.dot(x_ref[0], w_ref[...],
                preferred_element_type=jnp.float32) + b_ref[...]
    out_ref[0] = y.astype(out_ref.dtype)


# ---------------------------------------------------------------------------
# wrappers
# ---------------------------------------------------------------------------
def encoder_layer(x, p, *, num_heads):
    B, S, D = x.shape
    xspec = pl.BlockSpec((1, S, D), lambda b: (b, 0, 0))
    weights = (p['wqkv'], p['bqkv'], p['woh'], p['bo'], p['g1'], p['be1'],
               p['w1'], p['b1'], p['w2'], p['b2'], p['g2'], p['be2'])
    return pl.pallas_call(
        _make_encoder_kernel(num_heads),
        out_shape=jax.ShapeDtypeStruct((B, S, D), jnp.bfloat16),
        grid=(B,),
        in_specs=[xspec] + [_full_spec(w) for w in weights],
        out_specs=xspec,
        compiler_params=_CPARAMS,
    )(x, *weights)


def decoder_layer(x, enc, p, *, num_heads):
    B, S, D = x.shape
    S_src = enc.shape[1]
    xspec = pl.BlockSpec((1, S, D), lambda b: (b, 0, 0))
    espec = pl.BlockSpec((1, S_src, D), lambda b: (b, 0, 0))
    weights = (p['wqkv_s'], p['bqkv_s'], p['woh_s'], p['bo_s'], p['g1'], p['be1'],
               p['wq_c'], p['bq_c'], p['wkv_c'], p['bkv_c'], p['woh_c'], p['bo_c'],
               p['g2'], p['be2'],
               p['w1'], p['b1'], p['w2'], p['b2'], p['g3'], p['be3'])
    return pl.pallas_call(
        _make_decoder_kernel(num_heads),
        out_shape=jax.ShapeDtypeStruct((B, S, D), jnp.bfloat16),
        grid=(B,),
        in_specs=[xspec, espec] + [_full_spec(w) for w in weights],
        out_specs=xspec,
        compiler_params=_CPARAMS,
    )(x, enc, *weights)


def _output_projection(x, w, b):
    # TODO(synk): tile the vocab (N) dimension with a second grid axis for
    # production vocab sizes (a [1024, 32K] bf16 w_out alone is 64 MiB).
    B, S, D = x.shape
    V = w.shape[1]
    return pl.pallas_call(
        _linear_kernel,
        out_shape=jax.ShapeDtypeStruct((B, S, V), jnp.float32),
        grid=(B,),
        in_specs=[pl.BlockSpec((1, S, D), lambda b: (b, 0, 0)),
                  _full_spec(w), _full_spec(b)],
        out_specs=pl.BlockSpec((1, S, V), lambda b: (b, 0, 0)),
        compiler_params=_CPARAMS,
    )(x, w, b)


def transformer_pallas(src, tgt, params, *, num_heads):
    emb = params['embedding']
    pe = params['pos_encoding']
    # TODO(synk): token-id embedding gather + positional add left to XLA
    # (data-dependent row gather; not the hot path).
    x_src = (emb[src] + pe[None, :src.shape[1], :]).astype(jnp.bfloat16)
    x_tgt = (emb[tgt] + pe[None, :tgt.shape[1], :]).astype(jnp.bfloat16)

    enc = x_src
    for p in params['encoder_layers']:
        enc = encoder_layer(enc, p, num_heads=num_heads)

    dec = x_tgt
    for p in params['decoder_layers']:
        dec = decoder_layer(dec, enc, p, num_heads=num_heads)

    return _output_projection(dec, params['w_out'], params['b_out'])


# ---------------------------------------------------------------------------
# parameter init (deterministic; matmul weights stored bf16, bias/LN f32;
# the 1/sqrt(d_k) scale is folded into Wq / bq at init)
# ---------------------------------------------------------------------------
def _init_linear(key, fan_in, fan_out):
    kw, kb = jax.random.split(key)
    bound = 1.0 / math.sqrt(fan_in)
    w = jax.random.uniform(kw, (fan_in, fan_out), jnp.float32, -bound, bound)
    b = jax.random.uniform(kb, (1, fan_out), jnp.float32, -bound, bound)
    return w, b


def _ln_params(D):
    return jnp.ones((1, D), jnp.float32), jnp.zeros((1, D), jnp.float32)


def _fuse(ws, bs):
    return (jnp.concatenate(ws, axis=1).astype(jnp.bfloat16),
            jnp.concatenate(bs, axis=1))


def init_encoder_layer(key, D, F, H):
    ks = jax.random.split(key, 6)
    scale = 1.0 / math.sqrt(D // H)
    wq, bq = _init_linear(ks[0], D, D)
    wk, bk = _init_linear(ks[1], D, D)
    wv, bv = _init_linear(ks[2], D, D)
    wo, bo = _init_linear(ks[3], D, D)
    w1, b1 = _init_linear(ks[4], D, F)
    w2, b2 = _init_linear(ks[5], F, D)
    wqkv, bqkv = _fuse([wq * scale, wk, wv], [bq * scale, bk, bv])
    g1, be1 = _ln_params(D)
    g2, be2 = _ln_params(D)
    return dict(wqkv=wqkv, bqkv=bqkv,
                woh=wo.astype(jnp.bfloat16).reshape(H, D // H, D), bo=bo,
                w1=w1.astype(jnp.bfloat16), b1=b1,
                w2=w2.astype(jnp.bfloat16), b2=b2,
                g1=g1, be1=be1, g2=g2, be2=be2)


def init_decoder_layer(key, D, F, H):
    ks = jax.random.split(key, 10)
    scale = 1.0 / math.sqrt(D // H)
    wq_s, bq_s = _init_linear(ks[0], D, D)
    wk_s, bk_s = _init_linear(ks[1], D, D)
    wv_s, bv_s = _init_linear(ks[2], D, D)
    wo_s, bo_s = _init_linear(ks[3], D, D)
    wq_c, bq_c = _init_linear(ks[4], D, D)
    wk_c, bk_c = _init_linear(ks[5], D, D)
    wv_c, bv_c = _init_linear(ks[6], D, D)
    wo_c, bo_c = _init_linear(ks[7], D, D)
    w1, b1 = _init_linear(ks[8], D, F)
    w2, b2 = _init_linear(ks[9], F, D)
    wqkv_s, bqkv_s = _fuse([wq_s * scale, wk_s, wv_s], [bq_s * scale, bk_s, bv_s])
    wkv_c, bkv_c = _fuse([wk_c, wv_c], [bk_c, bv_c])
    g1, be1 = _ln_params(D)
    g2, be2 = _ln_params(D)
    g3, be3 = _ln_params(D)
    return dict(wqkv_s=wqkv_s, bqkv_s=bqkv_s,
                woh_s=wo_s.astype(jnp.bfloat16).reshape(H, D // H, D), bo_s=bo_s,
                wq_c=(wq_c * scale).astype(jnp.bfloat16), bq_c=bq_c * scale,
                wkv_c=wkv_c, bkv_c=bkv_c,
                woh_c=wo_c.astype(jnp.bfloat16).reshape(H, D // H, D), bo_c=bo_c,
                w1=w1.astype(jnp.bfloat16), b1=b1,
                w2=w2.astype(jnp.bfloat16), b2=b2,
                g1=g1, be1=be1, g2=g2, be2=be2, g3=g3, be3=be3)


def positional_encoding(max_len, D):
    pos = jnp.arange(max_len, dtype=jnp.float32)[:, None]
    div = jnp.exp(jnp.arange(0, D, 2, dtype=jnp.float32) * (-math.log(10000.0) / D))
    pe = jnp.zeros((max_len, D), jnp.float32)
    pe = pe.at[:, 0::2].set(jnp.sin(pos * div))
    pe = pe.at[:, 1::2].set(jnp.cos(pos * div))
    return pe


def init_transformer(key, vocab, D, F, H, num_layers, max_len):
    k_emb, k_enc, k_dec, k_out = jax.random.split(key, 4)
    w_out, b_out = _init_linear(k_out, D, vocab)
    return dict(
        embedding=jax.random.normal(k_emb, (vocab, D), jnp.float32),
        pos_encoding=positional_encoding(max_len, D),
        encoder_layers=[init_encoder_layer(k, D, F, H)
                        for k in jax.random.split(k_enc, num_layers)],
        decoder_layers=[init_decoder_layer(k, D, F, H)
                        for k in jax.random.split(k_dec, num_layers)],
        w_out=w_out.astype(jnp.bfloat16), b_out=b_out)


# ---------------------------------------------------------------------------
# pure-JAX references
# ---------------------------------------------------------------------------
def ref_transformer(src, tgt, params, num_heads, *, matched):
    """matched=True mimics the kernel's quantization (bf16 MXU operands, bf16
    inter-layer activations, f32 accumulation); matched=False is the plain f32
    PyTorch-style forward (weights upcast from their bf16 storage)."""
    emb, pe = params['embedding'], params['pos_encoding']
    D = emb.shape[1]
    dk = D // num_heads

    if matched:
        act = lambda a: a.astype(jnp.bfloat16)
        wz = lambda w: w
    else:
        act = lambda a: a
        wz = lambda w: w.astype(jnp.float32)
    hp = dict(preferred_element_type=jnp.float32,
              precision=jax.lax.Precision.HIGHEST)

    def lin(x, w, b):
        return jnp.einsum('bsd,df->bsf', act(x), wz(w), **hp) + b

    def split(t):
        B, S, _ = t.shape
        return t.reshape(B, S, num_heads, dk).transpose(0, 2, 1, 3)

    def mha_core(q, k, v, woh, bo):
        q, k, v = split(q), split(k), split(v)
        s = jnp.einsum('bhqd,bhkd->bhqk', q, k, **hp)
        p = jax.nn.softmax(s, axis=-1)
        ctx = jnp.einsum('bhqk,bhkd->bhqd', act(p), act(v), **hp)
        B, H, Sq, _ = ctx.shape
        ctx = ctx.transpose(0, 2, 1, 3).reshape(B, Sq, D)
        return lin(ctx, woh.reshape(D, D), bo)

    def self_attn(x, wqkv, bqkv, woh, bo):
        qkv = lin(x, wqkv, bqkv)
        return mha_core(act(qkv[..., :D]), act(qkv[..., D:2 * D]),
                        act(qkv[..., 2 * D:]), woh, bo)

    def cross_attn(xq, xkv, wq, bq, wkv, bkv, woh, bo):
        q = act(lin(xq, wq, bq))
        kv = lin(xkv, wkv, bkv)
        return mha_core(q, act(kv[..., :D]), act(kv[..., D:]), woh, bo)

    def ln(x, g, b):
        mu = jnp.mean(x, axis=-1, keepdims=True)
        var = jnp.mean((x - mu) ** 2, axis=-1, keepdims=True)
        return (x - mu) * jax.lax.rsqrt(var + 1e-5) * g + b

    def ffn(x, w1, b1, w2, b2):
        return lin(jnp.maximum(lin(x, w1, b1), 0.0), w2, b2)

    enc = act(emb[src] + pe[None, :src.shape[1], :])
    dec = act(emb[tgt] + pe[None, :tgt.shape[1], :])

    for p in params['encoder_layers']:
        a = self_attn(enc, p['wqkv'], p['bqkv'], p['woh'], p['bo'])
        x1 = ln(a + enc, p['g1'], p['be1'])
        enc = act(ln(ffn(x1, p['w1'], p['b1'], p['w2'], p['b2']) + x1,
                     p['g2'], p['be2']))

    for p in params['decoder_layers']:
        a = self_attn(dec, p['wqkv_s'], p['bqkv_s'], p['woh_s'], p['bo_s'])
        x1 = ln(a + dec, p['g1'], p['be1'])
        c = cross_attn(x1, enc, p['wq_c'], p['bq_c'], p['wkv_c'], p['bkv_c'],
                       p['woh_c'], p['bo_c'])
        x2 = ln(c + x1, p['g2'], p['be2'])
        dec = act(ln(ffn(x2, p['w1'], p['b1'], p['w2'], p['b2']) + x2,
                     p['g3'], p['be3']))

    return lin(dec, params['w_out'], params['b_out'])


if __name__ == "__main__":
    # Small, lane-dense config: D, FF, vocab multiples of 128.
    B, S, D = 2, 32, 128
    NUM_HEADS, FF_DIM, NUM_LAYERS = 4, 256, 2
    VOCAB, MAX_LEN = 256, 64

    root = jax.random.PRNGKey(0)
    kp, ksrc, ktgt = jax.random.split(root, 3)
    params = init_transformer(kp, VOCAB, D, FF_DIM, NUM_HEADS, NUM_LAYERS, MAX_LEN)
    src = jax.random.randint(ksrc, (B, S), 0, VOCAB, dtype=jnp.int32)
    tgt = jax.random.randint(ktgt, (B, S), 0, VOCAB, dtype=jnp.int32)

    fwd = jax.jit(functools.partial(transformer_pallas, num_heads=NUM_HEADS))
    out = jax.block_until_ready(fwd(src, tgt, params))
    assert out.shape == (B, S, VOCAB)

    # Tight check vs a matched-precision (bf16 operands / bf16 carried
    # activations, f32 accumulation) pure-JAX reference -> kernel semantics.
    ref_m = ref_transformer(src, tgt, params, NUM_HEADS, matched=True)
    max_diff = float(jnp.max(jnp.abs(out - ref_m)))
    assert jnp.allclose(out, ref_m, rtol=3e-2, atol=3e-2), (
        f"mismatch vs matched-precision reference, max abs diff = {max_diff}")

    # Looser check vs the plain f32 (PyTorch-semantics) reference.
    ref_f = ref_transformer(src, tgt, params, NUM_HEADS, matched=False)
    rel = float(jnp.sqrt(jnp.sum((out - ref_f) ** 2) / jnp.sum(ref_f ** 2)))
    assert rel < 0.1, f"relative L2 error vs f32 reference too large: {rel}"

    print("KERNEL_OK")
</pallas_src>

<mosaic_0001>
module attributes {stable_mosaic.version = 11 : i64} {
  func.func @kernel(%arg0: i32, %arg1: memref<1x32x128xbf16, #tpu.memory_space<vmem>>, %arg2: memref<128x384xbf16, #tpu.memory_space<vmem>>, %arg3: memref<1x384xf32, #tpu.memory_space<vmem>>, %arg4: memref<4x32x128xbf16, #tpu.memory_space<vmem>>, %arg5: memref<1x128xf32, #tpu.memory_space<vmem>>, %arg6: memref<1x128xf32, #tpu.memory_space<vmem>>, %arg7: memref<1x128xf32, #tpu.memory_space<vmem>>, %arg8: memref<128x256xbf16, #tpu.memory_space<vmem>>, %arg9: memref<1x256xf32, #tpu.memory_space<vmem>>, %arg10: memref<256x128xbf16, #tpu.memory_space<vmem>>, %arg11: memref<1x128xf32, #tpu.memory_space<vmem>>, %arg12: memref<1x128xf32, #tpu.memory_space<vmem>>, %arg13: memref<1x128xf32, #tpu.memory_space<vmem>>, %arg14: memref<1x32x128xbf16, #tpu.memory_space<vmem>>) attributes {dimension_semantics = [#tpu.dimension_semantics<parallel>], iteration_bounds = array<i64: 2>, scalar_prefetch = 0 : i64, scratch_operands = 0 : i64, tpu.core_type = #tpu.core_type<tc>, window_params = [{transform_indices = @transform_0, window_bounds = array<i64: 1, 32, 128>}, {pipeline_mode = #tpu.pipeline_mode<synchronous>, transform_indices = @transform_1, window_bounds = array<i64: 128, 384>}, {pipeline_mode = #tpu.pipeline_mode<synchronous>, transform_indices = @transform_2, window_bounds = array<i64: 1, 384>}, {pipeline_mode = #tpu.pipeline_mode<synchronous>, transform_indices = @transform_3, window_bounds = array<i64: 4, 32, 128>}, {pipeline_mode = #tpu.pipeline_mode<synchronous>, transform_indices = @transform_4, window_bounds = array<i64: 1, 128>}, {pipeline_mode = #tpu.pipeline_mode<synchronous>, transform_indices = @transform_5, window_bounds = array<i64: 1, 128>}, {pipeline_mode = #tpu.pipeline_mode<synchronous>, transform_indices = @transform_6, window_bounds = array<i64: 1, 128>}, {pipeline_mode = #tpu.pipeline_mode<synchronous>, transform_indices = @transform_7, window_bounds = array<i64: 128, 256>}, {pipeline_mode = #tpu.pipeline_mode<synchronous>, transform_indices = @transform_8, window_bounds = array<i64: 1, 256>}, {pipeline_mode = #tpu.pipeline_mode<synchronous>, transform_indices = @transform_9, window_bounds = array<i64: 256, 128>}, {pipeline_mode = #tpu.pipeline_mode<synchronous>, transform_indices = @transform_10, window_bounds = array<i64: 1, 128>}, {pipeline_mode = #tpu.pipeline_mode<synchronous>, transform_indices = @transform_11, window_bounds = array<i64: 1, 128>}, {pipeline_mode = #tpu.pipeline_mode<synchronous>, transform_indices = @transform_12, window_bounds = array<i64: 1, 128>}, {transform_indices = @transform_13, window_bounds = array<i64: 1, 32, 128>}]} {
    %c0 = arith.constant 0 : index
    %c0_0 = arith.constant 0 : index
    %c0_1 = arith.constant 0 : index
    %0 = vector.load %arg1[%c0, %c0_0, %c0_1] : memref<1x32x128xbf16, #tpu.memory_space<vmem>>, vector<1x32x128xbf16>
    %1 = vector.shape_cast %0 : vector<1x32x128xbf16> to vector<32x128xbf16>
    %2 = arith.extf %1 : vector<32x128xbf16> to vector<32x128xf32>
    %c0_2 = arith.constant 0 : index
    %c0_3 = arith.constant 0 : index
    %3 = vector.load %arg2[%c0_2, %c0_3] : memref<128x384xbf16, #tpu.memory_space<vmem>>, vector<128x384xbf16>
    %cst = arith.constant dense<0.000000e+00> : vector<32x384xf32>
    %4 = tpu.matmul %1, %3, %cst {dimension_numbers = #tpu.dot_dimension_numbers<[1], [0], [0], [1], [0, 0, 1, 1], [], []>} : vector<32x128xbf16>, vector<128x384xbf16>, vector<32x384xf32> -> vector<32x384xf32>
    %c0_4 = arith.constant 0 : index
    %c0_5 = arith.constant 0 : index
    %5 = vector.load %arg3[%c0_4, %c0_5] : memref<1x384xf32, #tpu.memory_space<vmem>>, vector<1x384xf32>
    %6 = vector.broadcast %5 : vector<1x384xf32> to vector<32x384xf32>
    %7 = arith.addf %4, %6 : vector<32x384xf32>
    %8 = vector.extract_strided_slice %7 {offsets = [0, 0], sizes = [32, 32], strides = [1, 1]} : vector<32x384xf32> to vector<32x32xf32>
    %9 = vector.extract_strided_slice %7 {offsets = [0, 32], sizes = [32, 32], strides = [1, 1]} : vector<32x384xf32> to vector<32x32xf32>
    %10 = vector.extract_strided_slice %7 {offsets = [0, 64], sizes = [32, 32], strides = [1, 1]} : vector<32x384xf32> to vector<32x32xf32>
    %11 = vector.extract_strided_slice %7 {offsets = [0, 96], sizes = [32, 32], strides = [1, 1]} : vector<32x384xf32> to vector<32x32xf32>
    %12 = vector.shape_cast %8 : vector<32x32xf32> to vector<1x32x32xf32>
    %13 = vector.shape_cast %9 : vector<32x32xf32> to vector<1x32x32xf32>
    %14 = vector.shape_cast %10 : vector<32x32xf32> to vector<1x32x32xf32>
    %15 = vector.shape_cast %11 : vector<32x32xf32> to vector<1x32x32xf32>
    %16 = tpu.concatenate %12, %13, %14, %15 in 0 : vector<1x32x32xf32>, vector<1x32x32xf32>, vector<1x32x32xf32>, vector<1x32x32xf32> -> vector<4x32x32xf32>
    %17 = arith.truncf %16 : vector<4x32x32xf32> to vector<4x32x32xbf16>
    %18 = vector.extract_strided_slice %7 {offsets = [0, 128], sizes = [32, 32], strides = [1, 1]} : vector<32x384xf32> to vector<32x32xf32>
    %19 = vector.extract_strided_slice %7 {offsets = [0, 160], sizes = [32, 32], strides = [1, 1]} : vector<32x384xf32> to vector<32x32xf32>
    %20 = vector.extract_strided_slice %7 {offsets = [0, 192], sizes = [32, 32], strides = [1, 1]} : vector<32x384xf32> to vector<32x32xf32>
    %21 = vector.extract_strided_slice %7 {offsets = [0, 224], sizes = [32, 32], strides = [1, 1]} : vector<32x384xf32> to vector<32x32xf32>
    %22 = vector.shape_cast %18 : vector<32x32xf32> to vector<1x32x32xf32>
    %23 = vector.shape_cast %19 : vector<32x32xf32> to vector<1x32x32xf32>
    %24 = vector.shape_cast %20 : vector<32x32xf32> to vector<1x32x32xf32>
    %25 = vector.shape_cast %21 : vector<32x32xf32> to vector<1x32x32xf32>
    %26 = tpu.concatenate %22, %23, %24, %25 in 0 : vector<1x32x32xf32>, vector<1x32x32xf32>, vector<1x32x32xf32>, vector<1x32x32xf32> -> vector<4x32x32xf32>
    %27 = arith.truncf %26 : vector<4x32x32xf32> to vector<4x32x32xbf16>
    %28 = vector.extract_strided_slice %7 {offsets = [0, 256], sizes = [32, 32], strides = [1, 1]} : vector<32x384xf32> to vector<32x32xf32>
    %29 = vector.extract_strided_slice %7 {offsets = [0, 288], sizes = [32, 32], strides = [1, 1]} : vector<32x384xf32> to vector<32x32xf32>
    %30 = vector.extract_strided_slice %7 {offsets = [0, 320], sizes = [32, 32], strides = [1, 1]} : vector<32x384xf32> to vector<32x32xf32>
    %31 = vector.extract_strided_slice %7 {offsets = [0, 352], sizes = [32, 32], strides = [1, 1]} : vector<32x384xf32> to vector<32x32xf32>
    %32 = vector.shape_cast %28 : vector<32x32xf32> to vector<1x32x32xf32>
    %33 = vector.shape_cast %29 : vector<32x32xf32> to vector<1x32x32xf32>
    %34 = vector.shape_cast %30 : vector<32x32xf32> to vector<1x32x32xf32>
    %35 = vector.shape_cast %31 : vector<32x32xf32> to vector<1x32x32xf32>
    %36 = tpu.concatenate %32, %33, %34, %35 in 0 : vector<1x32x32xf32>, vector<1x32x32xf32>, vector<1x32x32xf32>, vector<1x32x32xf32> -> vector<4x32x32xf32>
    %37 = arith.truncf %36 : vector<4x32x32xf32> to vector<4x32x32xbf16>
    "tpu.trace_start"() <{level = 10 : i32, message = "hqd,hkd->hqk"}> : () -> ()
    %cst_6 = arith.constant dense<0.000000e+00> : vector<4x32x32xf32>
    %38 = tpu.matmul %17, %27, %cst_6 {dimension_numbers = #tpu.dot_dimension_numbers<[2], [2], [1], [1], [0, 0, 0, 1, 1, 1], [0], [0]>} : vector<4x32x32xbf16>, vector<4x32x32xbf16>, vector<4x32x32xf32> -> vector<4x32x32xf32>
    "tpu.trace_stop"() : () -> ()
    %cst_7 = arith.constant dense<0xFF800000> : vector<4x32xf32>
    %39 = vector.multi_reduction <maximumf>, %38, %cst_7 [2] : vector<4x32x32xf32> to vector<4x32xf32>
    %40 = vector.shape_cast %39 : vector<4x32xf32> to vector<4x32x1xf32>
    %41 = vector.broadcast %40 : vector<4x32x1xf32> to vector<4x32x32xf32>
    %42 = arith.subf %38, %41 : vector<4x32x32xf32>
    %43 = math.exp %42 : vector<4x32x32xf32>
    %cst_8 = arith.constant dense<0.000000e+00> : vector<4x32xf32>
    %44 = vector.multi_reduction <add>, %43, %cst_8 [2] : vector<4x32x32xf32> to vector<4x32xf32>
    %45 = vector.shape_cast %44 : vector<4x32xf32> to vector<4x32x1xf32>
    %46 = tpu.reciprocal %45 {approx = true} : vector<4x32x1xf32> -> vector<4x32x1xf32>
    %47 = vector.broadcast %46 : vector<4x32x1xf32> to vector<4x32x32xf32>
    %48 = arith.mulf %43, %47 : vector<4x32x32xf32>
    %49 = arith.truncf %48 : vector<4x32x32xf32> to vector<4x32x32xbf16>
    "tpu.trace_start"() <{level = 10 : i32, message = "hqk,hkd->hqd"}> : () -> ()
    %cst_9 = arith.constant dense<0.000000e+00> : vector<4x32x32xf32>
    %50 = tpu.matmul %49, %37, %cst_9 {dimension_numbers = #tpu.dot_dimension_numbers<[2], [1], [1], [2], [0, 0, 0, 1, 1, 2], [0], [0]>} : vector<4x32x32xbf16>, vector<4x32x32xbf16>, vector<4x32x32xf32> -> vector<4x32x32xf32>
    "tpu.trace_stop"() : () -> ()
    %51 = arith.truncf %50 : vector<4x32x32xf32> to vector<4x32x32xbf16>
    %c0_10 = arith.constant 0 : index
    %c0_11 = arith.constant 0 : index
    %52 = vector.load %arg5[%c0_10, %c0_11] : memref<1x128xf32, #tpu.memory_space<vmem>>, vector<1x128xf32>
    %53 = vector.extract_strided_slice %51 {offsets = [0, 0, 0], sizes = [1, 32, 32], strides = [1, 1, 1]} : vector<4x32x32xbf16> to vector<1x32x32xbf16>
    %54 = vector.shape_cast %53 : vector<1x32x32xbf16> to vector<32x32xbf16>
    %c0_12 = arith.constant 0 : index
    %c0_13 = arith.constant 0 : index
    %c0_14 = arith.constant 0 : index
    %55 = vector.load %arg4[%c0_12, %c0_13, %c0_14] : memref<4x32x128xbf16, #tpu.memory_space<vmem>>, vector<1x32x128xbf16>
    %56 = vector.shape_cast %55 : vector<1x32x128xbf16> to vector<32x128xbf16>
    %cst_15 = arith.constant dense<0.000000e+00> : vector<32x128xf32>
    %57 = tpu.matmul %54, %56, %cst_15 {dimension_numbers = #tpu.dot_dimension_numbers<[1], [0], [0], [1], [0, 0, 1, 1], [], []>} : vector<32x32xbf16>, vector<32x128xbf16>, vector<32x128xf32> -> vector<32x128xf32>
    %58 = vector.broadcast %52 : vector<1x128xf32> to vector<32x128xf32>
    %59 = arith.addf %58, %57 : vector<32x128xf32>
    %60 = vector.extract_strided_slice %51 {offsets = [1, 0, 0], sizes = [1, 32, 32], strides = [1, 1, 1]} : vector<4x32x32xbf16> to vector<1x32x32xbf16>
    %61 = vector.shape_cast %60 : vector<1x32x32xbf16> to vector<32x32xbf16>
    %c1 = arith.constant 1 : index
    %c0_16 = arith.constant 0 : index
    %c0_17 = arith.constant 0 : index
    %62 = vector.load %arg4[%c1, %c0_16, %c0_17] : memref<4x32x128xbf16, #tpu.memory_space<vmem>>, vector<1x32x128xbf16>
    %63 = vector.shape_cast %62 : vector<1x32x128xbf16> to vector<32x128xbf16>
    %cst_18 = arith.constant dense<0.000000e+00> : vector<32x128xf32>
    %64 = tpu.matmul %61, %63, %cst_18 {dimension_numbers = #tpu.dot_dimension_numbers<[1], [0], [0], [1], [0, 0, 1, 1], [], []>} : vector<32x32xbf16>, vector<32x128xbf16>, vector<32x128xf32> -> vector<32x128xf32>
    %65 = arith.addf %59, %64 : vector<32x128xf32>
    %66 = vector.extract_strided_slice %51 {offsets = [2, 0, 0], sizes = [1, 32, 32], strides = [1, 1, 1]} : vector<4x32x32xbf16> to vector<1x32x32xbf16>
    %67 = vector.shape_cast %66 : vector<1x32x32xbf16> to vector<32x32xbf16>
    %c2 = arith.constant 2 : index
    %c0_19 = arith.constant 0 : index
    %c0_20 = arith.constant 0 : index
    %68 = vector.load %arg4[%c2, %c0_19, %c0_20] : memref<4x32x128xbf16, #tpu.memory_space<vmem>>, vector<1x32x128xbf16>
    %69 = vector.shape_cast %68 : vector<1x32x128xbf16> to vector<32x128xbf16>
    %cst_21 = arith.constant dense<0.000000e+00> : vector<32x128xf32>
    %70 = tpu.matmul %67, %69, %cst_21 {dimension_numbers = #tpu.dot_dimension_numbers<[1], [0], [0], [1], [0, 0, 1, 1], [], []>} : vector<32x32xbf16>, vector<32x128xbf16>, vector<32x128xf32> -> vector<32x128xf32>
    %71 = arith.addf %65, %70 : vector<32x128xf32>
    %72 = vector.extract_strided_slice %51 {offsets = [3, 0, 0], sizes = [1, 32, 32], strides = [1, 1, 1]} : vector<4x32x32xbf16> to vector<1x32x32xbf16>
    %73 = vector.shape_cast %72 : vector<1x32x32xbf16> to vector<32x32xbf16>
    %c3 = arith.constant 3 : index
    %c0_22 = arith.constant 0 : index
    %c0_23 = arith.constant 0 : index
    %74 = vector.load %arg4[%c3, %c0_22, %c0_23] : memref<4x32x128xbf16, #tpu.memory_space<vmem>>, vector<1x32x128xbf16>
    %75 = vector.shape_cast %74 : vector<1x32x128xbf16> to vector<32x128xbf16>
    %cst_24 = arith.constant dense<0.000000e+00> : vector<32x128xf32>
    %76 = tpu.matmul %73, %75, %cst_24 {dimension_numbers = #tpu.dot_dimension_numbers<[1], [0], [0], [1], [0, 0, 1, 1], [], []>} : vector<32x32xbf16>, vector<32x128xbf16>, vector<32x128xf32> -> vector<32x128xf32>
    %77 = arith.addf %71, %76 : vector<32x128xf32>
    %78 = arith.addf %77, %2 : vector<32x128xf32>
    %cst_25 = arith.constant dense<0.000000e+00> : vector<32xf32>
    %79 = vector.multi_reduction <add>, %78, %cst_25 [1] : vector<32x128xf32> to vector<32xf32>
    %80 = vector.shape_cast %79 : vector<32xf32> to vector<32x1xf32>
    %cst_26 = arith.constant 1.280000e+02 : f32
    %81 = vector.broadcast %cst_26 : f32 to vector<32x1xf32>
    %82 = arith.divf %80, %81 : vector<32x1xf32>
    %83 = vector.broadcast %82 : vector<32x1xf32> to vector<32x128xf32>
    %84 = arith.subf %78, %83 : vector<32x128xf32>
    %85 = arith.mulf %84, %84 : vector<32x128xf32>
    %cst_27 = arith.constant dense<0.000000e+00> : vector<32xf32>
    %86 = vector.multi_reduction <add>, %85, %cst_27 [1] : vector<32x128xf32> to vector<32xf32>
    %87 = vector.shape_cast %86 : vector<32xf32> to vector<32x1xf32>
    %cst_28 = arith.constant 1.280000e+02 : f32
    %88 = vector.broadcast %cst_28 : f32 to vector<32x1xf32>
    %89 = arith.divf %87, %88 : vector<32x1xf32>
    %90 = vector.broadcast %82 : vector<32x1xf32> to vector<32x128xf32>
    %91 = arith.subf %78, %90 : vector<32x128xf32>
    %cst_29 = arith.constant 9.99999974E-6 : f32
    %92 = vector.broadcast %cst_29 : f32 to vector<32x1xf32>
    %93 = arith.addf %89, %92 : vector<32x1xf32>
    %94 = math.rsqrt %93 : vector<32x1xf32>
    %95 = vector.broadcast %94 : vector<32x1xf32> to vector<32x128xf32>
    %96 = arith.mulf %91, %95 : vector<32x128xf32>
    %c0_30 = arith.constant 0 : index
    %c0_31 = arith.constant 0 : index
    %97 = vector.load %arg6[%c0_30, %c0_31] : memref<1x128xf32, #tpu.memory_space<vmem>>, vector<1x128xf32>
    %98 = vector.broadcast %97 : vector<1x128xf32> to vector<32x128xf32>
    %99 = arith.mulf %96, %98 : vector<32x128xf32>
    %c0_32 = arith.constant 0 : index
    %c0_33 = arith.constant 0 : index
    %100 = vector.load %arg7[%c0_32, %c0_33] : memref<1x128xf32, #tpu.memory_space<vmem>>, vector<1x128xf32>
    %101 = vector.broadcast %100 : vector<1x128xf32> to vector<32x128xf32>
    %102 = arith.addf %99, %101 : vector<32x128xf32>
    %103 = arith.truncf %102 : vector<32x128xf32> to vector<32x128xbf16>
    %c0_34 = arith.constant 0 : index
    %c0_35 = arith.constant 0 : index
    %104 = vector.load %arg8[%c0_34, %c0_35] : memref<128x256xbf16, #tpu.memory_space<vmem>>, vector<128x256xbf16>
    %cst_36 = arith.constant dense<0.000000e+00> : vector<32x256xf32>
    %105 = tpu.matmul %103, %104, %cst_36 {dimension_numbers = #tpu.dot_dimension_numbers<[1], [0], [0], [1], [0, 0, 1, 1], [], []>} : vector<32x128xbf16>, vector<128x256xbf16>, vector<32x256xf32> -> vector<32x256xf32>
    %c0_37 = arith.constant 0 : index
    %c0_38 = arith.constant 0 : index
    %106 = vector.load %arg9[%c0_37, %c0_38] : memref<1x256xf32, #tpu.memory_space<vmem>>, vector<1x256xf32>
    %107 = vector.broadcast %106 : vector<1x256xf32> to vector<32x256xf32>
    %108 = arith.addf %105, %107 : vector<32x256xf32>
    %cst_39 = arith.constant 0.000000e+00 : f32
    %109 = vector.broadcast %cst_39 : f32 to vector<32x256xf32>
    %110 = arith.maximumf %108, %109 : vector<32x256xf32>
    %111 = arith.truncf %110 : vector<32x256xf32> to vector<32x256xbf16>
    %c0_40 = arith.constant 0 : index
    %c0_41 = arith.constant 0 : index
    %112 = vector.load %arg10[%c0_40, %c0_41] : memref<256x128xbf16, #tpu.memory_space<vmem>>, vector<256x128xbf16>
    %cst_42 = arith.constant dense<0.000000e+00> : vector<32x128xf32>
    %113 = tpu.matmul %111, %112, %cst_42 {dimension_numbers = #tpu.dot_dimension_numbers<[1], [0], [0], [1], [0, 0, 1, 1], [], []>} : vector<32x256xbf16>, vector<256x128xbf16>, vector<32x128xf32> -> vector<32x128xf32>
    %c0_43 = arith.constant 0 : index
    %c0_44 = arith.constant 0 : index
    %114 = vector.load %arg11[%c0_43, %c0_44] : memref<1x128xf32, #tpu.memory_space<vmem>>, vector<1x128xf32>
    %115 = vector.broadcast %114 : vector<1x128xf32> to vector<32x128xf32>
    %116 = arith.addf %113, %115 : vector<32x128xf32>
    %117 = arith.addf %116, %102 : vector<32x128xf32>
    %cst_45 = arith.constant dense<0.000000e+00> : vector<32xf32>
    %118 = vector.multi_reduction <add>, %117, %cst_45 [1] : vector<32x128xf32> to vector<32xf32>
    %119 = vector.shape_cast %118 : vector<32xf32> to vector<32x1xf32>
    %cst_46 = arith.constant 1.280000e+02 : f32
    %120 = vector.broadcast %cst_46 : f32 to vector<32x1xf32>
    %121 = arith.divf %119, %120 : vector<32x1xf32>
    %122 = vector.broadcast %121 : vector<32x1xf32> to vector<32x128xf32>
    %123 = arith.subf %117, %122 : vector<32x128xf32>
    %124 = arith.mulf %123, %123 : vector<32x128xf32>
    %cst_47 = arith.constant dense<0.000000e+00> : vector<32xf32>
    %125 = vector.multi_reduction <add>, %124, %cst_47 [1] : vector<32x128xf32> to vector<32xf32>
    %126 = vector.shape_cast %125 : vector<32xf32> to vector<32x1xf32>
    %cst_48 = arith.constant 1.280000e+02 : f32
    %127 = vector.broadcast %cst_48 : f32 to vector<32x1xf32>
    %128 = arith.divf %126, %127 : vector<32x1xf32>
    %129 = vector.broadcast %121 : vector<32x1xf32> to vector<32x128xf32>
    %130 = arith.subf %117, %129 : vector<32x128xf32>
    %cst_49 = arith.constant 9.99999974E-6 : f32
    %131 = vector.broadcast %cst_49 : f32 to vector<32x1xf32>
    %132 = arith.addf %128, %131 : vector<32x1xf32>
    %133 = math.rsqrt %132 : vector<32x1xf32>
    %134 = vector.broadcast %133 : vector<32x1xf32> to vector<32x128xf32>
    %135 = arith.mulf %130, %134 : vector<32x128xf32>
    %c0_50 = arith.constant 0 : index
    %c0_51 = arith.constant 0 : index
    %136 = vector.load %arg12[%c0_50, %c0_51] : memref<1x128xf32, #tpu.memory_space<vmem>>, vector<1x128xf32>
    %137 = vector.broadcast %136 : vector<1x128xf32> to vector<32x128xf32>
    %138 = arith.mulf %135, %137 : vector<32x128xf32>
    %c0_52 = arith.constant 0 : index
    %c0_53 = arith.constant 0 : index
    %139 = vector.load %arg13[%c0_52, %c0_53] : memref<1x128xf32, #tpu.memory_space<vmem>>, vector<1x128xf32>
    %140 = vector.broadcast %139 : vector<1x128xf32> to vector<32x128xf32>
    %141 = arith.addf %138, %140 : vector<32x128xf32>
    %142 = arith.truncf %141 : vector<32x128xf32> to vector<32x128xbf16>
    %c0_54 = arith.constant 0 : index
    %c0_55 = arith.constant 0 : index
    %c0_56 = arith.constant 0 : index
    %143 = vector.load %arg14[%c0_54, %c0_55, %c0_56] : memref<1x32x128xbf16, #tpu.memory_space<vmem>>, vector<1x32x128xbf16>
    %144 = vector.shape_cast %143 : vector<1x32x128xbf16> to vector<32x128xbf16>
    %145 = vector.shape_cast %142 : vector<32x128xbf16> to vector<1x32x128xbf16>
    tpu.vector_store %arg14[%c0_54, %c0_55, %c0_56], %145 {strides = array<i32>} : memref<1x32x128xbf16, #tpu.memory_space<vmem>>, vector<1x32x128xbf16>,
    return
  }
  func.func @transform_0(%arg0: i32) -> (i32, i32, i32) {
    %c0_i32 = arith.constant 0 : i32
    %c0_i32_0 = arith.constant 0 : i32
    %c0_i32_1 = arith.constant 0 : i32
    return %arg0, %c0_i32, %c0_i32_0 : i32, i32, i32
  }
  func.func @transform_1(%arg0: i32) -> (i32, i32) {
    %c0_i32 = arith.constant 0 : i32
    %c0_i32_0 = arith.constant 0 : i32
    %c0_i32_1 = arith.constant 0 : i32
    return %c0_i32, %c0_i32_0 : i32, i32
  }
  func.func @transform_2(%arg0: i32) -> (i32, i32) {
    %c0_i32 = arith.constant 0 : i32
    %c0_i32_0 = arith.constant 0 : i32
    %c0_i32_1 = arith.constant 0 : i32
    return %c0_i32, %c0_i32_0 : i32, i32
  }
  func.func @transform_3(%arg0: i32) -> (i32, i32, i32) {
    %c0_i32 = arith.constant 0 : i32
    %c0_i32_0 = arith.constant 0 : i32
    %c0_i32_1 = arith.constant 0 : i32
    %c0_i32_2 = arith.constant 0 : i32
    return %c0_i32, %c0_i32_0, %c0_i32_1 : i32, i32, i32
  }
  func.func @transform_4(%arg0: i32) -> (i32, i32) {
    %c0_i32 = arith.constant 0 : i32
    %c0_i32_0 = arith.constant 0 : i32
    %c0_i32_1 = arith.constant 0 : i32
    return %c0_i32, %c0_i32_0 : i32, i32
  }
  func.func @transform_5(%arg0: i32) -> (i32, i32) {
    %c0_i32 = arith.constant 0 : i32
    %c0_i32_0 = arith.constant 0 : i32
    %c0_i32_1 = arith.constant 0 : i32
    return %c0_i32, %c0_i32_0 : i32, i32
  }
  func.func @transform_6(%arg0: i32) -> (i32, i32) {
    %c0_i32 = arith.constant 0 : i32
    %c0_i32_0 = arith.constant 0 : i32
    %c0_i32_1 = arith.constant 0 : i32
    return %c0_i32, %c0_i32_0 : i32, i32
  }
  func.func @transform_7(%arg0: i32) -> (i32, i32) {
    %c0_i32 = arith.constant 0 : i32
    %c0_i32_0 = arith.constant 0 : i32
    %c0_i32_1 = arith.constant 0 : i32
    return %c0_i32, %c0_i32_0 : i32, i32
  }
  func.func @transform_8(%arg0: i32) -> (i32, i32) {
    %c0_i32 = arith.constant 0 : i32
    %c0_i32_0 = arith.constant 0 : i32
    %c0_i32_1 = arith.constant 0 : i32
    return %c0_i32, %c0_i32_0 : i32, i32
  }
  func.func @transform_9(%arg0: i32) -> (i32, i32) {
    %c0_i32 = arith.constant 0 : i32
    %c0_i32_0 = arith.constant 0 : i32
    %c0_i32_1 = arith.constant 0 : i32
    return %c0_i32, %c0_i32_0 : i32, i32
  }
  func.func @transform_10(%arg0: i32) -> (i32, i32) {
    %c0_i32 = arith.constant 0 : i32
    %c0_i32_0 = arith.constant 0 : i32
    %c0_i32_1 = arith.constant 0 : i32
    return %c0_i32, %c0_i32_0 : i32, i32
  }
  func.func @transform_11(%arg0: i32) -> (i32, i32) {
    %c0_i32 = arith.constant 0 : i32
    %c0_i32_0 = arith.constant 0 : i32
    %c0_i32_1 = arith.constant 0 : i32
    return %c0_i32, %c0_i32_0 : i32, i32
  }
  func.func @transform_12(%arg0: i32) -> (i32, i32) {
    %c0_i32 = arith.constant 0 : i32
    %c0_i32_0 = arith.constant 0 : i32
    %c0_i32_1 = arith.constant 0 : i32
    return %c0_i32, %c0_i32_0 : i32, i32
  }
  func.func @transform_13(%arg0: i32) -> (i32, i32, i32) {
    %c0_i32 = arith.constant 0 : i32
    %c0_i32_0 = arith.constant 0 : i32
    %c0_i32_1 = arith.constant 0 : i32
    return %arg0, %c0_i32, %c0_i32_0 : i32, i32, i32
  }
}

module attributes {stable_mosaic.version = 11 : i64} {
  func.func @kernel(%arg0: i32, %arg1: memref<1x32x128xbf16, #tpu.memory_space<vmem>>, %arg2: memref<1x32x128xbf16, #tpu.memory_space<vmem>>, %arg3: memref<128x384xbf16, #tpu.memory_space<vmem>>, %arg4: memref<1x384xf32, #tpu.memory_space<vmem>>, %arg5: memref<4x32x128xbf16, #tpu.memory_space<vmem>>, %arg6: memref<1x128xf32, #tpu.memory_space<vmem>>, %arg7: memref<1x128xf32, #tpu.memory_space<vmem>>, %arg8: memref<1x128xf32, #tpu.memory_space<vmem>>, %arg9: memref<128x128xbf16, #tpu.memory_space<vmem>>, %arg10: memref<1x128xf32, #tpu.memory_space<vmem>>, %arg11: memref<128x256xbf16, #tpu.memory_space<vmem>>, %arg12: memref<1x256xf32, #tpu.memory_space<vmem>>, %arg13: memref<4x32x128xbf16, #tpu.memory_space<vmem>>, %arg14: memref<1x128xf32, #tpu.memory_space<vmem>>, %arg15: memref<1x128xf32, #tpu.memory_space<vmem>>, %arg16: memref<1x128xf32, #tpu.memory_space<vmem>>, %arg17: memref<128x256xbf16, #tpu.memory_space<vmem>>, %arg18: memref<1x256xf32, #tpu.memory_space<vmem>>, %arg19: memref<256x128xbf16, #tpu.memory_space<vmem>>, %arg20: memref<1x128xf32, #tpu.memory_space<vmem>>, %arg21: memref<1x128xf32, #tpu.memory_space<vmem>>, %arg22: memref<1x128xf32, #tpu.memory_space<vmem>>, %arg23: memref<1x32x128xbf16, #tpu.memory_space<vmem>>) attributes {dimension_semantics = [#tpu.dimension_semantics<parallel>], iteration_bounds = array<i64: 2>, scalar_prefetch = 0 : i64, scratch_operands = 0 : i64, tpu.core_type = #tpu.core_type<tc>, window_params = [{transform_indices = @transform_0, window_bounds = array<i64: 1, 32, 128>}, {transform_indices = @transform_1, window_bounds = array<i64: 1, 32, 128>}, {pipeline_mode = #tpu.pipeline_mode<synchronous>, transform_indices = @transform_2, window_bounds = array<i64: 128, 384>}, {pipeline_mode = #tpu.pipeline_mode<synchronous>, transform_indices = @transform_3, window_bounds = array<i64: 1, 384>}, {pipeline_mode = #tpu.pipeline_mode<synchronous>, transform_indices = @transform_4, window_bounds = array<i64: 4, 32, 128>}, {pipeline_mode = #tpu.pipeline_mode<synchronous>, transform_indices = @transform_5, window_bounds = array<i64: 1, 128>}, {pipeline_mode = #tpu.pipeline_mode<synchronous>, transform_indices = @transform_6, window_bounds = array<i64: 1, 128>}, {pipeline_mode = #tpu.pipeline_mode<synchronous>, transform_indices = @transform_7, window_bounds = array<i64: 1, 128>}, {pipeline_mode = #tpu.pipeline_mode<synchronous>, transform_indices = @transform_8, window_bounds = array<i64: 128, 128>}, {pipeline_mode = #tpu.pipeline_mode<synchronous>, transform_indices = @transform_9, window_bounds = array<i64: 1, 128>}, {pipeline_mode = #tpu.pipeline_mode<synchronous>, transform_indices = @transform_10, window_bounds = array<i64: 128, 256>}, {pipeline_mode = #tpu.pipeline_mode<synchronous>, transform_indices = @transform_11, window_bounds = array<i64: 1, 256>}, {pipeline_mode = #tpu.pipeline_mode<synchronous>, transform_indices = @transform_12, window_bounds = array<i64: 4, 32, 128>}, {pipeline_mode = #tpu.pipeline_mode<synchronous>, transform_indices = @transform_13, window_bounds = array<i64: 1, 128>}, {pipeline_mode = #tpu.pipeline_mode<synchronous>, transform_indices = @transform_14, window_bounds = array<i64: 1, 128>}, {pipeline_mode = #tpu.pipeline_mode<synchronous>, transform_indices = @transform_15, window_bounds = array<i64: 1, 128>}, {pipeline_mode = #tpu.pipeline_mode<synchronous>, transform_indices = @transform_16, window_bounds = array<i64: 128, 256>}, {pipeline_mode = #tpu.pipeline_mode<synchronous>, transform_indices = @transform_17, window_bounds = array<i64: 1, 256>}, {pipeline_mode = #tpu.pipeline_mode<synchronous>, transform_indices = @transform_18, window_bounds = array<i64: 256, 128>}, {pipeline_mode = #tpu.pipeline_mode<synchronous>, transform_indices = @transform_19, window_bounds = array<i64: 1, 128>}, {pipeline_mode = #tpu.pipeline_mode<synchronous>, transform_indices = @transform_20, window_bounds = array<i64: 1, 128>}, {pipeline_mode = #tpu.pipeline_mode<synchronous>, transform_indices = @transform_21, window_bounds = array<i64: 1, 128>}, {transform_indices = @transform_22, window_bounds = array<i64: 1, 32, 128>}]} {
    %c0 = arith.constant 0 : index
    %c0_0 = arith.constant 0 : index
    %c0_1 = arith.constant 0 : index
    %0 = vector.load %arg1[%c0, %c0_0, %c0_1] : memref<1x32x128xbf16, #tpu.memory_space<vmem>>, vector<1x32x128xbf16>
    %1 = vector.shape_cast %0 : vector<1x32x128xbf16> to vector<32x128xbf16>
    %2 = arith.extf %1 : vector<32x128xbf16> to vector<32x128xf32>
    %c0_2 = arith.constant 0 : index
    %c0_3 = arith.constant 0 : index
    %c0_4 = arith.constant 0 : index
    %3 = vector.load %arg2[%c0_2, %c0_3, %c0_4] : memref<1x32x128xbf16, #tpu.memory_space<vmem>>, vector<1x32x128xbf16>
    %4 = vector.shape_cast %3 : vector<1x32x128xbf16> to vector<32x128xbf16>
    %c0_5 = arith.constant 0 : index
    %c0_6 = arith.constant 0 : index
    %5 = vector.load %arg3[%c0_5, %c0_6] : memref<128x384xbf16, #tpu.memory_space<vmem>>, vector<128x384xbf16>
    %cst = arith.constant dense<0.000000e+00> : vector<32x384xf32>
    %6 = tpu.matmul %1, %5, %cst {dimension_numbers = #tpu.dot_dimension_numbers<[1], [0], [0], [1], [0, 0, 1, 1], [], []>} : vector<32x128xbf16>, vector<128x384xbf16>, vector<32x384xf32> -> vector<32x384xf32>
    %c0_7 = arith.constant 0 : index
    %c0_8 = arith.constant 0 : index
    %7 = vector.load %arg4[%c0_7, %c0_8] : memref<1x384xf32, #tpu.memory_space<vmem>>, vector<1x384xf32>
    %8 = vector.broadcast %7 : vector<1x384xf32> to vector<32x384xf32>
    %9 = arith.addf %6, %8 : vector<32x384xf32>
    %10 = vector.extract_strided_slice %9 {offsets = [0, 0], sizes = [32, 32], strides = [1, 1]} : vector<32x384xf32> to vector<32x32xf32>
    %11 = vector.extract_strided_slice %9 {offsets = [0, 32], sizes = [32, 32], strides = [1, 1]} : vector<32x384xf32> to vector<32x32xf32>
    %12 = vector.extract_strided_slice %9 {offsets = [0, 64], sizes = [32, 32], strides = [1, 1]} : vector<32x384xf32> to vector<32x32xf32>
    %13 = vector.extract_strided_slice %9 {offsets = [0, 96], sizes = [32, 32], strides = [1, 1]} : vector<32x384xf32> to vector<32x32xf32>
    %14 = vector.shape_cast %10 : vector<32x32xf32> to vector<1x32x32xf32>
    %15 = vector.shape_cast %11 : vector<32x32xf32> to vector<1x32x32xf32>
    %16 = vector.shape_cast %12 : vector<32x32xf32> to vector<1x32x32xf32>
    %17 = vector.shape_cast %13 : vector<32x32xf32> to vector<1x32x32xf32>
    %18 = tpu.concatenate %14, %15, %16, %17 in 0 : vector<1x32x32xf32>, vector<1x32x32xf32>, vector<1x32x32xf32>, vector<1x32x32xf32> -> vector<4x32x32xf32>
    %19 = arith.truncf %18 : vector<4x32x32xf32> to vector<4x32x32xbf16>
    %20 = vector.extract_strided_slice %9 {offsets = [0, 128], sizes = [32, 32], strides = [1, 1]} : vector<32x384xf32> to vector<32x32xf32>
    %21 = vector.extract_strided_slice %9 {offsets = [0, 160], sizes = [32, 32], strides = [1, 1]} : vector<32x384xf32> to vector<32x32xf32>
    %22 = vector.extract_strided_slice %9 {offsets = [0, 192], sizes = [32, 32], strides = [1, 1]} : vector<32x384xf32> to vector<32x32xf32>
    %23 = vector.extract_strided_slice %9 {offsets = [0, 224], sizes = [32, 32], strides = [1, 1]} : vector<32x384xf32> to vector<32x32xf32>
    %24 = vector.shape_cast %20 : vector<32x32xf32> to vector<1x32x32xf32>
    %25 = vector.shape_cast %21 : vector<32x32xf32> to vector<1x32x32xf32>
    %26 = vector.shape_cast %22 : vector<32x32xf32> to vector<1x32x32xf32>
    %27 = vector.shape_cast %23 : vector<32x32xf32> to vector<1x32x32xf32>
    %28 = tpu.concatenate %24, %25, %26, %27 in 0 : vector<1x32x32xf32>, vector<1x32x32xf32>, vector<1x32x32xf32>, vector<1x32x32xf32> -> vector<4x32x32xf32>
    %29 = arith.truncf %28 : vector<4x32x32xf32> to vector<4x32x32xbf16>
    %30 = vector.extract_strided_slice %9 {offsets = [0, 256], sizes = [32, 32], strides = [1, 1]} : vector<32x384xf32> to vector<32x32xf32>
    %31 = vector.extract_strided_slice %9 {offsets = [0, 288], sizes = [32, 32], strides = [1, 1]} : vector<32x384xf32> to vector<32x32xf32>
    %32 = vector.extract_strided_slice %9 {offsets = [0, 320], sizes = [32, 32], strides = [1, 1]} : vector<32x384xf32> to vector<32x32xf32>
    %33 = vector.extract_strided_slice %9 {offsets = [0, 352], sizes = [32, 32], strides = [1, 1]} : vector<32x384xf32> to vector<32x32xf32>
    %34 = vector.shape_cast %30 : vector<32x32xf32> to vector<1x32x32xf32>
    %35 = vector.shape_cast %31 : vector<32x32xf32> to vector<1x32x32xf32>
    %36 = vector.shape_cast %32 : vector<32x32xf32> to vector<1x32x32xf32>
    %37 = vector.shape_cast %33 : vector<32x32xf32> to vector<1x32x32xf32>
    %38 = tpu.concatenate %34, %35, %36, %37 in 0 : vector<1x32x32xf32>, vector<1x32x32xf32>, vector<1x32x32xf32>, vector<1x32x32xf32> -> vector<4x32x32xf32>
    %39 = arith.truncf %38 : vector<4x32x32xf32> to vector<4x32x32xbf16>
    "tpu.trace_start"() <{level = 10 : i32, message = "hqd,hkd->hqk"}> : () -> ()
    %cst_9 = arith.constant dense<0.000000e+00> : vector<4x32x32xf32>
    %40 = tpu.matmul %19, %29, %cst_9 {dimension_numbers = #tpu.dot_dimension_numbers<[2], [2], [1], [1], [0, 0, 0, 1, 1, 1], [0], [0]>} : vector<4x32x32xbf16>, vector<4x32x32xbf16>, vector<4x32x32xf32> -> vector<4x32x32xf32>
    "tpu.trace_stop"() : () -> ()
    %cst_10 = arith.constant dense<0xFF800000> : vector<4x32xf32>
    %41 = vector.multi_reduction <maximumf>, %40, %cst_10 [2] : vector<4x32x32xf32> to vector<4x32xf32>
    %42 = vector.shape_cast %41 : vector<4x32xf32> to vector<4x32x1xf32>
    %43 = vector.broadcast %42 : vector<4x32x1xf32> to vector<4x32x32xf32>
    %44 = arith.subf %40, %43 : vector<4x32x32xf32>
    %45 = math.exp %44 : vector<4x32x32xf32>
    %cst_11 = arith.constant dense<0.000000e+00> : vector<4x32xf32>
    %46 = vector.multi_reduction <add>, %45, %cst_11 [2] : vector<4x32x32xf32> to vector<4x32xf32>
    %47 = vector.shape_cast %46 : vector<4x32xf32> to vector<4x32x1xf32>
    %48 = tpu.reciprocal %47 {approx = true} : vector<4x32x1xf32> -> vector<4x32x1xf32>
    %49 = vector.broadcast %48 : vector<4x32x1xf32> to vector<4x32x32xf32>
    %50 = arith.mulf %45, %49 : vector<4x32x32xf32>
    %51 = arith.truncf %50 : vector<4x32x32xf32> to vector<4x32x32xbf16>
    "tpu.trace_start"() <{level = 10 : i32, message = "hqk,hkd->hqd"}> : () -> ()
    %cst_12 = arith.constant dense<0.000000e+00> : vector<4x32x32xf32>
    %52 = tpu.matmul %51, %39, %cst_12 {dimension_numbers = #tpu.dot_dimension_numbers<[2], [1], [1], [2], [0, 0, 0, 1, 1, 2], [0], [0]>} : vector<4x32x32xbf16>, vector<4x32x32xbf16>, vector<4x32x32xf32> -> vector<4x32x32xf32>
    "tpu.trace_stop"() : () -> ()
    %53 = arith.truncf %52 : vector<4x32x32xf32> to vector<4x32x32xbf16>
    %c0_13 = arith.constant 0 : index
    %c0_14 = arith.constant 0 : index
    %54 = vector.load %arg6[%c0_13, %c0_14] : memref<1x128xf32, #tpu.memory_space<vmem>>, vector<1x128xf32>
    %55 = vector.extract_strided_slice %53 {offsets = [0, 0, 0], sizes = [1, 32, 32], strides = [1, 1, 1]} : vector<4x32x32xbf16> to vector<1x32x32xbf16>
    %56 = vector.shape_cast %55 : vector<1x32x32xbf16> to vector<32x32xbf16>
    %c0_15 = arith.constant 0 : index
    %c0_16 = arith.constant 0 : index
    %c0_17 = arith.constant 0 : index
    %57 = vector.load %arg5[%c0_15, %c0_16, %c0_17] : memref<4x32x128xbf16, #tpu.memory_space<vmem>>, vector<1x32x128xbf16>
    %58 = vector.shape_cast %57 : vector<1x32x128xbf16> to vector<32x128xbf16>
    %cst_18 = arith.constant dense<0.000000e+00> : vector<32x128xf32>
    %59 = tpu.matmul %56, %58, %cst_18 {dimension_numbers = #tpu.dot_dimension_numbers<[1], [0], [0], [1], [0, 0, 1, 1], [], []>} : vector<32x32xbf16>, vector<32x128xbf16>, vector<32x128xf32> -> vector<32x128xf32>
    %60 = vector.broadcast %54 : vector<1x128xf32> to vector<32x128xf32>
    %61 = arith.addf %60, %59 : vector<32x128xf32>
    %62 = vector.extract_strided_slice %53 {offsets = [1, 0, 0], sizes = [1, 32, 32], strides = [1, 1, 1]} : vector<4x32x32xbf16> to vector<1x32x32xbf16>
    %63 = vector.shape_cast %62 : vector<1x32x32xbf16> to vector<32x32xbf16>
    %c1 = arith.constant 1 : index
    %c0_19 = arith.constant 0 : index
    %c0_20 = arith.constant 0 : index
    %64 = vector.load %arg5[%c1, %c0_19, %c0_20] : memref<4x32x128xbf16, #tpu.memory_space<vmem>>, vector<1x32x128xbf16>
    %65 = vector.shape_cast %64 : vector<1x32x128xbf16> to vector<32x128xbf16>
    %cst_21 = arith.constant dense<0.000000e+00> : vector<32x128xf32>
    %66 = tpu.matmul %63, %65, %cst_21 {dimension_numbers = #tpu.dot_dimension_numbers<[1], [0], [0], [1], [0, 0, 1, 1], [], []>} : vector<32x32xbf16>, vector<32x128xbf16>, vector<32x128xf32> -> vector<32x128xf32>
    %67 = arith.addf %61, %66 : vector<32x128xf32>
    %68 = vector.extract_strided_slice %53 {offsets = [2, 0, 0], sizes = [1, 32, 32], strides = [1, 1, 1]} : vector<4x32x32xbf16> to vector<1x32x32xbf16>
    %69 = vector.shape_cast %68 : vector<1x32x32xbf16> to vector<32x32xbf16>
    %c2 = arith.constant 2 : index
    %c0_22 = arith.constant 0 : index
    %c0_23 = arith.constant 0 : index
    %70 = vector.load %arg5[%c2, %c0_22, %c0_23] : memref<4x32x128xbf16, #tpu.memory_space<vmem>>, vector<1x32x128xbf16>
    %71 = vector.shape_cast %70 : vector<1x32x128xbf16> to vector<32x128xbf16>
    %cst_24 = arith.constant dense<0.000000e+00> : vector<32x128xf32>
    %72 = tpu.matmul %69, %71, %cst_24 {dimension_numbers = #tpu.dot_dimension_numbers<[1], [0], [0], [1], [0, 0, 1, 1], [], []>} : vector<32x32xbf16>, vector<32x128xbf16>, vector<32x128xf32> -> vector<32x128xf32>
    %73 = arith.addf %67, %72 : vector<32x128xf32>
    %74 = vector.extract_strided_slice %53 {offsets = [3, 0, 0], sizes = [1, 32, 32], strides = [1, 1, 1]} : vector<4x32x32xbf16> to vector<1x32x32xbf16>
    %75 = vector.shape_cast %74 : vector<1x32x32xbf16> to vector<32x32xbf16>
    %c3 = arith.constant 3 : index
    %c0_25 = arith.constant 0 : index
    %c0_26 = arith.constant 0 : index
    %76 = vector.load %arg5[%c3, %c0_25, %c0_26] : memref<4x32x128xbf16, #tpu.memory_space<vmem>>, vector<1x32x128xbf16>
    %77 = vector.shape_cast %76 : vector<1x32x128xbf16> to vector<32x128xbf16>
    %cst_27 = arith.constant dense<0.000000e+00> : vector<32x128xf32>
    %78 = tpu.matmul %75, %77, %cst_27 {dimension_numbers = #tpu.dot_dimension_numbers<[1], [0], [0], [1], [0, 0, 1, 1], [], []>} : vector<32x32xbf16>, vector<32x128xbf16>, vector<32x128xf32> -> vector<32x128xf32>
    %79 = arith.addf %73, %78 : vector<32x128xf32>
    %80 = arith.addf %79, %2 : vector<32x128xf32>
    %cst_28 = arith.constant dense<0.000000e+00> : vector<32xf32>
    %81 = vector.multi_reduction <add>, %80, %cst_28 [1] : vector<32x128xf32> to vector<32xf32>
    %82 = vector.shape_cast %81 : vector<32xf32> to vector<32x1xf32>
    %cst_29 = arith.constant 1.280000e+02 : f32
    %83 = vector.broadcast %cst_29 : f32 to vector<32x1xf32>
    %84 = arith.divf %82, %83 : vector<32x1xf32>
    %85 = vector.broadcast %84 : vector<32x1xf32> to vector<32x128xf32>
    %86 = arith.subf %80, %85 : vector<32x128xf32>
    %87 = arith.mulf %86, %86 : vector<32x128xf32>
    %cst_30 = arith.constant dense<0.000000e+00> : vector<32xf32>
    %88 = vector.multi_reduction <add>, %87, %cst_30 [1] : vector<32x128xf32> to vector<32xf32>
    %89 = vector.shape_cast %88 : vector<32xf32> to vector<32x1xf32>
    %cst_31 = arith.constant 1.280000e+02 : f32
    %90 = vector.broadcast %cst_31 : f32 to vector<32x1xf32>
    %91 = arith.divf %89, %90 : vector<32x1xf32>
    %92 = vector.broadcast %84 : vector<32x1xf32> to vector<32x128xf32>
    %93 = arith.subf %80, %92 : vector<32x128xf32>
    %cst_32 = arith.constant 9.99999974E-6 : f32
    %94 = vector.broadcast %cst_32 : f32 to vector<32x1xf32>
    %95 = arith.addf %91, %94 : vector<32x1xf32>
    %96 = math.rsqrt %95 : vector<32x1xf32>
    %97 = vector.broadcast %96 : vector<32x1xf32> to vector<32x128xf32>
    %98 = arith.mulf %93, %97 : vector<32x128xf32>
    %c0_33 = arith.constant 0 : index
    %c0_34 = arith.constant 0 : index
    %99 = vector.load %arg7[%c0_33, %c0_34] : memref<1x128xf32, #tpu.memory_space<vmem>>, vector<1x128xf32>
    %100 = vector.broadcast %99 : vector<1x128xf32> to vector<32x128xf32>
    %101 = arith.mulf %98, %100 : vector<32x128xf32>
    %c0_35 = arith.constant 0 : index
    %c0_36 = arith.constant 0 : index
    %102 = vector.load %arg8[%c0_35, %c0_36] : memref<1x128xf32, #tpu.memory_space<vmem>>, vector<1x128xf32>
    %103 = vector.broadcast %102 : vector<1x128xf32> to vector<32x128xf32>
    %104 = arith.addf %101, %103 : vector<32x128xf32>
    %105 = arith.truncf %104 : vector<32x128xf32> to vector<32x128xbf16>
    %c0_37 = arith.constant 0 : index
    %c0_38 = arith.constant 0 : index
    %106 = vector.load %arg9[%c0_37, %c0_38] : memref<128x128xbf16, #tpu.memory_space<vmem>>, vector<128x128xbf16>
    %cst_39 = arith.constant dense<0.000000e+00> : vector<32x128xf32>
    %107 = tpu.matmul %105, %106, %cst_39 {dimension_numbers = #tpu.dot_dimension_numbers<[1], [0], [0], [1], [0, 0, 1, 1], [], []>} : vector<32x128xbf16>, vector<128x128xbf16>, vector<32x128xf32> -> vector<32x128xf32>
    %c0_40 = arith.constant 0 : index
    %c0_41 = arith.constant 0 : index
    %108 = vector.load %arg10[%c0_40, %c0_41] : memref<1x128xf32, #tpu.memory_space<vmem>>, vector<1x128xf32>
    %109 = vector.broadcast %108 : vector<1x128xf32> to vector<32x128xf32>
    %110 = arith.addf %107, %109 : vector<32x128xf32>
    %c0_42 = arith.constant 0 : index
    %c0_43 = arith.constant 0 : index
    %111 = vector.load %arg11[%c0_42, %c0_43] : memref<128x256xbf16, #tpu.memory_space<vmem>>, vector<128x256xbf16>
    %cst_44 = arith.constant dense<0.000000e+00> : vector<32x256xf32>
    %112 = tpu.matmul %4, %111, %cst_44 {dimension_numbers = #tpu.dot_dimension_numbers<[1], [0], [0], [1], [0, 0, 1, 1], [], []>} : vector<32x128xbf16>, vector<128x256xbf16>, vector<32x256xf32> -> vector<32x256xf32>
    %c0_45 = arith.constant 0 : index
    %c0_46 = arith.constant 0 : index
    %113 = vector.load %arg12[%c0_45, %c0_46] : memref<1x256xf32, #tpu.memory_space<vmem>>, vector<1x256xf32>
    %114 = vector.broadcast %113 : vector<1x256xf32> to vector<32x256xf32>
    %115 = arith.addf %112, %114 : vector<32x256xf32>
    %116 = vector.extract_strided_slice %110 {offsets = [0, 0], sizes = [32, 32], strides = [1, 1]} : vector<32x128xf32> to vector<32x32xf32>
    %117 = vector.extract_strided_slice %110 {offsets = [0, 32], sizes = [32, 32], strides = [1, 1]} : vector<32x128xf32> to vector<32x32xf32>
    %118 = vector.extract_strided_slice %110 {offsets = [0, 64], sizes = [32, 32], strides = [1, 1]} : vector<32x128xf32> to vector<32x32xf32>
    %119 = vector.extract_strided_slice %110 {offsets = [0, 96], sizes = [32, 32], strides = [1, 1]} : vector<32x128xf32> to vector<32x32xf32>
    %120 = vector.shape_cast %116 : vector<32x32xf32> to vector<1x32x32xf32>
    %121 = vector.shape_cast %117 : vector<32x32xf32> to vector<1x32x32xf32>
    %122 = vector.shape_cast %118 : vector<32x32xf32> to vector<1x32x32xf32>
    %123 = vector.shape_cast %119 : vector<32x32xf32> to vector<1x32x32xf32>
    %124 = tpu.concatenate %120, %121, %122, %123 in 0 : vector<1x32x32xf32>, vector<1x32x32xf32>, vector<1x32x32xf32>, vector<1x32x32xf32> -> vector<4x32x32xf32>
    %125 = arith.truncf %124 : vector<4x32x32xf32> to vector<4x32x32xbf16>
    %126 = vector.extract_strided_slice %115 {offsets = [0, 0], sizes = [32, 32], strides = [1, 1]} : vector<32x256xf32> to vector<32x32xf32>
    %127 = vector.extract_strided_slice %115 {offsets = [0, 32], sizes = [32, 32], strides = [1, 1]} : vector<32x256xf32> to vector<32x32xf32>
    %128 = vector.extract_strided_slice %115 {offsets = [0, 64], sizes = [32, 32], strides = [1, 1]} : vector<32x256xf32> to vector<32x32xf32>
    %129 = vector.extract_strided_slice %115 {offsets = [0, 96], sizes = [32, 32], strides = [1, 1]} : vector<32x256xf32> to vector<32x32xf32>
    %130 = vector.shape_cast %126 : vector<32x32xf32> to vector<1x32x32xf32>
    %131 = vector.shape_cast %127 : vector<32x32xf32> to vector<1x32x32xf32>
    %132 = vector.shape_cast %128 : vector<32x32xf32> to vector<1x32x32xf32>
    %133 = vector.shape_cast %129 : vector<32x32xf32> to vector<1x32x32xf32>
    %134 = tpu.concatenate %130, %131, %132, %133 in 0 : vector<1x32x32xf32>, vector<1x32x32xf32>, vector<1x32x32xf32>, vector<1x32x32xf32> -> vector<4x32x32xf32>
    %135 = arith.truncf %134 : vector<4x32x32xf32> to vector<4x32x32xbf16>
    %136 = vector.extract_strided_slice %115 {offsets = [0, 128], sizes = [32, 32], strides = [1, 1]} : vector<32x256xf32> to vector<32x32xf32>
    %137 = vector.extract_strided_slice %115 {offsets = [0, 160], sizes = [32, 32], strides = [1, 1]} : vector<32x256xf32> to vector<32x32xf32>
    %138 = vector.extract_strided_slice %115 {offsets = [0, 192], sizes = [32, 32], strides = [1, 1]} : vector<32x256xf32> to vector<32x32xf32>
    %139 = vector.extract_strided_slice %115 {offsets = [0, 224], sizes = [32, 32], strides = [1, 1]} : vector<32x256xf32> to vector<32x32xf32>
    %140 = vector.shape_cast %136 : vector<32x32xf32> to vector<1x32x32xf32>
    %141 = vector.shape_cast %137 : vector<32x32xf32> to vector<1x32x32xf32>
    %142 = vector.shape_cast %138 : vector<32x32xf32> to vector<1x32x32xf32>
    %143 = vector.shape_cast %139 : vector<32x32xf32> to vector<1x32x32xf32>
    %144 = tpu.concatenate %140, %141, %142, %143 in 0 : vector<1x32x32xf32>, vector<1x32x32xf32>, vector<1x32x32xf32>, vector<1x32x32xf32> -> vector<4x32x32xf32>
    %145 = arith.truncf %144 : vector<4x32x32xf32> to vector<4x32x32xbf16>
    "tpu.trace_start"() <{level = 10 : i32, message = "hqd,hkd->hqk"}> : () -> ()
    %cst_47 = arith.constant dense<0.000000e+00> : vector<4x32x32xf32>
    %146 = tpu.matmul %125, %135, %cst_47 {dimension_numbers = #tpu.dot_dimension_numbers<[2], [2], [1], [1], [0, 0, 0, 1, 1, 1], [0], [0]>} : vector<4x32x32xbf16>, vector<4x32x32xbf16>, vector<4x32x32xf32> -> vector<4x32x32xf32>
    "tpu.trace_stop"() : () -> ()
    %cst_48 = arith.constant dense<0xFF800000> : vector<4x32xf32>
    %147 = vector.multi_reduction <maximumf>, %146, %cst_48 [2] : vector<4x32x32xf32> to vector<4x32xf32>
    %148 = vector.shape_cast %147 : vector<4x32xf32> to vector<4x32x1xf32>
    %149 = vector.broadcast %148 : vector<4x32x1xf32> to vector<4x32x32xf32>
    %150 = arith.subf %146, %149 : vector<4x32x32xf32>
    %151 = math.exp %150 : vector<4x32x32xf32>
    %cst_49 = arith.constant dense<0.000000e+00> : vector<4x32xf32>
    %152 = vector.multi_reduction <add>, %151, %cst_49 [2] : vector<4x32x32xf32> to vector<4x32xf32>
    %153 = vector.shape_cast %152 : vector<4x32xf32> to vector<4x32x1xf32>
    %154 = tpu.reciprocal %153 {approx = true} : vector<4x32x1xf32> -> vector<4x32x1xf32>
    %155 = vector.broadcast %154 : vector<4x32x1xf32> to vector<4x32x32xf32>
    %156 = arith.mulf %151, %155 : vector<4x32x32xf32>
    %157 = arith.truncf %156 : vector<4x32x32xf32> to vector<4x32x32xbf16>
    "tpu.trace_start"() <{level = 10 : i32, message = "hqk,hkd->hqd"}> : () -> ()
    %cst_50 = arith.constant dense<0.000000e+00> : vector<4x32x32xf32>
    %158 = tpu.matmul %157, %145, %cst_50 {dimension_numbers = #tpu.dot_dimension_numbers<[2], [1], [1], [2], [0, 0, 0, 1, 1, 2], [0], [0]>} : vector<4x32x32xbf16>, vector<4x32x32xbf16>, vector<4x32x32xf32> -> vector<4x32x32xf32>
    "tpu.trace_stop"() : () -> ()
    %159 = arith.truncf %158 : vector<4x32x32xf32> to vector<4x32x32xbf16>
    %c0_51 = arith.constant 0 : index
    %c0_52 = arith.constant 0 : index
    %160 = vector.load %arg14[%c0_51, %c0_52] : memref<1x128xf32, #tpu.memory_space<vmem>>, vector<1x128xf32>
    %161 = vector.extract_strided_slice %159 {offsets = [0, 0, 0], sizes = [1, 32, 32], strides = [1, 1, 1]} : vector<4x32x32xbf16> to vector<1x32x32xbf16>
    %162 = vector.shape_cast %161 : vector<1x32x32xbf16> to vector<32x32xbf16>
    %c0_53 = arith.constant 0 : index
    %c0_54 = arith.constant 0 : index
    %c0_55 = arith.constant 0 : index
    %163 = vector.load %arg13[%c0_53, %c0_54, %c0_55] : memref<4x32x128xbf16, #tpu.memory_space<vmem>>, vector<1x32x128xbf16>
    %164 = vector.shape_cast %163 : vector<1x32x128xbf16> to vector<32x128xbf16>
    %cst_56 = arith.constant dense<0.000000e+00> : vector<32x128xf32>
    %165 = tpu.matmul %162, %164, %cst_56 {dimension_numbers = #tpu.dot_dimension_numbers<[1], [0], [0], [1], [0, 0, 1, 1], [], []>} : vector<32x32xbf16>, vector<32x128xbf16>, vector<32x128xf32> -> vector<32x128xf32>
    %166 = vector.broadcast %160 : vector<1x128xf32> to vector<32x128xf32>
    %167 = arith.addf %166, %165 : vector<32x128xf32>
    %168 = vector.extract_strided_slice %159 {offsets = [1, 0, 0], sizes = [1, 32, 32], strides = [1, 1, 1]} : vector<4x32x32xbf16> to vector<1x32x32xbf16>
    %169 = vector.shape_cast %168 : vector<1x32x32xbf16> to vector<32x32xbf16>
    %c1_57 = arith.constant 1 : index
    %c0_58 = arith.constant 0 : index
    %c0_59 = arith.constant 0 : index
    %170 = vector.load %arg13[%c1_57, %c0_58, %c0_59] : memref<4x32x128xbf16, #tpu.memory_space<vmem>>, vector<1x32x128xbf16>
    %171 = vector.shape_cast %170 : vector<1x32x128xbf16> to vector<32x128xbf16>
    %cst_60 = arith.constant dense<0.000000e+00> : vector<32x128xf32>
    %172 = tpu.matmul %169, %171, %cst_60 {dimension_numbers = #tpu.dot_dimension_numbers<[1], [0], [0], [1], [0, 0, 1, 1], [], []>} : vector<32x32xbf16>, vector<32x128xbf16>, vector<32x128xf32> -> vector<32x128xf32>
    %173 = arith.addf %167, %172 : vector<32x128xf32>
    %174 = vector.extract_strided_slice %159 {offsets = [2, 0, 0], sizes = [1, 32, 32], strides = [1, 1, 1]} : vector<4x32x32xbf16> to vector<1x32x32xbf16>
    %175 = vector.shape_cast %174 : vector<1x32x32xbf16> to vector<32x32xbf16>
    %c2_61 = arith.constant 2 : index
    %c0_62 = arith.constant 0 : index
    %c0_63 = arith.constant 0 : index
    %176 = vector.load %arg13[%c2_61, %c0_62, %c0_63] : memref<4x32x128xbf16, #tpu.memory_space<vmem>>, vector<1x32x128xbf16>
    %177 = vector.shape_cast %176 : vector<1x32x128xbf16> to vector<32x128xbf16>
    %cst_64 = arith.constant dense<0.000000e+00> : vector<32x128xf32>
    %178 = tpu.matmul %175, %177, %cst_64 {dimension_numbers = #tpu.dot_dimension_numbers<[1], [0], [0], [1], [0, 0, 1, 1], [], []>} : vector<32x32xbf16>, vector<32x128xbf16>, vector<32x128xf32> -> vector<32x128xf32>
    %179 = arith.addf %173, %178 : vector<32x128xf32>
    %180 = vector.extract_strided_slice %159 {offsets = [3, 0, 0], sizes = [1, 32, 32], strides = [1, 1, 1]} : vector<4x32x32xbf16> to vector<1x32x32xbf16>
    %181 = vector.shape_cast %180 : vector<1x32x32xbf16> to vector<32x32xbf16>
    %c3_65 = arith.constant 3 : index
    %c0_66 = arith.constant 0 : index
    %c0_67 = arith.constant 0 : index
    %182 = vector.load %arg13[%c3_65, %c0_66, %c0_67] : memref<4x32x128xbf16, #tpu.memory_space<vmem>>, vector<1x32x128xbf16>
    %183 = vector.shape_cast %182 : vector<1x32x128xbf16> to vector<32x128xbf16>
    %cst_68 = arith.constant dense<0.000000e+00> : vector<32x128xf32>
    %184 = tpu.matmul %181, %183, %cst_68 {dimension_numbers = #tpu.dot_dimension_numbers<[1], [0], [0], [1], [0, 0, 1, 1], [], []>} : vector<32x32xbf16>, vector<32x128xbf16>, vector<32x128xf32> -> vector<32x128xf32>
    %185 = arith.addf %179, %184 : vector<32x128xf32>
    %186 = arith.addf %185, %104 : vector<32x128xf32>
    %cst_69 = arith.constant dense<0.000000e+00> : vector<32xf32>
    %187 = vector.multi_reduction <add>, %186, %cst_69 [1] : vector<32x128xf32> to vector<32xf32>
    %188 = vector.shape_cast %187 : vector<32xf32> to vector<32x1xf32>
    %cst_70 = arith.constant 1.280000e+02 : f32
    %189 = vector.broadcast %cst_70 : f32 to vector<32x1xf32>
    %190 = arith.divf %188, %189 : vector<32x1xf32>
    %191 = vector.broadcast %190 : vector<32x1xf32> to vector<32x128xf32>
    %192 = arith.subf %186, %191 : vector<32x128xf32>
    %193 = arith.mulf %192, %192 : vector<32x128xf32>
    %cst_71 = arith.constant dense<0.000000e+00> : vector<32xf32>
    %194 = vector.multi_reduction <add>, %193, %cst_71 [1] : vector<32x128xf32> to vector<32xf32>
    %195 = vector.shape_cast %194 : vector<32xf32> to vector<32x1xf32>
    %cst_72 = arith.constant 1.280000e+02 : f32
    %196 = vector.broadcast %cst_72 : f32 to vector<32x1xf32>
    %197 = arith.divf %195, %196 : vector<32x1xf32>
    %198 = vector.broadcast %190 : vector<32x1xf32> to vector<32x128xf32>
    %199 = arith.subf %186, %198 : vector<32x128xf32>
    %cst_73 = arith.constant 9.99999974E-6 : f32
    %200 = vector.broadcast %cst_73 : f32 to vector<32x1xf32>
    %201 = arith.addf %197, %200 : vector<32x1xf32>
    %202 = math.rsqrt %201 : vector<32x1xf32>
    %203 = vector.broadcast %202 : vector<32x1xf32> to vector<32x128xf32>
    %204 = arith.mulf %199, %203 : vector<32x128xf32>
    %c0_74 = arith.constant 0 : index
    %c0_75 = arith.constant 0 : index
    %205 = vector.load %arg15[%c0_74, %c0_75] : memref<1x128xf32, #tpu.memory_space<vmem>>, vector<1x128xf32>
    %206 = vector.broadcast %205 : vector<1x128xf32> to vector<32x128xf32>
    %207 = arith.mulf %204, %206 : vector<32x128xf32>
    %c0_76 = arith.constant 0 : index
    %c0_77 = arith.constant 0 : index
    %208 = vector.load %arg16[%c0_76, %c0_77] : memref<1x128xf32, #tpu.memory_space<vmem>>, vector<1x128xf32>
    %209 = vector.broadcast %208 : vector<1x128xf32> to vector<32x128xf32>
    %210 = arith.addf %207, %209 : vector<32x128xf32>
    %211 = arith.truncf %210 : vector<32x128xf32> to vector<32x128xbf16>
    %c0_78 = arith.constant 0 : index
    %c0_79 = arith.constant 0 : index
    %212 = vector.load %arg17[%c0_78, %c0_79] : memref<128x256xbf16, #tpu.memory_space<vmem>>, vector<128x256xbf16>
    %cst_80 = arith.constant dense<0.000000e+00> : vector<32x256xf32>
    %213 = tpu.matmul %211, %212, %cst_80 {dimension_numbers = #tpu.dot_dimension_numbers<[1], [0], [0], [1], [0, 0, 1, 1], [], []>} : vector<32x128xbf16>, vector<128x256xbf16>, vector<32x256xf32> -> vector<32x256xf32>
    %c0_81 = arith.constant 0 : index
    %c0_82 = arith.constant 0 : index
    %214 = vector.load %arg18[%c0_81, %c0_82] : memref<1x256xf32, #tpu.memory_space<vmem>>, vector<1x256xf32>
    %215 = vector.broadcast %214 : vector<1x256xf32> to vector<32x256xf32>
    %216 = arith.addf %213, %215 : vector<32x256xf32>
    %cst_83 = arith.constant 0.000000e+00 : f32
    %217 = vector.broadcast %cst_83 : f32 to vector<32x256xf32>
    %218 = arith.maximumf %216, %217 : vector<32x256xf32>
    %219 = arith.truncf %218 : vector<32x256xf32> to vector<32x256xbf16>
    %c0_84 = arith.constant 0 : index
    %c0_85 = arith.constant 0 : index
    %220 = vector.load %arg19[%c0_84, %c0_85] : memref<256x128xbf16, #tpu.memory_space<vmem>>, vector<256x128xbf16>
    %cst_86 = arith.constant dense<0.000000e+00> : vector<32x128xf32>
    %221 = tpu.matmul %219, %220, %cst_86 {dimension_numbers = #tpu.dot_dimension_numbers<[1], [0], [0], [1], [0, 0, 1, 1], [], []>} : vector<32x256xbf16>, vector<256x128xbf16>, vector<32x128xf32> -> vector<32x128xf32>
    %c0_87 = arith.constant 0 : index
    %c0_88 = arith.constant 0 : index
    %222 = vector.load %arg20[%c0_87, %c0_88] : memref<1x128xf32, #tpu.memory_space<vmem>>, vector<1x128xf32>
    %223 = vector.broadcast %222 : vector<1x128xf32> to vector<32x128xf32>
    %224 = arith.addf %221, %223 : vector<32x128xf32>
    %225 = arith.addf %224, %210 : vector<32x128xf32>
    %cst_89 = arith.constant dense<0.000000e+00> : vector<32xf32>
    %226 = vector.multi_reduction <add>, %225, %cst_89 [1] : vector<32x128xf32> to vector<32xf32>
    %227 = vector.shape_cast %226 : vector<32xf32> to vector<32x1xf32>
    %cst_90 = arith.constant 1.280000e+02 : f32
    %228 = vector.broadcast %cst_90 : f32 to vector<32x1xf32>
    %229 = arith.divf %227, %228 : vector<32x1xf32>
    %230 = vector.broadcast %229 : vector<32x1xf32> to vector<32x128xf32>
    %231 = arith.subf %225, %230 : vector<32x128xf32>
    %232 = arith.mulf %231, %231 : vector<32x128xf32>
    %cst_91 = arith.constant dense<0.000000e+00> : vector<32xf32>
    %233 = vector.multi_reduction <add>, %232, %cst_91 [1] : vector<32x128xf32> to vector<32xf32>
    %234 = vector.shape_cast %233 : vector<32xf32> to vector<32x1xf32>
    %cst_92 = arith.constant 1.280000e+02 : f32
    %235 = vector.broadcast %cst_92 : f32 to vector<32x1xf32>
    %236 = arith.divf %234, %235 : vector<32x1xf32>
    %237 = vector.broadcast %229 : vector<32x1xf32> to vector<32x128xf32>
    %238 = arith.subf %225, %237 : vector<32x128xf32>
    %cst_93 = arith.constant 9.99999974E-6 : f32
    %239 = vector.broadcast %cst_93 : f32 to vector<32x1xf32>
    %240 = arith.addf %236, %239 : vector<32x1xf32>
    %241 = math.rsqrt %240 : vector<32x1xf32>
    %242 = vector.broadcast %241 : vector<32x1xf32> to vector<32x128xf32>
    %243 = arith.mulf %238, %242 : vector<32x128xf32>
    %c0_94 = arith.constant 0 : index
    %c0_95 = arith.constant 0 : index
    %244 = vector.load %arg21[%c0_94, %c0_95] : memref<1x128xf32, #tpu.memory_space<vmem>>, vector<1x128xf32>
    %245 = vector.broadcast %244 : vector<1x128xf32> to vector<32x128xf32>
    %246 = arith.mulf %243, %245 : vector<32x128xf32>
    %c0_96 = arith.constant 0 : index
    %c0_97 = arith.constant 0 : index
    %247 = vector.load %arg22[%c0_96, %c0_97] : memref<1x128xf32, #tpu.memory_space<vmem>>, vector<1x128xf32>
    %248 = vector.broadcast %247 : vector<1x128xf32> to vector<32x128xf32>
    %249 = arith.addf %246, %248 : vector<32x128xf32>
    %250 = arith.truncf %249 : vector<32x128xf32> to vector<32x128xbf16>
    %c0_98 = arith.constant 0 : index
    %c0_99 = arith.constant 0 : index
    %c0_100 = arith.constant 0 : index
    %251 = vector.load %arg23[%c0_98, %c0_99, %c0_100] : memref<1x32x128xbf16, #tpu.memory_space<vmem>>, vector<1x32x128xbf16>
    %252 = vector.shape_cast %251 : vector<1x32x128xbf16> to vector<32x128xbf16>
    %253 = vector.shape_cast %250 : vector<32x128xbf16> to vector<1x32x128xbf16>
    tpu.vector_store %arg23[%c0_98, %c0_99, %c0_100], %253 {strides = array<i32>} : memref<1x32x128xbf16, #tpu.memory_space<vmem>>, vector<1x32x128xbf16>,
    return
  }
  func.func @transform_0(%arg0: i32) -> (i32, i32, i32) {
    %c0_i32 = arith.constant 0 : i32
    %c0_i32_0 = arith.constant 0 : i32
    %c0_i32_1 = arith.constant 0 : i32
    return %arg0, %c0_i32, %c0_i32_0 : i32, i32, i32
  }
  func.func @transform_1(%arg0: i32) -> (i32, i32, i32) {
    %c0_i32 = arith.constant 0 : i32
    %c0_i32_0 = arith.constant 0 : i32
    %c0_i32_1 = arith.constant 0 : i32
    return %arg0, %c0_i32, %c0_i32_0 : i32, i32, i32
  }
  func.func @transform_2(%arg0: i32) -> (i32, i32) {
    %c0_i32 = arith.constant 0 : i32
    %c0_i32_0 = arith.constant 0 : i32
    %c0_i32_1 = arith.constant 0 : i32
    return %c0_i32, %c0_i32_0 : i32, i32
  }
  func.func @transform_3(%arg0: i32) -> (i32, i32) {
    %c0_i32 = arith.constant 0 : i32
    %c0_i32_0 = arith.constant 0 : i32
    %c0_i32_1 = arith.constant 0 : i32
    return %c0_i32, %c0_i32_0 : i32, i32
  }
  func.func @transform_4(%arg0: i32) -> (i32, i32, i32) {
    %c0_i32 = arith.constant 0 : i32
    %c0_i32_0 = arith.constant 0 : i32
    %c0_i32_1 = arith.constant 0 : i32
    %c0_i32_2 = arith.constant 0 : i32
    return %c0_i32, %c0_i32_0, %c0_i32_1 : i32, i32, i32
  }
  func.func @transform_5(%arg0: i32) -> (i32, i32) {
    %c0_i32 = arith.constant 0 : i32
    %c0_i32_0 = arith.constant 0 : i32
    %c0_i32_1 = arith.constant 0 : i32
    return %c0_i32, %c0_i32_0 : i32, i32
  }
  func.func @transform_6(%arg0: i32) -> (i32, i32) {
    %c0_i32 = arith.constant 0 : i32
    %c0_i32_0 = arith.constant 0 : i32
    %c0_i32_1 = arith.constant 0 : i32
    return %c0_i32, %c0_i32_0 : i32, i32
  }
  func.func @transform_7(%arg0: i32) -> (i32, i32) {
    %c0_i32 = arith.constant 0 : i32
    %c0_i32_0 = arith.constant 0 : i32
    %c0_i32_1 = arith.constant 0 : i32
    return %c0_i32, %c0_i32_0 : i32, i32
  }
  func.func @transform_8(%arg0: i32) -> (i32, i32) {
    %c0_i32 = arith.constant 0 : i32
    %c0_i32_0 = arith.constant 0 : i32
    %c0_i32_1 = arith.constant 0 : i32
    return %c0_i32, %c0_i32_0 : i32, i32
  }
  func.func @transform_9(%arg0: i32) -> (i32, i32) {
    %c0_i32 = arith.constant 0 : i32
    %c0_i32_0 = arith.constant 0 : i32
    %c0_i32_1 = arith.constant 0 : i32
    return %c0_i32, %c0_i32_0 : i32, i32
  }
  func.func @transform_10(%arg0: i32) -> (i32, i32) {
    %c0_i32 = arith.constant 0 : i32
    %c0_i32_0 = arith.constant 0 : i32
    %c0_i32_1 = arith.constant 0 : i32
    return %c0_i32, %c0_i32_0 : i32, i32
  }
  func.func @transform_11(%arg0: i32) -> (i32, i32) {
    %c0_i32 = arith.constant 0 : i32
    %c0_i32_0 = arith.constant 0 : i32
    %c0_i32_1 = arith.constant 0 : i32
    return %c0_i32, %c0_i32_0 : i32, i32
  }
  func.func @transform_12(%arg0: i32) -> (i32, i32, i32) {
    %c0_i32 = arith.constant 0 : i32
    %c0_i32_0 = arith.constant 0 : i32
    %c0_i32_1 = arith.constant 0 : i32
    %c0_i32_2 = arith.constant 0 : i32
    return %c0_i32, %c0_i32_0, %c0_i32_1 : i32, i32, i32
  }
  func.func @transform_13(%arg0: i32) -> (i32, i32) {
    %c0_i32 = arith.constant 0 : i32
    %c0_i32_0 = arith.constant 0 : i32
    %c0_i32_1 = arith.constant 0 : i32
    return %c0_i32, %c0_i32_0 : i32, i32
  }
  func.func @transform_14(%arg0: i32) -> (i32, i32) {
    %c0_i32 = arith.constant 0 : i32
    %c0_i32_0 = arith.constant 0 : i32
    %c0_i32_1 = arith.constant 0 : i32
    return %c0_i32, %c0_i32_0 : i32, i32
  }
  func.func @transform_15(%arg0: i32) -> (i32, i32) {
    %c0_i32 = arith.constant 0 : i32
    %c0_i32_0 = arith.constant 0 : i32
    %c0_i32_1 = arith.constant 0 : i32
    return %c0_i32, %c0_i32_0 : i32, i32
  }
  func.func @transform_16(%arg0: i32) -> (i32, i32) {
    %c0_i32 = arith.constant 0 : i32
    %c0_i32_0 = arith.constant 0 : i32
    %c0_i32_1 = arith.constant 0 : i32
    return %c0_i32, %c0_i32_0 : i32, i32
  }
  func.func @transform_17(%arg0: i32) -> (i32, i32) {
    %c0_i32 = arith.constant 0 : i32
    %c0_i32_0 = arith.constant 0 : i32
    %c0_i32_1 = arith.constant 0 : i32
    return %c0_i32, %c0_i32_0 : i32, i32
  }
  func.func @transform_18(%arg0: i32) -> (i32, i32) {
    %c0_i32 = arith.constant 0 : i32
    %c0_i32_0 = arith.constant 0 : i32
    %c0_i32_1 = arith.constant 0 : i32
    return %c0_i32, %c0_i32_0 : i32, i32
  }
  func.func @transform_19(%arg0: i32) -> (i32, i32) {
    %c0_i32 = arith.constant 0 : i32
    %c0_i32_0 = arith.constant 0 : i32
    %c0_i32_1 = arith.constant 0 : i32
    return %c0_i32, %c0_i32_0 : i32, i32
  }
  func.func @transform_20(%arg0: i32) -> (i32, i32) {
    %c0_i32 = arith.constant 0 : i32
    %c0_i32_0 = arith.constant 0 : i32
    %c0_i32_1 = arith.constant 0 : i32
    return %c0_i32, %c0_i32_0 : i32, i32
  }
  func.func @transform_21(%arg0: i32) -> (i32, i32) {
    %c0_i32 = arith.constant 0 : i32
    %c0_i32_0 = arith.constant 0 : i32
    %c0_i32_1 = arith.constant 0 : i32
    return %c0_i32, %c0_i32_0 : i32, i32
  }
  func.func @transform_22(%arg0: i32) -> (i32, i32, i32) {
    %c0_i32 = arith.constant 0 : i32
    %c0_i32_0 = arith.constant 0 : i32
    %c0_i32_1 = arith.constant 0 : i32
    return %arg0, %c0_i32, %c0_i32_0 : i32, i32, i32
  }
}

module attributes {stable_mosaic.version = 11 : i64} {
  func.func @kernel(%arg0: i32, %arg1: memref<1x32x128xbf16, #tpu.memory_space<vmem>>, %arg2: memref<1x32x128xbf16, #tpu.memory_space<vmem>>, %arg3: memref<128x384xbf16, #tpu.memory_space<vmem>>, %arg4: memref<1x384xf32, #tpu.memory_space<vmem>>, %arg5: memref<4x32x128xbf16, #tpu.memory_space<vmem>>, %arg6: memref<1x128xf32, #tpu.memory_space<vmem>>, %arg7: memref<1x128xf32, #tpu.memory_space<vmem>>, %arg8: memref<1x128xf32, #tpu.memory_space<vmem>>, %arg9: memref<128x128xbf16, #tpu.memory_space<vmem>>, %arg10: memref<1x128xf32, #tpu.memory_space<vmem>>, %arg11: memref<128x256xbf16, #tpu.memory_space<vmem>>, %arg12: memref<1x256xf32, #tpu.memory_space<vmem>>, %arg13: memref<4x32x128xbf16, #tpu.memory_space<vmem>>, %arg14: memref<1x128xf32, #tpu.memory_space<vmem>>, %arg15: memref<1x128xf32, #tpu.memory_space<vmem>>, %arg16: memref<1x128xf32, #tpu.memory_space<vmem>>, %arg17: memref<128x256xbf16, #tpu.memory_space<vmem>>, %arg18: memref<1x256xf32, #tpu.memory_space<vmem>>, %arg19: memref<256x128xbf16, #tpu.memory_space<vmem>>, %arg20: memref<1x128xf32, #tpu.memory_space<vmem>>, %arg21: memref<1x128xf32, #tpu.memory_space<vmem>>, %arg22: memref<1x128xf32, #tpu.memory_space<vmem>>, %arg23: memref<1x32x128xbf16, #tpu.memory_space<vmem>>) attributes {dimension_semantics = [#tpu.dimension_semantics<parallel>], iteration_bounds = array<i64: 2>, scalar_prefetch = 0 : i64, scratch_operands = 0 : i64, tpu.core_type = #tpu.core_type<tc>, window_params = [{transform_indices = @transform_0, window_bounds = array<i64: 1, 32, 128>}, {transform_indices = @transform_1, window_bounds = array<i64: 1, 32, 128>}, {pipeline_mode = #tpu.pipeline_mode<synchronous>, transform_indices = @transform_2, window_bounds = array<i64: 128, 384>}, {pipeline_mode = #tpu.pipeline_mode<synchronous>, transform_indices = @transform_3, window_bounds = array<i64: 1, 384>}, {pipeline_mode = #tpu.pipeline_mode<synchronous>, transform_indices = @transform_4, window_bounds = array<i64: 4, 32, 128>}, {pipeline_mode = #tpu.pipeline_mode<synchronous>, transform_indices = @transform_5, window_bounds = array<i64: 1, 128>}, {pipeline_mode = #tpu.pipeline_mode<synchronous>, transform_indices = @transform_6, window_bounds = array<i64: 1, 128>}, {pipeline_mode = #tpu.pipeline_mode<synchronous>, transform_indices = @transform_7, window_bounds = array<i64: 1, 128>}, {pipeline_mode = #tpu.pipeline_mode<synchronous>, transform_indices = @transform_8, window_bounds = array<i64: 128, 128>}, {pipeline_mode = #tpu.pipeline_mode<synchronous>, transform_indices = @transform_9, window_bounds = array<i64: 1, 128>}, {pipeline_mode = #tpu.pipeline_mode<synchronous>, transform_indices = @transform_10, window_bounds = array<i64: 128, 256>}, {pipeline_mode = #tpu.pipeline_mode<synchronous>, transform_indices = @transform_11, window_bounds = array<i64: 1, 256>}, {pipeline_mode = #tpu.pipeline_mode<synchronous>, transform_indices = @transform_12, window_bounds = array<i64: 4, 32, 128>}, {pipeline_mode = #tpu.pipeline_mode<synchronous>, transform_indices = @transform_13, window_bounds = array<i64: 1, 128>}, {pipeline_mode = #tpu.pipeline_mode<synchronous>, transform_indices = @transform_14, window_bounds = array<i64: 1, 128>}, {pipeline_mode = #tpu.pipeline_mode<synchronous>, transform_indices = @transform_15, window_bounds = array<i64: 1, 128>}, {pipeline_mode = #tpu.pipeline_mode<synchronous>, transform_indices = @transform_16, window_bounds = array<i64: 128, 256>}, {pipeline_mode = #tpu.pipeline_mode<synchronous>, transform_indices = @transform_17, window_bounds = array<i64: 1, 256>}, {pipeline_mode = #tpu.pipeline_mode<synchronous>, transform_indices = @transform_18, window_bounds = array<i64: 256, 128>}, {pipeline_mode = #tpu.pipeline_mode<synchronous>, transform_indices = @transform_19, window_bounds = array<i64: 1, 128>}, {pipeline_mode = #tpu.pipeline_mode<synchronous>, transform_indices = @transform_20, window_bounds = array<i64: 1, 128>}, {pipeline_mode = #tpu.pipeline_mode<synchronous>, transform_indices = @transform_21, window_bounds = array<i64: 1, 128>}, {transform_indices = @transform_22, window_bounds = array<i64: 1, 32, 128>}]} {
    %c0 = arith.constant 0 : index
    %c0_0 = arith.constant 0 : index
    %c0_1 = arith.constant 0 : index
    %0 = vector.load %arg1[%c0, %c0_0, %c0_1] : memref<1x32x128xbf16, #tpu.memory_space<vmem>>, vector<1x32x128xbf16>
    %1 = vector.shape_cast %0 : vector<1x32x128xbf16> to vector<32x128xbf16>
    %2 = arith.extf %1 : vector<32x128xbf16> to vector<32x128xf32>
    %c0_2 = arith.constant 0 : index
    %c0_3 = arith.constant 0 : index
    %c0_4 = arith.constant 0 : index
    %3 = vector.load %arg2[%c0_2, %c0_3, %c0_4] : memref<1x32x128xbf16, #tpu.memory_space<vmem>>, vector<1x32x128xbf16>
    %4 = vector.shape_cast %3 : vector<1x32x128xbf16> to vector<32x128xbf16>
    %c0_5 = arith.constant 0 : index
    %c0_6 = arith.constant 0 : index
    %5 = vector.load %arg3[%c0_5, %c0_6] : memref<128x384xbf16, #tpu.memory_space<vmem>>, vector<128x384xbf16>
    %cst = arith.constant dense<0.000000e+00> : vector<32x384xf32>
    %6 = tpu.matmul %1, %5, %cst {dimension_numbers = #tpu.dot_dimension_numbers<[1], [0], [0], [1], [0, 0, 1, 1], [], []>} : vector<32x128xbf16>, vector<128x384xbf16>, vector<32x384xf32> -> vector<32x384xf32>
    %c0_7 = arith.constant 0 : index
    %c0_8 = arith.constant 0 : index
    %7 = vector.load %arg4[%c0_7, %c0_8] : memref<1x384xf32, #tpu.memory_space<vmem>>, vector<1x384xf32>
    %8 = vector.broadcast %7 : vector<1x384xf32> to vector<32x384xf32>
    %9 = arith.addf %6, %8 : vector<32x384xf32>
    %10 = vector.extract_strided_slice %9 {offsets = [0, 0], sizes = [32, 32], strides = [1, 1]} : vector<32x384xf32> to vector<32x32xf32>
    %11 = vector.extract_strided_slice %9 {offsets = [0, 32], sizes = [32, 32], strides = [1, 1]} : vector<32x384xf32> to vector<32x32xf32>
    %12 = vector.extract_strided_slice %9 {offsets = [0, 64], sizes = [32, 32], strides = [1, 1]} : vector<32x384xf32> to vector<32x32xf32>
    %13 = vector.extract_strided_slice %9 {offsets = [0, 96], sizes = [32, 32], strides = [1, 1]} : vector<32x384xf32> to vector<32x32xf32>
    %14 = vector.shape_cast %10 : vector<32x32xf32> to vector<1x32x32xf32>
    %15 = vector.shape_cast %11 : vector<32x32xf32> to vector<1x32x32xf32>
    %16 = vector.shape_cast %12 : vector<32x32xf32> to vector<1x32x32xf32>
    %17 = vector.shape_cast %13 : vector<32x32xf32> to vector<1x32x32xf32>
    %18 = tpu.concatenate %14, %15, %16, %17 in 0 : vector<1x32x32xf32>, vector<1x32x32xf32>, vector<1x32x32xf32>, vector<1x32x32xf32> -> vector<4x32x32xf32>
    %19 = arith.truncf %18 : vector<4x32x32xf32> to vector<4x32x32xbf16>
    %20 = vector.extract_strided_slice %9 {offsets = [0, 128], sizes = [32, 32], strides = [1, 1]} : vector<32x384xf32> to vector<32x32xf32>
    %21 = vector.extract_strided_slice %9 {offsets = [0, 160], sizes = [32, 32], strides = [1, 1]} : vector<32x384xf32> to vector<32x32xf32>
    %22 = vector.extract_strided_slice %9 {offsets = [0, 192], sizes = [32, 32], strides = [1, 1]} : vector<32x384xf32> to vector<32x32xf32>
    %23 = vector.extract_strided_slice %9 {offsets = [0, 224], sizes = [32, 32], strides = [1, 1]} : vector<32x384xf32> to vector<32x32xf32>
    %24 = vector.shape_cast %20 : vector<32x32xf32> to vector<1x32x32xf32>
    %25 = vector.shape_cast %21 : vector<32x32xf32> to vector<1x32x32xf32>
    %26 = vector.shape_cast %22 : vector<32x32xf32> to vector<1x32x32xf32>
    %27 = vector.shape_cast %23 : vector<32x32xf32> to vector<1x32x32xf32>
    %28 = tpu.concatenate %24, %25, %26, %27 in 0 : vector<1x32x32xf32>, vector<1x32x32xf32>, vector<1x32x32xf32>, vector<1x32x32xf32> -> vector<4x32x32xf32>
    %29 = arith.truncf %28 : vector<4x32x32xf32> to vector<4x32x32xbf16>
    %30 = vector.extract_strided_slice %9 {offsets = [0, 256], sizes = [32, 32], strides = [1, 1]} : vector<32x384xf32> to vector<32x32xf32>
    %31 = vector.extract_strided_slice %9 {offsets = [0, 288], sizes = [32, 32], strides = [1, 1]} : vector<32x384xf32> to vector<32x32xf32>
    %32 = vector.extract_strided_slice %9 {offsets = [0, 320], sizes = [32, 32], strides = [1, 1]} : vector<32x384xf32> to vector<32x32xf32>
    %33 = vector.extract_strided_slice %9 {offsets = [0, 352], sizes = [32, 32], strides = [1, 1]} : vector<32x384xf32> to vector<32x32xf32>
    %34 = vector.shape_cast %30 : vector<32x32xf32> to vector<1x32x32xf32>
    %35 = vector.shape_cast %31 : vector<32x32xf32> to vector<1x32x32xf32>
    %36 = vector.shape_cast %32 : vector<32x32xf32> to vector<1x32x32xf32>
    %37 = vector.shape_cast %33 : vector<32x32xf32> to vector<1x32x32xf32>
    %38 = tpu.concatenate %34, %35, %36, %37 in 0 : vector<1x32x32xf32>, vector<1x32x32xf32>, vector<1x32x32xf32>, vector<1x32x32xf32> -> vector<4x32x32xf32>
    %39 = arith.truncf %38 : vector<4x32x32xf32> to vector<4x32x32xbf16>
    "tpu.trace_start"() <{level = 10 : i32, message = "hqd,hkd->hqk"}> : () -> ()
    %cst_9 = arith.constant dense<0.000000e+00> : vector<4x32x32xf32>
    %40 = tpu.matmul %19, %29, %cst_9 {dimension_numbers = #tpu.dot_dimension_numbers<[2], [2], [1], [1], [0, 0, 0, 1, 1, 1], [0], [0]>} : vector<4x32x32xbf16>, vector<4x32x32xbf16>, vector<4x32x32xf32> -> vector<4x32x32xf32>
    "tpu.trace_stop"() : () -> ()
    %cst_10 = arith.constant dense<0xFF800000> : vector<4x32xf32>
    %41 = vector.multi_reduction <maximumf>, %40, %cst_10 [2] : vector<4x32x32xf32> to vector<4x32xf32>
    %42 = vector.shape_cast %41 : vector<4x32xf32> to vector<4x32x1xf32>
    %43 = vector.broadcast %42 : vector<4x32x1xf32> to vector<4x32x32xf32>
    %44 = arith.subf %40, %43 : vector<4x32x32xf32>
    %45 = math.exp %44 : vector<4x32x32xf32>
    %cst_11 = arith.constant dense<0.000000e+00> : vector<4x32xf32>
    %46 = vector.multi_reduction <add>, %45, %cst_11 [2] : vector<4x32x32xf32> to vector<4x32xf32>
    %47 = vector.shape_cast %46 : vector<4x32xf32> to vector<4x32x1xf32>
    %48 = tpu.reciprocal %47 {approx = true} : vector<4x32x1xf32> -> vector<4x32x1xf32>
    %49 = vector.broadcast %48 : vector<4x32x1xf32> to vector<4x32x32xf32>
    %50 = arith.mulf %45, %49 : vector<4x32x32xf32>
    %51 = arith.truncf %50 : vector<4x32x32xf32> to vector<4x32x32xbf16>
    "tpu.trace_start"() <{level = 10 : i32, message = "hqk,hkd->hqd"}> : () -> ()
    %cst_12 = arith.constant dense<0.000000e+00> : vector<4x32x32xf32>
    %52 = tpu.matmul %51, %39, %cst_12 {dimension_numbers = #tpu.dot_dimension_numbers<[2], [1], [1], [2], [0, 0, 0, 1, 1, 2], [0], [0]>} : vector<4x32x32xbf16>, vector<4x32x32xbf16>, vector<4x32x32xf32> -> vector<4x32x32xf32>
    "tpu.trace_stop"() : () -> ()
    %53 = arith.truncf %52 : vector<4x32x32xf32> to vector<4x32x32xbf16>
    %c0_13 = arith.constant 0 : index
    %c0_14 = arith.constant 0 : index
    %54 = vector.load %arg6[%c0_13, %c0_14] : memref<1x128xf32, #tpu.memory_space<vmem>>, vector<1x128xf32>
    %55 = vector.extract_strided_slice %53 {offsets = [0, 0, 0], sizes = [1, 32, 32], strides = [1, 1, 1]} : vector<4x32x32xbf16> to vector<1x32x32xbf16>
    %56 = vector.shape_cast %55 : vector<1x32x32xbf16> to vector<32x32xbf16>
    %c0_15 = arith.constant 0 : index
    %c0_16 = arith.constant 0 : index
    %c0_17 = arith.constant 0 : index
    %57 = vector.load %arg5[%c0_15, %c0_16, %c0_17] : memref<4x32x128xbf16, #tpu.memory_space<vmem>>, vector<1x32x128xbf16>
    %58 = vector.shape_cast %57 : vector<1x32x128xbf16> to vector<32x128xbf16>
    %cst_18 = arith.constant dense<0.000000e+00> : vector<32x128xf32>
    %59 = tpu.matmul %56, %58, %cst_18 {dimension_numbers = #tpu.dot_dimension_numbers<[1], [0], [0], [1], [0, 0, 1, 1], [], []>} : vector<32x32xbf16>, vector<32x128xbf16>, vector<32x128xf32> -> vector<32x128xf32>
    %60 = vector.broadcast %54 : vector<1x128xf32> to vector<32x128xf32>
    %61 = arith.addf %60, %59 : vector<32x128xf32>
    %62 = vector.extract_strided_slice %53 {offsets = [1, 0, 0], sizes = [1, 32, 32], strides = [1, 1, 1]} : vector<4x32x32xbf16> to vector<1x32x32xbf16>
    %63 = vector.shape_cast %62 : vector<1x32x32xbf16> to vector<32x32xbf16>
    %c1 = arith.constant 1 : index
    %c0_19 = arith.constant 0 : index
    %c0_20 = arith.constant 0 : index
    %64 = vector.load %arg5[%c1, %c0_19, %c0_20] : memref<4x32x128xbf16, #tpu.memory_space<vmem>>, vector<1x32x128xbf16>
    %65 = vector.shape_cast %64 : vector<1x32x128xbf16> to vector<32x128xbf16>
    %cst_21 = arith.constant dense<0.000000e+00> : vector<32x128xf32>
    %66 = tpu.matmul %63, %65, %cst_21 {dimension_numbers = #tpu.dot_dimension_numbers<[1], [0], [0], [1], [0, 0, 1, 1], [], []>} : vector<32x32xbf16>, vector<32x128xbf16>, vector<32x128xf32> -> vector<32x128xf32>
    %67 = arith.addf %61, %66 : vector<32x128xf32>
    %68 = vector.extract_strided_slice %53 {offsets = [2, 0, 0], sizes = [1, 32, 32], strides = [1, 1, 1]} : vector<4x32x32xbf16> to vector<1x32x32xbf16>
    %69 = vector.shape_cast %68 : vector<1x32x32xbf16> to vector<32x32xbf16>
    %c2 = arith.constant 2 : index
    %c0_22 = arith.constant 0 : index
    %c0_23 = arith.constant 0 : index
    %70 = vector.load %arg5[%c2, %c0_22, %c0_23] : memref<4x32x128xbf16, #tpu.memory_space<vmem>>, vector<1x32x128xbf16>
    %71 = vector.shape_cast %70 : vector<1x32x128xbf16> to vector<32x128xbf16>
    %cst_24 = arith.constant dense<0.000000e+00> : vector<32x128xf32>
    %72 = tpu.matmul %69, %71, %cst_24 {dimension_numbers = #tpu.dot_dimension_numbers<[1], [0], [0], [1], [0, 0, 1, 1], [], []>} : vector<32x32xbf16>, vector<32x128xbf16>, vector<32x128xf32> -> vector<32x128xf32>
    %73 = arith.addf %67, %72 : vector<32x128xf32>
    %74 = vector.extract_strided_slice %53 {offsets = [3, 0, 0], sizes = [1, 32, 32], strides = [1, 1, 1]} : vector<4x32x32xbf16> to vector<1x32x32xbf16>
    %75 = vector.shape_cast %74 : vector<1x32x32xbf16> to vector<32x32xbf16>
    %c3 = arith.constant 3 : index
    %c0_25 = arith.constant 0 : index
    %c0_26 = arith.constant 0 : index
    %76 = vector.load %arg5[%c3, %c0_25, %c0_26] : memref<4x32x128xbf16, #tpu.memory_space<vmem>>, vector<1x32x128xbf16>
    %77 = vector.shape_cast %76 : vector<1x32x128xbf16> to vector<32x128xbf16>
    %cst_27 = arith.constant dense<0.000000e+00> : vector<32x128xf32>
    %78 = tpu.matmul %75, %77, %cst_27 {dimension_numbers = #tpu.dot_dimension_numbers<[1], [0], [0], [1], [0, 0, 1, 1], [], []>} : vector<32x32xbf16>, vector<32x128xbf16>, vector<32x128xf32> -> vector<32x128xf32>
    %79 = arith.addf %73, %78 : vector<32x128xf32>
    %80 = arith.addf %79, %2 : vector<32x128xf32>
    %cst_28 = arith.constant dense<0.000000e+00> : vector<32xf32>
    %81 = vector.multi_reduction <add>, %80, %cst_28 [1] : vector<32x128xf32> to vector<32xf32>
    %82 = vector.shape_cast %81 : vector<32xf32> to vector<32x1xf32>
    %cst_29 = arith.constant 1.280000e+02 : f32
    %83 = vector.broadcast %cst_29 : f32 to vector<32x1xf32>
    %84 = arith.divf %82, %83 : vector<32x1xf32>
    %85 = vector.broadcast %84 : vector<32x1xf32> to vector<32x128xf32>
    %86 = arith.subf %80, %85 : vector<32x128xf32>
    %87 = arith.mulf %86, %86 : vector<32x128xf32>
    %cst_30 = arith.constant dense<0.000000e+00> : vector<32xf32>
    %88 = vector.multi_reduction <add>, %87, %cst_30 [1] : vector<32x128xf32> to vector<32xf32>
    %89 = vector.shape_cast %88 : vector<32xf32> to vector<32x1xf32>
    %cst_31 = arith.constant 1.280000e+02 : f32
    %90 = vector.broadcast %cst_31 : f32 to vector<32x1xf32>
    %91 = arith.divf %89, %90 : vector<32x1xf32>
    %92 = vector.broadcast %84 : vector<32x1xf32> to vector<32x128xf32>
    %93 = arith.subf %80, %92 : vector<32x128xf32>
    %cst_32 = arith.constant 9.99999974E-6 : f32
    %94 = vector.broadcast %cst_32 : f32 to vector<32x1xf32>
    %95 = arith.addf %91, %94 : vector<32x1xf32>
    %96 = math.rsqrt %95 : vector<32x1xf32>
    %97 = vector.broadcast %96 : vector<32x1xf32> to vector<32x128xf32>
    %98 = arith.mulf %93, %97 : vector<32x128xf32>
    %c0_33 = arith.constant 0 : index
    %c0_34 = arith.constant 0 : index
    %99 = vector.load %arg7[%c0_33, %c0_34] : memref<1x128xf32, #tpu.memory_space<vmem>>, vector<1x128xf32>
    %100 = vector.broadcast %99 : vector<1x128xf32> to vector<32x128xf32>
    %101 = arith.mulf %98, %100 : vector<32x128xf32>
    %c0_35 = arith.constant 0 : index
    %c0_36 = arith.constant 0 : index
    %102 = vector.load %arg8[%c0_35, %c0_36] : memref<1x128xf32, #tpu.memory_space<vmem>>, vector<1x128xf32>
    %103 = vector.broadcast %102 : vector<1x128xf32> to vector<32x128xf32>
    %104 = arith.addf %101, %103 : vector<32x128xf32>
    %105 = arith.truncf %104 : vector<32x128xf32> to vector<32x128xbf16>
    %c0_37 = arith.constant 0 : index
    %c0_38 = arith.constant 0 : index
    %106 = vector.load %arg9[%c0_37, %c0_38] : memref<128x128xbf16, #tpu.memory_space<vmem>>, vector<128x128xbf16>
    %cst_39 = arith.constant dense<0.000000e+00> : vector<32x128xf32>
    %107 = tpu.matmul %105, %106, %cst_39 {dimension_numbers = #tpu.dot_dimension_numbers<[1], [0], [0], [1], [0, 0, 1, 1], [], []>} : vector<32x128xbf16>, vector<128x128xbf16>, vector<32x128xf32> -> vector<32x128xf32>
    %c0_40 = arith.constant 0 : index
    %c0_41 = arith.constant 0 : index
    %108 = vector.load %arg10[%c0_40, %c0_41] : memref<1x128xf32, #tpu.memory_space<vmem>>, vector<1x128xf32>
    %109 = vector.broadcast %108 : vector<1x128xf32> to vector<32x128xf32>
    %110 = arith.addf %107, %109 : vector<32x128xf32>
    %c0_42 = arith.constant 0 : index
    %c0_43 = arith.constant 0 : index
    %111 = vector.load %arg11[%c0_42, %c0_43] : memref<128x256xbf16, #tpu.memory_space<vmem>>, vector<128x256xbf16>
    %cst_44 = arith.constant dense<0.000000e+00> : vector<32x256xf32>
    %112 = tpu.matmul %4, %111, %cst_44 {dimension_numbers = #tpu.dot_dimension_numbers<[1], [0], [0], [1], [0, 0, 1, 1], [], []>} : vector<32x128xbf16>, vector<128x256xbf16>, vector<32x256xf32> -> vector<32x256xf32>
    %c0_45 = arith.constant 0 : index
    %c0_46 = arith.constant 0 : index
    %113 = vector.load %arg12[%c0_45, %c0_46] : memref<1x256xf32, #tpu.memory_space<vmem>>, vector<1x256xf32>
    %114 = vector.broadcast %113 : vector<1x256xf32> to vector<32x256xf32>
    %115 = arith.addf %112, %114 : vector<32x256xf32>
    %116 = vector.extract_strided_slice %110 {offsets = [0, 0], sizes = [32, 32], strides = [1, 1]} : vector<32x128xf32> to vector<32x32xf32>
    %117 = vector.extract_strided_slice %110 {offsets = [0, 32], sizes = [32, 32], strides = [1, 1]} : vector<32x128xf32> to vector<32x32xf32>
    %118 = vector.extract_strided_slice %110 {offsets = [0, 64], sizes = [32, 32], strides = [1, 1]} : vector<32x128xf32> to vector<32x32xf32>
    %119 = vector.extract_strided_slice %110 {offsets = [0, 96], sizes = [32, 32], strides = [1, 1]} : vector<32x128xf32> to vector<32x32xf32>
    %120 = vector.shape_cast %116 : vector<32x32xf32> to vector<1x32x32xf32>
    %121 = vector.shape_cast %117 : vector<32x32xf32> to vector<1x32x32xf32>
    %122 = vector.shape_cast %118 : vector<32x32xf32> to vector<1x32x32xf32>
    %123 = vector.shape_cast %119 : vector<32x32xf32> to vector<1x32x32xf32>
    %124 = tpu.concatenate %120, %121, %122, %123 in 0 : vector<1x32x32xf32>, vector<1x32x32xf32>, vector<1x32x32xf32>, vector<1x32x32xf32> -> vector<4x32x32xf32>
    %125 = arith.truncf %124 : vector<4x32x32xf32> to vector<4x32x32xbf16>
    %126 = vector.extract_strided_slice %115 {offsets = [0, 0], sizes = [32, 32], strides = [1, 1]} : vector<32x256xf32> to vector<32x32xf32>
    %127 = vector.extract_strided_slice %115 {offsets = [0, 32], sizes = [32, 32], strides = [1, 1]} : vector<32x256xf32> to vector<32x32xf32>
    %128 = vector.extract_strided_slice %115 {offsets = [0, 64], sizes = [32, 32], strides = [1, 1]} : vector<32x256xf32> to vector<32x32xf32>
    %129 = vector.extract_strided_slice %115 {offsets = [0, 96], sizes = [32, 32], strides = [1, 1]} : vector<32x256xf32> to vector<32x32xf32>
    %130 = vector.shape_cast %126 : vector<32x32xf32> to vector<1x32x32xf32>
    %131 = vector.shape_cast %127 : vector<32x32xf32> to vector<1x32x32xf32>
    %132 = vector.shape_cast %128 : vector<32x32xf32> to vector<1x32x32xf32>
    %133 = vector.shape_cast %129 : vector<32x32xf32> to vector<1x32x32xf32>
    %134 = tpu.concatenate %130, %131, %132, %133 in 0 : vector<1x32x32xf32>, vector<1x32x32xf32>, vector<1x32x32xf32>, vector<1x32x32xf32> -> vector<4x32x32xf32>
    %135 = arith.truncf %134 : vector<4x32x32xf32> to vector<4x32x32xbf16>
    %136 = vector.extract_strided_slice %115 {offsets = [0, 128], sizes = [32, 32], strides = [1, 1]} : vector<32x256xf32> to vector<32x32xf32>
    %137 = vector.extract_strided_slice %115 {offsets = [0, 160], sizes = [32, 32], strides = [1, 1]} : vector<32x256xf32> to vector<32x32xf32>
    %138 = vector.extract_strided_slice %115 {offsets = [0, 192], sizes = [32, 32], strides = [1, 1]} : vector<32x256xf32> to vector<32x32xf32>
    %139 = vector.extract_strided_slice %115 {offsets = [0, 224], sizes = [32, 32], strides = [1, 1]} : vector<32x256xf32> to vector<32x32xf32>
    %140 = vector.shape_cast %136 : vector<32x32xf32> to vector<1x32x32xf32>
    %141 = vector.shape_cast %137 : vector<32x32xf32> to vector<1x32x32xf32>
    %142 = vector.shape_cast %138 : vector<32x32xf32> to vector<1x32x32xf32>
    %143 = vector.shape_cast %139 : vector<32x32xf32> to vector<1x32x32xf32>
    %144 = tpu.concatenate %140, %141, %142, %143 in 0 : vector<1x32x32xf32>, vector<1x32x32xf32>, vector<1x32x32xf32>, vector<1x32x32xf32> -> vector<4x32x32xf32>
    %145 = arith.truncf %144 : vector<4x32x32xf32> to vector<4x32x32xbf16>
    "tpu.trace_start"() <{level = 10 : i32, message = "hqd,hkd->hqk"}> : () -> ()
    %cst_47 = arith.constant dense<0.000000e+00> : vector<4x32x32xf32>
    %146 = tpu.matmul %125, %135, %cst_47 {dimension_numbers = #tpu.dot_dimension_numbers<[2], [2], [1], [1], [0, 0, 0, 1, 1, 1], [0], [0]>} : vector<4x32x32xbf16>, vector<4x32x32xbf16>, vector<4x32x32xf32> -> vector<4x32x32xf32>
    "tpu.trace_stop"() : () -> ()
    %cst_48 = arith.constant dense<0xFF800000> : vector<4x32xf32>
    %147 = vector.multi_reduction <maximumf>, %146, %cst_48 [2] : vector<4x32x32xf32> to vector<4x32xf32>
    %148 = vector.shape_cast %147 : vector<4x32xf32> to vector<4x32x1xf32>
    %149 = vector.broadcast %148 : vector<4x32x1xf32> to vector<4x32x32xf32>
    %150 = arith.subf %146, %149 : vector<4x32x32xf32>
    %151 = math.exp %150 : vector<4x32x32xf32>
    %cst_49 = arith.constant dense<0.000000e+00> : vector<4x32xf32>
    %152 = vector.multi_reduction <add>, %151, %cst_49 [2] : vector<4x32x32xf32> to vector<4x32xf32>
    %153 = vector.shape_cast %152 : vector<4x32xf32> to vector<4x32x1xf32>
    %154 = tpu.reciprocal %153 {approx = true} : vector<4x32x1xf32> -> vector<4x32x1xf32>
    %155 = vector.broadcast %154 : vector<4x32x1xf32> to vector<4x32x32xf32>
    %156 = arith.mulf %151, %155 : vector<4x32x32xf32>
    %157 = arith.truncf %156 : vector<4x32x32xf32> to vector<4x32x32xbf16>
    "tpu.trace_start"() <{level = 10 : i32, message = "hqk,hkd->hqd"}> : () -> ()
    %cst_50 = arith.constant dense<0.000000e+00> : vector<4x32x32xf32>
    %158 = tpu.matmul %157, %145, %cst_50 {dimension_numbers = #tpu.dot_dimension_numbers<[2], [1], [1], [2], [0, 0, 0, 1, 1, 2], [0], [0]>} : vector<4x32x32xbf16>, vector<4x32x32xbf16>, vector<4x32x32xf32> -> vector<4x32x32xf32>
    "tpu.trace_stop"() : () -> ()
    %159 = arith.truncf %158 : vector<4x32x32xf32> to vector<4x32x32xbf16>
    %c0_51 = arith.constant 0 : index
    %c0_52 = arith.constant 0 : index
    %160 = vector.load %arg14[%c0_51, %c0_52] : memref<1x128xf32, #tpu.memory_space<vmem>>, vector<1x128xf32>
    %161 = vector.extract_strided_slice %159 {offsets = [0, 0, 0], sizes = [1, 32, 32], strides = [1, 1, 1]} : vector<4x32x32xbf16> to vector<1x32x32xbf16>
    %162 = vector.shape_cast %161 : vector<1x32x32xbf16> to vector<32x32xbf16>
    %c0_53 = arith.constant 0 : index
    %c0_54 = arith.constant 0 : index
    %c0_55 = arith.constant 0 : index
    %163 = vector.load %arg13[%c0_53, %c0_54, %c0_55] : memref<4x32x128xbf16, #tpu.memory_space<vmem>>, vector<1x32x128xbf16>
    %164 = vector.shape_cast %163 : vector<1x32x128xbf16> to vector<32x128xbf16>
    %cst_56 = arith.constant dense<0.000000e+00> : vector<32x128xf32>
    %165 = tpu.matmul %162, %164, %cst_56 {dimension_numbers = #tpu.dot_dimension_numbers<[1], [0], [0], [1], [0, 0, 1, 1], [], []>} : vector<32x32xbf16>, vector<32x128xbf16>, vector<32x128xf32> -> vector<32x128xf32>
    %166 = vector.broadcast %160 : vector<1x128xf32> to vector<32x128xf32>
    %167 = arith.addf %166, %165 : vector<32x128xf32>
    %168 = vector.extract_strided_slice %159 {offsets = [1, 0, 0], sizes = [1, 32, 32], strides = [1, 1, 1]} : vector<4x32x32xbf16> to vector<1x32x32xbf16>
    %169 = vector.shape_cast %168 : vector<1x32x32xbf16> to vector<32x32xbf16>
    %c1_57 = arith.constant 1 : index
    %c0_58 = arith.constant 0 : index
    %c0_59 = arith.constant 0 : index
    %170 = vector.load %arg13[%c1_57, %c0_58, %c0_59] : memref<4x32x128xbf16, #tpu.memory_space<vmem>>, vector<1x32x128xbf16>
    %171 = vector.shape_cast %170 : vector<1x32x128xbf16> to vector<32x128xbf16>
    %cst_60 = arith.constant dense<0.000000e+00> : vector<32x128xf32>
    %172 = tpu.matmul %169, %171, %cst_60 {dimension_numbers = #tpu.dot_dimension_numbers<[1], [0], [0], [1], [0, 0, 1, 1], [], []>} : vector<32x32xbf16>, vector<32x128xbf16>, vector<32x128xf32> -> vector<32x128xf32>
    %173 = arith.addf %167, %172 : vector<32x128xf32>
    %174 = vector.extract_strided_slice %159 {offsets = [2, 0, 0], sizes = [1, 32, 32], strides = [1, 1, 1]} : vector<4x32x32xbf16> to vector<1x32x32xbf16>
    %175 = vector.shape_cast %174 : vector<1x32x32xbf16> to vector<32x32xbf16>
    %c2_61 = arith.constant 2 : index
    %c0_62 = arith.constant 0 : index
    %c0_63 = arith.constant 0 : index
    %176 = vector.load %arg13[%c2_61, %c0_62, %c0_63] : memref<4x32x128xbf16, #tpu.memory_space<vmem>>, vector<1x32x128xbf16>
    %177 = vector.shape_cast %176 : vector<1x32x128xbf16> to vector<32x128xbf16>
    %cst_64 = arith.constant dense<0.000000e+00> : vector<32x128xf32>
    %178 = tpu.matmul %175, %177, %cst_64 {dimension_numbers = #tpu.dot_dimension_numbers<[1], [0], [0], [1], [0, 0, 1, 1], [], []>} : vector<32x32xbf16>, vector<32x128xbf16>, vector<32x128xf32> -> vector<32x128xf32>
    %179 = arith.addf %173, %178 : vector<32x128xf32>
    %180 = vector.extract_strided_slice %159 {offsets = [3, 0, 0], sizes = [1, 32, 32], strides = [1, 1, 1]} : vector<4x32x32xbf16> to vector<1x32x32xbf16>
    %181 = vector.shape_cast %180 : vector<1x32x32xbf16> to vector<32x32xbf16>
    %c3_65 = arith.constant 3 : index
    %c0_66 = arith.constant 0 : index
    %c0_67 = arith.constant 0 : index
    %182 = vector.load %arg13[%c3_65, %c0_66, %c0_67] : memref<4x32x128xbf16, #tpu.memory_space<vmem>>, vector<1x32x128xbf16>
    %183 = vector.shape_cast %182 : vector<1x32x128xbf16> to vector<32x128xbf16>
    %cst_68 = arith.constant dense<0.000000e+00> : vector<32x128xf32>
    %184 = tpu.matmul %181, %183, %cst_68 {dimension_numbers = #tpu.dot_dimension_numbers<[1], [0], [0], [1], [0, 0, 1, 1], [], []>} : vector<32x32xbf16>, vector<32x128xbf16>, vector<32x128xf32> -> vector<32x128xf32>
    %185 = arith.addf %179, %184 : vector<32x128xf32>
    %186 = arith.addf %185, %104 : vector<32x128xf32>
    %cst_69 = arith.constant dense<0.000000e+00> : vector<32xf32>
    %187 = vector.multi_reduction <add>, %186, %cst_69 [1] : vector<32x128xf32> to vector<32xf32>
    %188 = vector.shape_cast %187 : vector<32xf32> to vector<32x1xf32>
    %cst_70 = arith.constant 1.280000e+02 : f32
    %189 = vector.broadcast %cst_70 : f32 to vector<32x1xf32>
    %190 = arith.divf %188, %189 : vector<32x1xf32>
    %191 = vector.broadcast %190 : vector<32x1xf32> to vector<32x128xf32>
    %192 = arith.subf %186, %191 : vector<32x128xf32>
    %193 = arith.mulf %192, %192 : vector<32x128xf32>
    %cst_71 = arith.constant dense<0.000000e+00> : vector<32xf32>
    %194 = vector.multi_reduction <add>, %193, %cst_71 [1] : vector<32x128xf32> to vector<32xf32>
    %195 = vector.shape_cast %194 : vector<32xf32> to vector<32x1xf32>
    %cst_72 = arith.constant 1.280000e+02 : f32
    %196 = vector.broadcast %cst_72 : f32 to vector<32x1xf32>
    %197 = arith.divf %195, %196 : vector<32x1xf32>
    %198 = vector.broadcast %190 : vector<32x1xf32> to vector<32x128xf32>
    %199 = arith.subf %186, %198 : vector<32x128xf32>
    %cst_73 = arith.constant 9.99999974E-6 : f32
    %200 = vector.broadcast %cst_73 : f32 to vector<32x1xf32>
    %201 = arith.addf %197, %200 : vector<32x1xf32>
    %202 = math.rsqrt %201 : vector<32x1xf32>
    %203 = vector.broadcast %202 : vector<32x1xf32> to vector<32x128xf32>
    %204 = arith.mulf %199, %203 : vector<32x128xf32>
    %c0_74 = arith.constant 0 : index
    %c0_75 = arith.constant 0 : index
    %205 = vector.load %arg15[%c0_74, %c0_75] : memref<1x128xf32, #tpu.memory_space<vmem>>, vector<1x128xf32>
    %206 = vector.broadcast %205 : vector<1x128xf32> to vector<32x128xf32>
    %207 = arith.mulf %204, %206 : vector<32x128xf32>
    %c0_76 = arith.constant 0 : index
    %c0_77 = arith.constant 0 : index
    %208 = vector.load %arg16[%c0_76, %c0_77] : memref<1x128xf32, #tpu.memory_space<vmem>>, vector<1x128xf32>
    %209 = vector.broadcast %208 : vector<1x128xf32> to vector<32x128xf32>
    %210 = arith.addf %207, %209 : vector<32x128xf32>
    %211 = arith.truncf %210 : vector<32x128xf32> to vector<32x128xbf16>
    %c0_78 = arith.constant 0 : index
    %c0_79 = arith.constant 0 : index
    %212 = vector.load %arg17[%c0_78, %c0_79] : memref<128x256xbf16, #tpu.memory_space<vmem>>, vector<128x256xbf16>
    %cst_80 = arith.constant dense<0.000000e+00> : vector<32x256xf32>
    %213 = tpu.matmul %211, %212, %cst_80 {dimension_numbers = #tpu.dot_dimension_numbers<[1], [0], [0], [1], [0, 0, 1, 1], [], []>} : vector<32x128xbf16>, vector<128x256xbf16>, vector<32x256xf32> -> vector<32x256xf32>
    %c0_81 = arith.constant 0 : index
    %c0_82 = arith.constant 0 : index
    %214 = vector.load %arg18[%c0_81, %c0_82] : memref<1x256xf32, #tpu.memory_space<vmem>>, vector<1x256xf32>
    %215 = vector.broadcast %214 : vector<1x256xf32> to vector<32x256xf32>
    %216 = arith.addf %213, %215 : vector<32x256xf32>
    %cst_83 = arith.constant 0.000000e+00 : f32
    %217 = vector.broadcast %cst_83 : f32 to vector<32x256xf32>
    %218 = arith.maximumf %216, %217 : vector<32x256xf32>
    %219 = arith.truncf %218 : vector<32x256xf32> to vector<32x256xbf16>
    %c0_84 = arith.constant 0 : index
    %c0_85 = arith.constant 0 : index
    %220 = vector.load %arg19[%c0_84, %c0_85] : memref<256x128xbf16, #tpu.memory_space<vmem>>, vector<256x128xbf16>
    %cst_86 = arith.constant dense<0.000000e+00> : vector<32x128xf32>
    %221 = tpu.matmul %219, %220, %cst_86 {dimension_numbers = #tpu.dot_dimension_numbers<[1], [0], [0], [1], [0, 0, 1, 1], [], []>} : vector<32x256xbf16>, vector<256x128xbf16>, vector<32x128xf32> -> vector<32x128xf32>
    %c0_87 = arith.constant 0 : index
    %c0_88 = arith.constant 0 : index
    %222 = vector.load %arg20[%c0_87, %c0_88] : memref<1x128xf32, #tpu.memory_space<vmem>>, vector<1x128xf32>
    %223 = vector.broadcast %222 : vector<1x128xf32> to vector<32x128xf32>
    %224 = arith.addf %221, %223 : vector<32x128xf32>
    %225 = arith.addf %224, %210 : vector<32x128xf32>
    %cst_89 = arith.constant dense<0.000000e+00> : vector<32xf32>
    %226 = vector.multi_reduction <add>, %225, %cst_89 [1] : vector<32x128xf32> to vector<32xf32>
    %227 = vector.shape_cast %226 : vector<32xf32> to vector<32x1xf32>
    %cst_90 = arith.constant 1.280000e+02 : f32
    %228 = vector.broadcast %cst_90 : f32 to vector<32x1xf32>
    %229 = arith.divf %227, %228 : vector<32x1xf32>
    %230 = vector.broadcast %229 : vector<32x1xf32> to vector<32x128xf32>
    %231 = arith.subf %225, %230 : vector<32x128xf32>
    %232 = arith.mulf %231, %231 : vector<32x128xf32>
    %cst_91 = arith.constant dense<0.000000e+00> : vector<32xf32>
    %233 = vector.multi_reduction <add>, %232, %cst_91 [1] : vector<32x128xf32> to vector<32xf32>
    %234 = vector.shape_cast %233 : vector<32xf32> to vector<32x1xf32>
    %cst_92 = arith.constant 1.280000e+02 : f32
    %235 = vector.broadcast %cst_92 : f32 to vector<32x1xf32>
    %236 = arith.divf %234, %235 : vector<32x1xf32>
    %237 = vector.broadcast %229 : vector<32x1xf32> to vector<32x128xf32>
    %238 = arith.subf %225, %237 : vector<32x128xf32>
    %cst_93 = arith.constant 9.99999974E-6 : f32
    %239 = vector.broadcast %cst_93 : f32 to vector<32x1xf32>
    %240 = arith.addf %236, %239 : vector<32x1xf32>
    %241 = math.rsqrt %240 : vector<32x1xf32>
    %242 = vector.broadcast %241 : vector<32x1xf32> to vector<32x128xf32>
    %243 = arith.mulf %238, %242 : vector<32x128xf32>
    %c0_94 = arith.constant 0 : index
    %c0_95 = arith.constant 0 : index
    %244 = vector.load %arg21[%c0_94, %c0_95] : memref<1x128xf32, #tpu.memory_space<vmem>>, vector<1x128xf32>
    %245 = vector.broadcast %244 : vector<1x128xf32> to vector<32x128xf32>
    %246 = arith.mulf %243, %245 : vector<32x128xf32>
    %c0_96 = arith.constant 0 : index
    %c0_97 = arith.constant 0 : index
    %247 = vector.load %arg22[%c0_96, %c0_97] : memref<1x128xf32, #tpu.memory_space<vmem>>, vector<1x128xf32>
    %248 = vector.broadcast %247 : vector<1x128xf32> to vector<32x128xf32>
    %249 = arith.addf %246, %248 : vector<32x128xf32>
    %250 = arith.truncf %249 : vector<32x128xf32> to vector<32x128xbf16>
    %c0_98 = arith.constant 0 : index
    %c0_99 = arith.constant 0 : index
    %c0_100 = arith.constant 0 : index
    %251 = vector.load %arg23[%c0_98, %c0_99, %c0_100] : memref<1x32x128xbf16, #tpu.memory_space<vmem>>, vector<1x32x128xbf16>
    %252 = vector.shape_cast %251 : vector<1x32x128xbf16> to vector<32x128xbf16>
    %253 = vector.shape_cast %250 : vector<32x128xbf16> to vector<1x32x128xbf16>
    tpu.vector_store %arg23[%c0_98, %c0_99, %c0_100], %253 {strides = array<i32>} : memref<1x32x128xbf16, #tpu.memory_space<vmem>>, vector<1x32x128xbf16>,
    return
  }
  func.func @transform_0(%arg0: i32) -> (i32, i32, i32) {
    %c0_i32 = arith.constant 0 : i32
    %c0_i32_0 = arith.constant 0 : i32
    %c0_i32_1 = arith.constant 0 : i32
    return %arg0, %c0_i32, %c0_i32_0 : i32, i32, i32
  }
  func.func @transform_1(%arg0: i32) -> (i32, i32, i32) {
    %c0_i32 = arith.constant 0 : i32
    %c0_i32_0 = arith.constant 0 : i32
    %c0_i32_1 = arith.constant 0 : i32
    return %arg0, %c0_i32, %c0_i32_0 : i32, i32, i32
  }
  func.func @transform_2(%arg0: i32) -> (i32, i32) {
    %c0_i32 = arith.constant 0 : i32
    %c0_i32_0 = arith.constant 0 : i32
    %c0_i32_1 = arith.constant 0 : i32
    return %c0_i32, %c0_i32_0 : i32, i32
  }
  func.func @transform_3(%arg0: i32) -> (i32, i32) {
    %c0_i32 = arith.constant 0 : i32
    %c0_i32_0 = arith.constant 0 : i32
    %c0_i32_1 = arith.constant 0 : i32
    return %c0_i32, %c0_i32_0 : i32, i32
  }
  func.func @transform_4(%arg0: i32) -> (i32, i32, i32) {
    %c0_i32 = arith.constant 0 : i32
    %c0_i32_0 = arith.constant 0 : i32
    %c0_i32_1 = arith.constant 0 : i32
    %c0_i32_2 = arith.constant 0 : i32
    return %c0_i32, %c0_i32_0, %c0_i32_1 : i32, i32, i32
  }
  func.func @transform_5(%arg0: i32) -> (i32, i32) {
    %c0_i32 = arith.constant 0 : i32
    %c0_i32_0 = arith.constant 0 : i32
    %c0_i32_1 = arith.constant 0 : i32
    return %c0_i32, %c0_i32_0 : i32, i32
  }
  func.func @transform_6(%arg0: i32) -> (i32, i32) {
    %c0_i32 = arith.constant 0 : i32
    %c0_i32_0 = arith.constant 0 : i32
    %c0_i32_1 = arith.constant 0 : i32
    return %c0_i32, %c0_i32_0 : i32, i32
  }
  func.func @transform_7(%arg0: i32) -> (i32, i32) {
    %c0_i32 = arith.constant 0 : i32
    %c0_i32_0 = arith.constant 0 : i32
    %c0_i32_1 = arith.constant 0 : i32
    return %c0_i32, %c0_i32_0 : i32, i32
  }
  func.func @transform_8(%arg0: i32) -> (i32, i32) {
    %c0_i32 = arith.constant 0 : i32
    %c0_i32_0 = arith.constant 0 : i32
    %c0_i32_1 = arith.constant 0 : i32
    return %c0_i32, %c0_i32_0 : i32, i32
  }
  func.func @transform_9(%arg0: i32) -> (i32, i32) {
    %c0_i32 = arith.constant 0 : i32
    %c0_i32_0 = arith.constant 0 : i32
    %c0_i32_1 = arith.constant 0 : i32
    return %c0_i32, %c0_i32_0 : i32, i32
  }
  func.func @transform_10(%arg0: i32) -> (i32, i32) {
    %c0_i32 = arith.constant 0 : i32
    %c0_i32_0 = arith.constant 0 : i32
    %c0_i32_1 = arith.constant 0 : i32
    return %c0_i32, %c0_i32_0 : i32, i32
  }
  func.func @transform_11(%arg0: i32) -> (i32, i32) {
    %c0_i32 = arith.constant 0 : i32
    %c0_i32_0 = arith.constant 0 : i32
    %c0_i32_1 = arith.constant 0 : i32
    return %c0_i32, %c0_i32_0 : i32, i32
  }
  func.func @transform_12(%arg0: i32) -> (i32, i32, i32) {
    %c0_i32 = arith.constant 0 : i32
    %c0_i32_0 = arith.constant 0 : i32
    %c0_i32_1 = arith.constant 0 : i32
    %c0_i32_2 = arith.constant 0 : i32
    return %c0_i32, %c0_i32_0, %c0_i32_1 : i32, i32, i32
  }
  func.func @transform_13(%arg0: i32) -> (i32, i32) {
    %c0_i32 = arith.constant 0 : i32
    %c0_i32_0 = arith.constant 0 : i32
    %c0_i32_1 = arith.constant 0 : i32
    return %c0_i32, %c0_i32_0 : i32, i32
  }
  func.func @transform_14(%arg0: i32) -> (i32, i32) {
    %c0_i32 = arith.constant 0 : i32
    %c0_i32_0 = arith.constant 0 : i32
    %c0_i32_1 = arith.constant 0 : i32
    return %c0_i32, %c0_i32_0 : i32, i32
  }
  func.func @transform_15(%arg0: i32) -> (i32, i32) {
    %c0_i32 = arith.constant 0 : i32
    %c0_i32_0 = arith.constant 0 : i32
    %c0_i32_1 = arith.constant 0 : i32
    return %c0_i32, %c0_i32_0 : i32, i32
  }
  func.func @transform_16(%arg0: i32) -> (i32, i32) {
    %c0_i32 = arith.constant 0 : i32
    %c0_i32_0 = arith.constant 0 : i32
    %c0_i32_1 = arith.constant 0 : i32
    return %c0_i32, %c0_i32_0 : i32, i32
  }
  func.func @transform_17(%arg0: i32) -> (i32, i32) {
    %c0_i32 = arith.constant 0 : i32
    %c0_i32_0 = arith.constant 0 : i32
    %c0_i32_1 = arith.constant 0 : i32
    return %c0_i32, %c0_i32_0 : i32, i32
  }
  func.func @transform_18(%arg0: i32) -> (i32, i32) {
    %c0_i32 = arith.constant 0 : i32
    %c0_i32_0 = arith.constant 0 : i32
    %c0_i32_1 = arith.constant 0 : i32
    return %c0_i32, %c0_i32_0 : i32, i32
  }
  func.func @transform_19(%arg0: i32) -> (i32, i32) {
    %c0_i32 = arith.constant 0 : i32
    %c0_i32_0 = arith.constant 0 : i32
    %c0_i32_1 = arith.constant 0 : i32
    return %c0_i32, %c0_i32_0 : i32, i32
  }
  func.func @transform_20(%arg0: i32) -> (i32, i32) {
    %c0_i32 = arith.constant 0 : i32
    %c0_i32_0 = arith.constant 0 : i32
    %c0_i32_1 = arith.constant 0 : i32
    return %c0_i32, %c0_i32_0 : i32, i32
  }
  func.func @transform_21(%arg0: i32) -> (i32, i32) {
    %c0_i32 = arith.constant 0 : i32
    %c0_i32_0 = arith.constant 0 : i32
    %c0_i32_1 = arith.constant 0 : i32
    return %c0_i32, %c0_i32_0 : i32, i32
  }
  func.func @transform_22(%arg0: i32) -> (i32, i32, i32) {
    %c0_i32 = arith.constant 0 : i32
    %c0_i32_0 = arith.constant 0 : i32
    %c0_i32_1 = arith.constant 0 : i32
    return %arg0, %c0_i32, %c0_i32_0 : i32, i32, i32
  }
}

module attributes {stable_mosaic.version = 11 : i64} {
  func.func @_linear_kernel(%arg0: i32, %arg1: memref<1x32x128xbf16, #tpu.memory_space<vmem>>, %arg2: memref<128x256xbf16, #tpu.memory_space<vmem>>, %arg3: memref<1x256xf32, #tpu.memory_space<vmem>>, %arg4: memref<1x32x256xf32, #tpu.memory_space<vmem>>) attributes {dimension_semantics = [#tpu.dimension_semantics<parallel>], iteration_bounds = array<i64: 2>, scalar_prefetch = 0 : i64, scratch_operands = 0 : i64, tpu.core_type = #tpu.core_type<tc>, window_params = [{transform_indices = @transform_0, window_bounds = array<i64: 1, 32, 128>}, {pipeline_mode = #tpu.pipeline_mode<synchronous>, transform_indices = @transform_1, window_bounds = array<i64: 128, 256>}, {pipeline_mode = #tpu.pipeline_mode<synchronous>, transform_indices = @transform_2, window_bounds = array<i64: 1, 256>}, {transform_indices = @transform_3, window_bounds = array<i64: 1, 32, 256>}]} {
    %c0 = arith.constant 0 : index
    %c0_0 = arith.constant 0 : index
    %c0_1 = arith.constant 0 : index
    %0 = vector.load %arg1[%c0, %c0_0, %c0_1] : memref<1x32x128xbf16, #tpu.memory_space<vmem>>, vector<1x32x128xbf16>
    %1 = vector.shape_cast %0 : vector<1x32x128xbf16> to vector<32x128xbf16>
    %c0_2 = arith.constant 0 : index
    %c0_3 = arith.constant 0 : index
    %2 = vector.load %arg2[%c0_2, %c0_3] : memref<128x256xbf16, #tpu.memory_space<vmem>>, vector<128x256xbf16>
    %cst = arith.constant dense<0.000000e+00> : vector<32x256xf32>
    %3 = tpu.matmul %1, %2, %cst {dimension_numbers = #tpu.dot_dimension_numbers<[1], [0], [0], [1], [0, 0, 1, 1], [], []>} : vector<32x128xbf16>, vector<128x256xbf16>, vector<32x256xf32> -> vector<32x256xf32>
    %c0_4 = arith.constant 0 : index
    %c0_5 = arith.constant 0 : index
    %4 = vector.load %arg3[%c0_4, %c0_5] : memref<1x256xf32, #tpu.memory_space<vmem>>, vector<1x256xf32>
    %5 = vector.broadcast %4 : vector<1x256xf32> to vector<32x256xf32>
    %6 = arith.addf %3, %5 : vector<32x256xf32>
    %c0_6 = arith.constant 0 : index
    %c0_7 = arith.constant 0 : index
    %c0_8 = arith.constant 0 : index
    %7 = vector.load %arg4[%c0_6, %c0_7, %c0_8] : memref<1x32x256xf32, #tpu.memory_space<vmem>>, vector<1x32x256xf32>
    %8 = vector.shape_cast %7 : vector<1x32x256xf32> to vector<32x256xf32>
    %9 = vector.shape_cast %6 : vector<32x256xf32> to vector<1x32x256xf32>
    tpu.vector_store %arg4[%c0_6, %c0_7, %c0_8], %9 {strides = array<i32>} : memref<1x32x256xf32, #tpu.memory_space<vmem>>, vector<1x32x256xf32>,
    return
  }
  func.func @transform_0(%arg0: i32) -> (i32, i32, i32) {
    %c0_i32 = arith.constant 0 : i32
    %c0_i32_0 = arith.constant 0 : i32
    %c0_i32_1 = arith.constant 0 : i32
    return %arg0, %c0_i32, %c0_i32_0 : i32, i32, i32
  }
  func.func @transform_1(%arg0: i32) -> (i32, i32) {
    %c0_i32 = arith.constant 0 : i32
    %c0_i32_0 = arith.constant 0 : i32
    %c0_i32_1 = arith.constant 0 : i32
    return %c0_i32, %c0_i32_0 : i32, i32
  }
  func.func @transform_2(%arg0: i32) -> (i32, i32) {
    %c0_i32 = arith.constant 0 : i32
    %c0_i32_0 = arith.constant 0 : i32
    %c0_i32_1 = arith.constant 0 : i32
    return %c0_i32, %c0_i32_0 : i32, i32
  }
  func.func @transform_3(%arg0: i32) -> (i32, i32, i32) {
    %c0_i32 = arith.constant 0 : i32
    %c0_i32_0 = arith.constant 0 : i32
    %c0_i32_1 = arith.constant 0 : i32
    return %arg0, %c0_i32, %c0_i32_0 : i32, i32, i32
  }
}

</mosaic_0001>

<bundles_post_ra>
// kernel: transformer_pallas.9
= control target key start
LH: loop header
LB: loop body
LE: loop exit
PB: predicated region body
PF: predicated region fallthrough
CT: control target
= control target key end

     0   :  { %8 = vsyncpa [#allocation3], 0  ;;  %s797_s0 = inlined_call_operand.vmem [shape: bf16[2,32,128], index: 0, kind: input, shape index: {}]   ;;  %s798_s1 = inlined_call_operand.vmem [shape: bf16[128,256], index: 1, kind: input, shape index: {}]   ;;  %s799_s2 = inlined_call_operand.vmem [shape: f32[1,256], index: 2, kind: input, shape index: {}]   ;;  %s800_s3 = inlined_call_operand.hbm [shape: f32[2,32,256], index: 3, kind: output, shape index: {}]  }
   0x1   :  { %10 = vsyncpa [#allocation3 + $0x1], 0  ;;  %s635_s12 = smov 0   ;;  %s637_s13 = smov 0  }
   0x2   :  { %s639_s14 = smov 0   ;;  %s641_s15 = smov 0  }
   0x3 LB: > { %s656_s16 = sadd.s32 4294967295, %s609_s15   ;;  %s431_s17 = sadd.s32 4294967294, %s609_s15   ;;  %s609_s15 = sphi %s641_s15, %s806_s15   ;;  %s605_s14 = sphi %s639_s14, %s805_s14   ;;  %s601_s13 = sphi %s637_s13, %s804_s13   ;;  %s597_s12 = sphi %s635_s12, %s803_s12  }
   0x4   : > { %s660_s18 = sadd.s32 1, %s609_s15   ;;  %s91_s19 = sadd.s32 1, %s605_s14 }
   0x5   : > { %s88_s20 = ssub.s32 %s609_s15, %s660_s18  ;;  %p101_p0 = scmp.ne.s32.totalorder %s605_s14, %s601_s13 }
   0x6   : > { %p89_p1 = scmp.eq.s32.totalorder %s88_s20, 0  ;;  %p102_p2 = scmp.eq.s32.totalorder %s656_s16, 1 }
   0x7   : > { %p107_p3 = scmp.ne.s32.totalorder %s601_s13, %s597_s12  ;;  %p108_p4 = scmp.eq.s32.totalorder %s431_s17, 1 }
   0x8   : > { %s671_s21 = scalar_select %p89_p1, %s605_s14, %s91_s19  }
   0x9   : > { %p673_p5 = por %p102_p2, %p101_p0  ;;  %p677_p6 = por %p108_p4, %p107_p3 }
   0xa   : > { %p434_p7 = scmp.ge.s32.totalorder %s609_s15, 1  ;;  %p140_p8 = scmp.lt.s32.totalorder %s609_s15, 3 }
   0xc   : > { %p141_p9 = pnand %p434_p7, %p140_p8 }
   0xd   : > { %v521_v0 = vld [vmem:[%s798_s1 + $0x4] ss:$8 sps:$4 sm:$0xff] (!%p141_p9)   ;;  %p164_p10 = scmp.lt.s32.totalorder (!%p141_p9), %s656_s16, 1  ;;  %v523_v1 = vld [vmem:[%s798_s1] ss:$8 sps:$4 sm:$0xff] (!%p141_p9)   ;;  %v611_v2 = vmov (!%p141_p9), 0   ;;  %v192_v19 = vlaneseq (!%p141_p9) }
   0xe   : > { %144 = sbr.rel (%p141_p9) target bundleno = 279 (0x117), region = 32  ;;  %326 = vmatprep.mubr.bf16.mxu0 (!%p141_p9), %v611_v2  ;;  %336 = vmatprep.mubr.bf16.mxu1 (!%p141_p9), %v611_v2  ;;  %v524_v3 = vld [vmem:[%s798_s1 + $0x14] ss:$8 sps:$4 sm:$0xff] (!%p141_p9)   ;;  %v526_v4 = vld [vmem:[%s798_s1 + $0x10] ss:$8 sps:$4 sm:$0xff] (!%p141_p9)   ;;  %s161_s26 = sand.u32 (!%p141_p9), 1, %s601_s13  }
   0xf   : > { %294 = vmatprep.subr.bf16.mxu0 (!%p141_p9), %v521_v0  ;;  %463 = vmatprep.subr.bf16.mxu1 (!%p141_p9), %v521_v0  ;;  %v527_v5 = vld [vmem:[%s798_s1 + $0x24] ss:$8 sps:$4 sm:$0xff] (!%p141_p9)   ;;  %v529_v6 = vld [vmem:[%s798_s1 + $0x20] ss:$8 sps:$4 sm:$0xff] (!%p141_p9)   ;;  %v530_v7 = vld [vmem:[%s798_s1 + $0x34] ss:$8 sps:$4 sm:$0xff] (!%p141_p9)  }
  0x10   : > { %295 = vmatpush1.bf16.msra.mxu0 (!%p141_p9), %v523_v1  ;;  %471 = vmatpush1.bf16.msra.mxu1 (!%p141_p9), %v523_v1  ;;  %v532_v8 = vld [vmem:[%s798_s1 + $0x30] ss:$8 sps:$4 sm:$0xff] (!%p141_p9)   ;;  %v533_v9 = vld [vmem:[%s798_s1 + $0x44] ss:$8 sps:$4 sm:$0xff] (!%p141_p9)   ;;  %v535_v10 = vld [vmem:[%s798_s1 + $0x40] ss:$8 sps:$4 sm:$0xff] (!%p141_p9)  }
  0x11   : > { %296 = vmatprep.subr.bf16.mxu0 (!%p141_p9), %v524_v3  ;;  %464 = vmatprep.subr.bf16.mxu1 (!%p141_p9), %v524_v3  ;;  %v536_v11 = vld [vmem:[%s798_s1 + $0x54] ss:$8 sps:$4 sm:$0xff] (!%p141_p9)   ;;  %v538_v12 = vld [vmem:[%s798_s1 + $0x50] ss:$8 sps:$4 sm:$0xff] (!%p141_p9)   ;;  %v539_v13 = vld [vmem:[%s798_s1 + $0x64] ss:$8 sps:$4 sm:$0xff] (!%p141_p9)  }
  0x12   : > { %v541_v14 = vld [vmem:[%s798_s1 + $0x60] ss:$8 sps:$4 sm:$0xff] (!%p141_p9)   ;;  %v542_v15 = vld [vmem:[%s798_s1 + $0x74] ss:$8 sps:$4 sm:$0xff] (!%p141_p9)   ;;  %v544_v16 = vld [vmem:[%s798_s1 + $0x70] ss:$8 sps:$4 sm:$0xff] (!%p141_p9)  }
  0x13   : > { %v193_v20 = vshrl.u32 (!%p141_p9), %v192_v19, 7  ;;  %v190_v22 = vld [vmem:[%s799_s2] sm:$0x3] (!%p141_p9)  ;;  %s435_s29 = sshll.u32 (!%p141_p9), %s161_s26, 6  ;;  %s756_s7 = scalar_lea.sflag (!%p141_p9), [#allocation3], %s161_s26 }
  0x14   : > { %297 = vmatpush1.bf16.msra.mxu0 (!%p141_p9), %v526_v4  ;;  %472 = vmatpush1.bf16.msra.mxu1 (!%p141_p9), %v526_v4  ;;  %s612_s9 = smov (!%p141_p9), [#allocation2]  }
  0x15   : > { %s165_s30 = scalar_select %p164_p10, %s656_s16, 1  ;;  %298 = vmatprep.subr.bf16.mxu0 %v527_v5  ;;  %465 = vmatprep.subr.bf16.mxu1 %v527_v5  ;;  %v194_v21 = vsub.s32 0, %v193_v20  ;;  %v198_v23 = vsub.s32 1, %v193_v20 }
  0x16   : > { %s551_s10 = sshll.u32 %s612_s9, 4  ;;  %s552_s10 = int_to_ptr.vmem [resolvable:$false] %s551_s10 }
  0x17   : > { %s461_s8 = sshll.u32 %s165_s30, 4  ;;  %v195_v24 = vrot.slane %v190_v22, %v194_v21  ;;  %v199_v25 = vrot.slane %v190_v22, %v198_v23  ;;  %s163_s30 = scalar_lea.vmem [#allocation2], %s435_s29 }
  0x18   : > { %s709_s24 = scalar_lea.vmem %s797_s0, %s461_s8  ;;  %299 = vmatpush1.bf16.msra.mxu0 %v529_v6  ;;  %473 = vmatpush1.bf16.msra.mxu1 %v529_v6  ;;  %s369_s4 = sshll.u32 %s163_s30, 4  ;;  %s752_s4 = int_to_ptr.vmem [resolvable:$true] %s369_s4 }
  0x19   : > { %300 = vmatprep.subr.bf16.mxu0 %v530_v7  ;;  %466 = vmatprep.subr.bf16.mxu1 %v530_v7  ;;  %v545_v17 = vld [vmem:[%s709_s24] sm:$0xff]   ;;  %v546_v18 = vld [vmem:[%s709_s24 + $0x8] sm:$0xff]   ;;  %s462_s24 = sshll.u32 %s656_s16, 10  ;;  %s547_s8 = scalar_lea.vmem %s752_s4, 1024 }
  0x1a   : > { %s750_s6 = scalar_lea.hbm %s800_s3, %s462_s24  ;;  %p548_p11 = scmp.ne.s32.totalorder %s752_s4, %s547_s8 }
  0x1b   : > { %s553_s11 = scalar_lea.vmem %s552_s10, 2048  ;;  %p554_p0 = scmp.lt.s32.totalorder %s752_s4, %s552_s10 }
  0x1c   : > { %301 = vmatpush1.bf16.msra.mxu0 %v532_v8  ;;  %474 = vmatpush1.bf16.msra.mxu1 %v532_v8  ;;  %p549_p12 = pnand %p548_p11, %p673_p5  ;;  %p555_p1 = scmp.lt.s32.totalorder %s553_s11, %s547_s8 }
  0x1d   : > { %302 = vmatprep.subr.bf16.mxu0 %v533_v9  ;;  %467 = vmatprep.subr.bf16.mxu1 %v533_v9 }
  0x1e   : > { %p550_p13 = pneg %p549_p12  ;;  %p556_p2 = por %p555_p1, %p554_p0 }
  0x20   : > { %303 = vmatpush1.bf16.msra.mxu0 %v535_v10  ;;  %475 = vmatpush1.bf16.msra.mxu1 %v535_v10  ;;  %p557_p3 = pnand %p556_p2, %p550_p13 }
  0x21   : > { %304 = vmatprep.subr.bf16.mxu0 %v536_v11  ;;  %468 = vmatprep.subr.bf16.mxu1 %v536_v11 }
  0x24   : > { %305 = vmatpush1.bf16.msra.mxu0 %v538_v12  ;;  %476 = vmatpush1.bf16.msra.mxu1 %v538_v12 }
  0x25   : > { %306 = vmatprep.subr.bf16.mxu0 %v539_v13  ;;  %469 = vmatprep.subr.bf16.mxu1 %v539_v13 }
  0x28   : > { %307 = vmatpush1.bf16.msra.mxu0 %v541_v14  ;;  %477 = vmatpush1.bf16.msra.mxu1 %v541_v14 }
  0x29   : > { %308 = vmatprep.subr.bf16.mxu0 %v542_v15  ;;  %470 = vmatprep.subr.bf16.mxu1 %v542_v15 }
  0x2c   : > { %309 = vmatpush1.bf16.msra.mxu0 %v544_v16  ;;  %478 = vmatpush1.bf16.msra.mxu1 %v544_v16 }
  0x2f   : > { %327 = vmatmul.mubr.bf16.vlgmr.msra.gmra.mrb[0].mxu0 %v545_v17  ;;  %337 = vmatmul.mubr.bf16.vlgmr.msra.gmra.mrb[0].mxu1 %v546_v18 }
 0x102   : > { %v328_v26 = vpop.f32.mrb[0].mxu0  ;;  %v338_v27 = vpop.f32.mrb[0].mxu1 }
 0x103   : > { %v329_v28 = vadd.f32 %v328_v26, %v195_v24  ;;  %v339_v29 = vadd.f32 %v338_v27, %v195_v24  ;;  %v330_v30 = vpop.f32.mrb[1].mxu0  ;;  %v340_v31 = vpop.f32.mrb[1].mxu1 }
 0x104   : > { %v331_v32 = vadd.f32 %v330_v30, %v199_v25  ;;  %v341_v33 = vadd.f32 %v340_v31, %v199_v25  ;;  %v332_v34 = vpop.f32.mrb[2].mxu0  ;;  %v342_v35 = vpop.f32.mrb[2].mxu1 }
 0x105   : > { %347 = vst [vmem:[%s163_s30] sm:$0xff] %v329_v28  ;;  %351 = vst [vmem:[%s163_s30 + $0x20] sm:$0xff] %v339_v29  ;;  %v333_v36 = vadd.f32 %v332_v34, %v195_v24  ;;  %v343_v37 = vadd.f32 %v342_v35, %v195_v24  ;;  %v334_v38 = vpop.f32.mrb[3].mxu0  ;;  %v344_v39 = vpop.f32.mrb[3].mxu1 }
 0x106   : > { %348 = vst [vmem:[%s163_s30 + $0x8] sm:$0xff] %v331_v32  ;;  %352 = vst [vmem:[%s163_s30 + $0x28] sm:$0xff] %v341_v33  ;;  %v335_v40 = vadd.f32 %v334_v38, %v199_v25  ;;  %v345_v41 = vadd.f32 %v344_v39, %v199_v25 }
 0x107   : > { %349 = vst [vmem:[%s163_s30 + $0x10] sm:$0xff] %v333_v36  ;;  %353 = vst [vmem:[%s163_s30 + $0x30] sm:$0xff] %v343_v37 }
 0x108   : > { %350 = vst [vmem:[%s163_s30 + $0x18] sm:$0xff] %v335_v40  ;;  %354 = vst [vmem:[%s163_s30 + $0x38] sm:$0xff] %v345_v41 }
 0x109   : > { %560 = shalt.err (!%p557_p3)
}
 0x10a   : > { %s561_s17 = scalar_lea.hbm %s750_s6, 1024  ;;  %s565_s25 = scalar_lea.hbm %s800_s3, 2048 }
 0x10b   : > { %p562_p4 = scmp.ne.s32.totalorder %s750_s6, %s561_s17  ;;  %p566_p9 = scmp.lt.u32.totalorder %s750_s6, %s800_s3 }
 0x10c   : > { %p567_p10 = scmp.lt.u32.totalorder %s565_s25, %s561_s17  ;;  %p569_p12 = scmp.lt.u32.totalorder %s561_s17, %s750_s6 }
 0x10d   : > { %p563_p7 = pnand %p562_p4, %p673_p5 }
 0x10e   : > { %p568_p11 = por %p567_p10, %p566_p9 }
 0x10f   : > { %p564_p8 = pneg %p563_p7 }
 0x110   : > { %p570_p13 = por %p569_p12, %p568_p11 }
 0x112   : > { %p571_p0 = pnand %p570_p13, %p564_p8 }
 0x114   : > { %574 = shalt.err (!%p571_p0)
}
 0x115   : > { %s613_s28 = smov 256   ;;  %s614_s29 = smov 16  }
 0x116   : > { %479 = dma.vmem_to_hbm [thread:$0]  (%p673_p5), %s752_s4, 1024, %s750_s6, %s756_s7, %s613_s28, %s613_s28, %s614_s29  }
 0x117 PF: > { %p485_p1 = scmp.ge.s32.totalorder %s609_s15, 2  ;;  %s384_s24 = sand.u32 1, %s597_s12  }
 0x118   : > { %s385_s30 = scalar_lea.sflag [#allocation3], %s384_s24 }
 0x119   : > { %p482_p2 = pnand %p485_p1, %p677_p6 }
 0x11b   : > { %592 = dma.done.wait (!%p482_p2), %s385_s30, 1024  }
 0x11c   : > { %594 = vsyncadd (!%p482_p2), %s385_s30, 4294966272  ;;  %p13_p3 = scmp.ge.s32.totalorder %s660_s18, 4   ;;  %s803_s12 = smov %s601_s13 }
 0x11d   : > { %s804_s13 = smov %s605_s14  ;;  %s805_s14 = smov %s671_s21 }
 0x11e   : > { %s806_s15 = smov %s660_s18  ;;  %15 = sbr.rel (!%p13_p3) target bundleno = 3 (0x3), region = 67 }
 0x125   :  { %390 = vsyncpa [#allocation3], 1 }
 0x126   :  { %392 = vsyncpa [#allocation3 + $0x1], 1 }

// kernel: transformer_pallas.5
= control target key start
LH: loop header
LB: loop body
LE: loop exit
PB: predicated region body
PF: predicated region fallthrough
CT: control target
= control target key end

     0   :  { %s3143_s25 = smov 0   ;;  %s3683_s0 = inlined_call_operand.vmem [shape: bf16[2,32,128], index: 0, kind: input, shape index: {}]   ;;  %s3684_s1 = inlined_call_operand.vmem [shape: bf16[128,384], index: 1, kind: input, shape index: {}]   ;;  %s3685_s2 = inlined_call_operand.vmem [shape: f32[1,384], index: 2, kind: input, shape index: {}]   ;;  %s3686_s3 = inlined_call_operand.vmem [shape: bf16[4,32,128], index: 3, kind: input, shape index: {}]   ;;  %s3687_s4 = inlined_call_operand.vmem [shape: f32[1,128], index: 4, kind: input, shape index: {}]   ;;  %s3688_s5 = inlined_call_operand.vmem [shape: f32[1,128], index: 5, kind: input, shape index: {}]   ;;  %s3689_s6 = inlined_call_operand.vmem [shape: f32[1,128], index: 6, kind: input, shape index: {}]   ;;  %s3690_s7 = inlined_call_operand.vmem [shape: bf16[128,256], index: 7, kind: input, shape index: {}]   ;;  %s3691_s8 = inlined_call_operand.vmem [shape: f32[1,256], index: 8, kind: input, shape index: {}]   ;;  %s3692_s9 = inlined_call_operand.vmem [shape: bf16[256,128], index: 9, kind: input, shape index: {}]   ;;  %s3693_s10 = inlined_call_operand.vmem [shape: f32[1,128], index: 10, kind: input, shape index: {}]   ;;  %s3694_s11 = inlined_call_operand.vmem [shape: f32[1,128], index: 11, kind: input, shape index: {}]   ;;  %s3695_s12 = inlined_call_operand.vmem [shape: f32[1,128], index: 12, kind: input, shape index: {}]   ;;  %s3696_s13 = inlined_call_operand.vmem [shape: bf16[2,32,128], index: 13, kind: output, shape index: {}]  }
   0x1 LB: > { %s2427_s26 = sadd.s32 4294967295, %s3067_s25   ;;  %p2431_p0 = scmp.ge.s32.totalorder %s3067_s25, 1  ;;  %s3067_s25 = sphi %s3143_s25, %s23_s25  }
   0x2   : > { %p387_p1 = scmp.lt.s32.totalorder %s3067_s25, 3 }
   0x4   : > { %p388_p2 = pnand %p2431_p0, %p387_p1 }
   0x5   : > { %v2895_v0 = vld [vmem:[%s3684_s1 + $0x4] ss:$12 sps:$4 sm:$0xff] (!%p388_p2)   ;;  %p431_p3 = scmp.lt.s32.totalorder (!%p388_p2), %s2427_s26, 1  ;;  %v2897_v1 = vld [vmem:[%s3684_s1] ss:$12 sps:$4 sm:$0xff] (!%p388_p2)   ;;  %v3069_v2 = vmov (!%p388_p2), 0   ;;  %v484_v27 = vlaneseq (!%p388_p2) }
   0x6   : > { %391 = sbr.rel (%p388_p2) target bundleno = 2509 (0x9cd), region = 72  ;;  %671 = vmatprep.mubr.bf16.mxu0 (!%p388_p2), %v3069_v2  ;;  %639 = vmatprep.subr.bf16.mxu0 (!%p388_p2), %v2895_v0  ;;  %v2898_v3 = vld [vmem:[%s3684_s1 + $0x1c] ss:$12 sps:$4 sm:$0xff] (!%p388_p2)   ;;  %v2900_v4 = vld [vmem:[%s3684_s1 + $0x18] ss:$12 sps:$4 sm:$0xff] (!%p388_p2)   ;;  %vm885_vm0 = vcmask (!%p388_p2), 261120  }
   0x7   : > { %640 = vmatpush1.bf16.msra.mxu0 (!%p388_p2), %v2897_v1  ;;  %v2901_v5 = vld [vmem:[%s3684_s1 + $0x34] ss:$12 sps:$4 sm:$0xff] (!%p388_p2)   ;;  %v2903_v6 = vld [vmem:[%s3684_s1 + $0x30] ss:$12 sps:$4 sm:$0xff] (!%p388_p2)   ;;  %v2904_v7 = vld [vmem:[%s3684_s1 + $0x4c] ss:$12 sps:$4 sm:$0xff] (!%p388_p2)  }
   0x8   : > { %641 = vmatprep.subr.bf16.mxu0 (!%p388_p2), %v2898_v3  ;;  %v2906_v8 = vld [vmem:[%s3684_s1 + $0x48] ss:$12 sps:$4 sm:$0xff] (!%p388_p2)   ;;  %v2907_v10 = vld [vmem:[%s3684_s1 + $0x64] ss:$12 sps:$4 sm:$0xff] (!%p388_p2)   ;;  %v2922_v12 = vld [vmem:[%s3684_s1 + $0x20] ss:$12 sps:$4 sm:$0xff] (!%p388_p2)  }
   0x9   : > { %v2921_v11 = vld [vmem:[%s3684_s1 + $0x8] ss:$12 sps:$4 sm:$0xff] (!%p388_p2)   ;;  %v2909_v13 = vld [vmem:[%s3684_s1 + $0x60] ss:$12 sps:$4 sm:$0xff] (!%p388_p2)   ;;  %v2923_v15 = vld [vmem:[%s3684_s1 + $0x38] ss:$12 sps:$4 sm:$0xff] (!%p388_p2)  }
   0xa   : > { %2653 = vmatprep.subr.bf16.mxu1 (!%p388_p2), %v2921_v11  ;;  %v2910_v14 = vld [vmem:[%s3684_s1 + $0x7c] ss:$12 sps:$4 sm:$0xff] (!%p388_p2)   ;;  %v2912_v16 = vld [vmem:[%s3684_s1 + $0x78] ss:$12 sps:$4 sm:$0xff] (!%p388_p2)   ;;  %v2913_v17 = vld [vmem:[%s3684_s1 + $0x94] ss:$12 sps:$4 sm:$0xff] (!%p388_p2)  }
   0xb   : > { %642 = vmatpush1.bf16.msra.mxu0 (!%p388_p2), %v2900_v4  ;;  %2654 = vmatpush3.bf16.msra.mxu1 (!%p388_p2), %v2921_v11  ;;  %v2924_v18 = vld [vmem:[%s3684_s1 + $0x50] ss:$12 sps:$4 sm:$0xff] (!%p388_p2)   ;;  %v2916_v20 = vld [vmem:[%s3684_s1 + $0xac] ss:$12 sps:$4 sm:$0xff] (!%p388_p2)   ;;  %v2925_v21 = vld [vmem:[%s3684_s1 + $0x68] ss:$12 sps:$4 sm:$0xff] (!%p388_p2)  }
   0xc   : > { %643 = vmatprep.subr.bf16.mxu0 (!%p388_p2), %v2901_v5  ;;  %2655 = vmatprep.subr.bf16.mxu1 (!%p388_p2), %v2922_v12  ;;  %v2915_v19 = vld [vmem:[%s3684_s1 + $0x90] ss:$12 sps:$4 sm:$0xff] (!%p388_p2)   ;;  %v2918_v22 = vld [vmem:[%s3684_s1 + $0xa8] ss:$12 sps:$4 sm:$0xff] (!%p388_p2)   ;;  %v2926_v23 = vld [vmem:[%s3684_s1 + $0x80] ss:$12 sps:$4 sm:$0xff] (!%p388_p2)  }
   0xd   : > { %s3698_s26 = smov (!%p431_p3, %s2427_s26), 1  ;;  %v2927_v24 = vld [vmem:[%s3684_s1 + $0x98] ss:$12 sps:$4 sm:$0xff]   ;;  %v2928_v26 = vld [vmem:[%s3684_s1 + $0xb0] ss:$12 sps:$4 sm:$0xff]   ;;  %v3237_v28 = vshrl.u32 %v484_v27, 7 }
   0xe   : > { %s2550_s20 = sshll.u32 %s3698_s26, 4  ;;  %v3243_v30 = vld [vmem:[%s3685_s2] sm:$0x7]  ;;  %s3070_s24 = smov 64  }
   0xf   : > { %s3178_s27 = scalar_lea.vmem %s3683_s0, %s2550_s20  ;;  %644 = vmatpush1.bf16.msra.mxu0 %v2903_v6  ;;  %2656 = vmatpush3.bf16.msra.mxu1 %v2922_v12  ;;  %v486_v29 = vsub.s32 0, %v3237_v28  ;;  %v490_v31 = vsub.s32 1, %v3237_v28  ;;  %s3071_s28 = smov 96   ;;  %v494_v3 = vsub.s32 2, %v3237_v28 }
  0x10   : > { %v442_v9 = vld [vmem:[%s3178_s27] sm:$0xff]   ;;  %645 = vmatprep.subr.bf16.mxu0 %v2904_v7  ;;  %2657 = vmatprep.subr.bf16.mxu1 %v2923_v15  ;;  %v444_v25 = vld [vmem:[%s3178_s27 + $0x8] sm:$0xff]   ;;  %s3072_s29 = smov 32  }
  0x11   : > { %2669 = vmatprep.mubr.bf16.mxu1 %v442_v9  ;;  %v487_v32 = vrot.slane %v3243_v30, %v486_v29  ;;  %v491_v34 = vrot.slane %v3243_v30, %v490_v31  ;;  %v495_v11 = vrot.slane %v3243_v30, %v494_v3 }
  0x13   : > { %646 = vmatpush1.bf16.msra.mxu0 %v2906_v8  ;;  %2658 = vmatpush3.bf16.msra.mxu1 %v2923_v15 }
  0x14   : > { %647 = vmatprep.subr.bf16.mxu0 %v2907_v10  ;;  %2659 = vmatprep.subr.bf16.mxu1 %v2924_v18 }
  0x17   : > { %648 = vmatpush1.bf16.msra.mxu0 %v2909_v13  ;;  %2660 = vmatpush3.bf16.msra.mxu1 %v2924_v18 }
  0x18   : > { %649 = vmatprep.subr.bf16.mxu0 %v2910_v14  ;;  %2661 = vmatprep.subr.bf16.mxu1 %v2925_v21 }
  0x1b   : > { %650 = vmatpush1.bf16.msra.mxu0 %v2912_v16  ;;  %2662 = vmatpush3.bf16.msra.mxu1 %v2925_v21 }
  0x1c   : > { %651 = vmatprep.subr.bf16.mxu0 %v2913_v17  ;;  %2663 = vmatprep.subr.bf16.mxu1 %v2926_v23 }
  0x1f   : > { %652 = vmatpush1.bf16.msra.mxu0 %v2915_v19  ;;  %2664 = vmatpush3.bf16.msra.mxu1 %v2926_v23 }
  0x20   : > { %653 = vmatprep.subr.bf16.mxu0 %v2916_v20  ;;  %2665 = vmatprep.subr.bf16.mxu1 %v2927_v24 }
  0x23   : > { %654 = vmatpush1.bf16.msra.mxu0 %v2918_v22  ;;  %2666 = vmatpush3.bf16.msra.mxu1 %v2927_v24 }
  0x24   : > { %2667 = vmatprep.subr.bf16.mxu1 %v2928_v26 }
  0x26   : > { %672 = vmatmul.mubr.bf16.vlgmr.msra.gmra.mrb[0].mxu0 %v442_v9 }
  0x27   : > { %681 = vmatprep.mubr.bf16.mxu0 %v3069_v2  ;;  %2668 = vmatpush3.bf16.msra.mxu1 %v2928_v26 }
  0x2a   : > { %2670 = vmatmul.mubr.bf16.vlgmr.msra.gmra.mrb[0].mxu1 %v444_v25 }
  0x2e   : > { %682 = vmatmul.mubr.bf16.gmra.mrb[4].mxu0 %v444_v25 }
  0xf9   : > { %v673_v33 = vpop.f32.mrb[0].mxu0 }
  0xfa   : > { %v675_v35 = vpop.f32.mrb[1].mxu0  ;;  %v674_v37 = vadd.f32 %v673_v33, %v487_v32 }
  0xfb   : > { %v677_v36 = vpop.f32.mrb[2].mxu0  ;;  %v676_v40 = vadd.f32 %v675_v35, %v491_v34 }
  0xfc   : > { %v678_v38 = vadd.f32 %v677_v36, %v487_v32  ;;  %v679_v39 = vpop.f32.mrb[3].mxu0 }
  0xfd   : > { %v680_v41 = vadd.f32 %v679_v39, %v491_v34  ;;  %v2671_v60 = vpop.f32.mrb[0].mxu1 }
  0xfe   : > { %v781_v42 = vpack.c.bf16 %v678_v38, %v674_v37  ;;  %v2820_v43 = vpack.i.bf16 %v678_v38, %v674_v37  ;;  %v726_v61 = vpop.f32.mrb[1].mxu1 }
  0xff   : > { %v2815_v44 = vpack.i.bf16 %v680_v41, %v676_v40  ;;  %v829_v45 = vpack.c.bf16 %v680_v41, %v676_v40  ;;  %v2672_v62 = vpop.f32.mrb[2].mxu1  ;;  %v3276_v18 = vadd.f32 %v726_v61, %v495_v11 }
 0x100   : > { %2677 = vmatprep.mubr.msk.bf16.mxu1 %vm885_vm0, %v781_v42  ;;  %v729_v63 = vpop.f32.mrb[3].mxu1 }
 0x101   : > { %v683_v46 = vpop.f32.mrb[4].mxu0  ;;  %2816 = vrot.lane.b32.xlu1 %v2815_v44, %s3070_s24  ;;  %2806 = vrot.lane.b32.xlu0 %v2815_v44, %s3071_s28  ;;  %v893_v47 = vsel %vm885_vm0, %v829_v45, 0  ;;  %v3278_v19 = vadd.f32 %v729_v63, %v495_v11 }
 0x102   : > { %2785 = vmatprep.subr.msk.bf16.mxu1 %vm885_vm0, %v829_v45  ;;  %v685_v48 = vpop.f32.mrb[5].mxu0  ;;  %v684_v50 = vadd.f32 %v683_v46, %v487_v32 }
 0x103   : > { %2674 = vmatpush3.bf16.xpose.msra.mxu1 %v893_v47  ;;  %v687_v49 = vpop.f32.mrb[6].mxu0  ;;  %v686_v53 = vadd.f32 %v685_v48, %v491_v34  ;;  %v877_v30 = vpack.c.bf16 %v3278_v19, %v3276_v18  ;;  %v3288_v48 = vadd.f32 %v2671_v60, %v495_v11 }
 0x104   : > { %v688_v51 = vadd.f32 %v687_v49, %v487_v32  ;;  %v689_v52 = vpop.f32.mrb[7].mxu0  ;;  %v3290_v49 = vadd.f32 %v2672_v62, %v495_v11 }
 0x105   : > { %v690_v54 = vadd.f32 %v689_v52, %v491_v34  ;;  %2821 = vrot.lane.b32.xlu1 %v2820_v43, %s3071_s28 }
 0x106   : > { %v782_v55 = vpack.c.bf16 %v688_v51, %v684_v50  ;;  %v2825_v56 = vpack.i.bf16 %v688_v51, %v684_v50 }
 0x107   : > { %v2810_v57 = vpack.i.bf16 %v690_v54, %v686_v53  ;;  %v830_v58 = vpack.c.bf16 %v690_v54, %v686_v53 }
 0x109   : > { %2811 = vrot.lane.b32.xlu0 %v2810_v57, %s3071_s28  ;;  %2786 = vmatprep.subr.msk.bf16.mxu1 %vm885_vm0, %v830_v58  ;;  %v896_v59 = vsel %vm885_vm0, %v830_v58, 0 }
 0x10a   : > { %2831 = vrot.lane.b32.xlu1 %v2810_v57, %s3070_s24 }
 0x10b   : > { %2676 = vmatpush3.bf16.xpose.msra.mxu1 %v896_v59 }
 0x10d   : > { %2826 = vrot.lane.b32.xlu0 %v2825_v56, %s3071_s28 }
 0x10e   : > { %2841 = vrot.lane.b32.xlu1 %v2820_v43, %s3070_s24 }
 0x111   : > { %2836 = vrot.lane.b32.xlu0 %v2815_v44, %s3072_s29 }
 0x112   : > { %2851 = vrot.lane.b32.xlu1 %v2810_v57, %s3072_s29  ;;  %2678 = vmatmul.mubr.msk.bf16.vlgmr.msra.gmra.mrb[4].mxu1 %vm885_vm0, %v782_v55 }
 0x115   : > { %2846 = vrot.lane.b32.xlu0 %v2825_v56, %s3070_s24 }
 0x116   : > { %2861 = vrot.lane.b32.xlu1 %v2825_v56, %s3072_s29  ;;  %v878_v56 = vpack.c.bf16 %v3290_v49, %v3288_v48 }
 0x119   : > { %2856 = vrot.lane.b32.xlu0 %v2820_v43, %s3072_s29 }
 0x173   : > { %v2817_v0 = vpop.permute.xlu1 %2816  ;;  %v2807_v1 = vpop.permute.xlu0 %2806 }
 0x174   : > { %v2819_v4 = vunpack.i.h.bf16 %v2817_v0  ;;  %v2818_v5 = vunpack.i.l.bf16 %v2817_v0  ;;  %v2809_v6 = vunpack.i.h.bf16 %v2807_v1  ;;  %v2808_v7 = vunpack.i.l.bf16 %v2807_v1 }
 0x176   : > { %v833_v8 = vpack.c.bf16 %v2819_v4, %v2818_v5  ;;  %v831_v9 = vpack.c.bf16 %v2809_v6, %v2808_v7 }
 0x177   : > { %v2822_v10 = vpop.permute.xlu1 %2821 }
 0x178   : > { %v2824_v12 = vunpack.i.h.bf16 %v2822_v10  ;;  %v2823_v13 = vunpack.i.l.bf16 %v2822_v10  ;;  %2787 = vmatprep.subr.msk.bf16.mxu1 %vm885_vm0, %v831_v9  ;;  %2789 = vmatprep.subr.msk.bf16.mxu0 %vm885_vm0, %v833_v8  ;;  %v954_v14 = vsel %vm885_vm0, %v831_v9, 0  ;;  %v1015_v15 = vsel %vm885_vm0, %v833_v8, 0 }
 0x179   : > { %2682 = vmatpush3.bf16.xpose.msra.mxu1 %v954_v14  ;;  %2690 = vmatpush3.bf16.xpose.msra.mxu0 %v1015_v15 }
 0x17a   : > { %v783_v16 = vpack.c.bf16 %v2824_v12, %v2823_v13 }
 0x17b   : > { %v2812_v17 = vpop.permute.xlu0 %2811 }
 0x17c   : > { %v2814_v20 = vunpack.i.h.bf16 %v2812_v17  ;;  %v2813_v21 = vunpack.i.l.bf16 %v2812_v17  ;;  %v2832_v22 = vpop.permute.xlu1 %2831  ;;  %2685 = vmatprep.mubr.msk.bf16.mxu1 %vm885_vm0, %v783_v16 }
 0x17d   : > { %v2834_v23 = vunpack.i.h.bf16 %v2832_v22  ;;  %v2833_v24 = vunpack.i.l.bf16 %v2832_v22 }
 0x17e   : > { %v832_v25 = vpack.c.bf16 %v2814_v20, %v2813_v21 }
 0x17f   : > { %v834_v26 = vpack.c.bf16 %v2834_v23, %v2833_v24  ;;  %v2827_v27 = vpop.permute.xlu0 %2826 }
 0x180   : > { %v2842_v32 = vpop.permute.xlu1 %2841  ;;  %2788 = vmatprep.subr.msk.bf16.mxu1 %vm885_vm0, %v832_v25  ;;  %v957_v33 = vsel %vm885_vm0, %v832_v25, 0  ;;  %v2829_v37 = vunpack.i.h.bf16 %v2827_v27  ;;  %v2828_v38 = vunpack.i.l.bf16 %v2827_v27 }
 0x181   : > { %v2844_v34 = vunpack.i.h.bf16 %v2842_v32  ;;  %v2843_v35 = vunpack.i.l.bf16 %v2842_v32  ;;  %2790 = vmatprep.subr.msk.bf16.mxu0 %vm885_vm0, %v834_v26  ;;  %2684 = vmatpush3.bf16.xpose.msra.mxu1 %v957_v33  ;;  %v1018_v36 = vsel %vm885_vm0, %v834_v26, 0 }
 0x182   : > { %2692 = vmatpush3.bf16.xpose.msra.mxu0 %v1018_v36  ;;  %v784_v46 = vpack.c.bf16 %v2829_v37, %v2828_v38  ;;  %v3356_v37 = vpack.i.bf16 %v3278_v19, %v3276_v18 }
 0x183   : > { %v785_v39 = vpack.c.bf16 %v2844_v34, %v2843_v35  ;;  %v2837_v40 = vpop.permute.xlu0 %2836  ;;  %2705 = vmatprep.subr.bf16.mxu0 %v877_v30 }
 0x184   : > { %v2839_v41 = vunpack.i.h.bf16 %v2837_v40  ;;  %v2838_v42 = vunpack.i.l.bf16 %v2837_v40  ;;  %v2852_v43 = vpop.permute.xlu1 %2851 }
 0x185   : > { %v2854_v44 = vunpack.i.h.bf16 %v2852_v43  ;;  %v2853_v45 = vunpack.i.l.bf16 %v2852_v43  ;;  %2693 = vmatprep.mubr.msk.bf16.mxu0 %vm885_vm0, %v785_v39  ;;  %v3362_v39 = vpack.i.bf16 %v3290_v49, %v3288_v48 }
 0x186   : > { %v835_v47 = vpack.c.bf16 %v2839_v41, %v2838_v42 }
 0x187   : > { %v2847_v50 = vpop.permute.xlu0 %2846  ;;  %v836_v51 = vpack.c.bf16 %v2854_v44, %v2853_v45 }
 0x188   : > { %v2849_v52 = vunpack.i.h.bf16 %v2847_v50  ;;  %v2848_v53 = vunpack.i.l.bf16 %v2847_v50  ;;  %2686 = vmatmul.mubr.msk.bf16.vlgmr.msra.gmra.mrb[8].mxu1 %vm885_vm0, %v784_v46  ;;  %2791 = vmatprep.subr.msk.bf16.mxu1 %vm885_vm0, %v835_v47  ;;  %v1076_v54 = vsel %vm885_vm0, %v835_v47, 0  ;;  %v2862_v61 = vpop.permute.xlu1 %2861 }
 0x189   : > { %2698 = vmatpush3.bf16.xpose.msra.mxu1 %v1076_v54  ;;  %v1079_v62 = vsel %vm885_vm0, %v836_v51, 0  ;;  %v2864_v63 = vunpack.i.h.bf16 %v2862_v61  ;;  %v2863_v0 = vunpack.i.l.bf16 %v2862_v61 }
 0x18a   : > { %v786_v55 = vpack.c.bf16 %v2849_v52, %v2848_v53  ;;  %2792 = vmatprep.subr.msk.bf16.mxu1 %vm885_vm0, %v836_v51 }
 0x18b   : > { %v2857_v57 = vpop.permute.xlu0 %2856  ;;  %v788_v1 = vpack.c.bf16 %v2864_v63, %v2863_v0 }
 0x18c   : > { %v2859_v58 = vunpack.i.h.bf16 %v2857_v57  ;;  %v2858_v59 = vunpack.i.l.bf16 %v2857_v57  ;;  %2694 = vmatmul.mubr.msk.bf16.vlgmr.msra.gmra.mrb[8].mxu0 %vm885_vm0, %v786_v55 }
 0x18d   : > { %2706 = vmatpush3.bf16.msra.mxu0 %v877_v30 }
 0x18e   : > { %v787_v60 = vpack.c.bf16 %v2859_v58, %v2858_v59  ;;  %2707 = vmatprep.subr.bf16.mxu0 %v878_v56 }
 0x190   : > { %2701 = vmatprep.mubr.msk.bf16.mxu1 %vm885_vm0, %v787_v60 }
 0x191   : > { %2700 = vmatpush3.bf16.xpose.msra.mxu1 %v1079_v62  ;;  %2708 = vmatpush3.bf16.msra.mxu0 %v878_v56 }
 0x198   : > { %2702 = vmatmul.mubr.msk.bf16.vlgmr.msra.gmra.mrb[12].mxu1 %vm885_vm0, %v788_v1 }
 0x1e5   : > { %v3302_v3 = vpop.f32.mrb[4].mxu1 }
 0x1e6   : > { %v3304_v4 = vpop.f32.mrb[5].mxu1  ;;  %v1136_v5 = vsel %vm885_vm0, %v3302_v3, -inf }
 0x1e7   : > { %1137 = vmax.xlane.f32.xlu0 %v1136_v5  ;;  %v2680_v6 = vpop.f32.mrb[6].mxu1  ;;  %v1130_v9 = vsel %vm885_vm0, %v3304_v4, -inf }
 0x1e8   : > { %v935_v7 = vpop.f32.mrb[7].mxu1  ;;  %v1139_v10 = vsel %vm885_vm0, %v2680_v6, -inf }
 0x1e9   : > { %v1133_v8 = vsel %vm885_vm0, %v935_v7, -inf }
 0x1ea   : > { %1134 = vmax.xlane.f32.xlu1 %v1133_v8 }
 0x1eb   : > { %1131 = vmax.xlane.f32.xlu0 %v1130_v9 }
 0x1ef   : > { %1140 = vmax.xlane.f32.xlu0 %v1139_v10 }
 0x25b   : > { %v3312_v11 = vpop.f32.mrb[8].mxu1 }
 0x25c   : > { %v3314_v12 = vpop.f32.mrb[9].mxu1  ;;  %v1148_v13 = vsel %vm885_vm0, %v3312_v11, -inf }
 0x25d   : > { %1149 = vmax.xlane.f32.xlu1 %v1148_v13  ;;  %v3318_v14 = vpop.f32.mrb[10].mxu1  ;;  %v1142_v25 = vsel %vm885_vm0, %v3314_v12, -inf }
 0x25e   : > { %v3320_v15 = vpop.f32.mrb[11].mxu1  ;;  %v1151_v16 = vsel %vm885_vm0, %v3318_v14, -inf }
 0x25f   : > { %v3324_v17 = vpop.f32.mrb[8].mxu0  ;;  %1152 = vmax.xlane.f32.xlu0 %v1151_v16  ;;  %v1145_v26 = vsel %vm885_vm0, %v3320_v15, -inf }
 0x260   : > { %v3326_v20 = vpop.f32.mrb[9].mxu0  ;;  %v1160_v21 = vsel %vm885_vm0, %v3324_v17, -inf }
 0x261   : > { %v3330_v22 = vpop.f32.mrb[10].mxu0  ;;  %1161 = vmax.xlane.f32.xlu1 %v1160_v21  ;;  %v1154_v18 = vsel %vm885_vm0, %v3326_v20, -inf }
 0x262   : > { %v3332_v23 = vpop.f32.mrb[11].mxu0  ;;  %v1163_v24 = vsel %vm885_vm0, %v3330_v22, -inf }
 0x263   : > { %1164 = vmax.xlane.f32.xlu0 %v1163_v24  ;;  %v1157_v27 = vsel %vm885_vm0, %v3332_v23, -inf }
 0x265   : > { %1143 = vmax.xlane.f32.xlu1 %v1142_v25 }
 0x267   : > { %1146 = vmax.xlane.f32.xlu0 %v1145_v26 }
 0x26b   : > { %1158 = vmax.xlane.f32.xlu0 %v1157_v27  ;;  %v3342_v30 = vpop.f32.mrb[12].mxu1 }
 0x26c   : > { %v3344_v32 = vpop.f32.mrb[13].mxu1  ;;  %v1172_v46 = vsel %vm885_vm0, %v3342_v30, -inf }
 0x26d   : > { %v3346_v33 = vpop.f32.mrb[14].mxu1  ;;  %v1166_v47 = vsel %vm885_vm0, %v3344_v32, -inf }
 0x26e   : > { %v3348_v34 = vpop.f32.mrb[15].mxu1  ;;  %v1175_v35 = vsel %vm885_vm0, %v3346_v33, -inf }
 0x26f   : > { %1176 = vmax.xlane.f32.xlu0 %v1175_v35  ;;  %v1169_v36 = vsel %vm885_vm0, %v3348_v34, -inf }
 0x273   : > { %1170 = vmax.xlane.f32.xlu0 %v1169_v36 }
 0x274   : > { %v1138_v38 = vpop.xlane.xlu0 %1137 }
 0x275   : > { %v1180_v52 = vsub.f32 %v3302_v3, %v1138_v38 }
 0x276   : > { %2866 = vrot.lane.b32.xlu1 %v3356_v37, %s3071_s28 }
 0x277   : > { %v1135_v43 = vpop.xlane.xlu1 %1134  ;;  %v1198_v53 = vmul.f32 1.442695, %v1180_v52 }
 0x278   : > { %v1132_v40 = vpop.xlane.xlu0 %1131  ;;  %v1179_v44 = vsub.f32 %v935_v7, %v1135_v43 }
 0x279   : > { %v1178_v54 = vsub.f32 %v3304_v4, %v1132_v40 }
 0x27a   : > { %v1196_v19 = vmul.f32 1.442695, %v1179_v44 }
 0x27b   : > { %v1194_v55 = vmul.f32 1.442695, %v1178_v54 }
 0x27c   : > { %v1141_v41 = vpop.xlane.xlu0 %1140 }
 0x27d   : > { %v1181_v42 = vsub.f32 %v2680_v6, %v1141_v41 }
 0x27f   : > { %v1200_v45 = vmul.f32 1.442695, %v1181_v42 }
 0x281   : > { %2979 = vpow2.f32 %v1200_v45 }
 0x282   : > { %2981 = vpow2.f32 %v1196_v19 }
 0x283   : > { %2983 = vpow2.f32 %v1198_v53 }
 0x284   : > { %2985 = vpow2.f32 %v1194_v55 }
 0x289   : > { %2871 = vrot.lane.b32.xlu0 %v3362_v39, %s3071_s28 }
 0x28b   : > { %v3372_v48 = vpop.eup %2979 }
 0x28c   : > { %v1235_v49 = vsel %vm885_vm0, %v3372_v48, 0.0  ;;  %v3376_v50 = vpop.eup %2981 }
 0x28d   : > { %v1229_v51 = vsel %vm885_vm0, %v3376_v50, 0.0  ;;  %v3384_v56 = vpop.eup %2983 }
 0x28e   : > { %v1232_v57 = vsel %vm885_vm0, %v3384_v56, 0.0  ;;  %v3388_v58 = vpop.eup %2985 }
 0x28f   : > { %v1226_v59 = vsel %vm885_vm0, %v3388_v58, 0.0 }
 0x29a   : > { %1155 = vmax.xlane.f32.xlu1 %v1154_v18 }
 0x29e   : > { %1173 = vmax.xlane.f32.xlu1 %v1172_v46 }
 0x2a2   : > { %1167 = vmax.xlane.f32.xlu1 %v1166_v47 }
 0x2a8   : > { %1236 = vadd.xlane.f32.xlu0 %v1235_v49 }
 0x2ac   : > { %1230 = vadd.xlane.f32.xlu0 %v1229_v51 }
 0x2b3   : > { %2876 = vrot.lane.b32.xlu1 %v3356_v37, %s3070_s24 }
 0x2d7   : > { %1233 = vadd.xlane.f32.xlu1 %v1232_v57 }
 0x2db   : > { %1227 = vadd.xlane.f32.xlu1 %v1226_v59 }
 0x2ea   : > { %v1150_v60 = vpop.xlane.xlu1 %1149 }
 0x2eb   : > { %v1184_v61 = vsub.f32 %v3312_v11, %v1150_v60 }
 0x2ec   : > { %v1153_v62 = vpop.xlane.xlu0 %1152 }
 0x2ed   : > { %v1206_v63 = vmul.f32 1.442695, %v1184_v61  ;;  %v1185_v0 = vsub.f32 %v3318_v14, %v1153_v62 }
 0x2ee   : > { %v1162_v1 = vpop.xlane.xlu1 %1161 }
 0x2ef   : > { %2987 = vpow2.f32 %v1206_v63  ;;  %v1208_v3 = vmul.f32 1.442695, %v1185_v0  ;;  %v1188_v4 = vsub.f32 %v3324_v17, %v1162_v1 }
 0x2f0   : > { %v1165_v5 = vpop.xlane.xlu0 %1164 }
 0x2f1   : > { %2989 = vpow2.f32 %v1208_v3  ;;  %v1214_v6 = vmul.f32 1.442695, %v1188_v4  ;;  %v1189_v7 = vsub.f32 %v3330_v22, %v1165_v5 }
 0x2f2   : > { %v1144_v8 = vpop.xlane.xlu1 %1143 }
 0x2f3   : > { %2991 = vpow2.f32 %v1214_v6  ;;  %v1216_v9 = vmul.f32 1.442695, %v1189_v7  ;;  %v1182_v10 = vsub.f32 %v3314_v12, %v1144_v8 }
 0x2f4   : > { %v1147_v11 = vpop.xlane.xlu0 %1146 }
 0x2f5   : > { %2993 = vpow2.f32 %v1216_v9  ;;  %v1202_v13 = vmul.f32 1.442695, %v1182_v10  ;;  %v1183_v14 = vsub.f32 %v3320_v15, %v1147_v11 }
 0x2f6   : > { %v2867_v16 = vpop.permute.xlu1 %2866 }
 0x2f7   : > { %2995 = vpow2.f32 %v1202_v13  ;;  %v1204_v21 = vmul.f32 1.442695, %v1183_v14  ;;  %v2869_v24 = vunpack.i.h.bf16 %v2867_v16  ;;  %v2868_v17 = vunpack.i.l.bf16 %v2867_v16 }
 0x2f8   : > { %v1159_v25 = vpop.xlane.xlu0 %1158 }
 0x2f9   : > { %v3398_v26 = vpop.eup %2987  ;;  %2997 = vpow2.f32 %v1204_v21  ;;  %v879_v22 = vpack.c.bf16 %v2869_v24, %v2868_v17  ;;  %v1187_v27 = vsub.f32 %v3332_v23, %v1159_v25 }
 0x2fa   : > { %v1244_v12 = vsel %vm885_vm0, %v3398_v26, 0.0 }
 0x2fb   : > { %v3403_v35 = vpop.eup %2989  ;;  %v1212_v36 = vmul.f32 1.442695, %v1187_v27  ;;  %2713 = vmatprep.subr.bf16.mxu1 %v879_v22  ;;  %1245 = vadd.xlane.f32.xlu1 %v1244_v12 }
 0x2fc   : > { %2714 = vmatpush3.bf16.msra.mxu1 %v879_v22  ;;  %v1177_v15 = vpop.xlane.xlu0 %1176  ;;  %v1247_v38 = vsel %vm885_vm0, %v3403_v35, 0.0 }
 0x2fd   : > { %v3407_v40 = vpop.eup %2991  ;;  %2999 = vpow2.f32 %v1212_v36  ;;  %v1193_v41 = vsub.f32 %v3346_v33, %v1177_v15  ;;  %1248 = vadd.xlane.f32.xlu0 %v1247_v38 }
 0x2fe   : > { %v1256_v23 = vsel %vm885_vm0, %v3407_v40, 0.0 }
 0x2ff   : > { %v3412_v42 = vpop.eup %2993  ;;  %v1224_v43 = vmul.f32 1.442695, %v1193_v41  ;;  %1257 = vadd.xlane.f32.xlu1 %v1256_v23 }
 0x300   : > { %v1171_v44 = vpop.xlane.xlu0 %1170  ;;  %v1259_v45 = vsel %vm885_vm0, %v3412_v42, 0.0 }
 0x301   : > { %v3416_v18 = vpop.eup %2995  ;;  %3001 = vpow2.f32 %v1224_v43  ;;  %v1191_v19 = vsub.f32 %v3348_v34, %v1171_v44  ;;  %1260 = vadd.xlane.f32.xlu0 %v1259_v45 }
 0x302   : > { %v1238_v33 = vsel %vm885_vm0, %v3416_v18, 0.0 }
 0x303   : > { %v3421_v46 = vpop.eup %2997  ;;  %v1220_v47 = vmul.f32 1.442695, %v1191_v19  ;;  %1239 = vadd.xlane.f32.xlu1 %v1238_v33 }
 0x304   : > { %v2872_v49 = vpop.permute.xlu0 %2871  ;;  %v1241_v51 = vsel %vm885_vm0, %v3421_v46, 0.0 }
 0x305   : > { %3003 = vpow2.f32 %v1220_v47  ;;  %v2874_v52 = vunpack.i.h.bf16 %v2872_v49  ;;  %v2873_v53 = vunpack.i.l.bf16 %v2872_v49  ;;  %1242 = vadd.xlane.f32.xlu0 %v1241_v51 }
 0x307   : > { %v3425_v54 = vpop.eup %2999  ;;  %v880_v55 = vpack.c.bf16 %v2874_v52, %v2873_v53 }
 0x308   : > { %v1253_v34 = vsel %vm885_vm0, %v3425_v54, 0.0 }
 0x309   : > { %1254 = vadd.xlane.f32.xlu0 %v1253_v34  ;;  %2715 = vmatprep.subr.bf16.mxu1 %v880_v55 }
 0x30a   : > { %2716 = vmatpush3.bf16.msra.mxu1 %v880_v55 }
 0x30b   : > { %v3429_v57 = vpop.eup %3001 }
 0x30c   : > { %v1271_v59 = vsel %vm885_vm0, %v3429_v57, 0.0 }
 0x30d   : > { %1272 = vadd.xlane.f32.xlu0 %v1271_v59 }
 0x30f   : > { %v3433_v60 = vpop.eup %3003 }
 0x310   : > { %v1265_v61 = vsel %vm885_vm0, %v3433_v60, 0.0 }
 0x311   : > { %1266 = vadd.xlane.f32.xlu0 %v1265_v61 }
 0x327   : > { %v1156_v62 = vpop.xlane.xlu1 %1155  ;;  %2881 = vrot.lane.b32.xlu0 %v3362_v39, %s3070_s24 }
 0x328   : > { %v1186_v63 = vsub.f32 %v3326_v20, %v1156_v62 }
 0x32a   : > { %v1210_v0 = vmul.f32 1.442695, %v1186_v63 }
 0x32b   : > { %v1174_v1 = vpop.xlane.xlu1 %1173 }
 0x32c   : > { %3005 = vpow2.f32 %v1210_v0  ;;  %v1192_v3 = vsub.f32 %v3342_v30, %v1174_v1 }
 0x32e   : > { %v1222_v4 = vmul.f32 1.442695, %v1192_v3 }
 0x32f   : > { %v1168_v5 = vpop.xlane.xlu1 %1167 }
 0x330   : > { %3007 = vpow2.f32 %v1222_v4  ;;  %v1190_v6 = vsub.f32 %v3344_v32, %v1168_v5 }
 0x332   : > { %v1218_v7 = vmul.f32 1.442695, %v1190_v6 }
 0x333   : > { %v2877_v8 = vpop.permute.xlu1 %2876 }
 0x334   : > { %3009 = vpow2.f32 %v1218_v7  ;;  %v2879_v9 = vunpack.i.h.bf16 %v2877_v8  ;;  %v2878_v10 = vunpack.i.l.bf16 %v2877_v8 }
 0x335   : > { %v1237_v21 = vpop.xlane.xlu0 %1236 }
 0x336   : > { %v3442_v11 = vpop.eup %3005  ;;  %v881_v13 = vpack.c.bf16 %v2879_v9, %v2878_v10 }
 0x337   : > { %v1250_v20 = vsel %vm885_vm0, %v3442_v11, 0.0 }
 0x338   : > { %1251 = vadd.xlane.f32.xlu1 %v1250_v20  ;;  %2721 = vmatprep.subr.bf16.mxu0 %v881_v13 }
 0x339   : > { %v1231_v24 = vpop.xlane.xlu0 %1230 }
 0x33a   : > { %v3446_v14 = vpop.eup %3007 }
 0x33b   : > { %v1268_v30 = vsel %vm885_vm0, %v3446_v14, 0.0 }
 0x33c   : > { %1269 = vadd.xlane.f32.xlu1 %v1268_v30 }
 0x33e   : > { %v3450_v32 = vpop.eup %3009 }
 0x33f   : > { %v1262_v16 = vsel %vm885_vm0, %v3450_v32, 0.0 }
 0x340   : > { %1263 = vadd.xlane.f32.xlu1 %v1262_v16 }
 0x351   : > { %2886 = vrot.lane.b32.xlu1 %v3356_v37, %s3072_s29 }
 0x355   : > { %2891 = vrot.lane.b32.xlu1 %v3362_v39, %s3072_s29  ;;  %s440_s29 = scalar_lea.vmem %s3696_s13, %s2550_s20 }
 0x364   : > { %v1234_v17 = vpop.xlane.xlu1 %1233 }
 0x365   : > { %3011 = vrcp.f32 %v1234_v17 }
 0x366   : > { %3013 = vrcp.f32 %v1231_v24 }
 0x367   : > { %3015 = vrcp.f32 %v1237_v21 }
 0x368   : > { %v1228_v25 = vpop.xlane.xlu1 %1227 }
 0x369   : > { %3017 = vrcp.f32 %v1228_v25  ;;  %v2930_v25 = vld [vmem:[%s3686_s3 + $0x8] sm:$0xff]  }
 0x36f   : > { %v3012_v22 = vpop.eup %3011 }
 0x370   : > { %v3014_v27 = vpop.eup %3013  ;;  %v1292_v15 = vmul.f32 %v3012_v22, %v3384_v56 }
 0x371   : > { %v3016_v12 = vpop.eup %3015  ;;  %v1291_v37 = vmul.f32 %v3014_v27, %v3376_v50 }
 0x372   : > { %v1293_v39 = vmul.f32 %v3016_v12, %v3372_v48 }
 0x373   : > { %v3018_v36 = vpop.eup %3017 }
 0x374   : > { %v1290_v38 = vmul.f32 %v3018_v36, %v3388_v58  ;;  %v1307_v23 = vpack.c.bf16 %v1293_v39, %v1292_v15 }
 0x376   : > { %v1306_v41 = vpack.c.bf16 %v1291_v37, %v1290_v38  ;;  %v2931_v38 = vld [vmem:[%s3686_s3 + $0x10] sm:$0xff]  }
 0x378   : > { %2709 = vmatprep.mubr.msk.bf16.mxu0 %vm885_vm0, %v1306_v41 }
 0x379   : > { %2710 = vmatmul.mubr.msk.bf16.vlgmr.msra.gmra.mrb[12].mxu0 %vm885_vm0, %v1307_v23 }
 0x37a   : > { %2722 = vmatpush3.bf16.msra.mxu0 %v881_v13 }
 0x388   : > { %v1246_v43 = vpop.xlane.xlu1 %1245 }
 0x38a   : > { %v1249_v44 = vpop.xlane.xlu0 %1248 }
 0x38b   : > { %3019 = vrcp.f32 %v1249_v44 }
 0x38c   : > { %v1258_v45 = vpop.xlane.xlu1 %1257 }
 0x38e   : > { %v1261_v19 = vpop.xlane.xlu0 %1260 }
 0x390   : > { %v1240_v33 = vpop.xlane.xlu1 %1239 }
 0x391   : > { %3021 = vrcp.f32 %v1240_v33  ;;  %v2933_v33 = vld [vmem:[%s3686_s3 + $0x20] sm:$0xff]  }
 0x392   : > { %3023 = vrcp.f32 %v1246_v43  ;;  %v1243_v56 = vpop.xlane.xlu0 %1242 }
 0x393   : > { %3025 = vrcp.f32 %v1243_v56 }
 0x394   : > { %3027 = vrcp.f32 %v1261_v19 }
 0x395   : > { %v3020_v58 = vpop.eup %3019 }
 0x396   : > { %v1255_v50 = vpop.xlane.xlu0 %1254  ;;  %v1297_v52 = vmul.f32 %v3020_v58, %v3403_v35  ;;  %v2929_v35 = vld [vmem:[%s3686_s3] sm:$0xff]  }
 0x397   : > { %3029 = vrcp.f32 %v1255_v50 }
 0x398   : > { %3031 = vrcp.f32 %v1258_v45 }
 0x39a   : > { %v1273_v48 = vpop.xlane.xlu0 %1272 }
 0x39b   : > { %v3022_v47 = vpop.eup %3021 }
 0x39c   : > { %v3024_v49 = vpop.eup %3023  ;;  %v1294_v55 = vmul.f32 %v3022_v47, %v3416_v18 }
 0x39d   : > { %v3026_v51 = vpop.eup %3025  ;;  %v1296_v59 = vmul.f32 %v3024_v49, %v3398_v26 }
 0x39e   : > { %v1267_v53 = vpop.xlane.xlu0 %1266  ;;  %v1295_v34 = vmul.f32 %v3026_v51, %v3421_v46  ;;  %v3028_v46 = vpop.eup %3027  ;;  %v2934_v51 = vld [vmem:[%s3686_s3 + $0x28] sm:$0xff]  }
 0x39f   : > { %v1309_v62 = vpack.c.bf16 %v1297_v52, %v1296_v59  ;;  %v1301_v8 = vmul.f32 %v3028_v46, %v3412_v42  ;;  %v2935_v52 = vld [vmem:[%s3686_s3 + $0x30] sm:$0xff]   ;;  %v2482_v46 = vld [vmem:[%s3687_s4] ss:$0 sm:$0xff] }
 0x3a0   : > { %v1308_v61 = vpack.c.bf16 %v1295_v34, %v1294_v55 }
 0x3a1   : > { %v3030_v5 = vpop.eup %3029 }
 0x3a2   : > { %2717 = vmatprep.mubr.msk.bf16.mxu1 %vm885_vm0, %v1308_v61  ;;  %v2882_v63 = vpop.permute.xlu0 %2881  ;;  %v3032_v6 = vpop.eup %3031  ;;  %v1299_v13 = vmul.f32 %v3030_v5, %v3425_v54  ;;  %v3059_v5 = vld [vmem:[%s3178_s27] sm:$0xff]  }
 0x3a3   : > { %v2884_v0 = vunpack.i.h.bf16 %v2882_v63  ;;  %v2883_v1 = vunpack.i.l.bf16 %v2882_v63  ;;  %2718 = vmatmul.mubr.msk.bf16.vlgmr.msra.gmra.mrb[16].mxu1 %vm885_vm0, %v1309_v62  ;;  %v1300_v20 = vmul.f32 %v3032_v6, %v3407_v40  ;;  %v2936_v63 = vld [vmem:[%s3686_s3 + $0x38] sm:$0xff]   ;;  %v446_v6 = vunpack.c.l.bf16 %v3059_v5 }
 0x3a5   : > { %v882_v3 = vpack.c.bf16 %v2884_v0, %v2883_v1  ;;  %v1311_v17 = vpack.c.bf16 %v1301_v8, %v1300_v20 }
 0x3a7   : > { %2723 = vmatprep.subr.bf16.mxu0 %v882_v3 }
 0x3a8   : > { %2724 = vmatpush3.bf16.msra.mxu0 %v882_v3 }
 0x3a9   : > { %2737 = vmatprep.subr.bf16.mxu0 %v2929_v35 }
 0x3c5   : > { %v1252_v26 = vpop.xlane.xlu1 %1251 }
 0x3c6   : > { %3033 = vrcp.f32 %v1252_v26 }
 0x3c9   : > { %v1270_v18 = vpop.xlane.xlu1 %1269 }
 0x3ca   : > { %3035 = vrcp.f32 %v1270_v18 }
 0x3cb   : > { %3037 = vrcp.f32 %v1267_v53 }
 0x3cc   : > { %3039 = vrcp.f32 %v1273_v48 }
 0x3cd   : > { %v1264_v4 = vpop.xlane.xlu1 %1263 }
 0x3ce   : > { %3041 = vrcp.f32 %v1264_v4 }
 0x3d0   : > { %v3034_v7 = vpop.eup %3033 }
 0x3d1   : > { %v2887_v9 = vpop.permute.xlu1 %2886  ;;  %v1298_v10 = vmul.f32 %v3034_v7, %v3442_v11 }
 0x3d2   : > { %v2889_v30 = vunpack.i.h.bf16 %v2887_v9  ;;  %v2888_v16 = vunpack.i.l.bf16 %v2887_v9 }
 0x3d3   : > { %v1310_v21 = vpack.c.bf16 %v1299_v13, %v1298_v10  ;;  %v447_v10 = vunpack.c.h.bf16 %v3059_v5 }
 0x3d4   : > { %v883_v24 = vpack.c.bf16 %v2889_v30, %v2888_v16  ;;  %v3036_v22 = vpop.eup %3035 }
 0x3d5   : > { %v2892_v27 = vpop.permute.xlu1 %2891  ;;  %2725 = vmatprep.mubr.msk.bf16.mxu0 %vm885_vm0, %v1310_v21  ;;  %v3038_v42 = vpop.eup %3037  ;;  %v1304_v36 = vmul.f32 %v3036_v22, %v3446_v14  ;;  %v3060_v21 = vld [vmem:[%s3178_s27 + $0x8] sm:$0xff]  }
 0x3d6   : > { %v2894_v12 = vunpack.i.h.bf16 %v2892_v27  ;;  %v2893_v11 = vunpack.i.l.bf16 %v2892_v27  ;;  %2726 = vmatmul.mubr.msk.bf16.vlgmr.msra.gmra.mrb[16].mxu0 %vm885_vm0, %v1311_v17  ;;  %2729 = vmatprep.subr.bf16.mxu1 %v883_v24  ;;  %v3040_v40 = vpop.eup %3039  ;;  %v1303_v39 = vmul.f32 %v3038_v42, %v3433_v60  ;;  %v449_v27 = vunpack.c.h.bf16 %v3060_v21 }
 0x3d7   : > { %2730 = vmatpush3.bf16.msra.mxu1 %v883_v24  ;;  %2738 = vmatpush3.bf16.msra.mxu0 %v2929_v35  ;;  %v1305_v41 = vmul.f32 %v3040_v40, %v3429_v57  ;;  %v2932_v57 = vld [vmem:[%s3686_s3 + $0x18] sm:$0xff]   ;;  %v448_v24 = vunpack.c.l.bf16 %v3060_v21 }
 0x3d8   : > { %v3042_v54 = vpop.eup %3041  ;;  %v884_v15 = vpack.c.bf16 %v2894_v12, %v2893_v11  ;;  %2739 = vmatprep.subr.bf16.mxu0 %v2930_v25  ;;  %v2937_v12 = vld [vmem:[%s3690_s7] ss:$8 sps:$4 sm:$0xff]   ;;  %v2939_v11 = vld [vmem:[%s3690_s7 + $0x4] ss:$8 sps:$4 sm:$0xff]   ;;  %v2942_v40 = vld [vmem:[%s3690_s7 + $0x14] ss:$8 sps:$4 sm:$0xff]  }
 0x3d9   : > { %v1302_v37 = vmul.f32 %v3042_v54, %v3450_v32  ;;  %v1313_v43 = vpack.c.bf16 %v1305_v41, %v1304_v36  ;;  %v2940_v54 = vld [vmem:[%s3690_s7 + $0x10] ss:$8 sps:$4 sm:$0xff]  }
 0x3da   : > { %2731 = vmatprep.subr.bf16.mxu1 %v884_v15 }
 0x3db   : > { %2732 = vmatpush3.bf16.msra.mxu1 %v884_v15  ;;  %v1312_v23 = vpack.c.bf16 %v1303_v39, %v1302_v37  ;;  %2740 = vmatpush3.bf16.msra.mxu0 %v2930_v25 }
 0x3dc   : > { %2745 = vmatprep.subr.bf16.mxu0 %v2931_v38  ;;  %2033 = vmatprep.subr.bf16.mxu1 %v2939_v11 }
 0x3dd   : > { %2733 = vmatprep.mubr.msk.bf16.mxu1 %vm885_vm0, %v1312_v23 }
 0x3de   : > { %2734 = vmatmul.mubr.msk.bf16.vlgmr.msra.gmra.mrb[20].mxu1 %vm885_vm0, %v1313_v43 }
 0x3df   : > { %2065 = vmatprep.mubr.bf16.mxu1 %v3069_v2  ;;  %2034 = vmatpush1.bf16.msra.mxu1 %v2937_v12 }
 0x3e0   : > { %2035 = vmatprep.subr.bf16.mxu1 %v2942_v40  ;;  %v2508_v40 = vld [vmem:[%s3689_s6] ss:$0 sm:$0xff] }
 0x3e3   : > { %2036 = vmatpush1.bf16.msra.mxu1 %v2940_v54 }
 0x44c   : > { %v2711_v14 = vpop.f32.mrb[12].mxu0 }
 0x44d   : > { %v1354_v44 = vpop.f32.mrb[13].mxu0 }
 0x44e   : > { %v2712_v45 = vpop.f32.mrb[14].mxu0 }
 0x44f   : > { %v1535_v32 = vpack.c.bf16 %v2712_v45, %v2711_v14  ;;  %v1357_v19 = vpop.f32.mrb[15].mxu0 }
 0x450   : > { %v1534_v60 = vpack.c.bf16 %v1357_v19, %v1354_v44 }
 0x452   : > { %2741 = vmatprep.mubr.msk.bf16.mxu0 %vm885_vm0, %v1534_v60 }
 0x453   : > { %2742 = vmatmul.mubr.msk.bf16.vlgmr.msra.gmra.mrb[20].mxu0 %vm885_vm0, %v1535_v32 }
 0x454   : > { %2746 = vmatpush3.bf16.msra.mxu0 %v2931_v38 }
 0x455   : > { %2747 = vmatprep.subr.bf16.mxu0 %v2932_v57 }
 0x458   : > { %2748 = vmatpush3.bf16.msra.mxu0 %v2932_v57 }
 0x459   : > { %2753 = vmatprep.subr.bf16.mxu0 %v2933_v33 }
 0x476   : > { %v2719_v56 = vpop.f32.mrb[16].mxu1 }
 0x477   : > { %v1409_v50 = vpop.f32.mrb[17].mxu1 }
 0x478   : > { %v2720_v58 = vpop.f32.mrb[18].mxu1 }
 0x479   : > { %v1537_v48 = vpack.c.bf16 %v2720_v58, %v2719_v56  ;;  %v1412_v47 = vpop.f32.mrb[19].mxu1  ;;  %v2945_v56 = vld [vmem:[%s3690_s7 + $0x24] ss:$8 sps:$4 sm:$0xff]   ;;  %v2948_v58 = vld [vmem:[%s3690_s7 + $0x34] ss:$8 sps:$4 sm:$0xff]  }
 0x47a   : > { %v1536_v49 = vpack.c.bf16 %v1412_v47, %v1409_v50  ;;  %v2943_v50 = vld [vmem:[%s3690_s7 + $0x20] ss:$8 sps:$4 sm:$0xff]   ;;  %2037 = vmatprep.subr.bf16.mxu1 %v2945_v56  ;;  %v2951_v47 = vld [vmem:[%s3690_s7 + $0x44] ss:$8 sps:$4 sm:$0xff]  }
 0x47b   : > { %2038 = vmatpush1.bf16.msra.mxu1 %v2943_v50 }
 0x47c   : > { %2749 = vmatprep.mubr.msk.bf16.mxu0 %vm885_vm0, %v1536_v49  ;;  %2039 = vmatprep.subr.bf16.mxu1 %v2948_v58  ;;  %v2949_v49 = vld [vmem:[%s3690_s7 + $0x40] ss:$8 sps:$4 sm:$0xff]  }
 0x47d   : > { %2750 = vmatmul.mubr.msk.bf16.vlgmr.msra.gmra.mrb[20].mxu0 %vm885_vm0, %v1537_v48  ;;  %v2946_v48 = vld [vmem:[%s3690_s7 + $0x30] ss:$8 sps:$4 sm:$0xff]  }
 0x47e   : > { %2754 = vmatpush3.bf16.msra.mxu0 %v2933_v33 }
 0x47f   : > { %2755 = vmatprep.subr.bf16.mxu0 %v2934_v51  ;;  %2040 = vmatpush1.bf16.msra.mxu1 %v2946_v48 }
 0x480   : > { %2041 = vmatprep.subr.bf16.mxu1 %v2951_v47 }
 0x482   : > { %2756 = vmatpush3.bf16.msra.mxu0 %v2934_v51  ;;  %v2954_v51 = vld [vmem:[%s3690_s7 + $0x54] ss:$8 sps:$4 sm:$0xff]  }
 0x483   : > { %2761 = vmatprep.subr.bf16.mxu0 %v2935_v52  ;;  %2042 = vmatpush1.bf16.msra.mxu1 %v2949_v49 }
 0x484   : > { %2043 = vmatprep.subr.bf16.mxu1 %v2954_v51 }
 0x4a9   : > { %v2727_v53 = vpop.f32.mrb[16].mxu0 }
 0x4aa   : > { %v1464_v55 = vpop.f32.mrb[17].mxu0 }
 0x4ab   : > { %v2728_v34 = vpop.f32.mrb[18].mxu0 }
 0x4ac   : > { %v1539_v59 = vpack.c.bf16 %v2728_v34, %v2727_v53  ;;  %v1467_v61 = vpop.f32.mrb[19].mxu0  ;;  %v2957_v53 = vld [vmem:[%s3690_s7 + $0x64] ss:$8 sps:$4 sm:$0xff]   ;;  %v2960_v34 = vld [vmem:[%s3690_s7 + $0x74] ss:$8 sps:$4 sm:$0xff]  }
 0x4ad   : > { %v1538_v62 = vpack.c.bf16 %v1467_v61, %v1464_v55  ;;  %v2955_v55 = vld [vmem:[%s3690_s7 + $0x60] ss:$8 sps:$4 sm:$0xff]  }
 0x4ae   : > { %v2961_v61 = vld [vmem:[%s3692_s9 + $0x40] sm:$0xff]  }
 0x4af   : > { %2757 = vmatprep.mubr.msk.bf16.mxu0 %vm885_vm0, %v1538_v62  ;;  %v2962_v62 = vld [vmem:[%s3692_s9] sm:$0xff]  }
 0x4b0   : > { %2758 = vmatmul.mubr.msk.bf16.vlgmr.msra.gmra.mrb[20].mxu0 %vm885_vm0, %v1539_v59  ;;  %v2958_v59 = vld [vmem:[%s3690_s7 + $0x70] ss:$8 sps:$4 sm:$0xff]  }
 0x4b1   : > { %2762 = vmatpush3.bf16.msra.mxu0 %v2935_v52  ;;  %v2735_v0 = vpop.f32.mrb[20].mxu1  ;;  %v2952_v52 = vld [vmem:[%s3690_s7 + $0x50] ss:$8 sps:$4 sm:$0xff]  }
 0x4b2   : > { %v1519_v1 = vpop.f32.mrb[21].mxu1  ;;  %2763 = vmatprep.subr.bf16.mxu0 %v2936_v63  ;;  %2044 = vmatpush1.bf16.msra.mxu1 %v2952_v52 }
 0x4b3   : > { %v2736_v3 = vpop.f32.mrb[22].mxu1  ;;  %2045 = vmatprep.subr.bf16.mxu1 %v2957_v53 }
 0x4b4   : > { %v1541_v35 = vpack.c.bf16 %v2736_v3, %v2735_v0  ;;  %v1522_v26 = vpop.f32.mrb[23].mxu1  ;;  %v2964_v0 = vld [vmem:[%s3692_s9 + $0x8] sm:$0xff]   ;;  %v2966_v3 = vld [vmem:[%s3692_s9 + $0x10] sm:$0xff]  }
 0x4b5   : > { %v1540_v18 = vpack.c.bf16 %v1522_v26, %v1519_v1  ;;  %2764 = vmatpush3.bf16.msra.mxu0 %v2936_v63  ;;  %v2963_v63 = vld [vmem:[%s3692_s9 + $0x48] sm:$0xff]   ;;  %v2965_v1 = vld [vmem:[%s3692_s9 + $0x50] sm:$0xff]   ;;  %v2968_v26 = vld [vmem:[%s3692_s9 + $0x18] sm:$0xff]  }
 0x4b6   : > { %2046 = vmatpush1.bf16.msra.mxu1 %v2955_v55  ;;  %2625 = vmatprep.subr.bf16.mxu0 %v2961_v61 }
 0x4b7   : > { %2765 = vmatprep.mubr.msk.bf16.mxu0 %vm885_vm0, %v1540_v18  ;;  %2047 = vmatprep.subr.bf16.mxu1 %v2960_v34  ;;  %v2969_v18 = vld [vmem:[%s3692_s9 + $0x60] sm:$0xff]  }
 0x4ba   : > { %2048 = vmatpush1.bf16.msra.mxu1 %v2958_v59 }
 0x4bc   : > { %2766 = vmatmul.mubr.msk.bf16.vlgmr.msra.gmra.mrb[20].mxu0 %vm885_vm0, %v1541_v35  ;;  %v2967_v35 = vld [vmem:[%s3692_s9 + $0x58] sm:$0xff]  }
 0x4bd   : > { %2626 = vmatpush3.bf16.msra.mxu0 %v2962_v62 }
 0x4be   : > { %2627 = vmatprep.subr.bf16.mxu0 %v2963_v63 }
 0x4c1   : > { %2628 = vmatpush3.bf16.msra.mxu0 %v2964_v0 }
 0x4c2   : > { %2629 = vmatprep.subr.bf16.mxu0 %v2965_v1 }
 0x4c5   : > { %2630 = vmatpush3.bf16.msra.mxu0 %v2966_v3 }
 0x4c6   : > { %2631 = vmatprep.subr.bf16.mxu0 %v2967_v35 }
 0x4c9   : > { %2632 = vmatpush3.bf16.msra.mxu0 %v2968_v26 }
 0x4ca   : > { %2633 = vmatprep.subr.bf16.mxu0 %v2969_v18 }
 0x58f   : > { %v2767_v4 = vpop.f32.mrb[20].mxu0 }
 0x590   : > { %v1833_v7 = vpop.f32.mrb[21].mxu0  ;;  %v2769_v20 = vadd.f32 %v2767_v4, %v2482_v46  ;;  %v2971_v4 = vld [vmem:[%s3692_s9 + $0x68] sm:$0xff]  }
 0x591   : > { %v2770_v8 = vadd.f32 %v2482_v46, %v1833_v7  ;;  %v2768_v9 = vpop.f32.mrb[22].mxu0 }
 0x592   : > { %v1836_v13 = vpop.f32.mrb[23].mxu0  ;;  %v2771_v25 = vadd.f32 %v2768_v9, %v2482_v46  ;;  %v1854_v22 = vadd.f32 %v2769_v20, %v448_v24 }
 0x593   : > { %v2772_v30 = vadd.f32 %v2482_v46, %v1836_v13  ;;  %v1852_v16 = vadd.f32 %v2770_v8, %v446_v6  ;;  %v2970_v46 = vld [vmem:[%s3692_s9 + $0x20] sm:$0xff]  }
 0x594   : > { %v1855_v42 = vadd.f32 %v2771_v25, %v449_v27  ;;  %2634 = vmatpush3.bf16.msra.mxu0 %v2970_v46  ;;  %v2507_v25 = vld [vmem:[%s3688_s5] ss:$0 sm:$0xff] }
 0x595   : > { %1856 = vadd.xlane.f32.xlu0 %v1852_v16  ;;  %v1853_v17 = vadd.f32 %v2772_v30, %v447_v10  ;;  %2635 = vmatprep.subr.bf16.mxu0 %v2971_v4 }
 0x597   : > { %1858 = vadd.xlane.f32.xlu1 %v1853_v17 }
 0x599   : > { %1860 = vadd.xlane.f32.xlu0 %v1854_v22 }
 0x59d   : > { %1862 = vadd.xlane.f32.xlu0 %v1855_v42 }
 0x622   : > { %v1857_v36 = vpop.xlane.xlu0 %1856 }
 0x623   : > { %v1865_v15 = vmul.f32 0.0078125, %v1857_v36 }
 0x624   : > { %v1859_v38 = vpop.xlane.xlu1 %1858 }
 0x625   : > { %v3532_v37 = vsub.f32 %v1852_v16, %v1865_v15  ;;  %v1866_v39 = vmul.f32 0.0078125, %v1859_v38 }
 0x626   : > { %v1861_v41 = vpop.xlane.xlu0 %1860 }
 0x627   : > { %v3534_v23 = vsub.f32 %v1853_v17, %v1866_v39  ;;  %v1867_v43 = vmul.f32 0.0078125, %v1861_v41  ;;  %v1873_v14 = vmul.f32 %v3532_v37, %v3532_v37 }
 0x629   : > { %v3538_v44 = vsub.f32 %v1854_v22, %v1867_v43  ;;  %1877 = vadd.xlane.f32.xlu1 %v1873_v14  ;;  %v1874_v45 = vmul.f32 %v3534_v23, %v3534_v23 }
 0x62a   : > { %v1863_v32 = vpop.xlane.xlu0 %1862 }
 0x62b   : > { %v1868_v19 = vmul.f32 0.0078125, %v1863_v32  ;;  %1879 = vadd.xlane.f32.xlu0 %v1874_v45  ;;  %v1875_v60 = vmul.f32 %v3538_v44, %v3538_v44 }
 0x62d   : > { %v3544_v57 = vsub.f32 %v1855_v42, %v1868_v19  ;;  %1881 = vadd.xlane.f32.xlu1 %v1875_v60  ;;  %v2973_v19 = vld [vmem:[%s3692_s9 + $0x70] sm:$0xff]   ;;  %v2975_v60 = vld [vmem:[%s3692_s9 + $0x78] sm:$0xff]  }
 0x62f   : > { %v1876_v33 = vmul.f32 %v3544_v57, %v3544_v57 }
 0x631   : > { %1883 = vadd.xlane.f32.xlu0 %v1876_v33  ;;  %v1941_v33 = vld [vmem:[%s3691_s8] sm:$0x3] }
 0x632   : > { %v1946_v56 = vrot.slane %v1941_v33, %v486_v29  ;;  %v1950_v50 = vrot.slane %v1941_v33, %v490_v31 }
 0x6b6   : > { %v1878_v5 = vpop.xlane.xlu1 %1877 }
 0x6b7   : > { %v1885_v6 = vmul.f32 0.0078125, %v1878_v5 }
 0x6b8   : > { %v1880_v7 = vpop.xlane.xlu0 %1879 }
 0x6b9   : > { %v1889_v8 = vadd.f32 1e-05, %v1885_v6  ;;  %v1886_v9 = vmul.f32 0.0078125, %v1880_v7 }
 0x6ba   : > { %v1882_v10 = vpop.xlane.xlu1 %1881 }
 0x6bb   : > { %3043 = vrsqrt.f32 %v1889_v8  ;;  %v1890_v13 = vadd.f32 1e-05, %v1886_v9  ;;  %v1887_v20 = vmul.f32 0.0078125, %v1882_v10  ;;  %v2525_v10 = vld [vmem:[%s3693_s10] ss:$0 sm:$0xff] }
 0x6bd   : > { %3045 = vrsqrt.f32 %v1890_v13  ;;  %v1891_v30 = vadd.f32 1e-05, %v1887_v20 }
 0x6be   : > { %v1884_v16 = vpop.xlane.xlu0 %1883 }
 0x6bf   : > { %3047 = vrsqrt.f32 %v1891_v30  ;;  %v1888_v21 = vmul.f32 0.0078125, %v1884_v16 }
 0x6c1   : > { %v1892_v24 = vadd.f32 1e-05, %v1888_v21 }
 0x6c3   : > { %3049 = vrsqrt.f32 %v1892_v24 }
 0x6c5   : > { %v3044_v17 = vpop.eup %3043 }
 0x6c6   : > { %v1897_v22 = vmul.f32 %v3044_v17, %v3532_v37 }
 0x6c7   : > { %v3046_v27 = vpop.eup %3045 }
 0x6c8   : > { %v1898_v42 = vmul.f32 %v3046_v27, %v3534_v23  ;;  %v1908_v12 = vmul.f32 %v2507_v25, %v1897_v22 }
 0x6c9   : > { %v3048_v11 = vpop.eup %3047 }
 0x6ca   : > { %v1909_v54 = vmul.f32 %v2507_v25, %v1898_v42  ;;  %v3625_v36 = vadd.f32 %v2508_v40, %v1908_v12  ;;  %v1899_v38 = vmul.f32 %v3048_v11, %v3538_v44  ;;  %v2972_v44 = vld [vmem:[%s3692_s9 + $0x28] sm:$0xff]  }
 0x6cb   : > { %2636 = vmatpush3.bf16.msra.mxu0 %v2972_v44 }
 0x6cc   : > { %v3627_v15 = vadd.f32 %v2508_v40, %v1909_v54  ;;  %v1910_v23 = vmul.f32 %v2507_v25, %v1899_v38  ;;  %2637 = vmatprep.subr.bf16.mxu0 %v2973_v19 }
 0x6cd   : > { %v3050_v39 = vpop.eup %3049 }
 0x6ce   : > { %v1923_v37 = vpack.c.bf16 %v3627_v15, %v3625_v36  ;;  %v1900_v41 = vmul.f32 %v3050_v39, %v3544_v57  ;;  %v3636_v45 = vadd.f32 %v2508_v40, %v1910_v23  ;;  %v2976_v57 = vld [vmem:[%s3692_s9 + $0x38] sm:$0xff]  }
 0x6d0   : > { %2066 = vmatmul.mubr.bf16.vlgmr.msra.gmra.mrb[24].mxu1 %v1923_v37  ;;  %v1911_v43 = vmul.f32 %v2507_v25, %v1900_v41 }
 0x6d1   : > { %2075 = vmatprep.mubr.bf16.mxu1 %v3069_v2  ;;  %v2974_v2 = vld [vmem:[%s3692_s9 + $0x30] sm:$0xff]  }
 0x6d2   : > { %v3634_v14 = vadd.f32 %v2508_v40, %v1911_v43  ;;  %2638 = vmatpush3.bf16.msra.mxu0 %v2974_v2 }
 0x6d3   : > { %2639 = vmatprep.subr.bf16.mxu0 %v2975_v60 }
 0x6d4   : > { %v1924_v32 = vpack.c.bf16 %v3634_v14, %v3636_v45 }
 0x6d6   : > { %2640 = vmatpush3.bf16.msra.mxu0 %v2976_v57 }
 0x6d8   : > { %2076 = vmatmul.mubr.bf16.gmra.mrb[28].mxu1 %v1924_v32 }
 0x7a3   : > { %v2067_v58 = vpop.f32.mrb[24].mxu1 }
 0x7a4   : > { %v2068_v48 = vadd.f32 %v2067_v58, %v1946_v56  ;;  %v2069_v47 = vpop.f32.mrb[25].mxu1 }
 0x7a5   : > { %v2070_v49 = vadd.f32 %v2069_v47, %v1950_v50  ;;  %v2071_v51 = vpop.f32.mrb[26].mxu1 }
 0x7a6   : > { %v2072_v52 = vadd.f32 %v2071_v51, %v1946_v56  ;;  %v2073_v53 = vpop.f32.mrb[27].mxu1  ;;  %v2086_v34 = vmax.f32 %v2068_v48, 0.0 }
 0x7a7   : > { %v2074_v55 = vadd.f32 %v2073_v53, %v1950_v50  ;;  %v2087_v61 = vmax.f32 %v2070_v49, 0.0 }
 0x7a8   : > { %v2088_v59 = vmax.f32 %v2072_v52, 0.0 }
 0x7a9   : > { %v2089_v62 = vmax.f32 %v2074_v55, 0.0 }
 0x7aa   : > { %v2094_v63 = vpack.c.bf16 %v2088_v59, %v2086_v34 }
 0x7ab   : > { %v2095_v0 = vpack.c.bf16 %v2089_v62, %v2087_v61  ;;  %v2077_v1 = vpop.f32.mrb[28].mxu1 }
 0x7ac   : > { %v2078_v3 = vadd.f32 %v2077_v1, %v1946_v56  ;;  %v2079_v29 = vpop.f32.mrb[29].mxu1  ;;  %v2542_v1 = vld [vmem:[%s3694_s11] ss:$0 sm:$0xff] }
 0x7ad   : > { %v2080_v35 = vadd.f32 %v2079_v29, %v1950_v50  ;;  %v2081_v28 = vpop.f32.mrb[30].mxu1  ;;  %2265 = vmatprep.mubr.bf16.mxu0 %v2095_v0 }
 0x7ae   : > { %v2082_v31 = vadd.f32 %v2081_v28, %v1946_v56  ;;  %v2083_v26 = vpop.f32.mrb[31].mxu1  ;;  %2266 = vmatmul.mubr.bf16.vlgmr.msra.gmra.mrb[24].mxu0 %v2094_v63  ;;  %v2090_v46 = vmax.f32 %v2078_v3, 0.0 }
 0x7af   : > { %v2084_v18 = vadd.f32 %v2083_v26, %v1950_v50  ;;  %v2091_v5 = vmax.f32 %v2080_v35, 0.0 }
 0x7b0   : > { %v2092_v4 = vmax.f32 %v2082_v31, 0.0  ;;  %v2543_v31 = vld [vmem:[%s3695_s12] ss:$0 sm:$0xff] }
 0x7b1   : > { %v2093_v6 = vmax.f32 %v2084_v18, 0.0 }
 0x7b2   : > { %v2096_v7 = vpack.c.bf16 %v2092_v4, %v2090_v46 }
 0x7b3   : > { %v2097_v8 = vpack.c.bf16 %v2093_v6, %v2091_v5 }
 0x7b5   : > { %2273 = vmatprep.mubr.bf16.mxu0 %v2097_v8 }
 0x7b6   : > { %2274 = vmatmul.mubr.bf16.gmra.mrb[28].mxu0 %v2096_v7 }
 0x881   : > { %v2641_v9 = vpop.f32.mrb[24].mxu0 }
 0x882   : > { %v2642_v13 = vpop.f32.mrb[25].mxu0 }
 0x883   : > { %v2643_v20 = vadd.f32 %v2642_v13, %v2641_v9  ;;  %v2644_v30 = vpop.f32.mrb[26].mxu0 }
 0x884   : > { %v2645_v16 = vpop.f32.mrb[27].mxu0 }
 0x885   : > { %v2268_v21 = vadd.f32 %v2643_v20, %v2525_v10  ;;  %v2646_v24 = vadd.f32 %v2645_v16, %v2644_v30 }
 0x887   : > { %v2271_v17 = vadd.f32 %v2646_v24, %v2525_v10  ;;  %v2282_v25 = vadd.f32 %v2268_v21, %v3625_v36 }
 0x889   : > { %2286 = vadd.xlane.f32.xlu1 %v2282_v25  ;;  %v2647_v22 = vpop.f32.mrb[28].mxu0  ;;  %v2283_v27 = vadd.f32 %v2271_v17, %v3627_v15 }
 0x88a   : > { %v2648_v42 = vpop.f32.mrb[29].mxu0 }
 0x88b   : > { %v2649_v12 = vadd.f32 %v2648_v42, %v2647_v22  ;;  %2288 = vadd.xlane.f32.xlu0 %v2283_v27  ;;  %v2650_v11 = vpop.f32.mrb[30].mxu0 }
 0x88c   : > { %v2651_v40 = vpop.f32.mrb[31].mxu0 }
 0x88d   : > { %v2276_v54 = vadd.f32 %v2649_v12, %v2525_v10  ;;  %v2652_v38 = vadd.f32 %v2651_v40, %v2650_v11 }
 0x88f   : > { %v2279_v39 = vadd.f32 %v2652_v38, %v2525_v10  ;;  %v2284_v37 = vadd.f32 %v2276_v54, %v3636_v45 }
 0x891   : > { %2290 = vadd.xlane.f32.xlu1 %v2284_v37  ;;  %v2285_v41 = vadd.f32 %v2279_v39, %v3634_v14 }
 0x893   : > { %2292 = vadd.xlane.f32.xlu0 %v2285_v41 }
 0x916   : > { %v2287_v23 = vpop.xlane.xlu1 %2286 }
 0x917   : > { %v2294_v36 = vmul.f32 0.0078125, %v2287_v23 }
 0x918   : > { %v2289_v43 = vpop.xlane.xlu0 %2288 }
 0x919   : > { %v2298_v32 = vsub.f32 %v2282_v25, %v2294_v36  ;;  %v2295_v44 = vmul.f32 0.0078125, %v2289_v43 }
 0x91b   : > { %v2299_v15 = vsub.f32 %v2283_v27, %v2295_v44  ;;  %v2302_v19 = vmul.f32 %v2298_v32, %v2298_v32 }
 0x91d   : > { %2306 = vadd.xlane.f32.xlu1 %v2302_v19  ;;  %v2303_v2 = vmul.f32 %v2299_v15, %v2299_v15 }
 0x91e   : > { %v2291_v60 = vpop.xlane.xlu1 %2290 }
 0x91f   : > { %v2296_v57 = vmul.f32 0.0078125, %v2291_v60  ;;  %2308 = vadd.xlane.f32.xlu0 %v2303_v2 }
 0x920   : > { %v2293_v33 = vpop.xlane.xlu0 %2292 }
 0x921   : > { %v2300_v56 = vsub.f32 %v2284_v37, %v2296_v57  ;;  %v2297_v50 = vmul.f32 0.0078125, %v2293_v33 }
 0x923   : > { %v2301_v45 = vsub.f32 %v2285_v41, %v2297_v50  ;;  %v2304_v58 = vmul.f32 %v2300_v56, %v2300_v56 }
 0x925   : > { %2310 = vadd.xlane.f32.xlu1 %v2304_v58  ;;  %v2305_v14 = vmul.f32 %v2301_v45, %v2301_v45 }
 0x927   : > { %2312 = vadd.xlane.f32.xlu0 %v2305_v14 }
 0x9aa   : > { %v2307_v48 = vpop.xlane.xlu1 %2306 }
 0x9ab   : > { %v2314_v47 = vmul.f32 0.0078125, %v2307_v48 }
 0x9ac   : > { %v2309_v49 = vpop.xlane.xlu0 %2308 }
 0x9ad   : > { %v2318_v51 = vadd.f32 1e-05, %v2314_v47  ;;  %v2315_v52 = vmul.f32 0.0078125, %v2309_v49 }
 0x9af   : > { %3051 = vrsqrt.f32 %v2318_v51  ;;  %v2319_v53 = vadd.f32 1e-05, %v2315_v52 }
 0x9b1   : > { %3053 = vrsqrt.f32 %v2319_v53 }
 0x9b2   : > { %v2311_v55 = vpop.xlane.xlu1 %2310 }
 0x9b3   : > { %v2316_v34 = vmul.f32 0.0078125, %v2311_v55 }
 0x9b4   : > { %v2313_v59 = vpop.xlane.xlu0 %2312 }
 0x9b5   : > { %v2320_v61 = vadd.f32 1e-05, %v2316_v34  ;;  %v2317_v62 = vmul.f32 0.0078125, %v2313_v59 }
 0x9b7   : > { %3055 = vrsqrt.f32 %v2320_v61  ;;  %v2321_v63 = vadd.f32 1e-05, %v2317_v62 }
 0x9b9   : > { %v3052_v0 = vpop.eup %3051  ;;  %3057 = vrsqrt.f32 %v2321_v63 }
 0x9ba   : > { %v2326_v3 = vmul.f32 %v3052_v0, %v2298_v32 }
 0x9bb   : > { %v3054_v29 = vpop.eup %3053 }
 0x9bc   : > { %v2337_v35 = vmul.f32 %v2542_v1, %v2326_v3  ;;  %v2327_v28 = vmul.f32 %v3054_v29, %v2299_v15 }
 0x9be   : > { %v2338_v26 = vmul.f32 %v2542_v1, %v2327_v28  ;;  %v2348_v18 = vadd.f32 %v2543_v31, %v2337_v35 }
 0x9c0   : > { %v2349_v46 = vadd.f32 %v2543_v31, %v2338_v26 }
 0x9c1   : > { %v3056_v4 = vpop.eup %3055 }
 0x9c2   : > { %v2559_v5 = vpack.c.bf16 %v2349_v46, %v2348_v18  ;;  %v2328_v6 = vmul.f32 %v3056_v4, %v2300_v56 }
 0x9c3   : > { %v3058_v7 = vpop.eup %3057 }
 0x9c4   : > { %2560 = vst [vmem:[%s440_s29] sm:$0xff] %v2559_v5   ;;  %v2339_v8 = vmul.f32 %v2542_v1, %v2328_v6  ;;  %v2329_v9 = vmul.f32 %v3058_v7, %v2301_v45 }
 0x9c6   : > { %v2340_v10 = vmul.f32 %v2542_v1, %v2329_v9  ;;  %v2350_v13 = vadd.f32 %v2543_v31, %v2339_v8 }
 0x9c8   : > { %v2351_v20 = vadd.f32 %v2543_v31, %v2340_v10 }
 0x9ca   : > { %v2564_v30 = vpack.c.bf16 %v2351_v20, %v2350_v13 }
 0x9cc   : > { %2566 = vst [vmem:[%s440_s29 + $0x8] sm:$0xff] %v2564_v30  }
 0x9cd PF: > { %s23_s25 = sadd.s32 1, %s3067_s25  }
 0x9ce   : > { %p20_p4 = scmp.ge.s32.totalorder %s23_s25, 4  }
 0x9d0   :  { %22 = sbr.rel (!%p20_p4) target bundleno = 1 (0x1), region = 105 }

// kernel: transformer_pallas.8
= control target key start
LH: loop header
LB: loop body
LE: loop exit
PB: predicated region body
PF: predicated region fallthrough
CT: control target
= control target key end

     0   :  { %s6731_s0 = inlined_call_operand.vmem [shape: bf16[2,32,128], index: 0, kind: input, shape index: {}]   ;;  %s6732_s1 = inlined_call_operand.vmem [shape: bf16[2,32,128], index: 1, kind: input, shape index: {}]   ;;  %s6733_s2 = inlined_call_operand.vmem [shape: bf16[128,384], index: 2, kind: input, shape index: {}]   ;;  %s6734_s3 = inlined_call_operand.vmem [shape: f32[1,384], index: 3, kind: input, shape index: {}]   ;;  %s6735_s4 = inlined_call_operand.vmem [shape: bf16[4,32,128], index: 4, kind: input, shape index: {}]   ;;  %s6736_s5 = inlined_call_operand.vmem [shape: f32[1,128], index: 5, kind: input, shape index: {}]   ;;  %s6737_s6 = inlined_call_operand.vmem [shape: f32[1,128], index: 6, kind: input, shape index: {}]   ;;  %s6738_s7 = inlined_call_operand.vmem [shape: f32[1,128], index: 7, kind: input, shape index: {}]   ;;  %s6739_s8 = inlined_call_operand.vmem [shape: bf16[128,128], index: 8, kind: input, shape index: {}]   ;;  %s6740_s9 = inlined_call_operand.vmem [shape: f32[1,128], index: 9, kind: input, shape index: {}]   ;;  %s6741_s10 = inlined_call_operand.vmem [shape: bf16[128,256], index: 10, kind: input, shape index: {}]   ;;  %s6742_s11 = inlined_call_operand.vmem [shape: f32[1,256], index: 11, kind: input, shape index: {}]   ;;  %s6743_s12 = inlined_call_operand.vmem [shape: bf16[4,32,128], index: 12, kind: input, shape index: {}]   ;;  %s6744_s13 = inlined_call_operand.vmem [shape: f32[1,128], index: 13, kind: input, shape index: {}]   ;;  %s6745_s14 = inlined_call_operand.vmem [shape: f32[1,128], index: 14, kind: input, shape index: {}]   ;;  %s6746_s15 = inlined_call_operand.hbm [shape: f32[1,128], index: 15, kind: input, shape index: {}]   ;;  %s6747_s16 = inlined_call_operand.vmem [shape: bf16[128,256], index: 16, kind: input, shape index: {}]   ;;  %s6748_s17 = inlined_call_operand.vmem [shape: f32[1,256], index: 17, kind: input, shape index: {}]   ;;  %s6749_s18 = inlined_call_operand.vmem [shape: bf16[256,128], index: 18, kind: input, shape index: {}]   ;;  %s6750_s19 = inlined_call_operand.hbm [shape: f32[1,128], index: 19, kind: input, shape index: {}]   ;;  %s6751_s20 = inlined_call_operand.hbm [shape: f32[1,128], index: 20, kind: input, shape index: {}]   ;;  %s6752_s21 = inlined_call_operand.hbm [shape: f32[1,128], index: 21, kind: input, shape index: {}]   ;;  %s6753_s22 = inlined_call_operand.vmem [shape: bf16[2,32,128], index: 22, kind: output, shape index: {}]  }
   0x1   :  { %6759 = sst [smem:[#allocation13_spill]] %s6731_s0 }
   0x2   :  { %6760 = sst [smem:[#allocation14_spill]] %s6732_s1 }
   0x3   :  { %6761 = sst [smem:[#allocation15_spill]] %s6733_s2 }
   0x4   :  { %6762 = sst [smem:[#allocation16_spill]] %s6734_s3 }
   0x5   :  { %6763 = sst [smem:[#allocation17_spill]] %s6735_s4 }
   0x6   :  { %6764 = sst [smem:[#allocation18_spill]] %s6736_s5 }
   0x7   :  { %6765 = sst [smem:[#allocation19_spill]] %s6737_s6 }
   0x8   :  { %6766 = sst [smem:[#allocation20_spill]] %s6748_s17 }
   0x9   :  { %6767 = sst [smem:[#allocation21_spill]] %s6753_s22 }
   0xa   :  { %27 = vsyncpa [#allocation3], 0 }
   0xb   :  { %28 = vsyncpa [#allocation5], 0 }
   0xc   :  { %29 = vsyncpa [#allocation8], 0  ;;  %s5690_s3 = smov 0  }
   0xd LB: > { %6768 = sst [smem:[#allocation12_spill]] %s5565_s3  ;;  %s5696_s28 = sadd.s32 4294967295, %s5565_s3   ;;  %s5565_s3 = sphi %s5690_s3, %s35_s3  }
   0xe   : > { %p4275_p0 = scmp.ge.s32.totalorder %s5565_s3, 1  ;;  %p538_p1 = scmp.lt.s32.totalorder %s5565_s3, 3 }
   0xf   : > { %p6757_p2 = scmp.eq.s32.totalorder %s5696_s28, 0  ;;  %s5567_s29 = smov [#allocation4]  }
  0x10   : > { %s610_s30 = sshll.u32 %s5567_s29, 4  ;;  %p5701_p3 = pnand %p4275_p0, %p538_p1  ;;  %s611_s30 = int_to_ptr.vmem [resolvable:$true] %s610_s30 }
  0x11   : > { %s5568_s0 = smov [#allocation2]   ;;  %s5569_s1 = smov [#allocation6]  }
  0x12   : > { %s6769_s4 = scalar_select %p5701_p3, 1, 0 }
  0x13   : > { %s590_s23 = sshll.u32 %s5568_s0, 4  ;;  %p4938_p4 = pneg %p5701_p3  ;;  %s5713_s23 = int_to_ptr.vmem [resolvable:$true] %s590_s23 }
  0x14   : > { %s621_s5 = sshll.u32 %s5569_s1, 4  ;;  %s5570_s6 = smov [#allocation7]   ;;  %s5715_s5 = int_to_ptr.vmem [resolvable:$true] %s621_s5 }
  0x15   : > { %p5709_p5 = pnand %p6757_p2, %p4938_p4  ;;  %s632_s25 = sshll.u32 %s5570_s6, 4  ;;  %s5717_s25 = int_to_ptr.vmem [resolvable:$true] %s632_s25 }
  0x16   : > { %s5435_s27 = scalar_lea.hbm %s6750_s19, 16 }
  0x17   : > { %p5436_p6 = scmp.ne.s32.totalorder %s6750_s19, %s5435_s27  ;;  %p5727_p7 = pneg %p5709_p5 }
  0x18   : > { %p5442_p10 = scmp.lt.u32.totalorder %s5435_s27, %s6750_s19 }
  0x19   : > { %p5438_p8 = pnand %p5727_p7, %p5436_p6 }
  0x1b   : > { %p5439_p9 = pneg %p5438_p8 }
  0x1d   : > { %p5444_p11 = pnand %p5442_p10, %p5439_p9 }
  0x1f   : > { %5447 = shalt.err (!%p5444_p11)
}
  0x20   : > { %s5448_s26 = scalar_lea.vmem %s611_s30, 16  ;;  %s5455_s2 = scalar_lea.vmem %s611_s30, 32 }
  0x21   : > { %p5449_p12 = scmp.ne.s32.totalorder %s611_s30, %s5448_s26  ;;  %p5456_p1 = scmp.lt.s32.totalorder %s611_s30, %s611_s30 }
  0x22   : > { %p5457_p4 = scmp.lt.s32.totalorder %s5455_s2, %s5448_s26 }
  0x23   : > { %p5451_p13 = pnand %p5449_p12, %p5727_p7 }
  0x24   : > { %p5458_p2 = por %p5457_p4, %p5456_p1 }
  0x25   : > { %p5452_p0 = pneg %p5451_p13 }
  0x27   : > { %p5459_p3 = pnand %p5458_p2, %p5452_p0 }
  0x29   : > { %5462 = shalt.err (!%p5459_p3)
}
  0x2a   : > { %4944 = dma.hbm_to_vmem [thread:$0]  (!%p5709_p5), %s6750_s19, 16, %s611_s30, [#allocation5]  }
  0x2b   : > { %s5463_s6 = scalar_lea.hbm %s6746_s15, 16 }
  0x2c   : > { %p5464_p6 = scmp.ne.s32.totalorder %s6746_s15, %s5463_s6  ;;  %p5470_p2 = scmp.lt.u32.totalorder %s5463_s6, %s6746_s15 }
  0x2e   : > { %p5466_p8 = pnand %p5464_p6, %p5727_p7 }
  0x30   : > { %p5467_p9 = pneg %p5466_p8 }
  0x32   : > { %p5472_p3 = pnand %p5470_p2, %p5467_p9 }
  0x34   : > { %5475 = shalt.err (!%p5472_p3)
}
  0x35   : > { %s5476_s30 = scalar_lea.vmem %s5713_s23, 16  ;;  %s5483_s17 = scalar_lea.vmem %s5713_s23, 32 }
  0x36   : > { %p5477_p10 = scmp.ne.s32.totalorder %s5713_s23, %s5476_s30  ;;  %p5484_p13 = scmp.lt.s32.totalorder %s5713_s23, %s5713_s23 }
  0x37   : > { %p5485_p0 = scmp.lt.s32.totalorder %s5483_s17, %s5476_s30 }
  0x38   : > { %p5479_p11 = pnand %p5477_p10, %p5727_p7 }
  0x39   : > { %p5486_p1 = por %p5485_p0, %p5484_p13 }
  0x3a   : > { %p5480_p12 = pneg %p5479_p11 }
  0x3c   : > { %p5487_p4 = pnand %p5486_p1, %p5480_p12 }
  0x3e   : > { %5490 = shalt.err (!%p5487_p4)
}
  0x3f   : > { %4941 = dma.hbm_to_vmem [thread:$0]  (!%p5709_p5), %s6746_s15, 16, %s5713_s23, [#allocation3]  }
  0x40   : > { %s5491_s27 = scalar_lea.hbm %s6751_s20, 16 }
  0x41   : > { %p5492_p6 = scmp.ne.s32.totalorder %s6751_s20, %s5491_s27  ;;  %p5498_p2 = scmp.lt.u32.totalorder %s5491_s27, %s6751_s20 }
  0x43   : > { %p5494_p8 = pnand %p5492_p6, %p5727_p7 }
  0x45   : > { %p5495_p9 = pneg %p5494_p8 }
  0x47   : > { %p5500_p3 = pnand %p5498_p2, %p5495_p9 }
  0x49   : > { %5503 = shalt.err (!%p5500_p3)
}
  0x4a   : > { %s5504_s23 = scalar_lea.vmem %s5715_s5, 16  ;;  %s5511_s17 = scalar_lea.vmem %s5715_s5, 32 }
  0x4b   : > { %p5505_p10 = scmp.ne.s32.totalorder %s5715_s5, %s5504_s23  ;;  %p5512_p13 = scmp.lt.s32.totalorder %s5715_s5, %s5715_s5 }
  0x4c   : > { %p5513_p0 = scmp.lt.s32.totalorder %s5511_s17, %s5504_s23 }
  0x4d   : > { %p5507_p11 = pnand %p5505_p10, %p5727_p7 }
  0x4e   : > { %p5514_p1 = por %p5513_p0, %p5512_p13 }
  0x4f   : > { %p5508_p12 = pneg %p5507_p11 }
  0x51   : > { %p5515_p4 = pnand %p5514_p1, %p5508_p12 }
  0x53   : > { %5518 = shalt.err (!%p5515_p4)
}
  0x54   : > { %4947 = dma.hbm_to_vmem [thread:$0]  (!%p5709_p5), %s6751_s20, 16, %s5715_s5, [#allocation5]  }
  0x55   : > { %s5519_s27 = scalar_lea.hbm %s6752_s21, 16 }
  0x56   : > { %p5520_p6 = scmp.ne.s32.totalorder %s6752_s21, %s5519_s27  ;;  %p5526_p2 = scmp.lt.u32.totalorder %s5519_s27, %s6752_s21 }
  0x58   : > { %p5522_p8 = pnand %p5520_p6, %p5727_p7 }
  0x5a   : > { %p5523_p9 = pneg %p5522_p8 }
  0x5c   : > { %p5528_p3 = pnand %p5526_p2, %p5523_p9 }
  0x5e   : > { %5531 = shalt.err (!%p5528_p3)
}
  0x5f   : > { %s5532_s5 = scalar_lea.vmem %s5717_s25, 16  ;;  %s5539_s23 = scalar_lea.vmem %s5717_s25, 32 }
  0x60   : > { %p5533_p10 = scmp.ne.s32.totalorder %s5717_s25, %s5532_s5  ;;  %p5540_p13 = scmp.lt.s32.totalorder %s5717_s25, %s5717_s25 }
  0x61   : > { %p5541_p0 = scmp.lt.s32.totalorder %s5539_s23, %s5532_s5 }
  0x62   : > { %p5535_p11 = pnand %p5533_p10, %p5727_p7 }
  0x63   : > { %p5542_p1 = por %p5541_p0, %p5540_p13 }
  0x64   : > { %p5536_p12 = pneg %p5535_p11 }
  0x66   : > { %p5543_p4 = pnand %p5542_p1, %p5536_p12 }
  0x68   : > { %5546 = shalt.err (!%p5543_p4)
}
  0x69   : > { %4950 = dma.hbm_to_vmem [thread:$0]  (!%p5709_p5), %s6752_s21, 16, %s5717_s25, [#allocation8]  }
  0x6a   : > { %p6772_p6 = scmp.ne.s32.totalorder %s6769_s4, 0 }
  0x6b   : > { %p6773_p7 = scmp.eq.s32.totalorder (!%p6772_p6), %s5696_s28, 0 }
  0x6c   : > { %661 = sbr.rel (%p6772_p6) target bundleno = 4337 (0x10f1), region = 108 }
  0x73   : > { %5552 = dma.done.wait (%p6773_p7), [#allocation3], 16   ;;  %p6774_p8 = pmov %p6773_p7 }
  0x74   : > { %p6775_p9 = pmov %p6773_p7 }
  0x75   : > { %5554 = vsyncadd (%p6774_p8), [#allocation3], 4294967280 }
  0x76   : > { %5556 = dma.done.wait (%p6775_p9), [#allocation5], 32   ;;  %p6776_p2 = pmov %p6773_p7 }
  0x78   : > { %5558 = vsyncadd (%p6776_p2), [#allocation5], 4294967264  ;;  %p6777_p3 = pmov %p6776_p2 }
  0x79   : > { %p6778_p5 = pmov %p6776_p2 }
  0x7a   : > { %5560 = dma.done.wait (%p6777_p3), [#allocation8], 16  }
  0x7b   : > { %5562 = vsyncadd (%p6778_p5), [#allocation8], 4294967280  ;;  %v5571_v0 = vmov 0   ;;  %p740_p10 = scmp.lt.s32.totalorder %s5696_s28, 1  ;;  %s6779_s25 = sld [smem:[#allocation15_spill]]  ;;  %v802_v27 = vlaneseq  ;;  %vm1203_vm0 = vcmask 261120  }
  0x7c   : > { %989 = vmatprep.mubr.bf16.mxu0 %v5571_v0  ;;  %s6780_s4 = sld [smem:[#allocation13_spill]]  ;;  %s6781_s23 = sld [smem:[#allocation16_spill]] }
  0x7d   : > { %s6790_s28 = smov (!%p740_p10, %s5696_s28), 1  ;;  %v5915_v28 = vshrl.u32 %v802_v27, 7  ;;  %s5572_s17 = smov 64  }
  0x7e   : > { %s5847_s30 = sshll.u32 %s6790_s28, 4  ;;  %s5573_s22 = smov 96  }
  0x7f   : > { %v5918_v29 = vsub.s32 0, %v5915_v28  ;;  %v5926_v31 = vsub.s32 1, %v5915_v28  ;;  %s6782_s0 = sld [smem:[#allocation17_spill]]  ;;  %s6783_s5 = sld [smem:[#allocation18_spill]] }
  0x80   : > { %s6787_s26 = sld [smem:[#allocation21_spill]] }
  0x81   : > { %v5155_v1 = vld [vmem:[%s6779_s25 + $0x4] ss:$12 sps:$4 sm:$0xff]   ;;  %v5157_v2 = vld [vmem:[%s6779_s25] ss:$12 sps:$4 sm:$0xff]   ;;  %v5158_v3 = vld [vmem:[%s6779_s25 + $0x1c] ss:$12 sps:$4 sm:$0xff]  }
  0x82   : > { %957 = vmatprep.subr.bf16.mxu0 %v5155_v1  ;;  %v5160_v4 = vld [vmem:[%s6779_s25 + $0x18] ss:$12 sps:$4 sm:$0xff]   ;;  %v5161_v5 = vld [vmem:[%s6779_s25 + $0x34] ss:$12 sps:$4 sm:$0xff]   ;;  %v5163_v6 = vld [vmem:[%s6779_s25 + $0x30] ss:$12 sps:$4 sm:$0xff]   ;;  %s5856_s24 = scalar_lea.vmem %s6780_s4, %s5847_s30 }
  0x83   : > { %958 = vmatpush1.bf16.msra.mxu0 %v5157_v2  ;;  %v5164_v7 = vld [vmem:[%s6779_s25 + $0x4c] ss:$12 sps:$4 sm:$0xff]   ;;  %v5166_v8 = vld [vmem:[%s6779_s25 + $0x48] ss:$12 sps:$4 sm:$0xff]   ;;  %v756_v9 = vld [vmem:[%s5856_s24] sm:$0xff]   ;;  %s5574_s4 = smov 32  }
  0x84   : > { %959 = vmatprep.subr.bf16.mxu0 %v5158_v3  ;;  %v5167_v10 = vld [vmem:[%s6779_s25 + $0x64] ss:$12 sps:$4 sm:$0xff]   ;;  %v5181_v11 = vld [vmem:[%s6779_s25 + $0x8] ss:$12 sps:$4 sm:$0xff]   ;;  %v5182_v12 = vld [vmem:[%s6779_s25 + $0x20] ss:$12 sps:$4 sm:$0xff]   ;;  %4658 = vmatprep.mubr.bf16.mxu1 %v756_v9 }
  0x85   : > { %v5169_v13 = vld [vmem:[%s6779_s25 + $0x60] ss:$12 sps:$4 sm:$0xff]   ;;  %4642 = vmatprep.subr.bf16.mxu1 %v5181_v11  ;;  %v5170_v14 = vld [vmem:[%s6779_s25 + $0x7c] ss:$12 sps:$4 sm:$0xff]   ;;  %v5183_v15 = vld [vmem:[%s6779_s25 + $0x38] ss:$12 sps:$4 sm:$0xff]  }
  0x86   : > { %4643 = vmatpush3.bf16.msra.mxu1 %v5181_v11  ;;  %v5172_v16 = vld [vmem:[%s6779_s25 + $0x78] ss:$12 sps:$4 sm:$0xff]   ;;  %v5173_v17 = vld [vmem:[%s6779_s25 + $0x94] ss:$12 sps:$4 sm:$0xff]   ;;  %v5184_v18 = vld [vmem:[%s6779_s25 + $0x50] ss:$12 sps:$4 sm:$0xff]   ;;  %s754_s2 = scalar_lea.vmem %s6787_s26, %s5847_s30 }
  0x87   : > { %960 = vmatpush1.bf16.msra.mxu0 %v5160_v4  ;;  %4644 = vmatprep.subr.bf16.mxu1 %v5182_v12  ;;  %v5175_v19 = vld [vmem:[%s6779_s25 + $0x90] ss:$12 sps:$4 sm:$0xff]   ;;  %v5176_v20 = vld [vmem:[%s6779_s25 + $0xac] ss:$12 sps:$4 sm:$0xff]   ;;  %v5185_v21 = vld [vmem:[%s6779_s25 + $0x68] ss:$12 sps:$4 sm:$0xff]  }
  0x88   : > { %961 = vmatprep.subr.bf16.mxu0 %v5161_v5  ;;  %v5178_v22 = vld [vmem:[%s6779_s25 + $0xa8] ss:$12 sps:$4 sm:$0xff]   ;;  %v5186_v23 = vld [vmem:[%s6779_s25 + $0x80] ss:$12 sps:$4 sm:$0xff]   ;;  %v5187_v24 = vld [vmem:[%s6779_s25 + $0x98] ss:$12 sps:$4 sm:$0xff]  }
  0x89   : > { %v758_v25 = vld [vmem:[%s5856_s24 + $0x8] sm:$0xff]   ;;  %v5188_v26 = vld [vmem:[%s6779_s25 + $0xb0] ss:$12 sps:$4 sm:$0xff]   ;;  %v5923_v30 = vld [vmem:[%s6781_s23] sm:$0x7]  ;;  %v812_v3 = vsub.s32 2, %v5915_v28 }
  0x8a   : > { %4645 = vmatpush3.bf16.msra.mxu1 %v5182_v12  ;;  %v805_v32 = vrot.slane %v5923_v30, %v5918_v29  ;;  %v809_v34 = vrot.slane %v5923_v30, %v5926_v31  ;;  %s6784_s23 = sld [smem:[#allocation14_spill]] }
  0x8b   : > { %962 = vmatpush1.bf16.msra.mxu0 %v5163_v6  ;;  %4646 = vmatprep.subr.bf16.mxu1 %v5183_v15  ;;  %v813_v11 = vrot.slane %v5923_v30, %v812_v3 }
  0x8c   : > { %963 = vmatprep.subr.bf16.mxu0 %v5164_v7 }
  0x8e   : > { %4647 = vmatpush3.bf16.msra.mxu1 %v5183_v15 }
  0x8f   : > { %964 = vmatpush1.bf16.msra.mxu0 %v5166_v8  ;;  %4648 = vmatprep.subr.bf16.mxu1 %v5184_v18 }
  0x90   : > { %965 = vmatprep.subr.bf16.mxu0 %v5167_v10  ;;  %s749_s1 = scalar_lea.vmem %s6784_s23, %s5847_s30 }
  0x92   : > { %4649 = vmatpush3.bf16.msra.mxu1 %v5184_v18 }
  0x93   : > { %966 = vmatpush1.bf16.msra.mxu0 %v5169_v13  ;;  %4650 = vmatprep.subr.bf16.mxu1 %v5185_v21 }
  0x94   : > { %967 = vmatprep.subr.bf16.mxu0 %v5170_v14 }
  0x96   : > { %4651 = vmatpush3.bf16.msra.mxu1 %v5185_v21 }
  0x97   : > { %968 = vmatpush1.bf16.msra.mxu0 %v5172_v16  ;;  %4652 = vmatprep.subr.bf16.mxu1 %v5186_v23 }
  0x98   : > { %969 = vmatprep.subr.bf16.mxu0 %v5173_v17 }
  0x9a   : > { %4653 = vmatpush3.bf16.msra.mxu1 %v5186_v23 }
  0x9b   : > { %970 = vmatpush1.bf16.msra.mxu0 %v5175_v19  ;;  %4654 = vmatprep.subr.bf16.mxu1 %v5187_v24 }
  0x9c   : > { %971 = vmatprep.subr.bf16.mxu0 %v5176_v20 }
  0x9e   : > { %4655 = vmatpush3.bf16.msra.mxu1 %v5187_v24 }
  0x9f   : > { %972 = vmatpush1.bf16.msra.mxu0 %v5178_v22  ;;  %4656 = vmatprep.subr.bf16.mxu1 %v5188_v26 }
  0xa2   : > { %990 = vmatmul.mubr.bf16.vlgmr.msra.gmra.mrb[0].mxu0 %v756_v9  ;;  %4657 = vmatpush3.bf16.msra.mxu1 %v5188_v26 }
  0xa3   : > { %999 = vmatprep.mubr.bf16.mxu0 %v5571_v0 }
  0xa5   : > { %4659 = vmatmul.mubr.bf16.vlgmr.msra.gmra.mrb[0].mxu1 %v758_v25 }
  0xaa   : > { %1000 = vmatmul.mubr.bf16.gmra.mrb[4].mxu0 %v758_v25 }
 0x175   : > { %v991_v33 = vpop.f32.mrb[0].mxu0 }
 0x176   : > { %v993_v35 = vpop.f32.mrb[1].mxu0  ;;  %v992_v37 = vadd.f32 %v991_v33, %v805_v32 }
 0x177   : > { %v995_v36 = vpop.f32.mrb[2].mxu0  ;;  %v994_v40 = vadd.f32 %v993_v35, %v809_v34 }
 0x178   : > { %v996_v38 = vadd.f32 %v995_v36, %v805_v32  ;;  %v997_v39 = vpop.f32.mrb[3].mxu0  ;;  %v4660_v60 = vpop.f32.mrb[0].mxu1 }
 0x179   : > { %v998_v41 = vadd.f32 %v997_v39, %v809_v34  ;;  %v1044_v61 = vpop.f32.mrb[1].mxu1 }
 0x17a   : > { %v1099_v42 = vpack.c.bf16 %v996_v38, %v992_v37  ;;  %v4990_v43 = vpack.i.bf16 %v996_v38, %v992_v37  ;;  %v4661_v62 = vpop.f32.mrb[2].mxu1  ;;  %v5956_v18 = vadd.f32 %v1044_v61, %v813_v11 }
 0x17b   : > { %v4985_v44 = vpack.i.bf16 %v998_v41, %v994_v40  ;;  %v1147_v45 = vpack.c.bf16 %v998_v41, %v994_v40  ;;  %v1047_v63 = vpop.f32.mrb[3].mxu1 }
 0x17c   : > { %4666 = vmatprep.mubr.msk.bf16.mxu1 %vm1203_vm0, %v1099_v42  ;;  %v5958_v19 = vadd.f32 %v1047_v63, %v813_v11 }
 0x17d   : > { %v1001_v46 = vpop.f32.mrb[4].mxu0  ;;  %4986 = vrot.lane.b32.xlu1 %v4985_v44, %s5572_s17  ;;  %4976 = vrot.lane.b32.xlu0 %v4985_v44, %s5573_s22  ;;  %v1211_v47 = vsel %vm1203_vm0, %v1147_v45, 0 }
 0x17e   : > { %4906 = vmatprep.subr.msk.bf16.mxu1 %vm1203_vm0, %v1147_v45  ;;  %v1003_v48 = vpop.f32.mrb[5].mxu0  ;;  %v1002_v50 = vadd.f32 %v1001_v46, %v805_v32  ;;  %v1195_v28 = vpack.c.bf16 %v5958_v19, %v5956_v18 }
 0x17f   : > { %4663 = vmatpush3.bf16.xpose.msra.mxu1 %v1211_v47  ;;  %v1005_v49 = vpop.f32.mrb[6].mxu0  ;;  %v1004_v53 = vadd.f32 %v1003_v48, %v809_v34  ;;  %v5968_v47 = vadd.f32 %v4660_v60, %v813_v11  ;;  %v5970_v48 = vadd.f32 %v4661_v62, %v813_v11 }
 0x180   : > { %v1006_v51 = vadd.f32 %v1005_v49, %v805_v32  ;;  %v1007_v52 = vpop.f32.mrb[7].mxu0 }
 0x181   : > { %v1008_v54 = vadd.f32 %v1007_v52, %v809_v34  ;;  %4991 = vrot.lane.b32.xlu1 %v4990_v43, %s5573_s22 }
 0x182   : > { %v1100_v55 = vpack.c.bf16 %v1006_v51, %v1002_v50  ;;  %v4995_v56 = vpack.i.bf16 %v1006_v51, %v1002_v50 }
 0x183   : > { %v4980_v57 = vpack.i.bf16 %v1008_v54, %v1004_v53  ;;  %v1148_v58 = vpack.c.bf16 %v1008_v54, %v1004_v53 }
 0x185   : > { %4981 = vrot.lane.b32.xlu0 %v4980_v57, %s5573_s22  ;;  %4907 = vmatprep.subr.msk.bf16.mxu1 %vm1203_vm0, %v1148_v58  ;;  %v1214_v59 = vsel %vm1203_vm0, %v1148_v58, 0 }
 0x186   : > { %5001 = vrot.lane.b32.xlu1 %v4980_v57, %s5572_s17 }
 0x187   : > { %4665 = vmatpush3.bf16.xpose.msra.mxu1 %v1214_v59 }
 0x189   : > { %4996 = vrot.lane.b32.xlu0 %v4995_v56, %s5573_s22 }
 0x18a   : > { %5011 = vrot.lane.b32.xlu1 %v4990_v43, %s5572_s17 }
 0x18d   : > { %5006 = vrot.lane.b32.xlu0 %v4985_v44, %s5574_s4 }
 0x18e   : > { %5021 = vrot.lane.b32.xlu1 %v4980_v57, %s5574_s4  ;;  %4667 = vmatmul.mubr.msk.bf16.vlgmr.msra.gmra.mrb[4].mxu1 %vm1203_vm0, %v1100_v55  ;;  %v1196_v55 = vpack.c.bf16 %v5970_v48, %v5968_v47 }
 0x191   : > { %5016 = vrot.lane.b32.xlu0 %v4995_v56, %s5572_s17 }
 0x192   : > { %5031 = vrot.lane.b32.xlu1 %v4995_v56, %s5574_s4 }
 0x195   : > { %5026 = vrot.lane.b32.xlu0 %v4990_v43, %s5574_s4 }
 0x1ef   : > { %v4987_v1 = vpop.permute.xlu1 %4986  ;;  %v4977_v2 = vpop.permute.xlu0 %4976 }
 0x1f0   : > { %v4989_v4 = vunpack.i.h.bf16 %v4987_v1  ;;  %v4988_v5 = vunpack.i.l.bf16 %v4987_v1  ;;  %v4979_v6 = vunpack.i.h.bf16 %v4977_v2  ;;  %v4978_v7 = vunpack.i.l.bf16 %v4977_v2 }
 0x1f2   : > { %v1151_v8 = vpack.c.bf16 %v4989_v4, %v4988_v5  ;;  %v1149_v9 = vpack.c.bf16 %v4979_v6, %v4978_v7 }
 0x1f3   : > { %v4992_v10 = vpop.permute.xlu1 %4991 }
 0x1f4   : > { %v4994_v12 = vunpack.i.h.bf16 %v4992_v10  ;;  %v4993_v13 = vunpack.i.l.bf16 %v4992_v10  ;;  %4908 = vmatprep.subr.msk.bf16.mxu1 %vm1203_vm0, %v1149_v9  ;;  %4910 = vmatprep.subr.msk.bf16.mxu0 %vm1203_vm0, %v1151_v8  ;;  %v1272_v14 = vsel %vm1203_vm0, %v1149_v9, 0  ;;  %v1333_v15 = vsel %vm1203_vm0, %v1151_v8, 0 }
 0x1f5   : > { %4671 = vmatpush3.bf16.xpose.msra.mxu1 %v1272_v14  ;;  %4679 = vmatpush3.bf16.xpose.msra.mxu0 %v1333_v15 }
 0x1f6   : > { %v1101_v16 = vpack.c.bf16 %v4994_v12, %v4993_v13 }
 0x1f7   : > { %v4982_v17 = vpop.permute.xlu0 %4981 }
 0x1f8   : > { %v4984_v20 = vunpack.i.h.bf16 %v4982_v17  ;;  %v4983_v21 = vunpack.i.l.bf16 %v4982_v17  ;;  %v5002_v22 = vpop.permute.xlu1 %5001  ;;  %4674 = vmatprep.mubr.msk.bf16.mxu1 %vm1203_vm0, %v1101_v16 }
 0x1f9   : > { %v5004_v23 = vunpack.i.h.bf16 %v5002_v22  ;;  %v5003_v24 = vunpack.i.l.bf16 %v5002_v22 }
 0x1fa   : > { %v1150_v25 = vpack.c.bf16 %v4984_v20, %v4983_v21 }
 0x1fb   : > { %v1152_v26 = vpack.c.bf16 %v5004_v23, %v5003_v24  ;;  %v4997_v27 = vpop.permute.xlu0 %4996 }
 0x1fc   : > { %v5012_v30 = vpop.permute.xlu1 %5011  ;;  %4909 = vmatprep.subr.msk.bf16.mxu1 %vm1203_vm0, %v1150_v25  ;;  %v1275_v32 = vsel %vm1203_vm0, %v1150_v25, 0  ;;  %v4999_v36 = vunpack.i.h.bf16 %v4997_v27  ;;  %v4998_v37 = vunpack.i.l.bf16 %v4997_v27 }
 0x1fd   : > { %v5014_v33 = vunpack.i.h.bf16 %v5012_v30  ;;  %v5013_v34 = vunpack.i.l.bf16 %v5012_v30  ;;  %4911 = vmatprep.subr.msk.bf16.mxu0 %vm1203_vm0, %v1152_v26  ;;  %4673 = vmatpush3.bf16.xpose.msra.mxu1 %v1275_v32  ;;  %v1336_v35 = vsel %vm1203_vm0, %v1152_v26, 0 }
 0x1fe   : > { %4681 = vmatpush3.bf16.xpose.msra.mxu0 %v1336_v35  ;;  %v1102_v45 = vpack.c.bf16 %v4999_v36, %v4998_v37  ;;  %v6036_v35 = vpack.i.bf16 %v5958_v19, %v5956_v18  ;;  %v6042_v37 = vpack.i.bf16 %v5970_v48, %v5968_v47 }
 0x1ff   : > { %v1103_v38 = vpack.c.bf16 %v5014_v33, %v5013_v34  ;;  %v5007_v39 = vpop.permute.xlu0 %5006  ;;  %4694 = vmatprep.subr.bf16.mxu0 %v1195_v28 }
 0x200   : > { %v5009_v40 = vunpack.i.h.bf16 %v5007_v39  ;;  %v5008_v41 = vunpack.i.l.bf16 %v5007_v39  ;;  %v5022_v42 = vpop.permute.xlu1 %5021 }
 0x201   : > { %v5024_v43 = vunpack.i.h.bf16 %v5022_v42  ;;  %v5023_v44 = vunpack.i.l.bf16 %v5022_v42  ;;  %4682 = vmatprep.mubr.msk.bf16.mxu0 %vm1203_vm0, %v1103_v38 }
 0x202   : > { %v1153_v46 = vpack.c.bf16 %v5009_v40, %v5008_v41 }
 0x203   : > { %v5017_v49 = vpop.permute.xlu0 %5016  ;;  %v1154_v50 = vpack.c.bf16 %v5024_v43, %v5023_v44 }
 0x204   : > { %v5019_v51 = vunpack.i.h.bf16 %v5017_v49  ;;  %v5018_v52 = vunpack.i.l.bf16 %v5017_v49  ;;  %4675 = vmatmul.mubr.msk.bf16.vlgmr.msra.gmra.mrb[8].mxu1 %vm1203_vm0, %v1102_v45  ;;  %4912 = vmatprep.subr.msk.bf16.mxu1 %vm1203_vm0, %v1153_v46  ;;  %v1394_v53 = vsel %vm1203_vm0, %v1153_v46, 0  ;;  %v5032_v60 = vpop.permute.xlu1 %5031 }
 0x205   : > { %4687 = vmatpush3.bf16.xpose.msra.mxu1 %v1394_v53  ;;  %v1397_v61 = vsel %vm1203_vm0, %v1154_v50, 0  ;;  %v5034_v62 = vunpack.i.h.bf16 %v5032_v60  ;;  %v5033_v63 = vunpack.i.l.bf16 %v5032_v60 }
 0x206   : > { %v1104_v54 = vpack.c.bf16 %v5019_v51, %v5018_v52  ;;  %4913 = vmatprep.subr.msk.bf16.mxu1 %vm1203_vm0, %v1154_v50 }
 0x207   : > { %v5027_v56 = vpop.permute.xlu0 %5026  ;;  %v1106_v1 = vpack.c.bf16 %v5034_v62, %v5033_v63 }
 0x208   : > { %v5029_v57 = vunpack.i.h.bf16 %v5027_v56  ;;  %v5028_v58 = vunpack.i.l.bf16 %v5027_v56  ;;  %4683 = vmatmul.mubr.msk.bf16.vlgmr.msra.gmra.mrb[8].mxu0 %vm1203_vm0, %v1104_v54 }
 0x209   : > { %4695 = vmatpush3.bf16.msra.mxu0 %v1195_v28 }
 0x20a   : > { %v1105_v59 = vpack.c.bf16 %v5029_v57, %v5028_v58  ;;  %4696 = vmatprep.subr.bf16.mxu0 %v1196_v55 }
 0x20c   : > { %4690 = vmatprep.mubr.msk.bf16.mxu1 %vm1203_vm0, %v1105_v59 }
 0x20d   : > { %4689 = vmatpush3.bf16.xpose.msra.mxu1 %v1397_v61  ;;  %4697 = vmatpush3.bf16.msra.mxu0 %v1196_v55 }
 0x214   : > { %4691 = vmatmul.mubr.msk.bf16.vlgmr.msra.gmra.mrb[12].mxu1 %vm1203_vm0, %v1106_v1 }
 0x261   : > { %v5982_v2 = vpop.f32.mrb[4].mxu1 }
 0x262   : > { %v5984_v3 = vpop.f32.mrb[5].mxu1  ;;  %v1454_v4 = vsel %vm1203_vm0, %v5982_v2, -inf }
 0x263   : > { %1455 = vmax.xlane.f32.xlu0 %v1454_v4  ;;  %v4669_v5 = vpop.f32.mrb[6].mxu1  ;;  %v1448_v8 = vsel %vm1203_vm0, %v5984_v3, -inf }
 0x264   : > { %v1253_v6 = vpop.f32.mrb[7].mxu1  ;;  %v1457_v9 = vsel %vm1203_vm0, %v4669_v5, -inf }
 0x265   : > { %v1451_v7 = vsel %vm1203_vm0, %v1253_v6, -inf }
 0x266   : > { %1452 = vmax.xlane.f32.xlu1 %v1451_v7 }
 0x267   : > { %1449 = vmax.xlane.f32.xlu0 %v1448_v8 }
 0x26b   : > { %1458 = vmax.xlane.f32.xlu0 %v1457_v9 }
 0x2d7   : > { %v5992_v10 = vpop.f32.mrb[8].mxu1 }
 0x2d8   : > { %v5994_v11 = vpop.f32.mrb[9].mxu1  ;;  %v1466_v12 = vsel %vm1203_vm0, %v5992_v10, -inf }
 0x2d9   : > { %1467 = vmax.xlane.f32.xlu1 %v1466_v12  ;;  %v5998_v13 = vpop.f32.mrb[10].mxu1  ;;  %v1460_v24 = vsel %vm1203_vm0, %v5994_v11, -inf }
 0x2da   : > { %v6000_v14 = vpop.f32.mrb[11].mxu1  ;;  %v1469_v15 = vsel %vm1203_vm0, %v5998_v13, -inf }
 0x2db   : > { %v6004_v16 = vpop.f32.mrb[8].mxu0  ;;  %1470 = vmax.xlane.f32.xlu0 %v1469_v15  ;;  %v1463_v25 = vsel %vm1203_vm0, %v6000_v14, -inf }
 0x2dc   : > { %v6006_v17 = vpop.f32.mrb[9].mxu0  ;;  %v1478_v20 = vsel %vm1203_vm0, %v6004_v16, -inf }
 0x2dd   : > { %v6010_v21 = vpop.f32.mrb[10].mxu0  ;;  %1479 = vmax.xlane.f32.xlu1 %v1478_v20  ;;  %v1472_v18 = vsel %vm1203_vm0, %v6006_v17, -inf }
 0x2de   : > { %v6012_v22 = vpop.f32.mrb[11].mxu0  ;;  %v1481_v23 = vsel %vm1203_vm0, %v6010_v21, -inf }
 0x2df   : > { %1482 = vmax.xlane.f32.xlu0 %v1481_v23  ;;  %v1475_v26 = vsel %vm1203_vm0, %v6012_v22, -inf }
 0x2e1   : > { %1461 = vmax.xlane.f32.xlu1 %v1460_v24 }
 0x2e3   : > { %1464 = vmax.xlane.f32.xlu0 %v1463_v25 }
 0x2e7   : > { %1476 = vmax.xlane.f32.xlu0 %v1475_v26  ;;  %v6022_v27 = vpop.f32.mrb[12].mxu1 }
 0x2e8   : > { %v6024_v28 = vpop.f32.mrb[13].mxu1  ;;  %v1490_v44 = vsel %vm1203_vm0, %v6022_v27, -inf }
 0x2e9   : > { %v6026_v30 = vpop.f32.mrb[14].mxu1  ;;  %v1484_v45 = vsel %vm1203_vm0, %v6024_v28, -inf }
 0x2ea   : > { %v6028_v32 = vpop.f32.mrb[15].mxu1  ;;  %v1493_v33 = vsel %vm1203_vm0, %v6026_v30, -inf }
 0x2eb   : > { %1494 = vmax.xlane.f32.xlu0 %v1493_v33  ;;  %v1487_v34 = vsel %vm1203_vm0, %v6028_v32, -inf }
 0x2ef   : > { %1488 = vmax.xlane.f32.xlu0 %v1487_v34 }
 0x2f0   : > { %v1456_v36 = vpop.xlane.xlu0 %1455 }
 0x2f1   : > { %v1498_v50 = vsub.f32 %v5982_v2, %v1456_v36 }
 0x2f2   : > { %5036 = vrot.lane.b32.xlu1 %v6036_v35, %s5573_s22 }
 0x2f3   : > { %v1453_v41 = vpop.xlane.xlu1 %1452  ;;  %v1516_v51 = vmul.f32 1.442695, %v1498_v50 }
 0x2f4   : > { %v1450_v38 = vpop.xlane.xlu0 %1449  ;;  %v1497_v42 = vsub.f32 %v1253_v6, %v1453_v41 }
 0x2f5   : > { %v1496_v52 = vsub.f32 %v5984_v3, %v1450_v38 }
 0x2f6   : > { %v1514_v19 = vmul.f32 1.442695, %v1497_v42 }
 0x2f7   : > { %v1512_v53 = vmul.f32 1.442695, %v1496_v52 }
 0x2f8   : > { %v1459_v39 = vpop.xlane.xlu0 %1458 }
 0x2f9   : > { %v1499_v40 = vsub.f32 %v4669_v5, %v1459_v39 }
 0x2fb   : > { %v1518_v43 = vmul.f32 1.442695, %v1499_v40 }
 0x2fd   : > { %5281 = vpow2.f32 %v1518_v43 }
 0x2fe   : > { %5283 = vpow2.f32 %v1514_v19 }
 0x2ff   : > { %5285 = vpow2.f32 %v1516_v51 }
 0x300   : > { %5287 = vpow2.f32 %v1512_v53 }
 0x305   : > { %5041 = vrot.lane.b32.xlu0 %v6042_v37, %s5573_s22 }
 0x307   : > { %v6052_v46 = vpop.eup %5281 }
 0x308   : > { %v1553_v47 = vsel %vm1203_vm0, %v6052_v46, 0.0  ;;  %v6056_v48 = vpop.eup %5283 }
 0x309   : > { %v1547_v49 = vsel %vm1203_vm0, %v6056_v48, 0.0  ;;  %v6064_v54 = vpop.eup %5285 }
 0x30a   : > { %v1550_v55 = vsel %vm1203_vm0, %v6064_v54, 0.0  ;;  %v6068_v56 = vpop.eup %5287 }
 0x30b   : > { %v1544_v57 = vsel %vm1203_vm0, %v6068_v56, 0.0 }
 0x316   : > { %1473 = vmax.xlane.f32.xlu1 %v1472_v18 }
 0x31a   : > { %1491 = vmax.xlane.f32.xlu1 %v1490_v44 }
 0x31e   : > { %1485 = vmax.xlane.f32.xlu1 %v1484_v45 }
 0x324   : > { %1554 = vadd.xlane.f32.xlu0 %v1553_v47 }
 0x328   : > { %1548 = vadd.xlane.f32.xlu0 %v1547_v49 }
 0x32f   : > { %5046 = vrot.lane.b32.xlu1 %v6036_v35, %s5572_s17 }
 0x353   : > { %1551 = vadd.xlane.f32.xlu1 %v1550_v55 }
 0x357   : > { %1545 = vadd.xlane.f32.xlu1 %v1544_v57 }
 0x366   : > { %v1468_v58 = vpop.xlane.xlu1 %1467 }
 0x367   : > { %v1502_v59 = vsub.f32 %v5992_v10, %v1468_v58 }
 0x368   : > { %v1471_v60 = vpop.xlane.xlu0 %1470 }
 0x369   : > { %v1524_v61 = vmul.f32 1.442695, %v1502_v59  ;;  %v1503_v62 = vsub.f32 %v5998_v13, %v1471_v60 }
 0x36a   : > { %v1480_v63 = vpop.xlane.xlu1 %1479 }
 0x36b   : > { %5289 = vpow2.f32 %v1524_v61  ;;  %v1526_v1 = vmul.f32 1.442695, %v1503_v62  ;;  %v1506_v2 = vsub.f32 %v6004_v16, %v1480_v63 }
 0x36c   : > { %v1483_v3 = vpop.xlane.xlu0 %1482 }
 0x36d   : > { %5291 = vpow2.f32 %v1526_v1  ;;  %v1532_v4 = vmul.f32 1.442695, %v1506_v2  ;;  %v1507_v5 = vsub.f32 %v6010_v21, %v1483_v3 }
 0x36e   : > { %v1462_v6 = vpop.xlane.xlu1 %1461 }
 0x36f   : > { %5293 = vpow2.f32 %v1532_v4  ;;  %v1534_v7 = vmul.f32 1.442695, %v1507_v5  ;;  %v1500_v8 = vsub.f32 %v5994_v11, %v1462_v6 }
 0x370   : > { %v1465_v9 = vpop.xlane.xlu0 %1464 }
 0x371   : > { %5295 = vpow2.f32 %v1534_v7  ;;  %v1520_v10 = vmul.f32 1.442695, %v1500_v8  ;;  %v1501_v12 = vsub.f32 %v6000_v14, %v1465_v9 }
 0x372   : > { %v5037_v13 = vpop.permute.xlu1 %5036 }
 0x373   : > { %5297 = vpow2.f32 %v1520_v10  ;;  %v1522_v15 = vmul.f32 1.442695, %v1501_v12  ;;  %v5039_v20 = vunpack.i.h.bf16 %v5037_v13  ;;  %v5038_v16 = vunpack.i.l.bf16 %v5037_v13 }
 0x374   : > { %v1477_v23 = vpop.xlane.xlu0 %1476 }
 0x375   : > { %v6078_v24 = vpop.eup %5289  ;;  %5299 = vpow2.f32 %v1522_v15  ;;  %v1505_v21 = vsub.f32 %v6012_v22, %v1477_v23  ;;  %v1197_v25 = vpack.c.bf16 %v5039_v20, %v5038_v16 }
 0x376   : > { %v1562_v11 = vsel %vm1203_vm0, %v6078_v24, 0.0 }
 0x377   : > { %v6083_v26 = vpop.eup %5291  ;;  %v1530_v33 = vmul.f32 1.442695, %v1505_v21  ;;  %4702 = vmatprep.subr.bf16.mxu1 %v1197_v25  ;;  %1563 = vadd.xlane.f32.xlu1 %v1562_v11 }
 0x378   : > { %4703 = vmatpush3.bf16.msra.mxu1 %v1197_v25  ;;  %v1495_v14 = vpop.xlane.xlu0 %1494  ;;  %v1565_v34 = vsel %vm1203_vm0, %v6083_v26, 0.0 }
 0x379   : > { %v6087_v36 = vpop.eup %5293  ;;  %5301 = vpow2.f32 %v1530_v33  ;;  %v1511_v38 = vsub.f32 %v6026_v30, %v1495_v14  ;;  %1566 = vadd.xlane.f32.xlu0 %v1565_v34 }
 0x37a   : > { %v1574_v22 = vsel %vm1203_vm0, %v6087_v36, 0.0 }
 0x37b   : > { %v6092_v39 = vpop.eup %5295  ;;  %v1542_v40 = vmul.f32 1.442695, %v1511_v38  ;;  %1575 = vadd.xlane.f32.xlu1 %v1574_v22 }
 0x37c   : > { %v1489_v41 = vpop.xlane.xlu0 %1488  ;;  %v1577_v42 = vsel %vm1203_vm0, %v6092_v39, 0.0 }
 0x37d   : > { %v6096_v43 = vpop.eup %5297  ;;  %5303 = vpow2.f32 %v1542_v40  ;;  %v1509_v18 = vsub.f32 %v6028_v32, %v1489_v41  ;;  %1578 = vadd.xlane.f32.xlu0 %v1577_v42 }
 0x37e   : > { %v1556_v30 = vsel %vm1203_vm0, %v6096_v43, 0.0 }
 0x37f   : > { %v6101_v19 = vpop.eup %5299  ;;  %v1538_v44 = vmul.f32 1.442695, %v1509_v18  ;;  %1557 = vadd.xlane.f32.xlu1 %v1556_v30 }
 0x380   : > { %v5042_v45 = vpop.permute.xlu0 %5041  ;;  %v1559_v47 = vsel %vm1203_vm0, %v6101_v19, 0.0 }
 0x381   : > { %5305 = vpow2.f32 %v1538_v44  ;;  %v5044_v49 = vunpack.i.h.bf16 %v5042_v45  ;;  %v5043_v50 = vunpack.i.l.bf16 %v5042_v45  ;;  %1560 = vadd.xlane.f32.xlu0 %v1559_v47 }
 0x383   : > { %v6105_v51 = vpop.eup %5301  ;;  %v1198_v52 = vpack.c.bf16 %v5044_v49, %v5043_v50 }
 0x384   : > { %v1571_v32 = vsel %vm1203_vm0, %v6105_v51, 0.0 }
 0x385   : > { %1572 = vadd.xlane.f32.xlu0 %v1571_v32  ;;  %4704 = vmatprep.subr.bf16.mxu1 %v1198_v52 }
 0x386   : > { %4705 = vmatpush3.bf16.msra.mxu1 %v1198_v52 }
 0x387   : > { %v6109_v53 = vpop.eup %5303 }
 0x388   : > { %v1589_v55 = vsel %vm1203_vm0, %v6109_v53, 0.0 }
 0x389   : > { %1590 = vadd.xlane.f32.xlu0 %v1589_v55 }
 0x38b   : > { %v6113_v57 = vpop.eup %5305 }
 0x38c   : > { %v1583_v58 = vsel %vm1203_vm0, %v6113_v57, 0.0 }
 0x38d   : > { %1584 = vadd.xlane.f32.xlu0 %v1583_v58 }
 0x3a3   : > { %v1474_v59 = vpop.xlane.xlu1 %1473  ;;  %5051 = vrot.lane.b32.xlu0 %v6042_v37, %s5572_s17 }
 0x3a4   : > { %v1504_v60 = vsub.f32 %v6006_v17, %v1474_v59 }
 0x3a6   : > { %v1528_v61 = vmul.f32 1.442695, %v1504_v60 }
 0x3a7   : > { %v1492_v62 = vpop.xlane.xlu1 %1491 }
 0x3a8   : > { %5307 = vpow2.f32 %v1528_v61  ;;  %v1510_v63 = vsub.f32 %v6022_v27, %v1492_v62 }
 0x3aa   : > { %v1540_v1 = vmul.f32 1.442695, %v1510_v63 }
 0x3ab   : > { %v1486_v2 = vpop.xlane.xlu1 %1485 }
 0x3ac   : > { %5309 = vpow2.f32 %v1540_v1  ;;  %v1508_v3 = vsub.f32 %v6024_v28, %v1486_v2 }
 0x3ae   : > { %v1536_v4 = vmul.f32 1.442695, %v1508_v3 }
 0x3af   : > { %v5047_v5 = vpop.permute.xlu1 %5046 }
 0x3b0   : > { %5311 = vpow2.f32 %v1536_v4  ;;  %v5049_v6 = vunpack.i.h.bf16 %v5047_v5  ;;  %v5048_v7 = vunpack.i.l.bf16 %v5047_v5 }
 0x3b1   : > { %v1555_v13 = vpop.xlane.xlu0 %1554 }
 0x3b2   : > { %v6122_v8 = vpop.eup %5307  ;;  %v1199_v9 = vpack.c.bf16 %v5049_v6, %v5048_v7 }
 0x3b3   : > { %v1568_v17 = vsel %vm1203_vm0, %v6122_v8, 0.0 }
 0x3b4   : > { %1569 = vadd.xlane.f32.xlu1 %v1568_v17  ;;  %4710 = vmatprep.subr.bf16.mxu0 %v1199_v9 }
 0x3b5   : > { %v1549_v15 = vpop.xlane.xlu0 %1548 }
 0x3b6   : > { %v6126_v10 = vpop.eup %5309 }
 0x3b7   : > { %v1586_v27 = vsel %vm1203_vm0, %v6126_v10, 0.0 }
 0x3b8   : > { %1587 = vadd.xlane.f32.xlu1 %v1586_v27 }
 0x3ba   : > { %v6130_v28 = vpop.eup %5311 }
 0x3bb   : > { %v1580_v12 = vsel %vm1203_vm0, %v6130_v28, 0.0 }
 0x3bc   : > { %1581 = vadd.xlane.f32.xlu1 %v1580_v12 }
 0x3cd   : > { %5056 = vrot.lane.b32.xlu1 %v6036_v35, %s5574_s4 }
 0x3d1   : > { %5061 = vrot.lane.b32.xlu1 %v6042_v37, %s5574_s4 }
 0x3e0   : > { %v1552_v20 = vpop.xlane.xlu1 %1551 }
 0x3e1   : > { %5313 = vrcp.f32 %v1552_v20  ;;  %v5190_v20 = vld [vmem:[%s6782_s0 + $0x8] sm:$0xff]  }
 0x3e2   : > { %5315 = vrcp.f32 %v1549_v15 }
 0x3e3   : > { %5317 = vrcp.f32 %v1555_v13 }
 0x3e4   : > { %v1546_v16 = vpop.xlane.xlu1 %1545 }
 0x3e5   : > { %5319 = vrcp.f32 %v1546_v16 }
 0x3eb   : > { %v5314_v23 = vpop.eup %5313 }
 0x3ec   : > { %v5316_v21 = vpop.eup %5315  ;;  %v1610_v33 = vmul.f32 %v5314_v23, %v6064_v54 }
 0x3ed   : > { %v5318_v25 = vpop.eup %5317  ;;  %v1609_v35 = vmul.f32 %v5316_v21, %v6056_v48 }
 0x3ee   : > { %v1611_v37 = vmul.f32 %v5318_v25, %v6052_v46 }
 0x3ef   : > { %v5320_v11 = vpop.eup %5319 }
 0x3f0   : > { %v1608_v14 = vmul.f32 %v5320_v11, %v6068_v56  ;;  %v1625_v38 = vpack.c.bf16 %v1611_v37, %v1610_v33  ;;  %v5191_v33 = vld [vmem:[%s6782_s0 + $0x10] sm:$0xff]  }
 0x3f2   : > { %v1624_v34 = vpack.c.bf16 %v1609_v35, %v1608_v14 }
 0x3f4   : > { %4698 = vmatprep.mubr.msk.bf16.mxu0 %vm1203_vm0, %v1624_v34 }
 0x3f5   : > { %4699 = vmatmul.mubr.msk.bf16.vlgmr.msra.gmra.mrb[12].mxu0 %vm1203_vm0, %v1625_v38 }
 0x3f6   : > { %4711 = vmatpush3.bf16.msra.mxu0 %v1199_v9 }
 0x404   : > { %v1564_v22 = vpop.xlane.xlu1 %1563 }
 0x406   : > { %v1567_v40 = vpop.xlane.xlu0 %1566 }
 0x407   : > { %5321 = vrcp.f32 %v1567_v40 }
 0x408   : > { %v1576_v41 = vpop.xlane.xlu1 %1575 }
 0x40a   : > { %v1579_v42 = vpop.xlane.xlu0 %1578 }
 0x40c   : > { %v1558_v18 = vpop.xlane.xlu1 %1557 }
 0x40d   : > { %5323 = vrcp.f32 %v1558_v18 }
 0x40e   : > { %5325 = vrcp.f32 %v1564_v22  ;;  %v1561_v54 = vpop.xlane.xlu0 %1560 }
 0x40f   : > { %5327 = vrcp.f32 %v1561_v54 }
 0x410   : > { %5329 = vrcp.f32 %v1579_v42 }
 0x411   : > { %v5322_v56 = vpop.eup %5321 }
 0x412   : > { %v1573_v48 = vpop.xlane.xlu0 %1572  ;;  %v1615_v47 = vmul.f32 %v5322_v56, %v6083_v26  ;;  %v5189_v26 = vld [vmem:[%s6782_s0] sm:$0xff]  }
 0x413   : > { %5331 = vrcp.f32 %v1573_v48 }
 0x414   : > { %5333 = vrcp.f32 %v1576_v41 }
 0x416   : > { %v1591_v46 = vpop.xlane.xlu0 %1590 }
 0x417   : > { %v5324_v30 = vpop.eup %5323 }
 0x418   : > { %v5326_v44 = vpop.eup %5325  ;;  %v1612_v50 = vmul.f32 %v5324_v30, %v6096_v43 }
 0x419   : > { %v5328_v45 = vpop.eup %5327  ;;  %v1614_v32 = vmul.f32 %v5326_v44, %v6078_v24  ;;  %v5194_v44 = vld [vmem:[%s6782_s0 + $0x28] sm:$0xff]  }
 0x41a   : > { %v1585_v49 = vpop.xlane.xlu0 %1584  ;;  %v1613_v52 = vmul.f32 %v5328_v45, %v6101_v19  ;;  %v5330_v19 = vpop.eup %5329  ;;  %v5195_v45 = vld [vmem:[%s6782_s0 + $0x30] sm:$0xff]  }
 0x41b   : > { %v1627_v58 = vpack.c.bf16 %v1615_v47, %v1614_v32  ;;  %v1619_v4 = vmul.f32 %v5330_v19, %v6092_v39 }
 0x41c   : > { %v1626_v55 = vpack.c.bf16 %v1613_v52, %v1612_v50 }
 0x41d   : > { %v5332_v1 = vpop.eup %5331 }
 0x41e   : > { %4706 = vmatprep.mubr.msk.bf16.mxu1 %vm1203_vm0, %v1626_v55  ;;  %v5052_v59 = vpop.permute.xlu0 %5051  ;;  %v5334_v2 = vpop.eup %5333  ;;  %v1617_v7 = vmul.f32 %v5332_v1, %v6105_v51 }
 0x41f   : > { %v5054_v60 = vunpack.i.h.bf16 %v5052_v59  ;;  %v5053_v61 = vunpack.i.l.bf16 %v5052_v59  ;;  %4707 = vmatmul.mubr.msk.bf16.vlgmr.msra.gmra.mrb[16].mxu1 %vm1203_vm0, %v1627_v58  ;;  %v1618_v9 = vmul.f32 %v5334_v2, %v6087_v36  ;;  %v5196_v58 = vld [vmem:[%s6782_s0 + $0x38] sm:$0xff]  }
 0x421   : > { %v1200_v62 = vpack.c.bf16 %v5054_v60, %v5053_v61  ;;  %v1629_v15 = vpack.c.bf16 %v1619_v4, %v1618_v9 }
 0x423   : > { %4712 = vmatprep.subr.bf16.mxu0 %v1200_v62 }
 0x424   : > { %4713 = vmatpush3.bf16.msra.mxu0 %v1200_v62 }
 0x425   : > { %4726 = vmatprep.subr.bf16.mxu0 %v5189_v26 }
 0x441   : > { %v1570_v24 = vpop.xlane.xlu1 %1569 }
 0x442   : > { %5335 = vrcp.f32 %v1570_v24 }
 0x445   : > { %v1588_v43 = vpop.xlane.xlu1 %1587 }
 0x446   : > { %5337 = vrcp.f32 %v1588_v43  ;;  %v4338_v43 = vld [vmem:[%s6783_s5] ss:$0 sm:$0xff]  ;;  %s6785_s5 = sld [smem:[#allocation19_spill]] }
 0x447   : > { %5339 = vrcp.f32 %v1585_v49 }
 0x448   : > { %5341 = vrcp.f32 %v1591_v46 }
 0x449   : > { %v1582_v63 = vpop.xlane.xlu1 %1581 }
 0x44a   : > { %5343 = vrcp.f32 %v1582_v63  ;;  %v5433_v63 = vld [vmem:[%s5856_s24] sm:$0xff]  }
 0x44b   : > { %v760_v1 = vunpack.c.l.bf16 %v5433_v63 }
 0x44c   : > { %v5336_v3 = vpop.eup %5335 }
 0x44d   : > { %v5057_v5 = vpop.permute.xlu1 %5056  ;;  %v1616_v6 = vmul.f32 %v5336_v3, %v6122_v8 }
 0x44e   : > { %v5059_v17 = vunpack.i.h.bf16 %v5057_v5  ;;  %v5058_v27 = vunpack.i.l.bf16 %v5057_v5  ;;  %v761_v5 = vunpack.c.h.bf16 %v5433_v63 }
 0x44f   : > { %v1628_v12 = vpack.c.bf16 %v1617_v7, %v1616_v6 }
 0x450   : > { %v1201_v13 = vpack.c.bf16 %v5059_v17, %v5058_v27  ;;  %v5338_v16 = vpop.eup %5337  ;;  %v5434_v27 = vld [vmem:[%s5856_s24 + $0x8] sm:$0xff]  }
 0x451   : > { %v5062_v23 = vpop.permute.xlu1 %5061  ;;  %4714 = vmatprep.mubr.msk.bf16.mxu0 %vm1203_vm0, %v1628_v12  ;;  %v5340_v39 = vpop.eup %5339  ;;  %v1622_v25 = vmul.f32 %v5338_v16, %v6126_v10  ;;  %v762_v12 = vunpack.c.l.bf16 %v5434_v27  ;;  %v763_v16 = vunpack.c.h.bf16 %v5434_v27 }
 0x452   : > { %v5064_v21 = vunpack.i.h.bf16 %v5062_v23  ;;  %v5063_v8 = vunpack.i.l.bf16 %v5062_v23  ;;  %4715 = vmatmul.mubr.msk.bf16.vlgmr.msra.gmra.mrb[16].mxu0 %vm1203_vm0, %v1629_v15  ;;  %4718 = vmatprep.subr.bf16.mxu1 %v1201_v13  ;;  %v5342_v36 = vpop.eup %5341  ;;  %v1621_v35 = vmul.f32 %v5340_v39, %v6113_v57  ;;  %v5193_v57 = vld [vmem:[%s6782_s0 + $0x20] sm:$0xff]  }
 0x453   : > { %4719 = vmatpush3.bf16.msra.mxu1 %v1201_v13  ;;  %4727 = vmatpush3.bf16.msra.mxu0 %v5189_v26  ;;  %v1623_v37 = vmul.f32 %v5342_v36, %v6109_v53  ;;  %v5192_v53 = vld [vmem:[%s6782_s0 + $0x18] sm:$0xff]   ;;  %v5197_v39 = vld [vmem:[%s6741_s10] ss:$8 sps:$4 sm:$0xff]  }
 0x454   : > { %v5344_v51 = vpop.eup %5343  ;;  %v1202_v11 = vpack.c.bf16 %v5064_v21, %v5063_v8  ;;  %4728 = vmatprep.subr.bf16.mxu0 %v5190_v20  ;;  %v5199_v21 = vld [vmem:[%s6741_s10 + $0x4] ss:$8 sps:$4 sm:$0xff]   ;;  %v5202_v8 = vld [vmem:[%s6741_s10 + $0x14] ss:$8 sps:$4 sm:$0xff]  }
 0x455   : > { %v1620_v14 = vmul.f32 %v5344_v51, %v6130_v28  ;;  %v1631_v38 = vpack.c.bf16 %v1623_v37, %v1622_v25  ;;  %v5209_v36 = vld [vmem:[%s6739_s8] sm:$0xff]   ;;  %v5200_v51 = vld [vmem:[%s6741_s10 + $0x10] ss:$8 sps:$4 sm:$0xff]  }
 0x456   : > { %4720 = vmatprep.subr.bf16.mxu1 %v1202_v11  ;;  %v5205_v25 = vld [vmem:[%s6741_s10 + $0x24] ss:$8 sps:$4 sm:$0xff]  }
 0x457   : > { %4721 = vmatpush3.bf16.msra.mxu1 %v1202_v11  ;;  %v1630_v34 = vpack.c.bf16 %v1621_v35, %v1620_v14  ;;  %4729 = vmatpush3.bf16.msra.mxu0 %v5190_v20  ;;  %v5203_v11 = vld [vmem:[%s6741_s10 + $0x20] ss:$8 sps:$4 sm:$0xff]   ;;  %v5206_v14 = vld [vmem:[%s6741_s10 + $0x30] ss:$8 sps:$4 sm:$0xff]  }
 0x458   : > { %4734 = vmatprep.subr.bf16.mxu0 %v5191_v33  ;;  %4758 = vmatprep.subr.bf16.mxu1 %v5209_v36 }
 0x459   : > { %4722 = vmatprep.mubr.msk.bf16.mxu1 %vm1203_vm0, %v1630_v34 }
 0x45a   : > { %4723 = vmatmul.mubr.msk.bf16.vlgmr.msra.gmra.mrb[20].mxu1 %vm1203_vm0, %v1631_v38 }
 0x45b   : > { %4759 = vmatpush3.bf16.msra.mxu1 %v5209_v36 }
 0x4c8   : > { %v4700_v10 = vpop.f32.mrb[12].mxu0 }
 0x4c9   : > { %v1672_v22 = vpop.f32.mrb[13].mxu0 }
 0x4ca   : > { %v4701_v40 = vpop.f32.mrb[14].mxu0 }
 0x4cb   : > { %v1853_v41 = vpack.c.bf16 %v4701_v40, %v4700_v10  ;;  %v1675_v42 = vpop.f32.mrb[15].mxu0 }
 0x4cc   : > { %v1852_v28 = vpack.c.bf16 %v1675_v42, %v1672_v22 }
 0x4ce   : > { %4730 = vmatprep.mubr.msk.bf16.mxu0 %vm1203_vm0, %v1852_v28 }
 0x4cf   : > { %4731 = vmatmul.mubr.msk.bf16.vlgmr.msra.gmra.mrb[20].mxu0 %vm1203_vm0, %v1853_v41 }
 0x4d0   : > { %4735 = vmatpush3.bf16.msra.mxu0 %v5191_v33  ;;  %v5208_v33 = vld [vmem:[%s6741_s10 + $0x34] ss:$8 sps:$4 sm:$0xff]  }
 0x4d1   : > { %4736 = vmatprep.subr.bf16.mxu0 %v5192_v53 }
 0x4d4   : > { %4737 = vmatpush3.bf16.msra.mxu0 %v5192_v53 }
 0x4d5   : > { %4742 = vmatprep.subr.bf16.mxu0 %v5193_v57 }
 0x4f2   : > { %v4708_v18 = vpop.f32.mrb[16].mxu1 }
 0x4f3   : > { %v1727_v54 = vpop.f32.mrb[17].mxu1 }
 0x4f4   : > { %v4709_v48 = vpop.f32.mrb[18].mxu1 }
 0x4f5   : > { %v1855_v56 = vpack.c.bf16 %v4709_v48, %v4708_v18  ;;  %v1730_v46 = vpop.f32.mrb[19].mxu1 }
 0x4f6   : > { %v1854_v30 = vpack.c.bf16 %v1730_v46, %v1727_v54  ;;  %v5212_v46 = vld [vmem:[%s6741_s10 + $0x44] ss:$8 sps:$4 sm:$0xff]  }
 0x4f8   : > { %4738 = vmatprep.mubr.msk.bf16.mxu0 %vm1203_vm0, %v1854_v30  ;;  %v5210_v30 = vld [vmem:[%s6741_s10 + $0x40] ss:$8 sps:$4 sm:$0xff]  }
 0x4f9   : > { %4739 = vmatmul.mubr.msk.bf16.vlgmr.msra.gmra.mrb[20].mxu0 %vm1203_vm0, %v1855_v56 }
 0x4fa   : > { %4743 = vmatpush3.bf16.msra.mxu0 %v5193_v57 }
 0x4fb   : > { %4744 = vmatprep.subr.bf16.mxu0 %v5194_v44 }
 0x4fe   : > { %4745 = vmatpush3.bf16.msra.mxu0 %v5194_v44  ;;  %v5213_v44 = vld [vmem:[%s6739_s8 + $0x8] sm:$0xff]  }
 0x4ff   : > { %4750 = vmatprep.subr.bf16.mxu0 %v5195_v45  ;;  %4760 = vmatprep.subr.bf16.mxu1 %v5213_v44 }
 0x500   : > { %4761 = vmatpush3.bf16.msra.mxu1 %v5213_v44 }
 0x525   : > { %v4716_v47 = vpop.f32.mrb[16].mxu0 }
 0x526   : > { %v1782_v49 = vpop.f32.mrb[17].mxu0 }
 0x527   : > { %v4717_v50 = vpop.f32.mrb[18].mxu0 }
 0x528   : > { %v1857_v52 = vpack.c.bf16 %v4717_v50, %v4716_v47  ;;  %v1785_v32 = vpop.f32.mrb[19].mxu0  ;;  %v5214_v47 = vld [vmem:[%s6741_s10 + $0x50] ss:$8 sps:$4 sm:$0xff]   ;;  %v5220_v50 = vld [vmem:[%s6741_s10 + $0x64] ss:$8 sps:$4 sm:$0xff]  }
 0x529   : > { %v1856_v55 = vpack.c.bf16 %v1785_v32, %v1782_v49  ;;  %v5217_v49 = vld [vmem:[%s6739_s8 + $0x10] sm:$0xff]   ;;  %v5221_v32 = vld [vmem:[%s6739_s8 + $0x18] sm:$0xff]  }
 0x52a   : > { %4762 = vmatprep.subr.bf16.mxu1 %v5217_v49 }
 0x52b   : > { %4746 = vmatprep.mubr.msk.bf16.mxu0 %vm1203_vm0, %v1856_v55  ;;  %4763 = vmatpush3.bf16.msra.mxu1 %v5217_v49  ;;  %v5224_v55 = vld [vmem:[%s6741_s10 + $0x74] ss:$8 sps:$4 sm:$0xff]  }
 0x52c   : > { %4747 = vmatmul.mubr.msk.bf16.vlgmr.msra.gmra.mrb[20].mxu0 %vm1203_vm0, %v1857_v52  ;;  %v5218_v52 = vld [vmem:[%s6741_s10 + $0x60] ss:$8 sps:$4 sm:$0xff]   ;;  %4764 = vmatprep.subr.bf16.mxu1 %v5221_v32 }
 0x52d   : > { %v4724_v59 = vpop.f32.mrb[20].mxu1  ;;  %4751 = vmatpush3.bf16.msra.mxu0 %v5195_v45  ;;  %v5216_v45 = vld [vmem:[%s6741_s10 + $0x54] ss:$8 sps:$4 sm:$0xff]  }
 0x52e   : > { %v1837_v60 = vpop.f32.mrb[21].mxu1  ;;  %4752 = vmatprep.subr.bf16.mxu0 %v5196_v58 }
 0x52f   : > { %v4725_v61 = vpop.f32.mrb[22].mxu1  ;;  %4765 = vmatpush3.bf16.msra.mxu1 %v5221_v32 }
 0x530   : > { %v1859_v62 = vpack.c.bf16 %v4725_v61, %v4724_v59  ;;  %v1840_v26 = vpop.f32.mrb[23].mxu1  ;;  %v5225_v59 = vld [vmem:[%s6739_s8 + $0x20] sm:$0xff]   ;;  %v5227_v61 = vld [vmem:[%s6739_s8 + $0x28] sm:$0xff]  }
 0x531   : > { %v1858_v24 = vpack.c.bf16 %v1840_v26, %v1837_v60  ;;  %4753 = vmatpush3.bf16.msra.mxu0 %v5196_v58  ;;  %v5222_v58 = vld [vmem:[%s6741_s10 + $0x70] ss:$8 sps:$4 sm:$0xff]   ;;  %4766 = vmatprep.subr.bf16.mxu1 %v5225_v59  ;;  %v5226_v60 = vld [vmem:[%s749_s1] sm:$0xff]   ;;  %v5229_v26 = vld [vmem:[%s749_s1 + $0x8] sm:$0xff]  }
 0x532   : > { %2483 = vmatprep.subr.bf16.mxu0 %v5199_v21 }
 0x533   : > { %4754 = vmatprep.mubr.msk.bf16.mxu0 %vm1203_vm0, %v1858_v24  ;;  %4767 = vmatpush3.bf16.msra.mxu1 %v5225_v59  ;;  %v5230_v24 = vld [vmem:[%s6739_s8 + $0x38] sm:$0xff]  }
 0x534   : > { %4768 = vmatprep.subr.bf16.mxu1 %v5227_v61 }
 0x537   : > { %4769 = vmatpush3.bf16.msra.mxu1 %v5227_v61 }
 0x538   : > { %4755 = vmatmul.mubr.msk.bf16.vlgmr.msra.gmra.mrb[20].mxu0 %vm1203_vm0, %v1859_v62  ;;  %v5228_v62 = vld [vmem:[%s6739_s8 + $0x30] sm:$0xff]  }
 0x539   : > { %2515 = vmatprep.mubr.bf16.mxu0 %v5571_v0  ;;  %2484 = vmatpush1.bf16.msra.mxu0 %v5197_v39  ;;  %v4364_v39 = vld [vmem:[%s6738_s7] ss:$0 sm:$0xff] }
 0x53a   : > { %2485 = vmatprep.subr.bf16.mxu0 %v5202_v8  ;;  %4770 = vmatprep.subr.bf16.mxu1 %v5228_v62 }
 0x53b   : > { %4771 = vmatpush3.bf16.msra.mxu1 %v5228_v62 }
 0x53c   : > { %4772 = vmatprep.subr.bf16.mxu1 %v5230_v24 }
 0x53d   : > { %2486 = vmatpush1.bf16.msra.mxu0 %v5200_v51 }
 0x53e   : > { %2487 = vmatprep.subr.bf16.mxu0 %v5205_v25 }
 0x53f   : > { %4773 = vmatpush3.bf16.msra.mxu1 %v5230_v24 }
 0x541   : > { %2488 = vmatpush1.bf16.msra.mxu0 %v5203_v11 }
 0x542   : > { %2489 = vmatprep.subr.bf16.mxu0 %v5208_v33 }
 0x545   : > { %2490 = vmatpush1.bf16.msra.mxu0 %v5206_v14 }
 0x546   : > { %2491 = vmatprep.subr.bf16.mxu0 %v5212_v46 }
 0x549   : > { %2492 = vmatpush1.bf16.msra.mxu0 %v5210_v30 }
 0x54a   : > { %2493 = vmatprep.subr.bf16.mxu0 %v5216_v45 }
 0x54d   : > { %2494 = vmatpush1.bf16.msra.mxu0 %v5214_v47 }
 0x54e   : > { %2495 = vmatprep.subr.bf16.mxu0 %v5220_v50 }
 0x551   : > { %2496 = vmatpush1.bf16.msra.mxu0 %v5218_v52 }
 0x552   : > { %2497 = vmatprep.subr.bf16.mxu0 %v5224_v55 }
 0x555   : > { %2498 = vmatpush1.bf16.msra.mxu0 %v5222_v58 }
 0x558   : > { %2516 = vmatmul.mubr.bf16.vlgmr.msra.gmra.mrb[24].mxu0 %v5226_v60 }
 0x559   : > { %2525 = vmatprep.mubr.bf16.mxu0 %v5571_v0 }
 0x560   : > { %2526 = vmatmul.mubr.bf16.gmra.mrb[28].mxu0 %v5229_v26 }
 0x60b   : > { %v4756_v19 = vpop.f32.mrb[20].mxu0 }
 0x60c   : > { %v2151_v2 = vpop.f32.mrb[21].mxu0  ;;  %v4874_v7 = vadd.f32 %v4756_v19, %v4338_v43 }
 0x60d   : > { %v4875_v3 = vadd.f32 %v4338_v43, %v2151_v2  ;;  %v4757_v4 = vpop.f32.mrb[22].mxu0 }
 0x60e   : > { %v2154_v6 = vpop.f32.mrb[23].mxu0  ;;  %v4876_v15 = vadd.f32 %v4757_v4, %v4338_v43  ;;  %v2172_v20 = vadd.f32 %v4874_v7, %v762_v12  ;;  %v4363_v12 = vld [vmem:[%s6785_s5] ss:$0 sm:$0xff] }
 0x60f   : > { %v4877_v9 = vadd.f32 %v4338_v43, %v2154_v6  ;;  %v2170_v17 = vadd.f32 %v4875_v3, %v760_v1 }
 0x610   : > { %v2173_v23 = vadd.f32 %v4876_v15, %v763_v16 }
 0x611   : > { %2174 = vadd.xlane.f32.xlu0 %v2170_v17  ;;  %v2171_v13 = vadd.f32 %v4877_v9, %v761_v5 }
 0x613   : > { %2176 = vadd.xlane.f32.xlu1 %v2171_v13 }
 0x615   : > { %2178 = vadd.xlane.f32.xlu0 %v2172_v20 }
 0x619   : > { %2180 = vadd.xlane.f32.xlu0 %v2173_v23 }
 0x69e   : > { %v2175_v35 = vpop.xlane.xlu0 %2174 }
 0x69f   : > { %v2183_v37 = vmul.f32 0.0078125, %v2175_v35 }
 0x6a0   : > { %v2177_v34 = vpop.xlane.xlu1 %2176 }
 0x6a1   : > { %v6227_v38 = vsub.f32 %v2170_v17, %v2183_v37  ;;  %v2184_v10 = vmul.f32 0.0078125, %v2177_v34 }
 0x6a2   : > { %v2179_v22 = vpop.xlane.xlu0 %2178 }
 0x6a3   : > { %v6229_v40 = vsub.f32 %v2171_v13, %v2184_v10  ;;  %v2185_v41 = vmul.f32 0.0078125, %v2179_v22  ;;  %v2191_v42 = vmul.f32 %v6227_v38, %v6227_v38  ;;  %v2379_v10 = vld [vmem:[%s6742_s11] sm:$0x3] }
 0x6a4   : > { %v2384_v22 = vrot.slane %v2379_v10, %v5918_v29 }
 0x6a5   : > { %v6233_v28 = vsub.f32 %v2172_v20, %v2185_v41  ;;  %2195 = vadd.xlane.f32.xlu1 %v2191_v42  ;;  %v2192_v53 = vmul.f32 %v6229_v40, %v6229_v40 }
 0x6a6   : > { %v2181_v57 = vpop.xlane.xlu0 %2180 }
 0x6a7   : > { %v2186_v18 = vmul.f32 0.0078125, %v2181_v57  ;;  %2197 = vadd.xlane.f32.xlu0 %v2192_v53  ;;  %v2193_v54 = vmul.f32 %v6233_v28, %v6233_v28 }
 0x6a9   : > { %v6239_v48 = vsub.f32 %v2173_v23, %v2186_v18  ;;  %2199 = vadd.xlane.f32.xlu1 %v2193_v54 }
 0x6ab   : > { %v2194_v56 = vmul.f32 %v6239_v48, %v6239_v48 }
 0x6ad   : > { %2201 = vadd.xlane.f32.xlu0 %v2194_v56 }
 0x732   : > { %v2196_v43 = vpop.xlane.xlu1 %2195 }
 0x733   : > { %v2203_v19 = vmul.f32 0.0078125, %v2196_v43 }
 0x734   : > { %v2198_v63 = vpop.xlane.xlu0 %2197 }
 0x735   : > { %v2207_v1 = vadd.f32 1e-05, %v2203_v19  ;;  %v2204_v2 = vmul.f32 0.0078125, %v2198_v63 }
 0x736   : > { %v2200_v3 = vpop.xlane.xlu1 %2199 }
 0x737   : > { %5345 = vrsqrt.f32 %v2207_v1  ;;  %v2208_v4 = vadd.f32 1e-05, %v2204_v2  ;;  %v2205_v5 = vmul.f32 0.0078125, %v2200_v3 }
 0x739   : > { %5347 = vrsqrt.f32 %v2208_v4  ;;  %v2209_v6 = vadd.f32 1e-05, %v2205_v5 }
 0x73a   : > { %v2202_v7 = vpop.xlane.xlu0 %2201 }
 0x73b   : > { %5349 = vrsqrt.f32 %v2209_v6  ;;  %v2206_v9 = vmul.f32 0.0078125, %v2202_v7 }
 0x73d   : > { %v2210_v17 = vadd.f32 1e-05, %v2206_v9  ;;  %v4365_v9 = vld [vmem:[%s6740_s9] ss:$0 sm:$0xff] }
 0x73f   : > { %5351 = vrsqrt.f32 %v2210_v17 }
 0x741   : > { %v5346_v27 = vpop.eup %5345 }
 0x742   : > { %v2215_v13 = vmul.f32 %v5346_v27, %v6227_v38 }
 0x743   : > { %v5348_v15 = vpop.eup %5347 }
 0x744   : > { %v2216_v20 = vmul.f32 %v5348_v15, %v6229_v40  ;;  %v2226_v16 = vmul.f32 %v4363_v12, %v2215_v13  ;;  %v2517_v40 = vpop.f32.mrb[24].mxu0 }
 0x745   : > { %v5350_v23 = vpop.eup %5349  ;;  %v2518_v41 = vadd.f32 %v2517_v40, %v2384_v22  ;;  %v2519_v42 = vpop.f32.mrb[25].mxu0 }
 0x746   : > { %v2217_v21 = vmul.f32 %v5350_v23, %v6233_v28  ;;  %v2227_v8 = vmul.f32 %v4363_v12, %v2216_v20  ;;  %v6302_v36 = vadd.f32 %v4364_v39, %v2226_v16  ;;  %v2388_v28 = vrot.slane %v2379_v10, %v5926_v31  ;;  %v2521_v53 = vpop.f32.mrb[26].mxu0 }
 0x747   : > { %v2522_v57 = vadd.f32 %v2521_v53, %v2384_v22  ;;  %v2523_v18 = vpop.f32.mrb[27].mxu0 }
 0x748   : > { %v6304_v51 = vadd.f32 %v4364_v39, %v2227_v8  ;;  %v2228_v14 = vmul.f32 %v4363_v12, %v2217_v21  ;;  %v2520_v56 = vadd.f32 %v2519_v42, %v2388_v28  ;;  %v2524_v46 = vadd.f32 %v2523_v18, %v2388_v28  ;;  %v2527_v44 = vpop.f32.mrb[28].mxu0 }
 0x749   : > { %v5352_v25 = vpop.eup %5351  ;;  %v2624_v54 = vpack.c.bf16 %v2522_v57, %v2518_v41  ;;  %v2528_v45 = vadd.f32 %v2527_v44, %v2384_v22  ;;  %v2529_v47 = vpop.f32.mrb[29].mxu0 }
 0x74a   : > { %v2218_v11 = vmul.f32 %v5352_v25, %v6239_v48  ;;  %v2241_v33 = vpack.c.bf16 %v6304_v51, %v6302_v36  ;;  %v6309_v37 = vadd.f32 %v4364_v39, %v2228_v14  ;;  %v5065_v48 = vpack.i.bf16 %v2522_v57, %v2518_v41  ;;  %v2531_v49 = vpop.f32.mrb[30].mxu0 }
 0x74b   : > { %4914 = vmatprep.subr.msk.bf16.mxu1 %vm1203_vm0, %v2624_v54  ;;  %v2687_v30 = vsel %vm1203_vm0, %v2624_v54, 0  ;;  %v6323_v50 = vpack.c.bf16 %v2524_v46, %v2520_v56  ;;  %v6325_v52 = vpack.i.bf16 %v2524_v46, %v2520_v56  ;;  %v2532_v32 = vadd.f32 %v2531_v49, %v2384_v22  ;;  %v2533_v60 = vpop.f32.mrb[31].mxu0 }
 0x74c   : > { %4774 = vmatprep.mubr.bf16.mxu1 %v2241_v33  ;;  %v2229_v35 = vmul.f32 %v4363_v12, %v2218_v11  ;;  %5066 = vrot.lane.b32.xlu1 %v5065_v48, %s5573_s22  ;;  %v2530_v59 = vadd.f32 %v2529_v47, %v2388_v28  ;;  %v2534_v62 = vadd.f32 %v2533_v60, %v2388_v28 }
 0x74d   : > { %v5070_v55 = vpack.i.bf16 %v2532_v32, %v2528_v45  ;;  %v2625_v58 = vpack.c.bf16 %v2532_v32, %v2528_v45 }
 0x74e   : > { %v6311_v34 = vadd.f32 %v4364_v39, %v2229_v35  ;;  %v6331_v26 = vpack.c.bf16 %v2534_v62, %v2530_v59  ;;  %v6333_v24 = vpack.i.bf16 %v2534_v62, %v2530_v59 }
 0x74f   : > { %5071 = vrot.lane.b32.xlu0 %v5070_v55, %s5573_s22  ;;  %v2690_v61 = vsel %vm1203_vm0, %v2625_v58, 0 }
 0x750   : > { %v2242_v38 = vpack.c.bf16 %v6311_v34, %v6309_v37  ;;  %5076 = vrot.lane.b32.xlu1 %v5065_v48, %s5572_s17 }
 0x752   : > { %4775 = vmatmul.mubr.bf16.vlgmr.msra.gmra.mrb[24].mxu1 %v2242_v38 }
 0x753   : > { %4779 = vmatpush3.bf16.xpose.msra.mxu1 %v2687_v30 }
 0x754   : > { %4915 = vmatprep.subr.msk.bf16.mxu1 %vm1203_vm0, %v2625_v58 }
 0x75b   : > { %4781 = vmatpush3.bf16.xpose.msra.mxu1 %v2690_v61 }
 0x7be   : > { %v5067_v43 = vpop.permute.xlu1 %5066 }
 0x7bf   : > { %v5069_v19 = vunpack.i.h.bf16 %v5067_v43  ;;  %v5068_v63 = vunpack.i.l.bf16 %v5067_v43 }
 0x7c1   : > { %v2626_v1 = vpack.c.bf16 %v5069_v19, %v5068_v63  ;;  %v5072_v17 = vpop.permute.xlu0 %5071 }
 0x7c2   : > { %v5077_v2 = vpop.permute.xlu1 %5076  ;;  %v5074_v16 = vunpack.i.h.bf16 %v5072_v17  ;;  %v5073_v23 = vunpack.i.l.bf16 %v5072_v17 }
 0x7c3   : > { %v5079_v3 = vunpack.i.h.bf16 %v5077_v2  ;;  %v5078_v4 = vunpack.i.l.bf16 %v5077_v2  ;;  %4916 = vmatprep.subr.msk.bf16.mxu1 %vm1203_vm0, %v2626_v1  ;;  %v2748_v14 = vsel %vm1203_vm0, %v2626_v1, 0 }
 0x7c4   : > { %v2627_v35 = vpack.c.bf16 %v5074_v16, %v5073_v23 }
 0x7c5   : > { %v2628_v5 = vpack.c.bf16 %v5079_v3, %v5078_v4 }
 0x7c6   : > { %v2751_v38 = vsel %vm1203_vm0, %v2627_v35, 0 }
 0x7c7   : > { %4918 = vmatprep.subr.msk.bf16.mxu0 %vm1203_vm0, %v2628_v5  ;;  %v2809_v6 = vsel %vm1203_vm0, %v2628_v5, 0 }
 0x7c8   : > { %4795 = vmatpush3.bf16.xpose.msra.mxu0 %v2809_v6 }
 0x825   : > { %v4776_v7 = vpop.f32.mrb[24].mxu1 }
 0x826   : > { %v2348_v27 = vpop.f32.mrb[25].mxu1  ;;  %v2357_v13 = vadd.f32 %v4776_v7, %v4365_v9 }
 0x827   : > { %v4777_v12 = vpop.f32.mrb[26].mxu1  ;;  %v2349_v39 = vadd.f32 %v4365_v9, %v2348_v27 }
 0x828   : > { %v2360_v15 = vadd.f32 %v4777_v12, %v4365_v9  ;;  %v2351_v20 = vpop.f32.mrb[27].mxu1 }
 0x829   : > { %v2352_v21 = vadd.f32 %v4365_v9, %v2351_v20 }
 0x82a   : > { %v2577_v8 = vpack.c.bf16 %v2360_v15, %v2357_v13  ;;  %v5085_v25 = vpack.i.bf16 %v2360_v15, %v2357_v13 }
 0x82b   : > { %v5080_v11 = vpack.i.bf16 %v2352_v21, %v2349_v39  ;;  %v2576_v33 = vpack.c.bf16 %v2352_v21, %v2349_v39 }
 0x82c   : > { %5086 = vrot.lane.b32.xlu0 %v5085_v25, %s5573_s22 }
 0x82d   : > { %5081 = vrot.lane.b32.xlu1 %v5080_v11, %s5573_s22  ;;  %4782 = vmatprep.mubr.msk.bf16.mxu1 %vm1203_vm0, %v2576_v33 }
 0x82e   : > { %4783 = vmatmul.mubr.msk.bf16.vlgmr.msra.gmra.mrb[28].mxu1 %vm1203_vm0, %v2577_v8 }
 0x82f   : > { %4787 = vmatpush3.bf16.xpose.msra.mxu1 %v2748_v14 }
 0x830   : > { %5096 = vrot.lane.b32.xlu0 %v5065_v48, %s5574_s4  ;;  %4917 = vmatprep.subr.msk.bf16.mxu1 %vm1203_vm0, %v2627_v35 }
 0x831   : > { %5091 = vrot.lane.b32.xlu1 %v5070_v55, %s5572_s17 }
 0x834   : > { %5106 = vrot.lane.b32.xlu0 %v5085_v25, %s5572_s17 }
 0x835   : > { %5101 = vrot.lane.b32.xlu1 %v5080_v11, %s5572_s17 }
 0x837   : > { %4789 = vmatpush3.bf16.xpose.msra.mxu1 %v2751_v38 }
 0x838   : > { %5116 = vrot.lane.b32.xlu0 %v5080_v11, %s5574_s4 }
 0x839   : > { %5111 = vrot.lane.b32.xlu1 %v5070_v55, %s5574_s4 }
 0x83d   : > { %5121 = vrot.lane.b32.xlu1 %v5085_v25, %s5574_s4 }
 0x89e   : > { %v5087_v10 = vpop.permute.xlu0 %5086 }
 0x89f   : > { %v5089_v22 = vunpack.i.h.bf16 %v5087_v10  ;;  %v5088_v40 = vunpack.i.l.bf16 %v5087_v10  ;;  %v5082_v41 = vpop.permute.xlu1 %5081 }
 0x8a0   : > { %v5084_v42 = vunpack.i.h.bf16 %v5082_v41  ;;  %v5083_v28 = vunpack.i.l.bf16 %v5082_v41 }
 0x8a1   : > { %v2579_v18 = vpack.c.bf16 %v5089_v22, %v5088_v40 }
 0x8a2   : > { %v2578_v53 = vpack.c.bf16 %v5084_v42, %v5083_v28  ;;  %v5097_v57 = vpop.permute.xlu0 %5096 }
 0x8a3   : > { %v5099_v54 = vunpack.i.h.bf16 %v5097_v57  ;;  %v5098_v48 = vunpack.i.l.bf16 %v5097_v57  ;;  %v5092_v56 = vpop.permute.xlu1 %5091 }
 0x8a4   : > { %v5094_v46 = vunpack.i.h.bf16 %v5092_v56  ;;  %v5093_v30 = vunpack.i.l.bf16 %v5092_v56  ;;  %4790 = vmatprep.mubr.msk.bf16.mxu1 %vm1203_vm0, %v2578_v53 }
 0x8a5   : > { %v2630_v44 = vpack.c.bf16 %v5099_v54, %v5098_v48  ;;  %4791 = vmatmul.mubr.msk.bf16.vlgmr.msra.gmra.mrb[32].mxu1 %vm1203_vm0, %v2579_v18 }
 0x8a6   : > { %v2629_v45 = vpack.c.bf16 %v5094_v46, %v5093_v30  ;;  %v5107_v47 = vpop.permute.xlu0 %5106 }
 0x8a7   : > { %v5102_v49 = vpop.permute.xlu1 %5101  ;;  %4920 = vmatprep.subr.msk.bf16.mxu1 %vm1203_vm0, %v2630_v44  ;;  %v2870_v32 = vsel %vm1203_vm0, %v2630_v44, 0  ;;  %v5109_v60 = vunpack.i.h.bf16 %v5107_v47  ;;  %v5108_v61 = vunpack.i.l.bf16 %v5107_v47 }
 0x8a8   : > { %v5104_v55 = vunpack.i.h.bf16 %v5102_v49  ;;  %v5103_v58 = vunpack.i.l.bf16 %v5102_v49  ;;  %4919 = vmatprep.subr.msk.bf16.mxu0 %vm1203_vm0, %v2629_v45  ;;  %4803 = vmatpush3.bf16.xpose.msra.mxu1 %v2870_v32  ;;  %v2812_v59 = vsel %vm1203_vm0, %v2629_v45, 0 }
 0x8a9   : > { %4797 = vmatpush3.bf16.xpose.msra.mxu0 %v2812_v59  ;;  %v2581_v5 = vpack.c.bf16 %v5109_v60, %v5108_v61 }
 0x8aa   : > { %v2580_v62 = vpack.c.bf16 %v5104_v55, %v5103_v58  ;;  %4810 = vmatprep.subr.bf16.mxu0 %v6323_v50  ;;  %v5117_v43 = vpop.permute.xlu0 %5116 }
 0x8ab   : > { %v5119_v19 = vunpack.i.h.bf16 %v5117_v43  ;;  %v5118_v63 = vunpack.i.l.bf16 %v5117_v43  ;;  %v5112_v1 = vpop.permute.xlu1 %5111 }
 0x8ac   : > { %v5114_v2 = vunpack.i.h.bf16 %v5112_v1  ;;  %v5113_v3 = vunpack.i.l.bf16 %v5112_v1  ;;  %4798 = vmatprep.mubr.msk.bf16.mxu0 %vm1203_vm0, %v2580_v62 }
 0x8ad   : > { %v2582_v4 = vpack.c.bf16 %v5119_v19, %v5118_v63 }
 0x8ae   : > { %v2631_v6 = vpack.c.bf16 %v5114_v2, %v5113_v3 }
 0x8af   : > { %v5122_v7 = vpop.permute.xlu1 %5121  ;;  %4806 = vmatprep.mubr.msk.bf16.mxu1 %vm1203_vm0, %v2582_v4 }
 0x8b0   : > { %4799 = vmatmul.mubr.msk.bf16.vlgmr.msra.gmra.mrb[32].mxu0 %vm1203_vm0, %v2581_v5  ;;  %4921 = vmatprep.subr.msk.bf16.mxu1 %vm1203_vm0, %v2631_v6  ;;  %v2873_v9 = vsel %vm1203_vm0, %v2631_v6, 0  ;;  %v5124_v17 = vunpack.i.h.bf16 %v5122_v7  ;;  %v5123_v27 = vunpack.i.l.bf16 %v5122_v7 }
 0x8b1   : > { %4805 = vmatpush3.bf16.xpose.msra.mxu1 %v2873_v9  ;;  %4811 = vmatpush3.bf16.msra.mxu0 %v6323_v50 }
 0x8b2   : > { %4812 = vmatprep.subr.bf16.mxu0 %v6331_v26  ;;  %v2583_v12 = vpack.c.bf16 %v5124_v17, %v5123_v27 }
 0x8b5   : > { %4813 = vmatpush3.bf16.msra.mxu0 %v6331_v26 }
 0x8b8   : > { %4807 = vmatmul.mubr.msk.bf16.vlgmr.msra.gmra.mrb[36].mxu1 %vm1203_vm0, %v2583_v12 }
 0x901   : > { %v6371_v13 = vpop.f32.mrb[28].mxu1 }
 0x902   : > { %v6373_v15 = vpop.f32.mrb[29].mxu1  ;;  %v2930_v20 = vsel %vm1203_vm0, %v6371_v13, -inf }
 0x903   : > { %2931 = vmax.xlane.f32.xlu0 %v2930_v20  ;;  %v4785_v16 = vpop.f32.mrb[30].mxu1  ;;  %v2924_v39 = vsel %vm1203_vm0, %v6373_v15, -inf }
 0x904   : > { %v2729_v23 = vpop.f32.mrb[31].mxu1  ;;  %v2933_v26 = vsel %vm1203_vm0, %v4785_v16, -inf }
 0x905   : > { %v2927_v50 = vsel %vm1203_vm0, %v2729_v23, -inf }
 0x906   : > { %2928 = vmax.xlane.f32.xlu1 %v2927_v50 }
 0x907   : > { %2925 = vmax.xlane.f32.xlu0 %v2924_v39 }
 0x90b   : > { %2934 = vmax.xlane.f32.xlu0 %v2933_v26 }
 0x978   : > { %v6381_v21 = vpop.f32.mrb[32].mxu1 }
 0x979   : > { %v6383_v8 = vpop.f32.mrb[33].mxu1  ;;  %v2942_v25 = vsel %vm1203_vm0, %v6381_v21, -inf }
 0x97a   : > { %2943 = vmax.xlane.f32.xlu1 %v2942_v25  ;;  %v6387_v11 = vpop.f32.mrb[34].mxu1  ;;  %v2936_v42 = vsel %vm1203_vm0, %v6383_v8, -inf }
 0x97b   : > { %v6389_v33 = vpop.f32.mrb[35].mxu1  ;;  %v2945_v14 = vsel %vm1203_vm0, %v6387_v11, -inf }
 0x97c   : > { %2946 = vmax.xlane.f32.xlu0 %v2945_v14  ;;  %v2939_v28 = vsel %vm1203_vm0, %v6389_v33, -inf }
 0x983   : > { %v6393_v35 = vpop.f32.mrb[32].mxu0 }
 0x984   : > { %v6395_v38 = vpop.f32.mrb[33].mxu0  ;;  %v2954_v10 = vsel %vm1203_vm0, %v6393_v35, -inf }
 0x985   : > { %v6399_v22 = vpop.f32.mrb[34].mxu0  ;;  %2955 = vmax.xlane.f32.xlu1 %v2954_v10  ;;  %v2948_v58 = vsel %vm1203_vm0, %v6395_v38, -inf }
 0x986   : > { %v6401_v40 = vpop.f32.mrb[35].mxu0  ;;  %v2957_v41 = vsel %vm1203_vm0, %v6399_v22, -inf }
 0x987   : > { %2958 = vmax.xlane.f32.xlu0 %v2957_v41  ;;  %v2951_v48 = vsel %vm1203_vm0, %v6401_v40, -inf }
 0x989   : > { %2937 = vmax.xlane.f32.xlu1 %v2936_v42 }
 0x98b   : > { %2940 = vmax.xlane.f32.xlu0 %v2939_v28  ;;  %v6409_v53 = vpop.f32.mrb[36].mxu1 }
 0x98c   : > { %v6411_v57 = vpop.f32.mrb[37].mxu1  ;;  %v2966_v60 = vsel %vm1203_vm0, %v6409_v53, -inf }
 0x98d   : > { %v6413_v18 = vpop.f32.mrb[38].mxu1  ;;  %v2960_v61 = vsel %vm1203_vm0, %v6411_v57, -inf }
 0x98e   : > { %v6415_v54 = vpop.f32.mrb[39].mxu1  ;;  %v2969_v56 = vsel %vm1203_vm0, %v6413_v18, -inf }
 0x98f   : > { %2952 = vmax.xlane.f32.xlu0 %v2951_v48  ;;  %v2963_v46 = vsel %vm1203_vm0, %v6415_v54, -inf }
 0x990   : > { %v2932_v30 = vpop.xlane.xlu0 %2931 }
 0x991   : > { %v2974_v1 = vsub.f32 %v6371_v13, %v2932_v30 }
 0x993   : > { %2970 = vmax.xlane.f32.xlu0 %v2969_v56  ;;  %v2929_v49 = vpop.xlane.xlu1 %2928  ;;  %v2992_v2 = vmul.f32 1.442695, %v2974_v1 }
 0x994   : > { %v2926_v44 = vpop.xlane.xlu0 %2925  ;;  %v2973_v32 = vsub.f32 %v2729_v23, %v2929_v49 }
 0x995   : > { %v2972_v3 = vsub.f32 %v6373_v15, %v2926_v44 }
 0x996   : > { %v2990_v59 = vmul.f32 1.442695, %v2973_v32 }
 0x997   : > { %2964 = vmax.xlane.f32.xlu0 %v2963_v46  ;;  %v2988_v4 = vmul.f32 1.442695, %v2972_v3 }
 0x998   : > { %v2935_v45 = vpop.xlane.xlu0 %2934 }
 0x999   : > { %v2975_v47 = vsub.f32 %v4785_v16, %v2935_v45 }
 0x99a   : > { %5126 = vrot.lane.b32.xlu1 %v6325_v52, %s5573_s22 }
 0x99b   : > { %v2994_v55 = vmul.f32 1.442695, %v2975_v47 }
 0x99d   : > { %5353 = vpow2.f32 %v2994_v55 }
 0x99e   : > { %5355 = vpow2.f32 %v2990_v59 }
 0x99f   : > { %5357 = vpow2.f32 %v2992_v2 }
 0x9a0   : > { %5359 = vpow2.f32 %v2988_v4 }
 0x9a7   : > { %v6433_v62 = vpop.eup %5353 }
 0x9a8   : > { %v3029_v43 = vsel %vm1203_vm0, %v6433_v62, 0.0  ;;  %v6437_v19 = vpop.eup %5355 }
 0x9a9   : > { %v3023_v63 = vsel %vm1203_vm0, %v6437_v19, 0.0  ;;  %v6445_v5 = vpop.eup %5357 }
 0x9aa   : > { %v3026_v6 = vsel %vm1203_vm0, %v6445_v5, 0.0  ;;  %v6449_v7 = vpop.eup %5359 }
 0x9ab   : > { %v3020_v9 = vsel %vm1203_vm0, %v6449_v7, 0.0 }
 0x9ad   : > { %5131 = vrot.lane.b32.xlu0 %v6333_v24, %s5573_s22 }
 0x9be   : > { %2949 = vmax.xlane.f32.xlu1 %v2948_v58 }
 0x9c2   : > { %2967 = vmax.xlane.f32.xlu1 %v2966_v60 }
 0x9c6   : > { %2961 = vmax.xlane.f32.xlu1 %v2960_v61 }
 0x9cc   : > { %3030 = vadd.xlane.f32.xlu0 %v3029_v43 }
 0x9d0   : > { %3024 = vadd.xlane.f32.xlu0 %v3023_v63 }
 0x9d7   : > { %5136 = vrot.lane.b32.xlu1 %v6325_v52, %s5572_s17 }
 0x9fb   : > { %3027 = vadd.xlane.f32.xlu1 %v3026_v6 }
 0x9ff   : > { %3021 = vadd.xlane.f32.xlu1 %v3020_v9 }
 0xa07   : > { %v2944_v17 = vpop.xlane.xlu1 %2943 }
 0xa08   : > { %v2978_v27 = vsub.f32 %v6381_v21, %v2944_v17 }
 0xa09   : > { %v2947_v12 = vpop.xlane.xlu0 %2946 }
 0xa0a   : > { %v3000_v13 = vmul.f32 1.442695, %v2978_v27  ;;  %v2979_v15 = vsub.f32 %v6387_v11, %v2947_v12 }
 0xa0c   : > { %5361 = vpow2.f32 %v3000_v13  ;;  %v3002_v20 = vmul.f32 1.442695, %v2979_v15 }
 0xa0e   : > { %5363 = vpow2.f32 %v3002_v20 }
 0xa12   : > { %v2956_v16 = vpop.xlane.xlu1 %2955 }
 0xa13   : > { %v2982_v23 = vsub.f32 %v6393_v35, %v2956_v16 }
 0xa14   : > { %v2959_v50 = vpop.xlane.xlu0 %2958 }
 0xa15   : > { %v3008_v39 = vmul.f32 1.442695, %v2982_v23  ;;  %v2983_v26 = vsub.f32 %v6399_v22, %v2959_v50 }
 0xa16   : > { %v6457_v25 = vpop.eup %5361  ;;  %v2938_v14 = vpop.xlane.xlu1 %2937 }
 0xa17   : > { %5365 = vpow2.f32 %v3008_v39  ;;  %v3010_v10 = vmul.f32 1.442695, %v2983_v26  ;;  %v2976_v21 = vsub.f32 %v6383_v8, %v2938_v14  ;;  %v3038_v11 = vsel %vm1203_vm0, %v6457_v25, 0.0 }
 0xa18   : > { %v6462_v41 = vpop.eup %5363  ;;  %v2941_v42 = vpop.xlane.xlu0 %2940  ;;  %3039 = vadd.xlane.f32.xlu1 %v3038_v11 }
 0xa19   : > { %5367 = vpow2.f32 %v3010_v10  ;;  %v2996_v35 = vmul.f32 1.442695, %v2976_v21  ;;  %v2977_v28 = vsub.f32 %v6389_v33, %v2941_v42  ;;  %v3041_v22 = vsel %vm1203_vm0, %v6462_v41, 0.0 }
 0xa1a   : > { %v5127_v48 = vpop.permute.xlu1 %5126  ;;  %3042 = vadd.xlane.f32.xlu0 %v3041_v22 }
 0xa1b   : > { %5369 = vpow2.f32 %v2996_v35  ;;  %v2998_v56 = vmul.f32 1.442695, %v2977_v28  ;;  %v5129_v46 = vunpack.i.h.bf16 %v5127_v48  ;;  %v5128_v8 = vunpack.i.l.bf16 %v5127_v48 }
 0xa1c   : > { %v2953_v30 = vpop.xlane.xlu0 %2952 }
 0xa1d   : > { %5371 = vpow2.f32 %v2998_v56  ;;  %v2674_v44 = vpack.c.bf16 %v5129_v46, %v5128_v8  ;;  %v2981_v45 = vsub.f32 %v6401_v40, %v2953_v30 }
 0xa1f   : > { %v3006_v47 = vmul.f32 1.442695, %v2981_v45  ;;  %4818 = vmatprep.subr.bf16.mxu1 %v2674_v44 }
 0xa20   : > { %4819 = vmatpush3.bf16.msra.mxu1 %v2674_v44  ;;  %v2971_v49 = vpop.xlane.xlu0 %2970 }
 0xa21   : > { %v6468_v32 = vpop.eup %5365  ;;  %5373 = vpow2.f32 %v3006_v47  ;;  %v2987_v33 = vsub.f32 %v6413_v18, %v2971_v49 }
 0xa22   : > { %v3050_v55 = vsel %vm1203_vm0, %v6468_v32, 0.0 }
 0xa23   : > { %v6473_v58 = vpop.eup %5367  ;;  %v3018_v59 = vmul.f32 1.442695, %v2987_v33  ;;  %3051 = vadd.xlane.f32.xlu1 %v3050_v55 }
 0xa24   : > { %v2965_v60 = vpop.xlane.xlu0 %2964  ;;  %v3053_v40 = vsel %vm1203_vm0, %v6473_v58, 0.0 }
 0xa25   : > { %v6477_v61 = vpop.eup %5369  ;;  %5375 = vpow2.f32 %v3018_v59  ;;  %v2985_v43 = vsub.f32 %v6415_v54, %v2965_v60  ;;  %3054 = vadd.xlane.f32.xlu0 %v3053_v40 }
 0xa26   : > { %v3032_v18 = vsel %vm1203_vm0, %v6477_v61, 0.0 }
 0xa27   : > { %v6482_v63 = vpop.eup %5371  ;;  %v3014_v1 = vmul.f32 1.442695, %v2985_v43  ;;  %3033 = vadd.xlane.f32.xlu1 %v3032_v18 }
 0xa28   : > { %v5132_v2 = vpop.permute.xlu0 %5131  ;;  %v3035_v3 = vsel %vm1203_vm0, %v6482_v63, 0.0 }
 0xa29   : > { %5377 = vpow2.f32 %v3014_v1  ;;  %v5134_v4 = vunpack.i.h.bf16 %v5132_v2  ;;  %v5133_v6 = vunpack.i.l.bf16 %v5132_v2  ;;  %3036 = vadd.xlane.f32.xlu0 %v3035_v3 }
 0xa2b   : > { %v6486_v9 = vpop.eup %5373  ;;  %v2675_v17 = vpack.c.bf16 %v5134_v4, %v5133_v6 }
 0xa2c   : > { %v3047_v54 = vsel %vm1203_vm0, %v6486_v9, 0.0 }
 0xa2d   : > { %3048 = vadd.xlane.f32.xlu0 %v3047_v54  ;;  %4820 = vmatprep.subr.bf16.mxu1 %v2675_v17 }
 0xa2e   : > { %4821 = vmatpush3.bf16.msra.mxu1 %v2675_v17 }
 0xa2f   : > { %v6490_v27 = vpop.eup %5375 }
 0xa30   : > { %v3065_v12 = vsel %vm1203_vm0, %v6490_v27, 0.0 }
 0xa31   : > { %3066 = vadd.xlane.f32.xlu0 %v3065_v12 }
 0xa33   : > { %v6494_v13 = vpop.eup %5377 }
 0xa34   : > { %v3059_v15 = vsel %vm1203_vm0, %v6494_v13, 0.0 }
 0xa35   : > { %3060 = vadd.xlane.f32.xlu0 %v3059_v15 }
 0xa4b   : > { %v2950_v20 = vpop.xlane.xlu1 %2949  ;;  %5141 = vrot.lane.b32.xlu0 %v6333_v24, %s5572_s17 }
 0xa4c   : > { %v2980_v16 = vsub.f32 %v6395_v38, %v2950_v20 }
 0xa4e   : > { %v3004_v23 = vmul.f32 1.442695, %v2980_v16 }
 0xa4f   : > { %v2968_v50 = vpop.xlane.xlu1 %2967 }
 0xa50   : > { %5379 = vpow2.f32 %v3004_v23  ;;  %v2986_v39 = vsub.f32 %v6409_v53, %v2968_v50 }
 0xa52   : > { %v3016_v26 = vmul.f32 1.442695, %v2986_v39 }
 0xa53   : > { %v2962_v14 = vpop.xlane.xlu1 %2961 }
 0xa54   : > { %5381 = vpow2.f32 %v3016_v26  ;;  %v2984_v10 = vsub.f32 %v6411_v57, %v2962_v14 }
 0xa56   : > { %v3012_v21 = vmul.f32 1.442695, %v2984_v10 }
 0xa57   : > { %v5137_v11 = vpop.permute.xlu1 %5136 }
 0xa58   : > { %5383 = vpow2.f32 %v3012_v21  ;;  %v5139_v42 = vunpack.i.h.bf16 %v5137_v11  ;;  %v5138_v35 = vunpack.i.l.bf16 %v5137_v11 }
 0xa59   : > { %v3031_v46 = vpop.xlane.xlu0 %3030 }
 0xa5a   : > { %v6503_v28 = vpop.eup %5379  ;;  %v2676_v22 = vpack.c.bf16 %v5139_v42, %v5138_v35 }
 0xa5b   : > { %v3044_v38 = vsel %vm1203_vm0, %v6503_v28, 0.0 }
 0xa5c   : > { %3045 = vadd.xlane.f32.xlu1 %v3044_v38  ;;  %4826 = vmatprep.subr.bf16.mxu0 %v2676_v22 }
 0xa5d   : > { %v3025_v8 = vpop.xlane.xlu0 %3024 }
 0xa5e   : > { %v6507_v48 = vpop.eup %5381 }
 0xa5f   : > { %v3062_v53 = vsel %vm1203_vm0, %v6507_v48, 0.0 }
 0xa60   : > { %3063 = vadd.xlane.f32.xlu1 %v3062_v53 }
 0xa62   : > { %v6511_v57 = vpop.eup %5383 }
 0xa63   : > { %v3056_v56 = vsel %vm1203_vm0, %v6511_v57, 0.0 }
 0xa64   : > { %3057 = vadd.xlane.f32.xlu1 %v3056_v56 }
 0xa75   : > { %5146 = vrot.lane.b32.xlu1 %v6325_v52, %s5574_s4 }
 0xa79   : > { %5151 = vrot.lane.b32.xlu1 %v6333_v24, %s5574_s4  ;;  %s6786_s4 = sld [smem:[#allocation20_spill]] }
 0xa88   : > { %v3028_v30 = vpop.xlane.xlu1 %3027 }
 0xa89   : > { %5385 = vrcp.f32 %v3028_v30 }
 0xa8a   : > { %5387 = vrcp.f32 %v3025_v8 }
 0xa8b   : > { %5389 = vrcp.f32 %v3031_v46 }
 0xa8c   : > { %v3022_v44 = vpop.xlane.xlu1 %3021 }
 0xa8d   : > { %5391 = vrcp.f32 %v3022_v44 }
 0xa93   : > { %v5386_v45 = vpop.eup %5385 }
 0xa94   : > { %v5388_v47 = vpop.eup %5387  ;;  %v3086_v55 = vmul.f32 %v5386_v45, %v6445_v5 }
 0xa95   : > { %v5390_v49 = vpop.eup %5389  ;;  %v3085_v52 = vmul.f32 %v5388_v47, %v6437_v19 }
 0xa96   : > { %v3087_v24 = vmul.f32 %v5390_v49, %v6433_v62  ;;  %v5232_v49 = vld [vmem:[%s6743_s12 + $0x8] sm:$0xff]  }
 0xa97   : > { %v5392_v33 = vpop.eup %5391 }
 0xa98   : > { %v3084_v59 = vmul.f32 %v5392_v33, %v6449_v7  ;;  %v3101_v40 = vpack.c.bf16 %v3087_v24, %v3086_v55 }
 0xa9a   : > { %v3100_v60 = vpack.c.bf16 %v3085_v52, %v3084_v59 }
 0xa9c   : > { %4814 = vmatprep.mubr.msk.bf16.mxu0 %vm1203_vm0, %v3100_v60  ;;  %v5233_v60 = vld [vmem:[%s6743_s12 + $0x10] sm:$0xff]  }
 0xa9d   : > { %4815 = vmatmul.mubr.msk.bf16.vlgmr.msra.gmra.mrb[36].mxu0 %vm1203_vm0, %v3101_v40 }
 0xa9e   : > { %4827 = vmatpush3.bf16.msra.mxu0 %v2676_v22 }
 0xaa5   : > { %v3040_v43 = vpop.xlane.xlu1 %3039 }
 0xaa7   : > { %v3043_v18 = vpop.xlane.xlu0 %3042 }
 0xaa8   : > { %5393 = vrcp.f32 %v3043_v18 }
 0xab0   : > { %v3052_v1 = vpop.xlane.xlu1 %3051 }
 0xab2   : > { %v3055_v2 = vpop.xlane.xlu0 %3054  ;;  %v5394_v7 = vpop.eup %5393 }
 0xab3   : > { %v3091_v54 = vmul.f32 %v5394_v7, %v6462_v41  ;;  %v5231_v41 = vld [vmem:[%s6743_s12] sm:$0xff]  }
 0xab4   : > { %v3034_v3 = vpop.xlane.xlu1 %3033  ;;  %v5235_v7 = vld [vmem:[%s6743_s12 + $0x20] sm:$0xff]  }
 0xab5   : > { %5395 = vrcp.f32 %v3034_v3 }
 0xab6   : > { %5397 = vrcp.f32 %v3040_v43  ;;  %v3037_v5 = vpop.xlane.xlu0 %3036 }
 0xab7   : > { %5399 = vrcp.f32 %v3037_v5 }
 0xab8   : > { %5401 = vrcp.f32 %v3055_v2 }
 0xaba   : > { %v3049_v19 = vpop.xlane.xlu0 %3048 }
 0xabb   : > { %5403 = vrcp.f32 %v3049_v19 }
 0xabc   : > { %5405 = vrcp.f32 %v3052_v1 }
 0xabe   : > { %v3067_v62 = vpop.xlane.xlu0 %3066 }
 0xabf   : > { %v5396_v4 = vpop.eup %5395 }
 0xac0   : > { %v5398_v6 = vpop.eup %5397  ;;  %v3088_v15 = vmul.f32 %v5396_v4, %v6477_v61 }
 0xac1   : > { %v5400_v17 = vpop.eup %5399  ;;  %v3090_v16 = vmul.f32 %v5398_v6, %v6457_v25 }
 0xac2   : > { %v3061_v12 = vpop.xlane.xlu0 %3060  ;;  %v3089_v20 = vmul.f32 %v5400_v17, %v6482_v63  ;;  %v5402_v63 = vpop.eup %5401 }
 0xac3   : > { %v3103_v50 = vpack.c.bf16 %v3091_v54, %v3090_v16  ;;  %v3095_v22 = vmul.f32 %v5402_v63, %v6473_v58 }
 0xac4   : > { %v3102_v23 = vpack.c.bf16 %v3089_v20, %v3088_v15  ;;  %v5236_v15 = vld [vmem:[%s6743_s12 + $0x28] sm:$0xff]   ;;  %v5237_v20 = vld [vmem:[%s6743_s12 + $0x30] sm:$0xff]  }
 0xac5   : > { %v5404_v11 = vpop.eup %5403 }
 0xac6   : > { %4822 = vmatprep.mubr.msk.bf16.mxu1 %vm1203_vm0, %v3102_v23  ;;  %v5142_v39 = vpop.permute.xlu0 %5141  ;;  %v5406_v42 = vpop.eup %5405  ;;  %v3093_v56 = vmul.f32 %v5404_v11, %v6486_v9 }
 0xac7   : > { %v5144_v26 = vunpack.i.h.bf16 %v5142_v39  ;;  %v5143_v14 = vunpack.i.l.bf16 %v5142_v39  ;;  %4823 = vmatmul.mubr.msk.bf16.vlgmr.msra.gmra.mrb[40].mxu1 %vm1203_vm0, %v3103_v50  ;;  %v3094_v46 = vmul.f32 %v5406_v42, %v6468_v32  ;;  %v4412_v42 = vld [vmem:[%s6744_s13] ss:$0 sm:$0xff] }
 0xac9   : > { %v2677_v10 = vpack.c.bf16 %v5144_v26, %v5143_v14  ;;  %v3105_v47 = vpack.c.bf16 %v3095_v22, %v3094_v46 }
 0xacb   : > { %4828 = vmatprep.subr.bf16.mxu0 %v2677_v10 }
 0xacc   : > { %4829 = vmatpush3.bf16.msra.mxu0 %v2677_v10  ;;  %v5238_v10 = vld [vmem:[%s6743_s12 + $0x38] sm:$0xff]  }
 0xacd   : > { %4842 = vmatprep.subr.bf16.mxu0 %v5231_v41 }
 0xae9   : > { %v3046_v25 = vpop.xlane.xlu1 %3045 }
 0xaea   : > { %5407 = vrcp.f32 %v3046_v25 }
 0xaed   : > { %v3064_v61 = vpop.xlane.xlu1 %3063 }
 0xaee   : > { %5409 = vrcp.f32 %v3064_v61 }
 0xaef   : > { %5411 = vrcp.f32 %v3061_v12 }
 0xaf0   : > { %5413 = vrcp.f32 %v3067_v62 }
 0xaf1   : > { %v3058_v21 = vpop.xlane.xlu1 %3057 }
 0xaf2   : > { %5415 = vrcp.f32 %v3058_v21 }
 0xaf4   : > { %v5408_v35 = vpop.eup %5407 }
 0xaf5   : > { %v5147_v38 = vpop.permute.xlu1 %5146  ;;  %v3092_v53 = vmul.f32 %v5408_v35, %v6503_v28 }
 0xaf6   : > { %v5149_v8 = vunpack.i.h.bf16 %v5147_v38  ;;  %v5148_v30 = vunpack.i.l.bf16 %v5147_v38 }
 0xaf7   : > { %v3104_v44 = vpack.c.bf16 %v3093_v56, %v3092_v53 }
 0xaf8   : > { %v2678_v45 = vpack.c.bf16 %v5149_v8, %v5148_v30  ;;  %v5410_v33 = vpop.eup %5409 }
 0xaf9   : > { %v5152_v55 = vpop.permute.xlu1 %5151  ;;  %4830 = vmatprep.mubr.msk.bf16.mxu0 %vm1203_vm0, %v3104_v44  ;;  %v5412_v58 = vpop.eup %5411  ;;  %v3098_v52 = vmul.f32 %v5410_v33, %v6507_v48  ;;  %v5239_v33 = vld [vmem:[%s6747_s16] ss:$8 sps:$4 sm:$0xff]  }
 0xafa   : > { %v5154_v59 = vunpack.i.h.bf16 %v5152_v55  ;;  %v5153_v28 = vunpack.i.l.bf16 %v5152_v55  ;;  %4831 = vmatmul.mubr.msk.bf16.vlgmr.msra.gmra.mrb[40].mxu0 %vm1203_vm0, %v3105_v47  ;;  %4834 = vmatprep.subr.bf16.mxu1 %v2678_v45  ;;  %v5414_v32 = vpop.eup %5413  ;;  %v3097_v43 = vmul.f32 %v5412_v58, %v6494_v13 }
 0xafb   : > { %4835 = vmatpush3.bf16.msra.mxu1 %v2678_v45  ;;  %4843 = vmatpush3.bf16.msra.mxu0 %v5231_v41  ;;  %v3099_v18 = vmul.f32 %v5414_v32, %v6490_v27  ;;  %v5234_v27 = vld [vmem:[%s6743_s12 + $0x18] sm:$0xff]  }
 0xafc   : > { %v5416_v9 = vpop.eup %5415  ;;  %v2679_v24 = vpack.c.bf16 %v5154_v59, %v5153_v28  ;;  %4844 = vmatprep.subr.bf16.mxu0 %v5232_v49 }
 0xafd   : > { %v3096_v40 = vmul.f32 %v5416_v9, %v6511_v57  ;;  %v3107_v2 = vpack.c.bf16 %v3099_v18, %v3098_v52 }
 0xafe   : > { %4836 = vmatprep.subr.bf16.mxu1 %v2679_v24 }
 0xaff   : > { %4837 = vmatpush3.bf16.msra.mxu1 %v2679_v24  ;;  %v3106_v1 = vpack.c.bf16 %v3097_v43, %v3096_v40  ;;  %4845 = vmatpush3.bf16.msra.mxu0 %v5232_v49 }
 0xb00   : > { %4850 = vmatprep.subr.bf16.mxu0 %v5233_v60 }
 0xb01   : > { %4838 = vmatprep.mubr.msk.bf16.mxu1 %vm1203_vm0, %v3106_v1 }
 0xb02   : > { %4839 = vmatmul.mubr.msk.bf16.vlgmr.msra.gmra.mrb[44].mxu1 %vm1203_vm0, %v3107_v2 }
 0xb03   : > { %3858 = vmatprep.mubr.bf16.mxu1 %v5571_v0 }
 0xb70   : > { %v4816_v48 = vpop.f32.mrb[36].mxu0 }
 0xb71   : > { %v3148_v3 = vpop.f32.mrb[37].mxu0 }
 0xb72   : > { %v4817_v5 = vpop.f32.mrb[38].mxu0 }
 0xb73   : > { %v3329_v57 = vpack.c.bf16 %v4817_v5, %v4816_v48  ;;  %v3151_v19 = vpop.f32.mrb[39].mxu0  ;;  %v5245_v5 = vld [vmem:[%s6747_s16 + $0x20] ss:$8 sps:$4 sm:$0xff]  }
 0xb74   : > { %v3328_v13 = vpack.c.bf16 %v3151_v19, %v3148_v3  ;;  %v5247_v3 = vld [vmem:[%s6747_s16 + $0x24] ss:$8 sps:$4 sm:$0xff]   ;;  %v5248_v19 = vld [vmem:[%s6747_s16 + $0x30] ss:$8 sps:$4 sm:$0xff]  }
 0xb76   : > { %4846 = vmatprep.mubr.msk.bf16.mxu0 %vm1203_vm0, %v3328_v13  ;;  %v5253_v13 = vld [vmem:[%s6747_s16 + $0x44] ss:$8 sps:$4 sm:$0xff]  }
 0xb77   : > { %4847 = vmatmul.mubr.msk.bf16.vlgmr.msra.gmra.mrb[44].mxu0 %vm1203_vm0, %v3329_v57  ;;  %v5250_v57 = vld [vmem:[%s6747_s16 + $0x34] ss:$8 sps:$4 sm:$0xff]  }
 0xb78   : > { %4851 = vmatpush3.bf16.msra.mxu0 %v5233_v60 }
 0xb79   : > { %4852 = vmatprep.subr.bf16.mxu0 %v5234_v27 }
 0xb7c   : > { %4853 = vmatpush3.bf16.msra.mxu0 %v5234_v27  ;;  %v5251_v27 = vld [vmem:[%s6747_s16 + $0x40] ss:$8 sps:$4 sm:$0xff]  }
 0xb7d   : > { %4858 = vmatprep.subr.bf16.mxu0 %v5235_v7 }
 0xb9a   : > { %v4824_v62 = vpop.f32.mrb[40].mxu1 }
 0xb9b   : > { %v3203_v4 = vpop.f32.mrb[41].mxu1 }
 0xb9c   : > { %v4825_v6 = vpop.f32.mrb[42].mxu1 }
 0xb9d   : > { %v3331_v17 = vpack.c.bf16 %v4825_v6, %v4824_v62  ;;  %v3206_v54 = vpop.f32.mrb[43].mxu1  ;;  %v5254_v62 = vld [vmem:[%s6747_s16 + $0x50] ss:$8 sps:$4 sm:$0xff]   ;;  %v5257_v6 = vld [vmem:[%s6747_s16 + $0x60] ss:$8 sps:$4 sm:$0xff]  }
 0xb9e   : > { %v3330_v12 = vpack.c.bf16 %v3206_v54, %v3203_v4  ;;  %v5259_v4 = vld [vmem:[%s6747_s16 + $0x64] ss:$8 sps:$4 sm:$0xff]   ;;  %v5260_v54 = vld [vmem:[%s6747_s16 + $0x70] ss:$8 sps:$4 sm:$0xff]  }
 0xba0   : > { %4854 = vmatprep.mubr.msk.bf16.mxu0 %vm1203_vm0, %v3330_v12  ;;  %v5263_v12 = vld [vmem:[%s6749_s18 + $0x40] sm:$0xff]  }
 0xba1   : > { %4855 = vmatmul.mubr.msk.bf16.vlgmr.msra.gmra.mrb[44].mxu0 %vm1203_vm0, %v3331_v17  ;;  %v5262_v17 = vld [vmem:[%s6747_s16 + $0x74] ss:$8 sps:$4 sm:$0xff]  }
 0xba2   : > { %4859 = vmatpush3.bf16.msra.mxu0 %v5235_v7  ;;  %v5256_v7 = vld [vmem:[%s6747_s16 + $0x54] ss:$8 sps:$4 sm:$0xff]  }
 0xba3   : > { %4860 = vmatprep.subr.bf16.mxu0 %v5236_v15 }
 0xba6   : > { %4861 = vmatpush3.bf16.msra.mxu0 %v5236_v15  ;;  %v5264_v15 = vld [vmem:[%s6749_s18] sm:$0xff]  }
 0xba7   : > { %4866 = vmatprep.subr.bf16.mxu0 %v5237_v20 }
 0xbcd   : > { %v4832_v16 = vpop.f32.mrb[40].mxu0 }
 0xbce   : > { %v3258_v23 = vpop.f32.mrb[41].mxu0 }
 0xbcf   : > { %v4833_v50 = vpop.f32.mrb[42].mxu0 }
 0xbd0   : > { %v3333_v39 = vpack.c.bf16 %v4833_v50, %v4832_v16  ;;  %v3261_v26 = vpop.f32.mrb[43].mxu0  ;;  %v5266_v16 = vld [vmem:[%s6749_s18 + $0x8] sm:$0xff]   ;;  %v5268_v50 = vld [vmem:[%s6749_s18 + $0x10] sm:$0xff]  }
 0xbd1   : > { %v3332_v14 = vpack.c.bf16 %v3261_v26, %v3258_v23  ;;  %v5267_v23 = vld [vmem:[%s6749_s18 + $0x50] sm:$0xff]   ;;  %v5270_v26 = vld [vmem:[%s6749_s18 + $0x18] sm:$0xff]  }
 0xbd3   : > { %4862 = vmatprep.mubr.msk.bf16.mxu0 %vm1203_vm0, %v3332_v14  ;;  %v5271_v14 = vld [vmem:[%s6749_s18 + $0x60] sm:$0xff]  }
 0xbd4   : > { %4863 = vmatmul.mubr.msk.bf16.vlgmr.msra.gmra.mrb[44].mxu0 %vm1203_vm0, %v3333_v39  ;;  %v5269_v39 = vld [vmem:[%s6749_s18 + $0x58] sm:$0xff]  }
 0xbd5   : > { %v4840_v41 = vpop.f32.mrb[44].mxu1  ;;  %4867 = vmatpush3.bf16.msra.mxu0 %v5237_v20  ;;  %v5265_v20 = vld [vmem:[%s6749_s18 + $0x48] sm:$0xff]  }
 0xbd6   : > { %v3313_v25 = vpop.f32.mrb[45].mxu1  ;;  %4868 = vmatprep.subr.bf16.mxu0 %v5238_v10 }
 0xbd7   : > { %v4841_v61 = vpop.f32.mrb[46].mxu1 }
 0xbd8   : > { %v3335_v63 = vpack.c.bf16 %v4841_v61, %v4840_v41  ;;  %v3316_v21 = vpop.f32.mrb[47].mxu1  ;;  %v5273_v41 = vld [vmem:[%s6749_s18 + $0x68] sm:$0xff]  }
 0xbd9   : > { %v3334_v11 = vpack.c.bf16 %v3316_v21, %v3313_v25  ;;  %4869 = vmatpush3.bf16.msra.mxu0 %v5238_v10  ;;  %v5272_v10 = vld [vmem:[%s6749_s18 + $0x20] sm:$0xff]  }
 0xbda   : > { %4614 = vmatprep.subr.bf16.mxu0 %v5263_v12 }
 0xbdb   : > { %4870 = vmatprep.mubr.msk.bf16.mxu0 %vm1203_vm0, %v3334_v11 }
 0xbe0   : > { %4871 = vmatmul.mubr.msk.bf16.vlgmr.msra.gmra.mrb[44].mxu0 %vm1203_vm0, %v3335_v63 }
 0xbe1   : > { %4615 = vmatpush3.bf16.msra.mxu0 %v5264_v15 }
 0xbe2   : > { %4616 = vmatprep.subr.bf16.mxu0 %v5265_v20 }
 0xbe5   : > { %4617 = vmatpush3.bf16.msra.mxu0 %v5266_v16 }
 0xbe6   : > { %4618 = vmatprep.subr.bf16.mxu0 %v5267_v23 }
 0xbe9   : > { %4619 = vmatpush3.bf16.msra.mxu0 %v5268_v50 }
 0xbea   : > { %4620 = vmatprep.subr.bf16.mxu0 %v5269_v39 }
 0xbed   : > { %4621 = vmatpush3.bf16.msra.mxu0 %v5270_v26 }
 0xbee   : > { %4622 = vmatprep.subr.bf16.mxu0 %v5271_v14 }
 0xbf1   : > { %4623 = vmatpush3.bf16.msra.mxu0 %v5272_v10 }
 0xbf2   : > { %4624 = vmatprep.subr.bf16.mxu0 %v5273_v41 }
 0xcb3   : > { %v4872_v35 = vpop.f32.mrb[44].mxu0 }
 0xcb4   : > { %v3627_v22 = vpop.f32.mrb[45].mxu0  ;;  %v4878_v46 = vadd.f32 %v4872_v35, %v4412_v42 }
 0xcb5   : > { %v4879_v38 = vadd.f32 %v4412_v42, %v3627_v22  ;;  %v4873_v53 = vpop.f32.mrb[46].mxu0 }
 0xcb6   : > { %v3630_v56 = vpop.f32.mrb[47].mxu0  ;;  %v3648_v45 = vadd.f32 %v4878_v46, %v6309_v37  ;;  %v4880_v47 = vadd.f32 %v4873_v53, %v4412_v42  ;;  %v5242_v37 = vld [vmem:[%s6747_s16 + $0x10] ss:$8 sps:$4 sm:$0xff]  }
 0xcb7   : > { %v3646_v8 = vadd.f32 %v4879_v38, %v6302_v36  ;;  %v4881_v30 = vadd.f32 %v4412_v42, %v3630_v56  ;;  %v5241_v36 = vld [vmem:[%s6747_s16 + $0x4] ss:$8 sps:$4 sm:$0xff]  }
 0xcb8   : > { %v3649_v49 = vadd.f32 %v4880_v47, %v6311_v34  ;;  %3826 = vmatprep.subr.bf16.mxu1 %v5241_v36  ;;  %v4438_v36 = vld [vmem:[#allocation2] ss:$0 sm:$0xff] }
 0xcb9   : > { %v3647_v44 = vadd.f32 %v4881_v30, %v6304_v51  ;;  %3650 = vadd.xlane.f32.xlu0 %v3646_v8  ;;  %v5244_v51 = vld [vmem:[%s6747_s16 + $0x14] ss:$8 sps:$4 sm:$0xff]   ;;  %3827 = vmatpush1.bf16.msra.mxu1 %v5239_v33  ;;  %v4437_v30 = vld [vmem:[%s6745_s14] ss:$0 sm:$0xff] }
 0xcba   : > { %3828 = vmatprep.subr.bf16.mxu1 %v5244_v51 }
 0xcbb   : > { %3652 = vadd.xlane.f32.xlu1 %v3647_v44 }
 0xcbd   : > { %3654 = vadd.xlane.f32.xlu0 %v3648_v45  ;;  %3829 = vmatpush1.bf16.msra.mxu1 %v5242_v37 }
 0xcbe   : > { %3830 = vmatprep.subr.bf16.mxu1 %v5247_v3 }
 0xcc1   : > { %3656 = vadd.xlane.f32.xlu0 %v3649_v49  ;;  %3831 = vmatpush1.bf16.msra.mxu1 %v5245_v5 }
 0xcc2   : > { %3832 = vmatprep.subr.bf16.mxu1 %v5250_v57 }
 0xcc5   : > { %3833 = vmatpush1.bf16.msra.mxu1 %v5248_v19 }
 0xcc6   : > { %3834 = vmatprep.subr.bf16.mxu1 %v5253_v13 }
 0xcc9   : > { %3835 = vmatpush1.bf16.msra.mxu1 %v5251_v27 }
 0xcca   : > { %3836 = vmatprep.subr.bf16.mxu1 %v5256_v7 }
 0xccd   : > { %3837 = vmatpush1.bf16.msra.mxu1 %v5254_v62 }
 0xcce   : > { %3838 = vmatprep.subr.bf16.mxu1 %v5259_v4 }
 0xcd1   : > { %3839 = vmatpush1.bf16.msra.mxu1 %v5257_v6 }
 0xcd2   : > { %3840 = vmatprep.subr.bf16.mxu1 %v5262_v17 }
 0xcd5   : > { %3841 = vmatpush1.bf16.msra.mxu1 %v5260_v54 }
 0xd46   : > { %v3651_v34 = vpop.xlane.xlu0 %3650 }
 0xd47   : > { %v3658_v55 = vmul.f32 0.0078125, %v3651_v34 }
 0xd48   : > { %v3653_v58 = vpop.xlane.xlu1 %3652 }
 0xd49   : > { %v6595_v59 = vsub.f32 %v3646_v8, %v3658_v55  ;;  %v3659_v28 = vmul.f32 0.0078125, %v3653_v58 }
 0xd4a   : > { %v3655_v32 = vpop.xlane.xlu0 %3654 }
 0xd4b   : > { %v6597_v9 = vsub.f32 %v3647_v44, %v3659_v28  ;;  %v3660_v52 = vmul.f32 0.0078125, %v3655_v32  ;;  %v3666_v24 = vmul.f32 %v6595_v59, %v6595_v59 }
 0xd4d   : > { %v6601_v60 = vsub.f32 %v3648_v45, %v3660_v52  ;;  %3670 = vadd.xlane.f32.xlu1 %v3666_v24  ;;  %v3667_v40 = vmul.f32 %v6597_v9, %v6597_v9 }
 0xd4e   : > { %v3657_v43 = vpop.xlane.xlu0 %3656 }
 0xd4f   : > { %v3661_v18 = vmul.f32 0.0078125, %v3657_v43  ;;  %3672 = vadd.xlane.f32.xlu0 %v3667_v40  ;;  %v3668_v1 = vmul.f32 %v6601_v60, %v6601_v60  ;;  %v5275_v43 = vld [vmem:[%s6749_s18 + $0x70] sm:$0xff]  }
 0xd51   : > { %v6607_v2 = vsub.f32 %v3649_v49, %v3661_v18  ;;  %3674 = vadd.xlane.f32.xlu1 %v3668_v1  ;;  %v5277_v18 = vld [vmem:[%s6749_s18 + $0x78] sm:$0xff]  }
 0xd52   : > { %v5278_v1 = vld [vmem:[%s6749_s18 + $0x38] sm:$0xff]  }
 0xd53   : > { %v3669_v48 = vmul.f32 %v6607_v2, %v6607_v2 }
 0xd55   : > { %3676 = vadd.xlane.f32.xlu0 %v3669_v48 }
 0xdda   : > { %v3671_v25 = vpop.xlane.xlu1 %3670 }
 0xddb   : > { %v3678_v61 = vmul.f32 0.0078125, %v3671_v25 }
 0xddc   : > { %v3673_v63 = vpop.xlane.xlu0 %3672 }
 0xddd   : > { %v3682_v21 = vadd.f32 1e-05, %v3678_v61  ;;  %v3679_v11 = vmul.f32 0.0078125, %v3673_v63 }
 0xdde   : > { %v3675_v42 = vpop.xlane.xlu1 %3674 }
 0xddf   : > { %5417 = vrsqrt.f32 %v3682_v21  ;;  %v3683_v35 = vadd.f32 1e-05, %v3679_v11  ;;  %v3680_v22 = vmul.f32 0.0078125, %v3675_v42  ;;  %v4455_v42 = vld [vmem:[#allocation4] ss:$0 sm:$0xff] }
 0xde1   : > { %5419 = vrsqrt.f32 %v3683_v35  ;;  %v3684_v38 = vadd.f32 1e-05, %v3680_v22 }
 0xde2   : > { %v3677_v53 = vpop.xlane.xlu0 %3676 }
 0xde3   : > { %5421 = vrsqrt.f32 %v3684_v38  ;;  %v3681_v56 = vmul.f32 0.0078125, %v3677_v53 }
 0xde5   : > { %v3685_v46 = vadd.f32 1e-05, %v3681_v56 }
 0xde7   : > { %5423 = vrsqrt.f32 %v3685_v46 }
 0xde9   : > { %v5418_v8 = vpop.eup %5417 }
 0xdea   : > { %v3690_v44 = vmul.f32 %v5418_v8, %v6595_v59 }
 0xdeb   : > { %v5420_v45 = vpop.eup %5419 }
 0xdec   : > { %v3691_v47 = vmul.f32 %v5420_v45, %v6597_v9  ;;  %v3701_v49 = vmul.f32 %v4437_v30, %v3690_v44 }
 0xded   : > { %v5422_v33 = vpop.eup %5421 }
 0xdee   : > { %v3702_v51 = vmul.f32 %v4437_v30, %v3691_v47  ;;  %v6685_v37 = vadd.f32 %v4438_v36, %v3701_v49  ;;  %v3692_v55 = vmul.f32 %v5422_v33, %v6601_v60  ;;  %v5274_v60 = vld [vmem:[%s6749_s18 + $0x28] sm:$0xff]  }
 0xdef   : > { %4625 = vmatpush3.bf16.msra.mxu0 %v5274_v60 }
 0xdf0   : > { %v6687_v34 = vadd.f32 %v4438_v36, %v3702_v51  ;;  %v3703_v59 = vmul.f32 %v4437_v30, %v3692_v55  ;;  %4626 = vmatprep.subr.bf16.mxu0 %v5275_v43 }
 0xdf1   : > { %v5424_v58 = vpop.eup %5423 }
 0xdf2   : > { %v3716_v28 = vpack.c.bf16 %v6687_v34, %v6685_v37  ;;  %v3693_v32 = vmul.f32 %v5424_v58, %v6607_v2  ;;  %v6696_v24 = vadd.f32 %v4438_v36, %v3703_v59  ;;  %v3734_v2 = vld [vmem:[%s6786_s4] sm:$0x3] }
 0xdf3   : > { %v3739_v48 = vrot.slane %v3734_v2, %v5918_v29  ;;  %v3743_v3 = vrot.slane %v3734_v2, %v5926_v31 }
 0xdf4   : > { %3859 = vmatmul.mubr.bf16.vlgmr.msra.gmra.mrb[48].mxu1 %v3716_v28  ;;  %v3704_v52 = vmul.f32 %v4437_v30, %v3693_v32 }
 0xdf5   : > { %3868 = vmatprep.mubr.bf16.mxu1 %v5571_v0  ;;  %v5276_v0 = vld [vmem:[%s6749_s18 + $0x30] sm:$0xff]  }
 0xdf6   : > { %v6694_v9 = vadd.f32 %v4438_v36, %v3704_v52  ;;  %4627 = vmatpush3.bf16.msra.mxu0 %v5276_v0 }
 0xdf7   : > { %4628 = vmatprep.subr.bf16.mxu0 %v5277_v18 }
 0xdf8   : > { %v3717_v40 = vpack.c.bf16 %v6694_v9, %v6696_v24 }
 0xdfa   : > { %4629 = vmatpush3.bf16.msra.mxu0 %v5278_v1 }
 0xdfc   : > { %3869 = vmatmul.mubr.bf16.gmra.mrb[52].mxu1 %v3717_v40 }
 0xec7   : > { %v3860_v5 = vpop.f32.mrb[48].mxu1 }
 0xec8   : > { %v3861_v57 = vadd.f32 %v3860_v5, %v3739_v48  ;;  %v3862_v19 = vpop.f32.mrb[49].mxu1 }
 0xec9   : > { %v3863_v13 = vadd.f32 %v3862_v19, %v3743_v3  ;;  %v3864_v27 = vpop.f32.mrb[50].mxu1 }
 0xeca   : > { %v3865_v7 = vadd.f32 %v3864_v27, %v3739_v48  ;;  %v3866_v62 = vpop.f32.mrb[51].mxu1  ;;  %v3879_v6 = vmax.f32 %v3861_v57, 0.0 }
 0xecb   : > { %v3867_v4 = vadd.f32 %v3866_v62, %v3743_v3  ;;  %v3880_v54 = vmax.f32 %v3863_v13, 0.0 }
 0xecc   : > { %v3881_v17 = vmax.f32 %v3865_v7, 0.0 }
 0xecd   : > { %v3882_v12 = vmax.f32 %v3867_v4, 0.0 }
 0xece   : > { %v3887_v15 = vpack.c.bf16 %v3881_v17, %v3879_v6 }
 0xecf   : > { %v3888_v20 = vpack.c.bf16 %v3882_v12, %v3880_v54  ;;  %v3870_v16 = vpop.f32.mrb[52].mxu1 }
 0xed0   : > { %v3871_v23 = vadd.f32 %v3870_v16, %v3739_v48  ;;  %v3872_v50 = vpop.f32.mrb[53].mxu1  ;;  %v4472_v16 = vld [vmem:[#allocation6] ss:$0 sm:$0xff] }
 0xed1   : > { %v3873_v29 = vadd.f32 %v3872_v50, %v3743_v3  ;;  %v3874_v39 = vpop.f32.mrb[54].mxu1  ;;  %4058 = vmatprep.mubr.bf16.mxu0 %v3888_v20 }
 0xed2   : > { %v3875_v31 = vadd.f32 %v3874_v39, %v3739_v48  ;;  %v3876_v26 = vpop.f32.mrb[55].mxu1  ;;  %4059 = vmatmul.mubr.bf16.vlgmr.msra.gmra.mrb[48].mxu0 %v3887_v15  ;;  %v3883_v10 = vmax.f32 %v3871_v23, 0.0 }
 0xed3   : > { %v3877_v14 = vadd.f32 %v3876_v26, %v3743_v3  ;;  %v3884_v25 = vmax.f32 %v3873_v29, 0.0 }
 0xed4   : > { %v3885_v41 = vmax.f32 %v3875_v31, 0.0  ;;  %v4473_v31 = vld [vmem:[#allocation7] ss:$0 sm:$0xff] }
 0xed5   : > { %v3886_v61 = vmax.f32 %v3877_v14, 0.0 }
 0xed6   : > { %v3889_v63 = vpack.c.bf16 %v3885_v41, %v3883_v10 }
 0xed7   : > { %v3890_v21 = vpack.c.bf16 %v3886_v61, %v3884_v25 }
 0xed9   : > { %4066 = vmatprep.mubr.bf16.mxu0 %v3890_v21 }
 0xeda   : > { %4067 = vmatmul.mubr.bf16.gmra.mrb[52].mxu0 %v3889_v63 }
 0xfa5   : > { %v4630_v11 = vpop.f32.mrb[48].mxu0 }
 0xfa6   : > { %v4631_v35 = vpop.f32.mrb[49].mxu0 }
 0xfa7   : > { %v4632_v22 = vadd.f32 %v4631_v35, %v4630_v11  ;;  %v4633_v38 = vpop.f32.mrb[50].mxu0 }
 0xfa8   : > { %v4634_v53 = vpop.f32.mrb[51].mxu0 }
 0xfa9   : > { %v4061_v56 = vadd.f32 %v4632_v22, %v4455_v42  ;;  %v4635_v46 = vadd.f32 %v4634_v53, %v4633_v38 }
 0xfab   : > { %v4064_v8 = vadd.f32 %v4635_v46, %v4455_v42  ;;  %v4075_v30 = vadd.f32 %v4061_v56, %v6685_v37 }
 0xfad   : > { %4079 = vadd.xlane.f32.xlu1 %v4075_v30  ;;  %v4636_v44 = vpop.f32.mrb[52].mxu0  ;;  %v4076_v45 = vadd.f32 %v4064_v8, %v6687_v34 }
 0xfae   : > { %v4637_v47 = vpop.f32.mrb[53].mxu0 }
 0xfaf   : > { %v4638_v49 = vadd.f32 %v4637_v47, %v4636_v44  ;;  %4081 = vadd.xlane.f32.xlu0 %v4076_v45  ;;  %v4639_v33 = vpop.f32.mrb[54].mxu0 }
 0xfb0   : > { %v4640_v36 = vpop.f32.mrb[55].mxu0 }
 0xfb1   : > { %v4069_v51 = vadd.f32 %v4638_v49, %v4455_v42  ;;  %v4641_v55 = vadd.f32 %v4640_v36, %v4639_v33 }
 0xfb3   : > { %v4072_v58 = vadd.f32 %v4641_v55, %v4455_v42  ;;  %v4077_v28 = vadd.f32 %v4069_v51, %v6696_v24 }
 0xfb5   : > { %4083 = vadd.xlane.f32.xlu1 %v4077_v28  ;;  %v4078_v32 = vadd.f32 %v4072_v58, %v6694_v9 }
 0xfb7   : > { %4085 = vadd.xlane.f32.xlu0 %v4078_v32 }
0x103a   : > { %v4080_v59 = vpop.xlane.xlu1 %4079 }
0x103b   : > { %v4087_v37 = vmul.f32 0.0078125, %v4080_v59 }
0x103c   : > { %v4082_v52 = vpop.xlane.xlu0 %4081 }
0x103d   : > { %v4091_v40 = vsub.f32 %v4075_v30, %v4087_v37  ;;  %v4088_v60 = vmul.f32 0.0078125, %v4082_v52 }
0x103f   : > { %v4092_v34 = vsub.f32 %v4076_v45, %v4088_v60  ;;  %v4095_v43 = vmul.f32 %v4091_v40, %v4091_v40 }
0x1041   : > { %4099 = vadd.xlane.f32.xlu1 %v4095_v43  ;;  %v4096_v0 = vmul.f32 %v4092_v34, %v4092_v34 }
0x1042   : > { %v4084_v18 = vpop.xlane.xlu1 %4083 }
0x1043   : > { %v4089_v1 = vmul.f32 0.0078125, %v4084_v18  ;;  %4101 = vadd.xlane.f32.xlu0 %v4096_v0 }
0x1044   : > { %v4086_v2 = vpop.xlane.xlu0 %4085 }
0x1045   : > { %v4093_v48 = vsub.f32 %v4077_v28, %v4089_v1  ;;  %v4090_v3 = vmul.f32 0.0078125, %v4086_v2 }
0x1047   : > { %v4094_v24 = vsub.f32 %v4078_v32, %v4090_v3  ;;  %v4097_v5 = vmul.f32 %v4093_v48, %v4093_v48 }
0x1049   : > { %4103 = vadd.xlane.f32.xlu1 %v4097_v5  ;;  %v4098_v9 = vmul.f32 %v4094_v24, %v4094_v24 }
0x104b   : > { %4105 = vadd.xlane.f32.xlu0 %v4098_v9 }
0x10ce   : > { %v4100_v57 = vpop.xlane.xlu1 %4099 }
0x10cf   : > { %v4107_v19 = vmul.f32 0.0078125, %v4100_v57 }
0x10d0   : > { %v4102_v13 = vpop.xlane.xlu0 %4101 }
0x10d1   : > { %v4111_v27 = vadd.f32 1e-05, %v4107_v19  ;;  %v4108_v7 = vmul.f32 0.0078125, %v4102_v13 }
0x10d3   : > { %5425 = vrsqrt.f32 %v4111_v27  ;;  %v4112_v62 = vadd.f32 1e-05, %v4108_v7 }
0x10d5   : > { %5427 = vrsqrt.f32 %v4112_v62 }
0x10d6   : > { %v4104_v4 = vpop.xlane.xlu1 %4103 }
0x10d7   : > { %v4109_v6 = vmul.f32 0.0078125, %v4104_v4 }
0x10d8   : > { %v4106_v17 = vpop.xlane.xlu0 %4105 }
0x10d9   : > { %v4113_v54 = vadd.f32 1e-05, %v4109_v6  ;;  %v4110_v12 = vmul.f32 0.0078125, %v4106_v17 }
0x10db   : > { %5429 = vrsqrt.f32 %v4113_v54  ;;  %v4114_v15 = vadd.f32 1e-05, %v4110_v12 }
0x10dd   : > { %v5426_v20 = vpop.eup %5425  ;;  %5431 = vrsqrt.f32 %v4114_v15 }
0x10de   : > { %v4119_v23 = vmul.f32 %v5426_v20, %v4091_v40 }
0x10df   : > { %v5428_v50 = vpop.eup %5427 }
0x10e0   : > { %v4130_v29 = vmul.f32 %v4472_v16, %v4119_v23  ;;  %v4120_v39 = vmul.f32 %v5428_v50, %v4092_v34 }
0x10e2   : > { %v4131_v26 = vmul.f32 %v4472_v16, %v4120_v39  ;;  %v4141_v14 = vadd.f32 %v4473_v31, %v4130_v29 }
0x10e4   : > { %v4142_v10 = vadd.f32 %v4473_v31, %v4131_v26 }
0x10e5   : > { %v5430_v41 = vpop.eup %5429 }
0x10e6   : > { %v4490_v25 = vpack.c.bf16 %v4142_v10, %v4141_v14  ;;  %v4121_v61 = vmul.f32 %v5430_v41, %v4093_v48 }
0x10e7   : > { %v5432_v63 = vpop.eup %5431 }
0x10e8   : > { %4491 = vst [vmem:[%s754_s2] sm:$0xff] %v4490_v25   ;;  %v4132_v21 = vmul.f32 %v4472_v16, %v4121_v61  ;;  %v4122_v11 = vmul.f32 %v5432_v63, %v4094_v24 }
0x10ea   : > { %v4133_v42 = vmul.f32 %v4472_v16, %v4122_v11  ;;  %v4143_v35 = vadd.f32 %v4473_v31, %v4132_v21 }
0x10ec   : > { %v4144_v22 = vadd.f32 %v4473_v31, %v4133_v42 }
0x10ee   : > { %v4495_v38 = vpack.c.bf16 %v4144_v22, %v4143_v35 }
0x10f0   : > { %4497 = vst [vmem:[%s754_s2 + $0x8] sm:$0xff] %v4495_v38  }
0x10f1 PF: > { %s6788_s5 = sld [smem:[#allocation12_spill]] }
0x10f7   : > { %s35_s3 = sadd.s32 1, %s6788_s5  }
0x10f8   : > { %p32_p11 = scmp.ge.s32.totalorder %s35_s3, 4  }
0x10fa   :  { %34 = sbr.rel (!%p32_p11) target bundleno = 13 (0xd), region = 164 }
0x1101   :  { %4186 = vsyncpa [#allocation3], 1 }
0x1102   :  { %4188 = vsyncpa [#allocation3 + $0x1], 1 }
0x1103   :  { %4189 = vsyncpa [#allocation5], 1 }
0x1104   :  { %4190 = vsyncpa [#allocation8], 1 }

// kernel: transformer_pallas.7
= control target key start
LH: loop header
LB: loop body
LE: loop exit
PB: predicated region body
PF: predicated region fallthrough
CT: control target
= control target key end

     0   :  { %s7231_s0 = inlined_call_operand.vmem [shape: bf16[2,32,128], index: 0, kind: input, shape index: {}]   ;;  %s7232_s1 = inlined_call_operand.vmem [shape: bf16[2,32,128], index: 1, kind: input, shape index: {}]   ;;  %s7233_s2 = inlined_call_operand.vmem [shape: bf16[128,384], index: 2, kind: input, shape index: {}]   ;;  %s7234_s3 = inlined_call_operand.vmem [shape: f32[1,384], index: 3, kind: input, shape index: {}]   ;;  %s7235_s4 = inlined_call_operand.vmem [shape: bf16[4,32,128], index: 4, kind: input, shape index: {}]   ;;  %s7236_s5 = inlined_call_operand.hbm [shape: f32[1,128], index: 5, kind: input, shape index: {}]   ;;  %s7237_s6 = inlined_call_operand.hbm [shape: f32[1,128], index: 6, kind: input, shape index: {}]   ;;  %s7238_s7 = inlined_call_operand.hbm [shape: f32[1,128], index: 7, kind: input, shape index: {}]   ;;  %s7239_s8 = inlined_call_operand.vmem [shape: bf16[128,128], index: 8, kind: input, shape index: {}]   ;;  %s7240_s9 = inlined_call_operand.hbm [shape: f32[1,128], index: 9, kind: input, shape index: {}]   ;;  %s7241_s10 = inlined_call_operand.vmem [shape: bf16[128,256], index: 10, kind: input, shape index: {}]   ;;  %s7242_s11 = inlined_call_operand.vmem [shape: f32[1,256], index: 11, kind: input, shape index: {}]   ;;  %s7243_s12 = inlined_call_operand.vmem [shape: bf16[4,32,128], index: 12, kind: input, shape index: {}]   ;;  %s7244_s13 = inlined_call_operand.hbm [shape: f32[1,128], index: 13, kind: input, shape index: {}]   ;;  %s7245_s14 = inlined_call_operand.hbm [shape: f32[1,128], index: 14, kind: input, shape index: {}]   ;;  %s7246_s15 = inlined_call_operand.hbm [shape: f32[1,128], index: 15, kind: input, shape index: {}]   ;;  %s7247_s16 = inlined_call_operand.vmem [shape: bf16[128,256], index: 16, kind: input, shape index: {}]   ;;  %s7248_s17 = inlined_call_operand.vmem [shape: f32[1,256], index: 17, kind: input, shape index: {}]   ;;  %s7249_s18 = inlined_call_operand.vmem [shape: bf16[256,128], index: 18, kind: input, shape index: {}]   ;;  %s7250_s19 = inlined_call_operand.hbm [shape: f32[1,128], index: 19, kind: input, shape index: {}]   ;;  %s7251_s20 = inlined_call_operand.hbm [shape: f32[1,128], index: 20, kind: input, shape index: {}]   ;;  %s7252_s21 = inlined_call_operand.hbm [shape: f32[1,128], index: 21, kind: input, shape index: {}]   ;;  %s7253_s22 = inlined_call_operand.vmem [shape: bf16[2,32,128], index: 22, kind: output, shape index: {}]  }
   0x1   :  { %7262 = sst [smem:[#allocation25_spill]] %s7231_s0 }
   0x2   :  { %7263 = sst [smem:[#allocation26_spill]] %s7232_s1 }
   0x3   :  { %7264 = sst [smem:[#allocation27_spill]] %s7233_s2 }
   0x4   :  { %7265 = sst [smem:[#allocation28_spill]] %s7234_s3 }
   0x5   :  { %7266 = sst [smem:[#allocation29_spill]] %s7235_s4 }
   0x6   :  { %7267 = sst [smem:[#allocation30_spill]] %s7236_s5 }
   0x7   :  { %7268 = sst [smem:[#allocation31_spill]] %s7237_s6 }
   0x8   :  { %7269 = sst [smem:[#allocation32_spill]] %s7240_s9 }
   0x9   :  { %7270 = sst [smem:[#allocation33_spill]] %s7248_s17 }
   0xa   :  { %7271 = sst [smem:[#allocation34_spill]] %s7249_s18 }
   0xb   :  { %7272 = sst [smem:[#allocation35_spill]] %s7253_s22 }
   0xc   :  { %27 = vsyncpa [#allocation3], 0 }
   0xd   :  { %28 = vsyncpa [#allocation5], 0 }
   0xe   :  { %29 = vsyncpa [#allocation8], 0 }
   0xf   :  { %30 = vsyncpa [#allocation11], 0 }
  0x10   :  { %31 = vsyncpa [#allocation14], 0 }
  0x11   :  { %32 = vsyncpa [#allocation17], 0  ;;  %s6080_s3 = smov 0  }
  0x12 LB: > { %7273 = sst [smem:[#allocation24_spill]] %s5949_s3  ;;  %s5951_s28 = smov [#allocation4]   ;;  %s5949_s3 = sphi %s6080_s3, %s38_s3  }
  0x13   : > { %s574_s29 = sshll.u32 %s5951_s28, 4  ;;  %s6086_s30 = sadd.s32 4294967295, %s5949_s3   ;;  %s6091_s29 = int_to_ptr.vmem [resolvable:$true] %s574_s29 }
  0x14   : > { %p4407_p0 = scmp.ge.s32.totalorder %s5949_s3, 1  ;;  %p541_p1 = scmp.lt.s32.totalorder %s5949_s3, 3 }
  0x15   : > { %p7260_p2 = scmp.eq.s32.totalorder %s6086_s30, 0  ;;  %s5952_s0 = smov [#allocation7]  }
  0x16   : > { %p6093_p3 = pnand %p4407_p0, %p541_p1  ;;  %s599_s23 = sshll.u32 %s5952_s0, 4  ;;  %s6099_s23 = int_to_ptr.vmem [resolvable:$true] %s599_s23 }
  0x17   : > { %s5953_s1 = smov [#allocation10]   ;;  %s5954_s6 = smov [#allocation13]  }
  0x18   : > { %s7274_s4 = scalar_select %p6093_p3, 1, 0 }
  0x19   : > { %p5106_p4 = pneg %p6093_p3  ;;  %s630_s5 = sshll.u32 %s5953_s1, 4  ;;  %s6107_s5 = int_to_ptr.vmem [resolvable:$true] %s630_s5 }
  0x1a   : > { %s661_s25 = sshll.u32 %s5954_s6, 4  ;;  %s7276_s27 = sld [smem:[#allocation31_spill]]  ;;  %s6109_s25 = int_to_ptr.vmem [resolvable:$true] %s661_s25 }
  0x1b   : > { %p6103_p5 = pnand %p7260_p2, %p5106_p4 }
  0x1d   : > { %p6119_p7 = pneg %p6103_p5 }
  0x20   : > { %s5639_s28 = scalar_lea.hbm %s7276_s27, 16 }
  0x21   : > { %p5640_p6 = scmp.ne.s32.totalorder %s7276_s27, %s5639_s28  ;;  %p5646_p10 = scmp.lt.u32.totalorder %s5639_s28, %s7276_s27 }
  0x23   : > { %p5642_p8 = pnand %p6119_p7, %p5640_p6 }
  0x25   : > { %p5643_p9 = pneg %p5642_p8 }
  0x27   : > { %p5648_p11 = pnand %p5646_p10, %p5643_p9 }
  0x29   : > { %5651 = shalt.err (!%p5648_p11)
}
  0x2a   : > { %s5652_s3 = scalar_lea.vmem %s6091_s29, 16  ;;  %s5659_s26 = scalar_lea.vmem %s6091_s29, 32 }
  0x2b   : > { %p5653_p12 = scmp.ne.s32.totalorder %s6091_s29, %s5652_s3  ;;  %p5660_p1 = scmp.lt.s32.totalorder %s6091_s29, %s6091_s29 }
  0x2c   : > { %p5661_p4 = scmp.lt.s32.totalorder %s5659_s26, %s5652_s3 }
  0x2d   : > { %p5655_p13 = pnand %p5653_p12, %p6119_p7 }
  0x2e   : > { %p5662_p6 = por %p5661_p4, %p5660_p1 }
  0x2f   : > { %p5656_p0 = pneg %p5655_p13 }
  0x31   : > { %p5663_p8 = pnand %p5662_p6, %p5656_p0 }
  0x33   : > { %5666 = shalt.err (!%p5663_p8)
}
  0x34   : > { %5112 = dma.hbm_to_vmem [thread:$0]  (!%p6103_p5), %s7276_s27, 16, %s6091_s29, [#allocation5]  }
  0x35   : > { %s7278_s9 = sld [smem:[#allocation32_spill]] }
  0x3b   : > { %s5667_s6 = scalar_lea.hbm %s7278_s9, 16 }
  0x3c   : > { %p5668_p9 = scmp.ne.s32.totalorder %s7278_s9, %s5667_s6  ;;  %p5674_p12 = scmp.lt.u32.totalorder %s5667_s6, %s7278_s9 }
  0x3e   : > { %p5670_p10 = pnand %p5668_p9, %p6119_p7 }
  0x40   : > { %p5671_p11 = pneg %p5670_p10 }
  0x42   : > { %p5676_p13 = pnand %p5674_p12, %p5671_p11 }
  0x44   : > { %5679 = shalt.err (!%p5676_p13)
}
  0x45   : > { %s5680_s29 = scalar_lea.vmem %s6099_s23, 16  ;;  %s5687_s17 = scalar_lea.vmem %s6099_s23, 32 }
  0x46   : > { %p5681_p0 = scmp.ne.s32.totalorder %s6099_s23, %s5680_s29  ;;  %p5688_p6 = scmp.lt.s32.totalorder %s6099_s23, %s6099_s23 }
  0x47   : > { %p5689_p8 = scmp.lt.s32.totalorder %s5687_s17, %s5680_s29 }
  0x48   : > { %p5683_p1 = pnand %p5681_p0, %p6119_p7 }
  0x49   : > { %p5690_p9 = por %p5689_p8, %p5688_p6 }
  0x4a   : > { %p5684_p4 = pneg %p5683_p1 }
  0x4c   : > { %p5691_p10 = pnand %p5690_p9, %p5684_p4 }
  0x4e   : > { %5694 = shalt.err (!%p5691_p10)
}
  0x4f   : > { %5118 = dma.hbm_to_vmem [thread:$0]  (!%p6103_p5), %s7278_s9, 16, %s6099_s23, [#allocation8]  }
  0x50   : > { %s5695_s0 = scalar_lea.hbm %s7245_s14, 16 }
  0x51   : > { %p5696_p11 = scmp.ne.s32.totalorder %s7245_s14, %s5695_s0  ;;  %p5702_p0 = scmp.lt.u32.totalorder %s5695_s0, %s7245_s14 }
  0x53   : > { %p5698_p12 = pnand %p5696_p11, %p6119_p7 }
  0x55   : > { %p5699_p13 = pneg %p5698_p12 }
  0x57   : > { %p5704_p1 = pnand %p5702_p0, %p5699_p13 }
  0x59   : > { %5707 = shalt.err (!%p5704_p1)
}
  0x5a   : > { %s5708_s23 = scalar_lea.vmem %s6107_s5, 16  ;;  %s5715_s17 = scalar_lea.vmem %s6107_s5, 32 }
  0x5b   : > { %p5709_p4 = scmp.ne.s32.totalorder %s6107_s5, %s5708_s23  ;;  %p5716_p9 = scmp.lt.s32.totalorder %s6107_s5, %s6107_s5 }
  0x5c   : > { %p5717_p10 = scmp.lt.s32.totalorder %s5715_s17, %s5708_s23 }
  0x5d   : > { %p5711_p6 = pnand %p5709_p4, %p6119_p7 }
  0x5e   : > { %p5718_p11 = por %p5717_p10, %p5716_p9 }
  0x5f   : > { %p5712_p8 = pneg %p5711_p6 }
  0x61   : > { %p5719_p12 = pnand %p5718_p11, %p5712_p8 }
  0x63   : > { %5722 = shalt.err (!%p5719_p12)
}
  0x64   : > { %5124 = dma.hbm_to_vmem [thread:$0]  (!%p6103_p5), %s7245_s14, 16, %s6107_s5, [#allocation11]  }
  0x65   : > { %s5723_s0 = scalar_lea.hbm %s7250_s19, 16 }
  0x66   : > { %p5724_p13 = scmp.ne.s32.totalorder %s7250_s19, %s5723_s0  ;;  %p5730_p4 = scmp.lt.u32.totalorder %s5723_s0, %s7250_s19 }
  0x68   : > { %p5726_p0 = pnand %p5724_p13, %p6119_p7 }
  0x6a   : > { %p5727_p1 = pneg %p5726_p0 }
  0x6c   : > { %p5732_p6 = pnand %p5730_p4, %p5727_p1 }
  0x6e   : > { %5735 = shalt.err (!%p5732_p6)
}
  0x6f   : > { %s5736_s5 = scalar_lea.vmem %s6109_s25, 16  ;;  %s5743_s23 = scalar_lea.vmem %s6109_s25, 32 }
  0x70   : > { %p5737_p8 = scmp.ne.s32.totalorder %s6109_s25, %s5736_s5  ;;  %p5744_p11 = scmp.lt.s32.totalorder %s6109_s25, %s6109_s25 }
  0x71   : > { %p5745_p12 = scmp.lt.s32.totalorder %s5743_s23, %s5736_s5 }
  0x72   : > { %p5739_p9 = pnand %p5737_p8, %p6119_p7 }
  0x73   : > { %p5746_p13 = por %p5745_p12, %p5744_p11 }
  0x74   : > { %p5740_p10 = pneg %p5739_p9 }
  0x76   : > { %p5747_p0 = pnand %p5746_p13, %p5740_p10 }
  0x78   : > { %5750 = shalt.err (!%p5747_p0)
}
  0x79   : > { %5130 = dma.hbm_to_vmem [thread:$0]  (!%p6103_p5), %s7250_s19, 16, %s6109_s25, [#allocation14]  }
  0x7a   : > { %s5955_s22 = smov [#allocation2]   ;;  %s5956_s28 = smov [#allocation6]  }
  0x7b   : > { %s563_s2 = sshll.u32 %s5955_s22, 4  ;;  %s585_s0 = sshll.u32 %s5956_s28, 4  ;;  %s564_s2 = int_to_ptr.vmem [resolvable:$true] %s563_s2  ;;  %s586_s0 = int_to_ptr.vmem [resolvable:$true] %s585_s0 }
  0x7c   : > { %s7279_s26 = sld [smem:[#allocation30_spill]] }
  0x82   : > { %s5751_s29 = scalar_lea.hbm %s7279_s26, 16 }
  0x83   : > { %p5752_p1 = scmp.ne.s32.totalorder %s7279_s26, %s5751_s29  ;;  %p5758_p8 = scmp.lt.u32.totalorder %s5751_s29, %s7279_s26 }
  0x85   : > { %p5754_p4 = pnand %p5752_p1, %p6119_p7 }
  0x87   : > { %p5755_p6 = pneg %p5754_p4 }
  0x89   : > { %p5760_p9 = pnand %p5758_p8, %p5755_p6 }
  0x8b   : > { %5763 = shalt.err (!%p5760_p9)
}
  0x8c   : > { %s5764_s25 = scalar_lea.vmem %s564_s2, 16  ;;  %s5771_s18 = scalar_lea.vmem %s564_s2, 32 }
  0x8d   : > { %p5765_p10 = scmp.ne.s32.totalorder %s564_s2, %s5764_s25  ;;  %p5772_p13 = scmp.lt.s32.totalorder %s564_s2, %s564_s2 }
  0x8e   : > { %p5773_p0 = scmp.lt.s32.totalorder %s5771_s18, %s5764_s25 }
  0x8f   : > { %p5767_p11 = pnand %p5765_p10, %p6119_p7 }
  0x90   : > { %p5774_p2 = por %p5773_p0, %p5772_p13 }
  0x91   : > { %p5768_p12 = pneg %p5767_p11 }
  0x93   : > { %p5775_p3 = pnand %p5774_p2, %p5768_p12 }
  0x95   : > { %5778 = shalt.err (!%p5775_p3)
}
  0x96   : > { %5109 = dma.hbm_to_vmem [thread:$0]  (!%p6103_p5), %s7279_s26, 16, %s564_s2, [#allocation3]  }
  0x97   : > { %s5779_s3 = scalar_lea.hbm %s7238_s7, 16 }
  0x98   : > { %p5780_p1 = scmp.ne.s32.totalorder %s7238_s7, %s5779_s3  ;;  %p5786_p3 = scmp.lt.u32.totalorder %s5779_s3, %s7238_s7 }
  0x9a   : > { %p5782_p4 = pnand %p5780_p1, %p6119_p7 }
  0x9c   : > { %p5783_p2 = pneg %p5782_p4 }
  0x9e   : > { %p5788_p6 = pnand %p5786_p3, %p5783_p2 }
  0xa0   : > { %5791 = shalt.err (!%p5788_p6)
}
  0xa1   : > { %s5792_s25 = scalar_lea.vmem %s586_s0, 16  ;;  %s5799_s2 = scalar_lea.vmem %s586_s0, 32 }
  0xa2   : > { %p5793_p8 = scmp.ne.s32.totalorder %s586_s0, %s5792_s25  ;;  %p5800_p11 = scmp.lt.s32.totalorder %s586_s0, %s586_s0 }
  0xa3   : > { %p5801_p12 = scmp.lt.s32.totalorder %s5799_s2, %s5792_s25 }
  0xa4   : > { %p5795_p9 = pnand %p5793_p8, %p6119_p7 }
  0xa5   : > { %p5802_p13 = por %p5801_p12, %p5800_p11 }
  0xa6   : > { %p5796_p10 = pneg %p5795_p9 }
  0xa8   : > { %p5803_p0 = pnand %p5802_p13, %p5796_p10 }
  0xaa   : > { %5806 = shalt.err (!%p5803_p0)
}
  0xab   : > { %5115 = dma.hbm_to_vmem [thread:$0]  (!%p6103_p5), %s7238_s7, 16, %s586_s0, [#allocation5]  }
  0xac   : > { %s5957_s28 = smov [#allocation9]   ;;  %s5958_s6 = smov [#allocation12]  }
  0xad   : > { %s619_s9 = sshll.u32 %s5957_s28, 4  ;;  %s641_s3 = sshll.u32 %s5958_s6, 4  ;;  %s620_s9 = int_to_ptr.vmem [resolvable:$true] %s619_s9  ;;  %s642_s3 = int_to_ptr.vmem [resolvable:$true] %s641_s3 }
  0xae   : > { %s5807_s23 = scalar_lea.hbm %s7244_s13, 16 }
  0xaf   : > { %p5808_p1 = scmp.ne.s32.totalorder %s7244_s13, %s5807_s23  ;;  %p5814_p3 = scmp.lt.u32.totalorder %s5807_s23, %s7244_s13 }
  0xb1   : > { %p5810_p4 = pnand %p5808_p1, %p6119_p7 }
  0xb3   : > { %p5811_p2 = pneg %p5810_p4 }
  0xb5   : > { %p5816_p6 = pnand %p5814_p3, %p5811_p2 }
  0xb7   : > { %5819 = shalt.err (!%p5816_p6)
}
  0xb8   : > { %s5820_s0 = scalar_lea.vmem %s620_s9, 16  ;;  %s5827_s22 = scalar_lea.vmem %s620_s9, 32 }
  0xb9   : > { %p5821_p8 = scmp.ne.s32.totalorder %s620_s9, %s5820_s0  ;;  %p5828_p11 = scmp.lt.s32.totalorder %s620_s9, %s620_s9 }
  0xba   : > { %p5829_p12 = scmp.lt.s32.totalorder %s5827_s22, %s5820_s0 }
  0xbb   : > { %p5823_p9 = pnand %p5821_p8, %p6119_p7 }
  0xbc   : > { %p5830_p13 = por %p5829_p12, %p5828_p11 }
  0xbd   : > { %p5824_p10 = pneg %p5823_p9 }
  0xbf   : > { %p5831_p0 = pnand %p5830_p13, %p5824_p10 }
  0xc1   : > { %5834 = shalt.err (!%p5831_p0)
}
  0xc2   : > { %5121 = dma.hbm_to_vmem [thread:$0]  (!%p6103_p5), %s7244_s13, 16, %s620_s9, [#allocation8]  }
  0xc3   : > { %s5835_s23 = scalar_lea.hbm %s7246_s15, 16 }
  0xc4   : > { %p5836_p1 = scmp.ne.s32.totalorder %s7246_s15, %s5835_s23  ;;  %p5842_p3 = scmp.lt.u32.totalorder %s5835_s23, %s7246_s15 }
  0xc6   : > { %p5838_p4 = pnand %p5836_p1, %p6119_p7 }
  0xc8   : > { %p5839_p2 = pneg %p5838_p4 }
  0xca   : > { %p5844_p6 = pnand %p5842_p3, %p5839_p2 }
  0xcc   : > { %5847 = shalt.err (!%p5844_p6)
}
  0xcd   : > { %s5848_s0 = scalar_lea.vmem %s642_s3, 16  ;;  %s5855_s9 = scalar_lea.vmem %s642_s3, 32 }
  0xce   : > { %p5849_p8 = scmp.ne.s32.totalorder %s642_s3, %s5848_s0  ;;  %p5856_p11 = scmp.lt.s32.totalorder %s642_s3, %s642_s3 }
  0xcf   : > { %p5857_p12 = scmp.lt.s32.totalorder %s5855_s9, %s5848_s0 }
  0xd0   : > { %p5851_p9 = pnand %p5849_p8, %p6119_p7 }
  0xd1   : > { %p5858_p13 = por %p5857_p12, %p5856_p11 }
  0xd2   : > { %p5852_p10 = pneg %p5851_p9 }
  0xd4   : > { %p5859_p0 = pnand %p5858_p13, %p5852_p10 }
  0xd6   : > { %5862 = shalt.err (!%p5859_p0)
}
  0xd7   : > { %5127 = dma.hbm_to_vmem [thread:$0]  (!%p6103_p5), %s7246_s15, 16, %s642_s3, [#allocation11]  }
  0xd8   : > { %s5959_s6 = smov [#allocation15]   ;;  %s5960_s5 = smov [#allocation16]  }
  0xd9   : > { %s672_s29 = sshll.u32 %s5959_s6, 4  ;;  %s683_s23 = sshll.u32 %s5960_s5, 4  ;;  %s673_s29 = int_to_ptr.vmem [resolvable:$true] %s672_s29  ;;  %s684_s23 = int_to_ptr.vmem [resolvable:$true] %s683_s23 }
  0xda   : > { %s5863_s2 = scalar_lea.hbm %s7251_s20, 16 }
  0xdb   : > { %p5864_p1 = scmp.ne.s32.totalorder %s7251_s20, %s5863_s2  ;;  %p5870_p3 = scmp.lt.u32.totalorder %s5863_s2, %s7251_s20 }
  0xdd   : > { %p5866_p4 = pnand %p5864_p1, %p6119_p7 }
  0xdf   : > { %p5867_p2 = pneg %p5866_p4 }
  0xe1   : > { %p5872_p6 = pnand %p5870_p3, %p5867_p2 }
  0xe3   : > { %5875 = shalt.err (!%p5872_p6)
}
  0xe4   : > { %s5876_s3 = scalar_lea.vmem %s673_s29, 16  ;;  %s5883_s28 = scalar_lea.vmem %s673_s29, 32 }
  0xe5   : > { %p5877_p8 = scmp.ne.s32.totalorder %s673_s29, %s5876_s3  ;;  %p5884_p11 = scmp.lt.s32.totalorder %s673_s29, %s673_s29 }
  0xe6   : > { %p5885_p12 = scmp.lt.s32.totalorder %s5883_s28, %s5876_s3 }
  0xe7   : > { %p5879_p9 = pnand %p5877_p8, %p6119_p7 }
  0xe8   : > { %p5886_p13 = por %p5885_p12, %p5884_p11 }
  0xe9   : > { %p5880_p10 = pneg %p5879_p9 }
  0xeb   : > { %p5887_p0 = pnand %p5886_p13, %p5880_p10 }
  0xed   : > { %5890 = shalt.err (!%p5887_p0)
}
  0xee   : > { %5133 = dma.hbm_to_vmem [thread:$0]  (!%p6103_p5), %s7251_s20, 16, %s673_s29, [#allocation14]  }
  0xef   : > { %s5891_s2 = scalar_lea.hbm %s7252_s21, 16 }
  0xf0   : > { %p5892_p1 = scmp.ne.s32.totalorder %s7252_s21, %s5891_s2  ;;  %p5898_p3 = scmp.lt.u32.totalorder %s5891_s2, %s7252_s21 }
  0xf2   : > { %p5894_p4 = pnand %p5892_p1, %p6119_p7 }
  0xf4   : > { %p5895_p2 = pneg %p5894_p4 }
  0xf6   : > { %p5900_p6 = pnand %p5898_p3, %p5895_p2 }
  0xf8   : > { %5903 = shalt.err (!%p5900_p6)
}
  0xf9   : > { %s5904_s3 = scalar_lea.vmem %s684_s23, 16  ;;  %s5911_s29 = scalar_lea.vmem %s684_s23, 32 }
  0xfa   : > { %p5905_p8 = scmp.ne.s32.totalorder %s684_s23, %s5904_s3  ;;  %p5912_p11 = scmp.lt.s32.totalorder %s684_s23, %s684_s23 }
  0xfb   : > { %p5913_p12 = scmp.lt.s32.totalorder %s5911_s29, %s5904_s3 }
  0xfc   : > { %p5907_p9 = pnand %p5905_p8, %p6119_p7 }
  0xfd   : > { %p5914_p13 = por %p5913_p12, %p5912_p11 }
  0xfe   : > { %p5908_p10 = pneg %p5907_p9 }
 0x100   : > { %p5915_p0 = pnand %p5914_p13, %p5908_p10 }
 0x102   : > { %5918 = shalt.err (!%p5915_p0)
}
 0x103   : > { %5136 = dma.hbm_to_vmem [thread:$0]  (!%p6103_p5), %s7252_s21, 16, %s684_s23, [#allocation17]  }
 0x104   : > { %p7280_p1 = scmp.ne.s32.totalorder %s7274_s4, 0 }
 0x105   : > { %p7281_p4 = scmp.eq.s32.totalorder (!%p7280_p1), %s6086_s30, 0 }
 0x106   : > { %712 = sbr.rel (%p7280_p1) target bundleno = 4499 (0x1193), region = 108 }
 0x10d   : > { %5924 = dma.done.wait (%p7281_p4), [#allocation3], 16   ;;  %p7282_p7 = pmov %p7281_p4 }
 0x10e   : > { %p7283_p2 = pmov %p7281_p4 }
 0x10f   : > { %5926 = vsyncadd (%p7282_p7), [#allocation3], 4294967280 }
 0x110   : > { %5928 = dma.done.wait (%p7283_p2), [#allocation5], 32   ;;  %p7284_p3 = pmov %p7283_p2 }
 0x111   : > { %p7285_p6 = pmov %p7283_p2 }
 0x112   : > { %5930 = vsyncadd (%p7284_p3), [#allocation5], 4294967264 }
 0x113   : > { %5932 = dma.done.wait (%p7285_p6), [#allocation8], 32   ;;  %p7286_p5 = pmov %p7283_p2 }
 0x114   : > { %p7287_p8 = pmov %p7283_p2 }
 0x115   : > { %5934 = vsyncadd (%p7286_p5), [#allocation8], 4294967264 }
 0x116   : > { %5936 = dma.done.wait (%p7287_p8), [#allocation11], 32   ;;  %p7288_p9 = pmov %p7283_p2 }
 0x117   : > { %p7289_p10 = pmov %p7283_p2 }
 0x118   : > { %5938 = vsyncadd (%p7288_p9), [#allocation11], 4294967264 }
 0x119   : > { %5940 = dma.done.wait (%p7289_p10), [#allocation14], 32   ;;  %p7290_p11 = pmov %p7283_p2 }
 0x11a   : > { %p7291_p12 = pmov %p7283_p2 }
 0x11b   : > { %5942 = vsyncadd (%p7290_p11), [#allocation14], 4294967264 }
 0x11c   : > { %5944 = dma.done.wait (%p7291_p12), [#allocation17], 16   ;;  %p7292_p13 = pmov %p7283_p2 }
 0x11d   : > { %v5961_v0 = vmov 0   ;;  %p815_p0 = scmp.lt.s32.totalorder %s6086_s30, 1  ;;  %s7293_s1 = sld [smem:[#allocation27_spill]]  ;;  %v877_v27 = vlaneseq  ;;  %vm1278_vm0 = vcmask 261120  }
 0x11e   : > { %5946 = vsyncadd (%p7292_p13), [#allocation17], 4294967280  ;;  %1064 = vmatprep.mubr.bf16.mxu0 %v5961_v0  ;;  %s7294_s4 = sld [smem:[#allocation25_spill]]  ;;  %s7295_s29 = sld [smem:[#allocation28_spill]] }
 0x11f   : > { %s7303_s30 = smov (!%p815_p0, %s6086_s30), 1  ;;  %v6433_v28 = vshrl.u32 %v877_v27, 7  ;;  %s5962_s28 = smov 64  }
 0x120   : > { %s6365_s22 = sshll.u32 %s7303_s30, 4  ;;  %s5963_s6 = smov 96  }
 0x121   : > { %v6436_v29 = vsub.s32 0, %v6433_v28  ;;  %v6444_v31 = vsub.s32 1, %v6433_v28  ;;  %s7296_s17 = sld [smem:[#allocation29_spill]]  ;;  %s7297_s0 = sld [smem:[#allocation26_spill]] }
 0x122   : > { %s7298_s23 = sld [smem:[#allocation34_spill]] }
 0x123   : > { %v5359_v1 = vld [vmem:[%s7293_s1 + $0x4] ss:$12 sps:$4 sm:$0xff]   ;;  %v5361_v2 = vld [vmem:[%s7293_s1] ss:$12 sps:$4 sm:$0xff]   ;;  %v5362_v3 = vld [vmem:[%s7293_s1 + $0x1c] ss:$12 sps:$4 sm:$0xff]  }
 0x124   : > { %1032 = vmatprep.subr.bf16.mxu0 %v5359_v1  ;;  %v5364_v4 = vld [vmem:[%s7293_s1 + $0x18] ss:$12 sps:$4 sm:$0xff]   ;;  %v5365_v5 = vld [vmem:[%s7293_s1 + $0x34] ss:$12 sps:$4 sm:$0xff]   ;;  %v5367_v6 = vld [vmem:[%s7293_s1 + $0x30] ss:$12 sps:$4 sm:$0xff]   ;;  %s6374_s24 = scalar_lea.vmem %s7294_s4, %s6365_s22 }
 0x125   : > { %1033 = vmatpush1.bf16.msra.mxu0 %v5361_v2  ;;  %v5368_v7 = vld [vmem:[%s7293_s1 + $0x4c] ss:$12 sps:$4 sm:$0xff]   ;;  %v5370_v8 = vld [vmem:[%s7293_s1 + $0x48] ss:$12 sps:$4 sm:$0xff]   ;;  %v831_v9 = vld [vmem:[%s6374_s24] sm:$0xff]   ;;  %s5964_s4 = smov 32  }
 0x126   : > { %1034 = vmatprep.subr.bf16.mxu0 %v5362_v3  ;;  %v5371_v10 = vld [vmem:[%s7293_s1 + $0x64] ss:$12 sps:$4 sm:$0xff]   ;;  %v5385_v11 = vld [vmem:[%s7293_s1 + $0x8] ss:$12 sps:$4 sm:$0xff]   ;;  %v5386_v12 = vld [vmem:[%s7293_s1 + $0x20] ss:$12 sps:$4 sm:$0xff]   ;;  %4802 = vmatprep.mubr.bf16.mxu1 %v831_v9 }
 0x127   : > { %v5373_v13 = vld [vmem:[%s7293_s1 + $0x60] ss:$12 sps:$4 sm:$0xff]   ;;  %4786 = vmatprep.subr.bf16.mxu1 %v5385_v11  ;;  %v5374_v14 = vld [vmem:[%s7293_s1 + $0x7c] ss:$12 sps:$4 sm:$0xff]   ;;  %v5387_v15 = vld [vmem:[%s7293_s1 + $0x38] ss:$12 sps:$4 sm:$0xff]   ;;  %s824_s9 = scalar_lea.vmem %s7297_s0, %s6365_s22 }
 0x128   : > { %4787 = vmatpush3.bf16.msra.mxu1 %v5385_v11  ;;  %v5376_v16 = vld [vmem:[%s7293_s1 + $0x78] ss:$12 sps:$4 sm:$0xff]   ;;  %v5377_v17 = vld [vmem:[%s7293_s1 + $0x94] ss:$12 sps:$4 sm:$0xff]   ;;  %v5388_v18 = vld [vmem:[%s7293_s1 + $0x50] ss:$12 sps:$4 sm:$0xff]  }
 0x129   : > { %1035 = vmatpush1.bf16.msra.mxu0 %v5364_v4  ;;  %4788 = vmatprep.subr.bf16.mxu1 %v5386_v12  ;;  %v5379_v19 = vld [vmem:[%s7293_s1 + $0x90] ss:$12 sps:$4 sm:$0xff]   ;;  %v5380_v20 = vld [vmem:[%s7293_s1 + $0xac] ss:$12 sps:$4 sm:$0xff]   ;;  %v5389_v21 = vld [vmem:[%s7293_s1 + $0x68] ss:$12 sps:$4 sm:$0xff]  }
 0x12a   : > { %1036 = vmatprep.subr.bf16.mxu0 %v5365_v5  ;;  %v5382_v22 = vld [vmem:[%s7293_s1 + $0xa8] ss:$12 sps:$4 sm:$0xff]   ;;  %v5390_v23 = vld [vmem:[%s7293_s1 + $0x80] ss:$12 sps:$4 sm:$0xff]   ;;  %v5391_v24 = vld [vmem:[%s7293_s1 + $0x98] ss:$12 sps:$4 sm:$0xff]  }
 0x12b   : > { %v833_v25 = vld [vmem:[%s6374_s24 + $0x8] sm:$0xff]   ;;  %v5392_v26 = vld [vmem:[%s7293_s1 + $0xb0] ss:$12 sps:$4 sm:$0xff]   ;;  %v6441_v30 = vld [vmem:[%s7295_s29] sm:$0x7]  ;;  %v887_v3 = vsub.s32 2, %v6433_v28 }
 0x12c   : > { %4789 = vmatpush3.bf16.msra.mxu1 %v5386_v12  ;;  %v880_v32 = vrot.slane %v6441_v30, %v6436_v29  ;;  %v884_v34 = vrot.slane %v6441_v30, %v6444_v31  ;;  %s7300_s0 = sld [smem:[#allocation35_spill]] }
 0x12d   : > { %1037 = vmatpush1.bf16.msra.mxu0 %v5367_v6  ;;  %4790 = vmatprep.subr.bf16.mxu1 %v5387_v15  ;;  %v888_v11 = vrot.slane %v6441_v30, %v887_v3 }
 0x12e   : > { %1038 = vmatprep.subr.bf16.mxu0 %v5368_v7 }
 0x130   : > { %4791 = vmatpush3.bf16.msra.mxu1 %v5387_v15 }
 0x131   : > { %1039 = vmatpush1.bf16.msra.mxu0 %v5370_v8  ;;  %4792 = vmatprep.subr.bf16.mxu1 %v5388_v18 }
 0x132   : > { %1040 = vmatprep.subr.bf16.mxu0 %v5371_v10 }
 0x134   : > { %4793 = vmatpush3.bf16.msra.mxu1 %v5388_v18 }
 0x135   : > { %1041 = vmatpush1.bf16.msra.mxu0 %v5373_v13  ;;  %4794 = vmatprep.subr.bf16.mxu1 %v5389_v21 }
 0x136   : > { %1042 = vmatprep.subr.bf16.mxu0 %v5374_v14 }
 0x138   : > { %4795 = vmatpush3.bf16.msra.mxu1 %v5389_v21 }
 0x139   : > { %1043 = vmatpush1.bf16.msra.mxu0 %v5376_v16  ;;  %4796 = vmatprep.subr.bf16.mxu1 %v5390_v23 }
 0x13a   : > { %1044 = vmatprep.subr.bf16.mxu0 %v5377_v17 }
 0x13c   : > { %4797 = vmatpush3.bf16.msra.mxu1 %v5390_v23 }
 0x13d   : > { %1045 = vmatpush1.bf16.msra.mxu0 %v5379_v19  ;;  %4798 = vmatprep.subr.bf16.mxu1 %v5391_v24 }
 0x13e   : > { %1046 = vmatprep.subr.bf16.mxu0 %v5380_v20 }
 0x140   : > { %4799 = vmatpush3.bf16.msra.mxu1 %v5391_v24 }
 0x141   : > { %1047 = vmatpush1.bf16.msra.mxu0 %v5382_v22  ;;  %4800 = vmatprep.subr.bf16.mxu1 %v5392_v26 }
 0x144   : > { %1065 = vmatmul.mubr.bf16.vlgmr.msra.gmra.mrb[0].mxu0 %v831_v9  ;;  %4801 = vmatpush3.bf16.msra.mxu1 %v5392_v26 }
 0x145   : > { %1074 = vmatprep.mubr.bf16.mxu0 %v5961_v0 }
 0x147   : > { %4803 = vmatmul.mubr.bf16.vlgmr.msra.gmra.mrb[0].mxu1 %v833_v25 }
 0x14c   : > { %1075 = vmatmul.mubr.bf16.gmra.mrb[4].mxu0 %v833_v25 }
 0x217   : > { %v1066_v33 = vpop.f32.mrb[0].mxu0 }
 0x218   : > { %v1068_v35 = vpop.f32.mrb[1].mxu0  ;;  %v1067_v37 = vadd.f32 %v1066_v33, %v880_v32 }
 0x219   : > { %v1070_v36 = vpop.f32.mrb[2].mxu0  ;;  %v1069_v40 = vadd.f32 %v1068_v35, %v884_v34 }
 0x21a   : > { %v1071_v38 = vadd.f32 %v1070_v36, %v880_v32  ;;  %v1072_v39 = vpop.f32.mrb[3].mxu0  ;;  %v4804_v60 = vpop.f32.mrb[0].mxu1 }
 0x21b   : > { %v1073_v41 = vadd.f32 %v1072_v39, %v884_v34  ;;  %v1119_v61 = vpop.f32.mrb[1].mxu1 }
 0x21c   : > { %v1174_v42 = vpack.c.bf16 %v1071_v38, %v1067_v37  ;;  %v5194_v43 = vpack.i.bf16 %v1071_v38, %v1067_v37  ;;  %v4805_v62 = vpop.f32.mrb[2].mxu1  ;;  %v6474_v18 = vadd.f32 %v1119_v61, %v888_v11 }
 0x21d   : > { %v5189_v44 = vpack.i.bf16 %v1073_v41, %v1069_v40  ;;  %v1222_v45 = vpack.c.bf16 %v1073_v41, %v1069_v40  ;;  %v1122_v63 = vpop.f32.mrb[3].mxu1 }
 0x21e   : > { %4810 = vmatprep.mubr.msk.bf16.mxu1 %vm1278_vm0, %v1174_v42  ;;  %v6476_v19 = vadd.f32 %v1122_v63, %v888_v11 }
 0x21f   : > { %v1076_v46 = vpop.f32.mrb[4].mxu0  ;;  %5190 = vrot.lane.b32.xlu1 %v5189_v44, %s5962_s28  ;;  %5180 = vrot.lane.b32.xlu0 %v5189_v44, %s5963_s6  ;;  %v1286_v47 = vsel %vm1278_vm0, %v1222_v45, 0 }
 0x220   : > { %5050 = vmatprep.subr.msk.bf16.mxu1 %vm1278_vm0, %v1222_v45  ;;  %v1078_v48 = vpop.f32.mrb[5].mxu0  ;;  %v1077_v50 = vadd.f32 %v1076_v46, %v880_v32  ;;  %v1270_v28 = vpack.c.bf16 %v6476_v19, %v6474_v18 }
 0x221   : > { %4807 = vmatpush3.bf16.xpose.msra.mxu1 %v1286_v47  ;;  %v1080_v49 = vpop.f32.mrb[6].mxu0  ;;  %v1079_v53 = vadd.f32 %v1078_v48, %v884_v34  ;;  %v6486_v47 = vadd.f32 %v4804_v60, %v888_v11  ;;  %v6488_v48 = vadd.f32 %v4805_v62, %v888_v11 }
 0x222   : > { %v1081_v51 = vadd.f32 %v1080_v49, %v880_v32  ;;  %v1082_v52 = vpop.f32.mrb[7].mxu0 }
 0x223   : > { %v1083_v54 = vadd.f32 %v1082_v52, %v884_v34  ;;  %5195 = vrot.lane.b32.xlu1 %v5194_v43, %s5963_s6 }
 0x224   : > { %v1175_v55 = vpack.c.bf16 %v1081_v51, %v1077_v50  ;;  %v5199_v56 = vpack.i.bf16 %v1081_v51, %v1077_v50 }
 0x225   : > { %v5184_v57 = vpack.i.bf16 %v1083_v54, %v1079_v53  ;;  %v1223_v58 = vpack.c.bf16 %v1083_v54, %v1079_v53 }
 0x227   : > { %5185 = vrot.lane.b32.xlu0 %v5184_v57, %s5963_s6  ;;  %5051 = vmatprep.subr.msk.bf16.mxu1 %vm1278_vm0, %v1223_v58  ;;  %v1289_v59 = vsel %vm1278_vm0, %v1223_v58, 0 }
 0x228   : > { %5205 = vrot.lane.b32.xlu1 %v5184_v57, %s5962_s28 }
 0x229   : > { %4809 = vmatpush3.bf16.xpose.msra.mxu1 %v1289_v59 }
 0x22b   : > { %5200 = vrot.lane.b32.xlu0 %v5199_v56, %s5963_s6 }
 0x22c   : > { %5215 = vrot.lane.b32.xlu1 %v5194_v43, %s5962_s28 }
 0x22f   : > { %5210 = vrot.lane.b32.xlu0 %v5189_v44, %s5964_s4 }
 0x230   : > { %5225 = vrot.lane.b32.xlu1 %v5184_v57, %s5964_s4  ;;  %4811 = vmatmul.mubr.msk.bf16.vlgmr.msra.gmra.mrb[4].mxu1 %vm1278_vm0, %v1175_v55  ;;  %v1271_v55 = vpack.c.bf16 %v6488_v48, %v6486_v47 }
 0x233   : > { %5220 = vrot.lane.b32.xlu0 %v5199_v56, %s5962_s28 }
 0x234   : > { %5235 = vrot.lane.b32.xlu1 %v5199_v56, %s5964_s4 }
 0x237   : > { %5230 = vrot.lane.b32.xlu0 %v5194_v43, %s5964_s4 }
 0x291   : > { %v5191_v1 = vpop.permute.xlu1 %5190  ;;  %v5181_v2 = vpop.permute.xlu0 %5180 }
 0x292   : > { %v5193_v4 = vunpack.i.h.bf16 %v5191_v1  ;;  %v5192_v5 = vunpack.i.l.bf16 %v5191_v1  ;;  %v5183_v6 = vunpack.i.h.bf16 %v5181_v2  ;;  %v5182_v7 = vunpack.i.l.bf16 %v5181_v2 }
 0x294   : > { %v1226_v8 = vpack.c.bf16 %v5193_v4, %v5192_v5  ;;  %v1224_v9 = vpack.c.bf16 %v5183_v6, %v5182_v7 }
 0x295   : > { %v5196_v10 = vpop.permute.xlu1 %5195 }
 0x296   : > { %v5198_v12 = vunpack.i.h.bf16 %v5196_v10  ;;  %v5197_v13 = vunpack.i.l.bf16 %v5196_v10  ;;  %5052 = vmatprep.subr.msk.bf16.mxu1 %vm1278_vm0, %v1224_v9  ;;  %5054 = vmatprep.subr.msk.bf16.mxu0 %vm1278_vm0, %v1226_v8  ;;  %v1347_v14 = vsel %vm1278_vm0, %v1224_v9, 0  ;;  %v1408_v15 = vsel %vm1278_vm0, %v1226_v8, 0 }
 0x297   : > { %4815 = vmatpush3.bf16.xpose.msra.mxu1 %v1347_v14  ;;  %4823 = vmatpush3.bf16.xpose.msra.mxu0 %v1408_v15 }
 0x298   : > { %v1176_v16 = vpack.c.bf16 %v5198_v12, %v5197_v13 }
 0x299   : > { %v5186_v17 = vpop.permute.xlu0 %5185 }
 0x29a   : > { %v5188_v20 = vunpack.i.h.bf16 %v5186_v17  ;;  %v5187_v21 = vunpack.i.l.bf16 %v5186_v17  ;;  %v5206_v22 = vpop.permute.xlu1 %5205  ;;  %4818 = vmatprep.mubr.msk.bf16.mxu1 %vm1278_vm0, %v1176_v16 }
 0x29b   : > { %v5208_v23 = vunpack.i.h.bf16 %v5206_v22  ;;  %v5207_v24 = vunpack.i.l.bf16 %v5206_v22 }
 0x29c   : > { %v1225_v25 = vpack.c.bf16 %v5188_v20, %v5187_v21 }
 0x29d   : > { %v1227_v26 = vpack.c.bf16 %v5208_v23, %v5207_v24  ;;  %v5201_v27 = vpop.permute.xlu0 %5200 }
 0x29e   : > { %v5216_v30 = vpop.permute.xlu1 %5215  ;;  %5053 = vmatprep.subr.msk.bf16.mxu1 %vm1278_vm0, %v1225_v25  ;;  %v1350_v32 = vsel %vm1278_vm0, %v1225_v25, 0  ;;  %v5203_v36 = vunpack.i.h.bf16 %v5201_v27  ;;  %v5202_v37 = vunpack.i.l.bf16 %v5201_v27 }
 0x29f   : > { %v5218_v33 = vunpack.i.h.bf16 %v5216_v30  ;;  %v5217_v34 = vunpack.i.l.bf16 %v5216_v30  ;;  %5055 = vmatprep.subr.msk.bf16.mxu0 %vm1278_vm0, %v1227_v26  ;;  %4817 = vmatpush3.bf16.xpose.msra.mxu1 %v1350_v32  ;;  %v1411_v35 = vsel %vm1278_vm0, %v1227_v26, 0 }
 0x2a0   : > { %4825 = vmatpush3.bf16.xpose.msra.mxu0 %v1411_v35  ;;  %v1177_v45 = vpack.c.bf16 %v5203_v36, %v5202_v37  ;;  %v6554_v35 = vpack.i.bf16 %v6476_v19, %v6474_v18  ;;  %v6560_v37 = vpack.i.bf16 %v6488_v48, %v6486_v47 }
 0x2a1   : > { %v1178_v38 = vpack.c.bf16 %v5218_v33, %v5217_v34  ;;  %v5211_v39 = vpop.permute.xlu0 %5210  ;;  %4838 = vmatprep.subr.bf16.mxu0 %v1270_v28 }
 0x2a2   : > { %v5213_v40 = vunpack.i.h.bf16 %v5211_v39  ;;  %v5212_v41 = vunpack.i.l.bf16 %v5211_v39  ;;  %v5226_v42 = vpop.permute.xlu1 %5225 }
 0x2a3   : > { %v5228_v43 = vunpack.i.h.bf16 %v5226_v42  ;;  %v5227_v44 = vunpack.i.l.bf16 %v5226_v42  ;;  %4826 = vmatprep.mubr.msk.bf16.mxu0 %vm1278_vm0, %v1178_v38 }
 0x2a4   : > { %v1228_v46 = vpack.c.bf16 %v5213_v40, %v5212_v41 }
 0x2a5   : > { %v5221_v49 = vpop.permute.xlu0 %5220  ;;  %v1229_v50 = vpack.c.bf16 %v5228_v43, %v5227_v44 }
 0x2a6   : > { %v5223_v51 = vunpack.i.h.bf16 %v5221_v49  ;;  %v5222_v52 = vunpack.i.l.bf16 %v5221_v49  ;;  %4819 = vmatmul.mubr.msk.bf16.vlgmr.msra.gmra.mrb[8].mxu1 %vm1278_vm0, %v1177_v45  ;;  %5056 = vmatprep.subr.msk.bf16.mxu1 %vm1278_vm0, %v1228_v46  ;;  %v1469_v53 = vsel %vm1278_vm0, %v1228_v46, 0  ;;  %v5236_v60 = vpop.permute.xlu1 %5235 }
 0x2a7   : > { %4831 = vmatpush3.bf16.xpose.msra.mxu1 %v1469_v53  ;;  %v1472_v61 = vsel %vm1278_vm0, %v1229_v50, 0  ;;  %v5238_v62 = vunpack.i.h.bf16 %v5236_v60  ;;  %v5237_v63 = vunpack.i.l.bf16 %v5236_v60 }
 0x2a8   : > { %v1179_v54 = vpack.c.bf16 %v5223_v51, %v5222_v52  ;;  %5057 = vmatprep.subr.msk.bf16.mxu1 %vm1278_vm0, %v1229_v50 }
 0x2a9   : > { %v5231_v56 = vpop.permute.xlu0 %5230  ;;  %v1181_v1 = vpack.c.bf16 %v5238_v62, %v5237_v63 }
 0x2aa   : > { %v5233_v57 = vunpack.i.h.bf16 %v5231_v56  ;;  %v5232_v58 = vunpack.i.l.bf16 %v5231_v56  ;;  %4827 = vmatmul.mubr.msk.bf16.vlgmr.msra.gmra.mrb[8].mxu0 %vm1278_vm0, %v1179_v54 }
 0x2ab   : > { %4839 = vmatpush3.bf16.msra.mxu0 %v1270_v28 }
 0x2ac   : > { %v1180_v59 = vpack.c.bf16 %v5233_v57, %v5232_v58  ;;  %4840 = vmatprep.subr.bf16.mxu0 %v1271_v55 }
 0x2ae   : > { %4834 = vmatprep.mubr.msk.bf16.mxu1 %vm1278_vm0, %v1180_v59 }
 0x2af   : > { %4833 = vmatpush3.bf16.xpose.msra.mxu1 %v1472_v61  ;;  %4841 = vmatpush3.bf16.msra.mxu0 %v1271_v55 }
 0x2b6   : > { %4835 = vmatmul.mubr.msk.bf16.vlgmr.msra.gmra.mrb[12].mxu1 %vm1278_vm0, %v1181_v1 }
 0x303   : > { %v6500_v2 = vpop.f32.mrb[4].mxu1 }
 0x304   : > { %v6502_v3 = vpop.f32.mrb[5].mxu1  ;;  %v1529_v4 = vsel %vm1278_vm0, %v6500_v2, -inf }
 0x305   : > { %1530 = vmax.xlane.f32.xlu0 %v1529_v4  ;;  %v4813_v5 = vpop.f32.mrb[6].mxu1  ;;  %v1523_v8 = vsel %vm1278_vm0, %v6502_v3, -inf }
 0x306   : > { %v1328_v6 = vpop.f32.mrb[7].mxu1  ;;  %v1532_v9 = vsel %vm1278_vm0, %v4813_v5, -inf }
 0x307   : > { %v1526_v7 = vsel %vm1278_vm0, %v1328_v6, -inf }
 0x308   : > { %1527 = vmax.xlane.f32.xlu1 %v1526_v7 }
 0x309   : > { %1524 = vmax.xlane.f32.xlu0 %v1523_v8 }
 0x30d   : > { %1533 = vmax.xlane.f32.xlu0 %v1532_v9 }
 0x379   : > { %v6510_v10 = vpop.f32.mrb[8].mxu1 }
 0x37a   : > { %v6512_v11 = vpop.f32.mrb[9].mxu1  ;;  %v1541_v12 = vsel %vm1278_vm0, %v6510_v10, -inf }
 0x37b   : > { %1542 = vmax.xlane.f32.xlu1 %v1541_v12  ;;  %v6516_v13 = vpop.f32.mrb[10].mxu1  ;;  %v1535_v24 = vsel %vm1278_vm0, %v6512_v11, -inf }
 0x37c   : > { %v6518_v14 = vpop.f32.mrb[11].mxu1  ;;  %v1544_v15 = vsel %vm1278_vm0, %v6516_v13, -inf }
 0x37d   : > { %v6522_v16 = vpop.f32.mrb[8].mxu0  ;;  %1545 = vmax.xlane.f32.xlu0 %v1544_v15  ;;  %v1538_v25 = vsel %vm1278_vm0, %v6518_v14, -inf }
 0x37e   : > { %v6524_v17 = vpop.f32.mrb[9].mxu0  ;;  %v1553_v20 = vsel %vm1278_vm0, %v6522_v16, -inf }
 0x37f   : > { %v6528_v21 = vpop.f32.mrb[10].mxu0  ;;  %1554 = vmax.xlane.f32.xlu1 %v1553_v20  ;;  %v1547_v18 = vsel %vm1278_vm0, %v6524_v17, -inf }
 0x380   : > { %v6530_v22 = vpop.f32.mrb[11].mxu0  ;;  %v1556_v23 = vsel %vm1278_vm0, %v6528_v21, -inf }
 0x381   : > { %1557 = vmax.xlane.f32.xlu0 %v1556_v23  ;;  %v1550_v26 = vsel %vm1278_vm0, %v6530_v22, -inf }
 0x383   : > { %1536 = vmax.xlane.f32.xlu1 %v1535_v24 }
 0x385   : > { %1539 = vmax.xlane.f32.xlu0 %v1538_v25 }
 0x389   : > { %1551 = vmax.xlane.f32.xlu0 %v1550_v26  ;;  %v6540_v27 = vpop.f32.mrb[12].mxu1 }
 0x38a   : > { %v6542_v28 = vpop.f32.mrb[13].mxu1  ;;  %v1565_v44 = vsel %vm1278_vm0, %v6540_v27, -inf }
 0x38b   : > { %v6544_v30 = vpop.f32.mrb[14].mxu1  ;;  %v1559_v45 = vsel %vm1278_vm0, %v6542_v28, -inf }
 0x38c   : > { %v6546_v32 = vpop.f32.mrb[15].mxu1  ;;  %v1568_v33 = vsel %vm1278_vm0, %v6544_v30, -inf }
 0x38d   : > { %1569 = vmax.xlane.f32.xlu0 %v1568_v33  ;;  %v1562_v34 = vsel %vm1278_vm0, %v6546_v32, -inf }
 0x391   : > { %1563 = vmax.xlane.f32.xlu0 %v1562_v34 }
 0x392   : > { %v1531_v36 = vpop.xlane.xlu0 %1530 }
 0x393   : > { %v1573_v50 = vsub.f32 %v6500_v2, %v1531_v36 }
 0x394   : > { %5240 = vrot.lane.b32.xlu1 %v6554_v35, %s5963_s6 }
 0x395   : > { %v1528_v41 = vpop.xlane.xlu1 %1527  ;;  %v1591_v51 = vmul.f32 1.442695, %v1573_v50 }
 0x396   : > { %v1525_v38 = vpop.xlane.xlu0 %1524  ;;  %v1572_v42 = vsub.f32 %v1328_v6, %v1528_v41 }
 0x397   : > { %v1571_v52 = vsub.f32 %v6502_v3, %v1525_v38 }
 0x398   : > { %v1589_v19 = vmul.f32 1.442695, %v1572_v42 }
 0x399   : > { %v1587_v53 = vmul.f32 1.442695, %v1571_v52 }
 0x39a   : > { %v1534_v39 = vpop.xlane.xlu0 %1533 }
 0x39b   : > { %v1574_v40 = vsub.f32 %v4813_v5, %v1534_v39 }
 0x39d   : > { %v1593_v43 = vmul.f32 1.442695, %v1574_v40 }
 0x39f   : > { %5485 = vpow2.f32 %v1593_v43 }
 0x3a0   : > { %5487 = vpow2.f32 %v1589_v19 }
 0x3a1   : > { %5489 = vpow2.f32 %v1591_v51 }
 0x3a2   : > { %5491 = vpow2.f32 %v1587_v53 }
 0x3a7   : > { %5245 = vrot.lane.b32.xlu0 %v6560_v37, %s5963_s6 }
 0x3a9   : > { %v6570_v46 = vpop.eup %5485 }
 0x3aa   : > { %v1628_v47 = vsel %vm1278_vm0, %v6570_v46, 0.0  ;;  %v6574_v48 = vpop.eup %5487 }
 0x3ab   : > { %v1622_v49 = vsel %vm1278_vm0, %v6574_v48, 0.0  ;;  %v6582_v54 = vpop.eup %5489 }
 0x3ac   : > { %v1625_v55 = vsel %vm1278_vm0, %v6582_v54, 0.0  ;;  %v6586_v56 = vpop.eup %5491 }
 0x3ad   : > { %v1619_v57 = vsel %vm1278_vm0, %v6586_v56, 0.0 }
 0x3b8   : > { %1548 = vmax.xlane.f32.xlu1 %v1547_v18 }
 0x3bc   : > { %1566 = vmax.xlane.f32.xlu1 %v1565_v44 }
 0x3c0   : > { %1560 = vmax.xlane.f32.xlu1 %v1559_v45 }
 0x3c6   : > { %1629 = vadd.xlane.f32.xlu0 %v1628_v47 }
 0x3ca   : > { %1623 = vadd.xlane.f32.xlu0 %v1622_v49 }
 0x3d1   : > { %5250 = vrot.lane.b32.xlu1 %v6554_v35, %s5962_s28 }
 0x3f5   : > { %1626 = vadd.xlane.f32.xlu1 %v1625_v55 }
 0x3f9   : > { %1620 = vadd.xlane.f32.xlu1 %v1619_v57 }
 0x408   : > { %v1543_v58 = vpop.xlane.xlu1 %1542 }
 0x409   : > { %v1577_v59 = vsub.f32 %v6510_v10, %v1543_v58 }
 0x40a   : > { %v1546_v60 = vpop.xlane.xlu0 %1545 }
 0x40b   : > { %v1599_v61 = vmul.f32 1.442695, %v1577_v59  ;;  %v1578_v62 = vsub.f32 %v6516_v13, %v1546_v60 }
 0x40c   : > { %v1555_v63 = vpop.xlane.xlu1 %1554 }
 0x40d   : > { %5493 = vpow2.f32 %v1599_v61  ;;  %v1601_v1 = vmul.f32 1.442695, %v1578_v62  ;;  %v1581_v2 = vsub.f32 %v6522_v16, %v1555_v63 }
 0x40e   : > { %v1558_v3 = vpop.xlane.xlu0 %1557 }
 0x40f   : > { %5495 = vpow2.f32 %v1601_v1  ;;  %v1607_v4 = vmul.f32 1.442695, %v1581_v2  ;;  %v1582_v5 = vsub.f32 %v6528_v21, %v1558_v3 }
 0x410   : > { %v1537_v6 = vpop.xlane.xlu1 %1536 }
 0x411   : > { %5497 = vpow2.f32 %v1607_v4  ;;  %v1609_v7 = vmul.f32 1.442695, %v1582_v5  ;;  %v1575_v8 = vsub.f32 %v6512_v11, %v1537_v6 }
 0x412   : > { %v1540_v9 = vpop.xlane.xlu0 %1539 }
 0x413   : > { %5499 = vpow2.f32 %v1609_v7  ;;  %v1595_v10 = vmul.f32 1.442695, %v1575_v8  ;;  %v1576_v12 = vsub.f32 %v6518_v14, %v1540_v9 }
 0x414   : > { %v5241_v13 = vpop.permute.xlu1 %5240 }
 0x415   : > { %5501 = vpow2.f32 %v1595_v10  ;;  %v1597_v15 = vmul.f32 1.442695, %v1576_v12  ;;  %v5243_v20 = vunpack.i.h.bf16 %v5241_v13  ;;  %v5242_v16 = vunpack.i.l.bf16 %v5241_v13 }
 0x416   : > { %v1552_v23 = vpop.xlane.xlu0 %1551 }
 0x417   : > { %v6596_v24 = vpop.eup %5493  ;;  %5503 = vpow2.f32 %v1597_v15  ;;  %v1580_v21 = vsub.f32 %v6530_v22, %v1552_v23  ;;  %v1272_v25 = vpack.c.bf16 %v5243_v20, %v5242_v16 }
 0x418   : > { %v1637_v11 = vsel %vm1278_vm0, %v6596_v24, 0.0 }
 0x419   : > { %v6601_v26 = vpop.eup %5495  ;;  %v1605_v33 = vmul.f32 1.442695, %v1580_v21  ;;  %4846 = vmatprep.subr.bf16.mxu1 %v1272_v25  ;;  %1638 = vadd.xlane.f32.xlu1 %v1637_v11 }
 0x41a   : > { %4847 = vmatpush3.bf16.msra.mxu1 %v1272_v25  ;;  %v1570_v14 = vpop.xlane.xlu0 %1569  ;;  %v1640_v34 = vsel %vm1278_vm0, %v6601_v26, 0.0 }
 0x41b   : > { %v6605_v36 = vpop.eup %5497  ;;  %5505 = vpow2.f32 %v1605_v33  ;;  %v1586_v38 = vsub.f32 %v6544_v30, %v1570_v14  ;;  %1641 = vadd.xlane.f32.xlu0 %v1640_v34 }
 0x41c   : > { %v1649_v22 = vsel %vm1278_vm0, %v6605_v36, 0.0 }
 0x41d   : > { %v6610_v39 = vpop.eup %5499  ;;  %v1617_v40 = vmul.f32 1.442695, %v1586_v38  ;;  %1650 = vadd.xlane.f32.xlu1 %v1649_v22 }
 0x41e   : > { %v1564_v41 = vpop.xlane.xlu0 %1563  ;;  %v1652_v42 = vsel %vm1278_vm0, %v6610_v39, 0.0 }
 0x41f   : > { %v6614_v43 = vpop.eup %5501  ;;  %5507 = vpow2.f32 %v1617_v40  ;;  %v1584_v18 = vsub.f32 %v6546_v32, %v1564_v41  ;;  %1653 = vadd.xlane.f32.xlu0 %v1652_v42 }
 0x420   : > { %v1631_v30 = vsel %vm1278_vm0, %v6614_v43, 0.0 }
 0x421   : > { %v6619_v19 = vpop.eup %5503  ;;  %v1613_v44 = vmul.f32 1.442695, %v1584_v18  ;;  %1632 = vadd.xlane.f32.xlu1 %v1631_v30 }
 0x422   : > { %v5246_v45 = vpop.permute.xlu0 %5245  ;;  %v1634_v47 = vsel %vm1278_vm0, %v6619_v19, 0.0 }
 0x423   : > { %5509 = vpow2.f32 %v1613_v44  ;;  %v5248_v49 = vunpack.i.h.bf16 %v5246_v45  ;;  %v5247_v50 = vunpack.i.l.bf16 %v5246_v45  ;;  %1635 = vadd.xlane.f32.xlu0 %v1634_v47 }
 0x425   : > { %v6623_v51 = vpop.eup %5505  ;;  %v1273_v52 = vpack.c.bf16 %v5248_v49, %v5247_v50 }
 0x426   : > { %v1646_v32 = vsel %vm1278_vm0, %v6623_v51, 0.0 }
 0x427   : > { %1647 = vadd.xlane.f32.xlu0 %v1646_v32  ;;  %4848 = vmatprep.subr.bf16.mxu1 %v1273_v52 }
 0x428   : > { %4849 = vmatpush3.bf16.msra.mxu1 %v1273_v52 }
 0x429   : > { %v6627_v53 = vpop.eup %5507 }
 0x42a   : > { %v1664_v55 = vsel %vm1278_vm0, %v6627_v53, 0.0 }
 0x42b   : > { %1665 = vadd.xlane.f32.xlu0 %v1664_v55 }
 0x42d   : > { %v6631_v57 = vpop.eup %5509 }
 0x42e   : > { %v1658_v58 = vsel %vm1278_vm0, %v6631_v57, 0.0 }
 0x42f   : > { %1659 = vadd.xlane.f32.xlu0 %v1658_v58 }
 0x445   : > { %v1549_v59 = vpop.xlane.xlu1 %1548  ;;  %5255 = vrot.lane.b32.xlu0 %v6560_v37, %s5962_s28 }
 0x446   : > { %v1579_v60 = vsub.f32 %v6524_v17, %v1549_v59 }
 0x448   : > { %v1603_v61 = vmul.f32 1.442695, %v1579_v60 }
 0x449   : > { %v1567_v62 = vpop.xlane.xlu1 %1566 }
 0x44a   : > { %5511 = vpow2.f32 %v1603_v61  ;;  %v1585_v63 = vsub.f32 %v6540_v27, %v1567_v62 }
 0x44c   : > { %v1615_v1 = vmul.f32 1.442695, %v1585_v63 }
 0x44d   : > { %v1561_v2 = vpop.xlane.xlu1 %1560 }
 0x44e   : > { %5513 = vpow2.f32 %v1615_v1  ;;  %v1583_v3 = vsub.f32 %v6542_v28, %v1561_v2 }
 0x450   : > { %v1611_v4 = vmul.f32 1.442695, %v1583_v3 }
 0x451   : > { %v5251_v5 = vpop.permute.xlu1 %5250 }
 0x452   : > { %5515 = vpow2.f32 %v1611_v4  ;;  %v5253_v6 = vunpack.i.h.bf16 %v5251_v5  ;;  %v5252_v7 = vunpack.i.l.bf16 %v5251_v5 }
 0x453   : > { %v1630_v13 = vpop.xlane.xlu0 %1629 }
 0x454   : > { %v6640_v8 = vpop.eup %5511  ;;  %v1274_v9 = vpack.c.bf16 %v5253_v6, %v5252_v7 }
 0x455   : > { %v1643_v17 = vsel %vm1278_vm0, %v6640_v8, 0.0 }
 0x456   : > { %1644 = vadd.xlane.f32.xlu1 %v1643_v17  ;;  %4854 = vmatprep.subr.bf16.mxu0 %v1274_v9 }
 0x457   : > { %v1624_v15 = vpop.xlane.xlu0 %1623 }
 0x458   : > { %v6644_v10 = vpop.eup %5513 }
 0x459   : > { %v1661_v27 = vsel %vm1278_vm0, %v6644_v10, 0.0 }
 0x45a   : > { %1662 = vadd.xlane.f32.xlu1 %v1661_v27 }
 0x45c   : > { %v6648_v28 = vpop.eup %5515 }
 0x45d   : > { %v1655_v12 = vsel %vm1278_vm0, %v6648_v28, 0.0 }
 0x45e   : > { %1656 = vadd.xlane.f32.xlu1 %v1655_v12 }
 0x46f   : > { %5260 = vrot.lane.b32.xlu1 %v6554_v35, %s5964_s4 }
 0x473   : > { %5265 = vrot.lane.b32.xlu1 %v6560_v37, %s5964_s4 }
 0x482   : > { %v1627_v20 = vpop.xlane.xlu1 %1626 }
 0x483   : > { %5517 = vrcp.f32 %v1627_v20  ;;  %v5394_v20 = vld [vmem:[%s7296_s17 + $0x8] sm:$0xff]  }
 0x484   : > { %5519 = vrcp.f32 %v1624_v15 }
 0x485   : > { %5521 = vrcp.f32 %v1630_v13 }
 0x486   : > { %v1621_v16 = vpop.xlane.xlu1 %1620 }
 0x487   : > { %5523 = vrcp.f32 %v1621_v16 }
 0x48d   : > { %v5518_v23 = vpop.eup %5517 }
 0x48e   : > { %v5520_v21 = vpop.eup %5519  ;;  %v1685_v33 = vmul.f32 %v5518_v23, %v6582_v54 }
 0x48f   : > { %v5522_v25 = vpop.eup %5521  ;;  %v1684_v35 = vmul.f32 %v5520_v21, %v6574_v48 }
 0x490   : > { %v1686_v37 = vmul.f32 %v5522_v25, %v6570_v46 }
 0x491   : > { %v5524_v11 = vpop.eup %5523 }
 0x492   : > { %v1683_v14 = vmul.f32 %v5524_v11, %v6586_v56  ;;  %v1700_v38 = vpack.c.bf16 %v1686_v37, %v1685_v33  ;;  %v5395_v33 = vld [vmem:[%s7296_s17 + $0x10] sm:$0xff]  }
 0x494   : > { %v1699_v34 = vpack.c.bf16 %v1684_v35, %v1683_v14 }
 0x496   : > { %4842 = vmatprep.mubr.msk.bf16.mxu0 %vm1278_vm0, %v1699_v34 }
 0x497   : > { %4843 = vmatmul.mubr.msk.bf16.vlgmr.msra.gmra.mrb[12].mxu0 %vm1278_vm0, %v1700_v38 }
 0x498   : > { %4855 = vmatpush3.bf16.msra.mxu0 %v1274_v9 }
 0x4a6   : > { %v1639_v22 = vpop.xlane.xlu1 %1638 }
 0x4a8   : > { %v1642_v40 = vpop.xlane.xlu0 %1641 }
 0x4a9   : > { %5525 = vrcp.f32 %v1642_v40 }
 0x4aa   : > { %v1651_v41 = vpop.xlane.xlu1 %1650 }
 0x4ac   : > { %v1654_v42 = vpop.xlane.xlu0 %1653 }
 0x4ae   : > { %v1633_v18 = vpop.xlane.xlu1 %1632 }
 0x4af   : > { %5527 = vrcp.f32 %v1633_v18 }
 0x4b0   : > { %5529 = vrcp.f32 %v1639_v22  ;;  %v1636_v54 = vpop.xlane.xlu0 %1635 }
 0x4b1   : > { %5531 = vrcp.f32 %v1636_v54 }
 0x4b2   : > { %5533 = vrcp.f32 %v1654_v42 }
 0x4b3   : > { %v5526_v56 = vpop.eup %5525 }
 0x4b4   : > { %v1648_v48 = vpop.xlane.xlu0 %1647  ;;  %v1690_v47 = vmul.f32 %v5526_v56, %v6601_v26  ;;  %v5393_v26 = vld [vmem:[%s7296_s17] sm:$0xff]  }
 0x4b5   : > { %5535 = vrcp.f32 %v1648_v48 }
 0x4b6   : > { %5537 = vrcp.f32 %v1651_v41 }
 0x4b8   : > { %v1666_v46 = vpop.xlane.xlu0 %1665 }
 0x4b9   : > { %v5528_v30 = vpop.eup %5527 }
 0x4ba   : > { %v5530_v44 = vpop.eup %5529  ;;  %v1687_v50 = vmul.f32 %v5528_v30, %v6614_v43 }
 0x4bb   : > { %v5532_v45 = vpop.eup %5531  ;;  %v1689_v32 = vmul.f32 %v5530_v44, %v6596_v24  ;;  %v5398_v44 = vld [vmem:[%s7296_s17 + $0x28] sm:$0xff]  }
 0x4bc   : > { %v1660_v49 = vpop.xlane.xlu0 %1659  ;;  %v1688_v52 = vmul.f32 %v5532_v45, %v6619_v19  ;;  %v5534_v19 = vpop.eup %5533  ;;  %v5399_v45 = vld [vmem:[%s7296_s17 + $0x30] sm:$0xff]  }
 0x4bd   : > { %v1702_v58 = vpack.c.bf16 %v1690_v47, %v1689_v32  ;;  %v1694_v4 = vmul.f32 %v5534_v19, %v6610_v39 }
 0x4be   : > { %v1701_v55 = vpack.c.bf16 %v1688_v52, %v1687_v50 }
 0x4bf   : > { %v5536_v1 = vpop.eup %5535 }
 0x4c0   : > { %4850 = vmatprep.mubr.msk.bf16.mxu1 %vm1278_vm0, %v1701_v55  ;;  %v5256_v59 = vpop.permute.xlu0 %5255  ;;  %v5538_v2 = vpop.eup %5537  ;;  %v1692_v7 = vmul.f32 %v5536_v1, %v6623_v51 }
 0x4c1   : > { %v5258_v60 = vunpack.i.h.bf16 %v5256_v59  ;;  %v5257_v61 = vunpack.i.l.bf16 %v5256_v59  ;;  %4851 = vmatmul.mubr.msk.bf16.vlgmr.msra.gmra.mrb[16].mxu1 %vm1278_vm0, %v1702_v58  ;;  %v1693_v9 = vmul.f32 %v5538_v2, %v6605_v36  ;;  %v5400_v58 = vld [vmem:[%s7296_s17 + $0x38] sm:$0xff]  }
 0x4c3   : > { %v1275_v62 = vpack.c.bf16 %v5258_v60, %v5257_v61  ;;  %v1704_v15 = vpack.c.bf16 %v1694_v4, %v1693_v9 }
 0x4c5   : > { %4856 = vmatprep.subr.bf16.mxu0 %v1275_v62 }
 0x4c6   : > { %4857 = vmatpush3.bf16.msra.mxu0 %v1275_v62 }
 0x4c7   : > { %4870 = vmatprep.subr.bf16.mxu0 %v5393_v26 }
 0x4e3   : > { %v1645_v24 = vpop.xlane.xlu1 %1644 }
 0x4e4   : > { %5539 = vrcp.f32 %v1645_v24 }
 0x4e7   : > { %v1663_v43 = vpop.xlane.xlu1 %1662 }
 0x4e8   : > { %5541 = vrcp.f32 %v1663_v43  ;;  %v4482_v43 = vld [vmem:[#allocation2] ss:$0 sm:$0xff] }
 0x4e9   : > { %5543 = vrcp.f32 %v1660_v49 }
 0x4ea   : > { %5545 = vrcp.f32 %v1666_v46 }
 0x4eb   : > { %v1657_v63 = vpop.xlane.xlu1 %1656 }
 0x4ec   : > { %5547 = vrcp.f32 %v1657_v63  ;;  %v5637_v63 = vld [vmem:[%s6374_s24] sm:$0xff]  }
 0x4ed   : > { %v835_v1 = vunpack.c.l.bf16 %v5637_v63 }
 0x4ee   : > { %v5540_v3 = vpop.eup %5539 }
 0x4ef   : > { %v5261_v5 = vpop.permute.xlu1 %5260  ;;  %v1691_v6 = vmul.f32 %v5540_v3, %v6640_v8 }
 0x4f0   : > { %v5263_v17 = vunpack.i.h.bf16 %v5261_v5  ;;  %v5262_v27 = vunpack.i.l.bf16 %v5261_v5  ;;  %v836_v5 = vunpack.c.h.bf16 %v5637_v63 }
 0x4f1   : > { %v1703_v12 = vpack.c.bf16 %v1692_v7, %v1691_v6 }
 0x4f2   : > { %v1276_v13 = vpack.c.bf16 %v5263_v17, %v5262_v27  ;;  %v5542_v16 = vpop.eup %5541  ;;  %v5638_v27 = vld [vmem:[%s6374_s24 + $0x8] sm:$0xff]  }
 0x4f3   : > { %v5266_v23 = vpop.permute.xlu1 %5265  ;;  %4858 = vmatprep.mubr.msk.bf16.mxu0 %vm1278_vm0, %v1703_v12  ;;  %v5544_v39 = vpop.eup %5543  ;;  %v1697_v25 = vmul.f32 %v5542_v16, %v6644_v10  ;;  %v837_v12 = vunpack.c.l.bf16 %v5638_v27  ;;  %v838_v16 = vunpack.c.h.bf16 %v5638_v27 }
 0x4f4   : > { %v5268_v21 = vunpack.i.h.bf16 %v5266_v23  ;;  %v5267_v8 = vunpack.i.l.bf16 %v5266_v23  ;;  %4859 = vmatmul.mubr.msk.bf16.vlgmr.msra.gmra.mrb[16].mxu0 %vm1278_vm0, %v1704_v15  ;;  %4862 = vmatprep.subr.bf16.mxu1 %v1276_v13  ;;  %v5546_v36 = vpop.eup %5545  ;;  %v1696_v35 = vmul.f32 %v5544_v39, %v6631_v57  ;;  %v5397_v57 = vld [vmem:[%s7296_s17 + $0x20] sm:$0xff]  }
 0x4f5   : > { %4863 = vmatpush3.bf16.msra.mxu1 %v1276_v13  ;;  %4871 = vmatpush3.bf16.msra.mxu0 %v5393_v26  ;;  %v1698_v37 = vmul.f32 %v5546_v36, %v6627_v53  ;;  %v5396_v53 = vld [vmem:[%s7296_s17 + $0x18] sm:$0xff]   ;;  %v5401_v39 = vld [vmem:[%s7241_s10] ss:$8 sps:$4 sm:$0xff]  }
 0x4f6   : > { %v5548_v51 = vpop.eup %5547  ;;  %v1277_v11 = vpack.c.bf16 %v5268_v21, %v5267_v8  ;;  %4872 = vmatprep.subr.bf16.mxu0 %v5394_v20  ;;  %v5403_v21 = vld [vmem:[%s7241_s10 + $0x4] ss:$8 sps:$4 sm:$0xff]   ;;  %v5406_v8 = vld [vmem:[%s7241_s10 + $0x14] ss:$8 sps:$4 sm:$0xff]  }
 0x4f7   : > { %v1695_v14 = vmul.f32 %v5548_v51, %v6648_v28  ;;  %v1706_v38 = vpack.c.bf16 %v1698_v37, %v1697_v25  ;;  %v5413_v36 = vld [vmem:[%s7239_s8] sm:$0xff]   ;;  %v5404_v51 = vld [vmem:[%s7241_s10 + $0x10] ss:$8 sps:$4 sm:$0xff]  }
 0x4f8   : > { %4864 = vmatprep.subr.bf16.mxu1 %v1277_v11  ;;  %v5409_v25 = vld [vmem:[%s7241_s10 + $0x24] ss:$8 sps:$4 sm:$0xff]  }
 0x4f9   : > { %4865 = vmatpush3.bf16.msra.mxu1 %v1277_v11  ;;  %v1705_v34 = vpack.c.bf16 %v1696_v35, %v1695_v14  ;;  %4873 = vmatpush3.bf16.msra.mxu0 %v5394_v20  ;;  %v5407_v11 = vld [vmem:[%s7241_s10 + $0x20] ss:$8 sps:$4 sm:$0xff]   ;;  %v5410_v14 = vld [vmem:[%s7241_s10 + $0x30] ss:$8 sps:$4 sm:$0xff]  }
 0x4fa   : > { %4878 = vmatprep.subr.bf16.mxu0 %v5395_v33  ;;  %4902 = vmatprep.subr.bf16.mxu1 %v5413_v36 }
 0x4fb   : > { %4866 = vmatprep.mubr.msk.bf16.mxu1 %vm1278_vm0, %v1705_v34 }
 0x4fc   : > { %4867 = vmatmul.mubr.msk.bf16.vlgmr.msra.gmra.mrb[20].mxu1 %vm1278_vm0, %v1706_v38 }
 0x4fd   : > { %4903 = vmatpush3.bf16.msra.mxu1 %v5413_v36 }
 0x56a   : > { %v4844_v10 = vpop.f32.mrb[12].mxu0 }
 0x56b   : > { %v1747_v22 = vpop.f32.mrb[13].mxu0 }
 0x56c   : > { %v4845_v40 = vpop.f32.mrb[14].mxu0 }
 0x56d   : > { %v1928_v41 = vpack.c.bf16 %v4845_v40, %v4844_v10  ;;  %v1750_v42 = vpop.f32.mrb[15].mxu0 }
 0x56e   : > { %v1927_v28 = vpack.c.bf16 %v1750_v42, %v1747_v22 }
 0x570   : > { %4874 = vmatprep.mubr.msk.bf16.mxu0 %vm1278_vm0, %v1927_v28 }
 0x571   : > { %4875 = vmatmul.mubr.msk.bf16.vlgmr.msra.gmra.mrb[20].mxu0 %vm1278_vm0, %v1928_v41 }
 0x572   : > { %4879 = vmatpush3.bf16.msra.mxu0 %v5395_v33  ;;  %v5412_v33 = vld [vmem:[%s7241_s10 + $0x34] ss:$8 sps:$4 sm:$0xff]  }
 0x573   : > { %4880 = vmatprep.subr.bf16.mxu0 %v5396_v53 }
 0x576   : > { %4881 = vmatpush3.bf16.msra.mxu0 %v5396_v53 }
 0x577   : > { %4886 = vmatprep.subr.bf16.mxu0 %v5397_v57 }
 0x594   : > { %v4852_v18 = vpop.f32.mrb[16].mxu1 }
 0x595   : > { %v1802_v54 = vpop.f32.mrb[17].mxu1 }
 0x596   : > { %v4853_v48 = vpop.f32.mrb[18].mxu1 }
 0x597   : > { %v1930_v56 = vpack.c.bf16 %v4853_v48, %v4852_v18  ;;  %v1805_v46 = vpop.f32.mrb[19].mxu1 }
 0x598   : > { %v1929_v30 = vpack.c.bf16 %v1805_v46, %v1802_v54  ;;  %v5416_v46 = vld [vmem:[%s7241_s10 + $0x44] ss:$8 sps:$4 sm:$0xff]  }
 0x59a   : > { %4882 = vmatprep.mubr.msk.bf16.mxu0 %vm1278_vm0, %v1929_v30  ;;  %v5414_v30 = vld [vmem:[%s7241_s10 + $0x40] ss:$8 sps:$4 sm:$0xff]  }
 0x59b   : > { %4883 = vmatmul.mubr.msk.bf16.vlgmr.msra.gmra.mrb[20].mxu0 %vm1278_vm0, %v1930_v56 }
 0x59c   : > { %4887 = vmatpush3.bf16.msra.mxu0 %v5397_v57 }
 0x59d   : > { %4888 = vmatprep.subr.bf16.mxu0 %v5398_v44 }
 0x5a0   : > { %4889 = vmatpush3.bf16.msra.mxu0 %v5398_v44  ;;  %v5417_v44 = vld [vmem:[%s7239_s8 + $0x8] sm:$0xff]  }
 0x5a1   : > { %4894 = vmatprep.subr.bf16.mxu0 %v5399_v45  ;;  %4904 = vmatprep.subr.bf16.mxu1 %v5417_v44 }
 0x5a2   : > { %4905 = vmatpush3.bf16.msra.mxu1 %v5417_v44 }
 0x5c7   : > { %v4860_v47 = vpop.f32.mrb[16].mxu0 }
 0x5c8   : > { %v1857_v49 = vpop.f32.mrb[17].mxu0 }
 0x5c9   : > { %v4861_v50 = vpop.f32.mrb[18].mxu0 }
 0x5ca   : > { %v1932_v52 = vpack.c.bf16 %v4861_v50, %v4860_v47  ;;  %v1860_v32 = vpop.f32.mrb[19].mxu0  ;;  %v5418_v47 = vld [vmem:[%s7241_s10 + $0x50] ss:$8 sps:$4 sm:$0xff]   ;;  %v5424_v50 = vld [vmem:[%s7241_s10 + $0x64] ss:$8 sps:$4 sm:$0xff]  }
 0x5cb   : > { %v1931_v55 = vpack.c.bf16 %v1860_v32, %v1857_v49  ;;  %v5421_v49 = vld [vmem:[%s7239_s8 + $0x10] sm:$0xff]   ;;  %v5425_v32 = vld [vmem:[%s7239_s8 + $0x18] sm:$0xff]  }
 0x5cc   : > { %4906 = vmatprep.subr.bf16.mxu1 %v5421_v49 }
 0x5cd   : > { %4890 = vmatprep.mubr.msk.bf16.mxu0 %vm1278_vm0, %v1931_v55  ;;  %4907 = vmatpush3.bf16.msra.mxu1 %v5421_v49  ;;  %v5428_v55 = vld [vmem:[%s7241_s10 + $0x74] ss:$8 sps:$4 sm:$0xff]  }
 0x5ce   : > { %4891 = vmatmul.mubr.msk.bf16.vlgmr.msra.gmra.mrb[20].mxu0 %vm1278_vm0, %v1932_v52  ;;  %v5422_v52 = vld [vmem:[%s7241_s10 + $0x60] ss:$8 sps:$4 sm:$0xff]   ;;  %4908 = vmatprep.subr.bf16.mxu1 %v5425_v32 }
 0x5cf   : > { %v4868_v59 = vpop.f32.mrb[20].mxu1  ;;  %4895 = vmatpush3.bf16.msra.mxu0 %v5399_v45  ;;  %v5420_v45 = vld [vmem:[%s7241_s10 + $0x54] ss:$8 sps:$4 sm:$0xff]  }
 0x5d0   : > { %v1912_v60 = vpop.f32.mrb[21].mxu1  ;;  %4896 = vmatprep.subr.bf16.mxu0 %v5400_v58 }
 0x5d1   : > { %v4869_v61 = vpop.f32.mrb[22].mxu1  ;;  %4909 = vmatpush3.bf16.msra.mxu1 %v5425_v32 }
 0x5d2   : > { %v1934_v62 = vpack.c.bf16 %v4869_v61, %v4868_v59  ;;  %v1915_v26 = vpop.f32.mrb[23].mxu1  ;;  %v5429_v59 = vld [vmem:[%s7239_s8 + $0x20] sm:$0xff]   ;;  %v5431_v61 = vld [vmem:[%s7239_s8 + $0x28] sm:$0xff]  }
 0x5d3   : > { %v1933_v24 = vpack.c.bf16 %v1915_v26, %v1912_v60  ;;  %4897 = vmatpush3.bf16.msra.mxu0 %v5400_v58  ;;  %v5426_v58 = vld [vmem:[%s7241_s10 + $0x70] ss:$8 sps:$4 sm:$0xff]   ;;  %4910 = vmatprep.subr.bf16.mxu1 %v5429_v59  ;;  %v5430_v60 = vld [vmem:[%s824_s9] sm:$0xff]   ;;  %v5433_v26 = vld [vmem:[%s824_s9 + $0x8] sm:$0xff]   ;;  %s829_s9 = scalar_lea.vmem %s7300_s0, %s6365_s22 }
 0x5d4   : > { %2558 = vmatprep.subr.bf16.mxu0 %v5403_v21 }
 0x5d5   : > { %4898 = vmatprep.mubr.msk.bf16.mxu0 %vm1278_vm0, %v1933_v24  ;;  %4911 = vmatpush3.bf16.msra.mxu1 %v5429_v59  ;;  %v5434_v24 = vld [vmem:[%s7239_s8 + $0x38] sm:$0xff]  }
 0x5d6   : > { %4912 = vmatprep.subr.bf16.mxu1 %v5431_v61 }
 0x5d9   : > { %4913 = vmatpush3.bf16.msra.mxu1 %v5431_v61 }
 0x5da   : > { %4899 = vmatmul.mubr.msk.bf16.vlgmr.msra.gmra.mrb[20].mxu0 %vm1278_vm0, %v1934_v62  ;;  %v5432_v62 = vld [vmem:[%s7239_s8 + $0x30] sm:$0xff]  }
 0x5db   : > { %2590 = vmatprep.mubr.bf16.mxu0 %v5961_v0  ;;  %2559 = vmatpush1.bf16.msra.mxu0 %v5401_v39  ;;  %v4508_v39 = vld [vmem:[#allocation6] ss:$0 sm:$0xff] }
 0x5dc   : > { %2560 = vmatprep.subr.bf16.mxu0 %v5406_v8  ;;  %4914 = vmatprep.subr.bf16.mxu1 %v5432_v62 }
 0x5dd   : > { %4915 = vmatpush3.bf16.msra.mxu1 %v5432_v62 }
 0x5de   : > { %4916 = vmatprep.subr.bf16.mxu1 %v5434_v24 }
 0x5df   : > { %2561 = vmatpush1.bf16.msra.mxu0 %v5404_v51 }
 0x5e0   : > { %2562 = vmatprep.subr.bf16.mxu0 %v5409_v25 }
 0x5e1   : > { %4917 = vmatpush3.bf16.msra.mxu1 %v5434_v24 }
 0x5e3   : > { %2563 = vmatpush1.bf16.msra.mxu0 %v5407_v11 }
 0x5e4   : > { %2564 = vmatprep.subr.bf16.mxu0 %v5412_v33 }
 0x5e7   : > { %2565 = vmatpush1.bf16.msra.mxu0 %v5410_v14 }
 0x5e8   : > { %2566 = vmatprep.subr.bf16.mxu0 %v5416_v46 }
 0x5eb   : > { %2567 = vmatpush1.bf16.msra.mxu0 %v5414_v30 }
 0x5ec   : > { %2568 = vmatprep.subr.bf16.mxu0 %v5420_v45 }
 0x5ef   : > { %2569 = vmatpush1.bf16.msra.mxu0 %v5418_v47 }
 0x5f0   : > { %2570 = vmatprep.subr.bf16.mxu0 %v5424_v50 }
 0x5f3   : > { %2571 = vmatpush1.bf16.msra.mxu0 %v5422_v52 }
 0x5f4   : > { %2572 = vmatprep.subr.bf16.mxu0 %v5428_v55 }
 0x5f7   : > { %2573 = vmatpush1.bf16.msra.mxu0 %v5426_v58 }
 0x5fa   : > { %2591 = vmatmul.mubr.bf16.vlgmr.msra.gmra.mrb[24].mxu0 %v5430_v60 }
 0x5fb   : > { %2600 = vmatprep.mubr.bf16.mxu0 %v5961_v0 }
 0x602   : > { %2601 = vmatmul.mubr.bf16.gmra.mrb[28].mxu0 %v5433_v26 }
 0x6ad   : > { %v4900_v19 = vpop.f32.mrb[20].mxu0 }
 0x6ae   : > { %v2226_v2 = vpop.f32.mrb[21].mxu0  ;;  %v5018_v7 = vadd.f32 %v4900_v19, %v4482_v43 }
 0x6af   : > { %v5019_v3 = vadd.f32 %v4482_v43, %v2226_v2  ;;  %v4901_v4 = vpop.f32.mrb[22].mxu0 }
 0x6b0   : > { %v2229_v6 = vpop.f32.mrb[23].mxu0  ;;  %v5020_v15 = vadd.f32 %v4901_v4, %v4482_v43  ;;  %v2247_v20 = vadd.f32 %v5018_v7, %v837_v12  ;;  %v4507_v12 = vld [vmem:[#allocation4] ss:$0 sm:$0xff] }
 0x6b1   : > { %v5021_v9 = vadd.f32 %v4482_v43, %v2229_v6  ;;  %v2245_v17 = vadd.f32 %v5019_v3, %v835_v1 }
 0x6b2   : > { %v2248_v23 = vadd.f32 %v5020_v15, %v838_v16 }
 0x6b3   : > { %2249 = vadd.xlane.f32.xlu0 %v2245_v17  ;;  %v2246_v13 = vadd.f32 %v5021_v9, %v836_v5 }
 0x6b5   : > { %2251 = vadd.xlane.f32.xlu1 %v2246_v13 }
 0x6b7   : > { %2253 = vadd.xlane.f32.xlu0 %v2247_v20 }
 0x6bb   : > { %2255 = vadd.xlane.f32.xlu0 %v2248_v23 }
 0x740   : > { %v2250_v35 = vpop.xlane.xlu0 %2249 }
 0x741   : > { %v2258_v37 = vmul.f32 0.0078125, %v2250_v35 }
 0x742   : > { %v2252_v34 = vpop.xlane.xlu1 %2251 }
 0x743   : > { %v6742_v38 = vsub.f32 %v2245_v17, %v2258_v37  ;;  %v2259_v10 = vmul.f32 0.0078125, %v2252_v34 }
 0x744   : > { %v2254_v22 = vpop.xlane.xlu0 %2253 }
 0x745   : > { %v6744_v40 = vsub.f32 %v2246_v13, %v2259_v10  ;;  %v2260_v41 = vmul.f32 0.0078125, %v2254_v22  ;;  %v2266_v42 = vmul.f32 %v6742_v38, %v6742_v38  ;;  %v2454_v10 = vld [vmem:[%s7242_s11] sm:$0x3] }
 0x746   : > { %v2459_v22 = vrot.slane %v2454_v10, %v6436_v29 }
 0x747   : > { %v6748_v28 = vsub.f32 %v2247_v20, %v2260_v41  ;;  %2270 = vadd.xlane.f32.xlu1 %v2266_v42  ;;  %v2267_v53 = vmul.f32 %v6744_v40, %v6744_v40 }
 0x748   : > { %v2256_v57 = vpop.xlane.xlu0 %2255 }
 0x749   : > { %v2261_v18 = vmul.f32 0.0078125, %v2256_v57  ;;  %2272 = vadd.xlane.f32.xlu0 %v2267_v53  ;;  %v2268_v54 = vmul.f32 %v6748_v28, %v6748_v28 }
 0x74b   : > { %v6754_v48 = vsub.f32 %v2248_v23, %v2261_v18  ;;  %2274 = vadd.xlane.f32.xlu1 %v2268_v54 }
 0x74d   : > { %v2269_v56 = vmul.f32 %v6754_v48, %v6754_v48 }
 0x74f   : > { %2276 = vadd.xlane.f32.xlu0 %v2269_v56 }
 0x7d4   : > { %v2271_v43 = vpop.xlane.xlu1 %2270 }
 0x7d5   : > { %v2278_v19 = vmul.f32 0.0078125, %v2271_v43 }
 0x7d6   : > { %v2273_v63 = vpop.xlane.xlu0 %2272 }
 0x7d7   : > { %v2282_v1 = vadd.f32 1e-05, %v2278_v19  ;;  %v2279_v2 = vmul.f32 0.0078125, %v2273_v63 }
 0x7d8   : > { %v2275_v3 = vpop.xlane.xlu1 %2274 }
 0x7d9   : > { %5549 = vrsqrt.f32 %v2282_v1  ;;  %v2283_v4 = vadd.f32 1e-05, %v2279_v2  ;;  %v2280_v5 = vmul.f32 0.0078125, %v2275_v3 }
 0x7db   : > { %5551 = vrsqrt.f32 %v2283_v4  ;;  %v2284_v6 = vadd.f32 1e-05, %v2280_v5 }
 0x7dc   : > { %v2277_v7 = vpop.xlane.xlu0 %2276 }
 0x7dd   : > { %5553 = vrsqrt.f32 %v2284_v6  ;;  %v2281_v9 = vmul.f32 0.0078125, %v2277_v7 }
 0x7df   : > { %v2285_v17 = vadd.f32 1e-05, %v2281_v9  ;;  %v4509_v9 = vld [vmem:[#allocation7] ss:$0 sm:$0xff] }
 0x7e1   : > { %5555 = vrsqrt.f32 %v2285_v17 }
 0x7e3   : > { %v5550_v27 = vpop.eup %5549 }
 0x7e4   : > { %v2290_v13 = vmul.f32 %v5550_v27, %v6742_v38 }
 0x7e5   : > { %v5552_v15 = vpop.eup %5551 }
 0x7e6   : > { %v2291_v20 = vmul.f32 %v5552_v15, %v6744_v40  ;;  %v2301_v16 = vmul.f32 %v4507_v12, %v2290_v13  ;;  %v2592_v40 = vpop.f32.mrb[24].mxu0 }
 0x7e7   : > { %v5554_v23 = vpop.eup %5553  ;;  %v2593_v41 = vadd.f32 %v2592_v40, %v2459_v22  ;;  %v2594_v42 = vpop.f32.mrb[25].mxu0 }
 0x7e8   : > { %v2292_v21 = vmul.f32 %v5554_v23, %v6748_v28  ;;  %v2302_v8 = vmul.f32 %v4507_v12, %v2291_v20  ;;  %v6811_v36 = vadd.f32 %v4508_v39, %v2301_v16  ;;  %v2463_v28 = vrot.slane %v2454_v10, %v6444_v31  ;;  %v2596_v53 = vpop.f32.mrb[26].mxu0 }
 0x7e9   : > { %v2597_v57 = vadd.f32 %v2596_v53, %v2459_v22  ;;  %v2598_v18 = vpop.f32.mrb[27].mxu0 }
 0x7ea   : > { %v6813_v51 = vadd.f32 %v4508_v39, %v2302_v8  ;;  %v2303_v14 = vmul.f32 %v4507_v12, %v2292_v21  ;;  %v2595_v56 = vadd.f32 %v2594_v42, %v2463_v28  ;;  %v2599_v46 = vadd.f32 %v2598_v18, %v2463_v28  ;;  %v2602_v44 = vpop.f32.mrb[28].mxu0 }
 0x7eb   : > { %v5556_v25 = vpop.eup %5555  ;;  %v2699_v54 = vpack.c.bf16 %v2597_v57, %v2593_v41  ;;  %v2603_v45 = vadd.f32 %v2602_v44, %v2459_v22  ;;  %v2604_v47 = vpop.f32.mrb[29].mxu0 }
 0x7ec   : > { %v2293_v11 = vmul.f32 %v5556_v25, %v6754_v48  ;;  %v2316_v33 = vpack.c.bf16 %v6813_v51, %v6811_v36  ;;  %v6818_v37 = vadd.f32 %v4508_v39, %v2303_v14  ;;  %v5269_v48 = vpack.i.bf16 %v2597_v57, %v2593_v41  ;;  %v2606_v49 = vpop.f32.mrb[30].mxu0 }
 0x7ed   : > { %5058 = vmatprep.subr.msk.bf16.mxu1 %vm1278_vm0, %v2699_v54  ;;  %v2762_v30 = vsel %vm1278_vm0, %v2699_v54, 0  ;;  %v6832_v50 = vpack.c.bf16 %v2599_v46, %v2595_v56  ;;  %v6834_v52 = vpack.i.bf16 %v2599_v46, %v2595_v56  ;;  %v2607_v32 = vadd.f32 %v2606_v49, %v2459_v22  ;;  %v2608_v60 = vpop.f32.mrb[31].mxu0 }
 0x7ee   : > { %4918 = vmatprep.mubr.bf16.mxu1 %v2316_v33  ;;  %v2304_v35 = vmul.f32 %v4507_v12, %v2293_v11  ;;  %5270 = vrot.lane.b32.xlu1 %v5269_v48, %s5963_s6  ;;  %v2605_v59 = vadd.f32 %v2604_v47, %v2463_v28  ;;  %v2609_v62 = vadd.f32 %v2608_v60, %v2463_v28 }
 0x7ef   : > { %v5274_v55 = vpack.i.bf16 %v2607_v32, %v2603_v45  ;;  %v2700_v58 = vpack.c.bf16 %v2607_v32, %v2603_v45 }
 0x7f0   : > { %v6820_v34 = vadd.f32 %v4508_v39, %v2304_v35  ;;  %v6840_v26 = vpack.c.bf16 %v2609_v62, %v2605_v59  ;;  %v6842_v24 = vpack.i.bf16 %v2609_v62, %v2605_v59 }
 0x7f1   : > { %5275 = vrot.lane.b32.xlu0 %v5274_v55, %s5963_s6  ;;  %v2765_v61 = vsel %vm1278_vm0, %v2700_v58, 0 }
 0x7f2   : > { %v2317_v38 = vpack.c.bf16 %v6820_v34, %v6818_v37  ;;  %5280 = vrot.lane.b32.xlu1 %v5269_v48, %s5962_s28 }
 0x7f4   : > { %4919 = vmatmul.mubr.bf16.vlgmr.msra.gmra.mrb[24].mxu1 %v2317_v38 }
 0x7f5   : > { %4923 = vmatpush3.bf16.xpose.msra.mxu1 %v2762_v30 }
 0x7f6   : > { %5059 = vmatprep.subr.msk.bf16.mxu1 %vm1278_vm0, %v2700_v58 }
 0x7fd   : > { %4925 = vmatpush3.bf16.xpose.msra.mxu1 %v2765_v61 }
 0x860   : > { %v5271_v43 = vpop.permute.xlu1 %5270 }
 0x861   : > { %v5273_v19 = vunpack.i.h.bf16 %v5271_v43  ;;  %v5272_v63 = vunpack.i.l.bf16 %v5271_v43 }
 0x863   : > { %v2701_v1 = vpack.c.bf16 %v5273_v19, %v5272_v63  ;;  %v5276_v17 = vpop.permute.xlu0 %5275 }
 0x864   : > { %v5281_v2 = vpop.permute.xlu1 %5280  ;;  %v5278_v16 = vunpack.i.h.bf16 %v5276_v17  ;;  %v5277_v23 = vunpack.i.l.bf16 %v5276_v17 }
 0x865   : > { %v5283_v3 = vunpack.i.h.bf16 %v5281_v2  ;;  %v5282_v4 = vunpack.i.l.bf16 %v5281_v2  ;;  %5060 = vmatprep.subr.msk.bf16.mxu1 %vm1278_vm0, %v2701_v1  ;;  %v2823_v14 = vsel %vm1278_vm0, %v2701_v1, 0 }
 0x866   : > { %v2702_v35 = vpack.c.bf16 %v5278_v16, %v5277_v23 }
 0x867   : > { %v2703_v5 = vpack.c.bf16 %v5283_v3, %v5282_v4 }
 0x868   : > { %v2826_v38 = vsel %vm1278_vm0, %v2702_v35, 0 }
 0x869   : > { %5062 = vmatprep.subr.msk.bf16.mxu0 %vm1278_vm0, %v2703_v5  ;;  %v2884_v6 = vsel %vm1278_vm0, %v2703_v5, 0 }
 0x86a   : > { %4939 = vmatpush3.bf16.xpose.msra.mxu0 %v2884_v6 }
 0x8c7   : > { %v4920_v7 = vpop.f32.mrb[24].mxu1 }
 0x8c8   : > { %v2423_v27 = vpop.f32.mrb[25].mxu1  ;;  %v2432_v13 = vadd.f32 %v4920_v7, %v4509_v9 }
 0x8c9   : > { %v4921_v12 = vpop.f32.mrb[26].mxu1  ;;  %v2424_v39 = vadd.f32 %v4509_v9, %v2423_v27 }
 0x8ca   : > { %v2435_v15 = vadd.f32 %v4921_v12, %v4509_v9  ;;  %v2426_v20 = vpop.f32.mrb[27].mxu1 }
 0x8cb   : > { %v2427_v21 = vadd.f32 %v4509_v9, %v2426_v20 }
 0x8cc   : > { %v2652_v8 = vpack.c.bf16 %v2435_v15, %v2432_v13  ;;  %v5289_v25 = vpack.i.bf16 %v2435_v15, %v2432_v13 }
 0x8cd   : > { %v5284_v11 = vpack.i.bf16 %v2427_v21, %v2424_v39  ;;  %v2651_v33 = vpack.c.bf16 %v2427_v21, %v2424_v39 }
 0x8ce   : > { %5290 = vrot.lane.b32.xlu0 %v5289_v25, %s5963_s6 }
 0x8cf   : > { %5285 = vrot.lane.b32.xlu1 %v5284_v11, %s5963_s6  ;;  %4926 = vmatprep.mubr.msk.bf16.mxu1 %vm1278_vm0, %v2651_v33 }
 0x8d0   : > { %4927 = vmatmul.mubr.msk.bf16.vlgmr.msra.gmra.mrb[28].mxu1 %vm1278_vm0, %v2652_v8 }
 0x8d1   : > { %4931 = vmatpush3.bf16.xpose.msra.mxu1 %v2823_v14 }
 0x8d2   : > { %5300 = vrot.lane.b32.xlu0 %v5269_v48, %s5964_s4  ;;  %5061 = vmatprep.subr.msk.bf16.mxu1 %vm1278_vm0, %v2702_v35 }
 0x8d3   : > { %5295 = vrot.lane.b32.xlu1 %v5274_v55, %s5962_s28 }
 0x8d6   : > { %5310 = vrot.lane.b32.xlu0 %v5289_v25, %s5962_s28 }
 0x8d7   : > { %5305 = vrot.lane.b32.xlu1 %v5284_v11, %s5962_s28 }
 0x8d9   : > { %4933 = vmatpush3.bf16.xpose.msra.mxu1 %v2826_v38 }
 0x8da   : > { %5320 = vrot.lane.b32.xlu0 %v5284_v11, %s5964_s4 }
 0x8db   : > { %5315 = vrot.lane.b32.xlu1 %v5274_v55, %s5964_s4 }
 0x8df   : > { %5325 = vrot.lane.b32.xlu1 %v5289_v25, %s5964_s4 }
 0x940   : > { %v5291_v10 = vpop.permute.xlu0 %5290 }
 0x941   : > { %v5293_v22 = vunpack.i.h.bf16 %v5291_v10  ;;  %v5292_v40 = vunpack.i.l.bf16 %v5291_v10  ;;  %v5286_v41 = vpop.permute.xlu1 %5285 }
 0x942   : > { %v5288_v42 = vunpack.i.h.bf16 %v5286_v41  ;;  %v5287_v28 = vunpack.i.l.bf16 %v5286_v41 }
 0x943   : > { %v2654_v18 = vpack.c.bf16 %v5293_v22, %v5292_v40 }
 0x944   : > { %v2653_v53 = vpack.c.bf16 %v5288_v42, %v5287_v28  ;;  %v5301_v57 = vpop.permute.xlu0 %5300 }
 0x945   : > { %v5303_v54 = vunpack.i.h.bf16 %v5301_v57  ;;  %v5302_v48 = vunpack.i.l.bf16 %v5301_v57  ;;  %v5296_v56 = vpop.permute.xlu1 %5295 }
 0x946   : > { %v5298_v46 = vunpack.i.h.bf16 %v5296_v56  ;;  %v5297_v30 = vunpack.i.l.bf16 %v5296_v56  ;;  %4934 = vmatprep.mubr.msk.bf16.mxu1 %vm1278_vm0, %v2653_v53 }
 0x947   : > { %v2705_v44 = vpack.c.bf16 %v5303_v54, %v5302_v48  ;;  %4935 = vmatmul.mubr.msk.bf16.vlgmr.msra.gmra.mrb[32].mxu1 %vm1278_vm0, %v2654_v18 }
 0x948   : > { %v2704_v45 = vpack.c.bf16 %v5298_v46, %v5297_v30  ;;  %v5311_v47 = vpop.permute.xlu0 %5310 }
 0x949   : > { %v5306_v49 = vpop.permute.xlu1 %5305  ;;  %5064 = vmatprep.subr.msk.bf16.mxu1 %vm1278_vm0, %v2705_v44  ;;  %v2945_v32 = vsel %vm1278_vm0, %v2705_v44, 0  ;;  %v5313_v60 = vunpack.i.h.bf16 %v5311_v47  ;;  %v5312_v61 = vunpack.i.l.bf16 %v5311_v47 }
 0x94a   : > { %v5308_v55 = vunpack.i.h.bf16 %v5306_v49  ;;  %v5307_v58 = vunpack.i.l.bf16 %v5306_v49  ;;  %5063 = vmatprep.subr.msk.bf16.mxu0 %vm1278_vm0, %v2704_v45  ;;  %4947 = vmatpush3.bf16.xpose.msra.mxu1 %v2945_v32  ;;  %v2887_v59 = vsel %vm1278_vm0, %v2704_v45, 0 }
 0x94b   : > { %4941 = vmatpush3.bf16.xpose.msra.mxu0 %v2887_v59  ;;  %v2656_v5 = vpack.c.bf16 %v5313_v60, %v5312_v61 }
 0x94c   : > { %v2655_v62 = vpack.c.bf16 %v5308_v55, %v5307_v58  ;;  %4954 = vmatprep.subr.bf16.mxu0 %v6832_v50  ;;  %v5321_v43 = vpop.permute.xlu0 %5320 }
 0x94d   : > { %v5323_v19 = vunpack.i.h.bf16 %v5321_v43  ;;  %v5322_v63 = vunpack.i.l.bf16 %v5321_v43  ;;  %v5316_v1 = vpop.permute.xlu1 %5315 }
 0x94e   : > { %v5318_v2 = vunpack.i.h.bf16 %v5316_v1  ;;  %v5317_v3 = vunpack.i.l.bf16 %v5316_v1  ;;  %4942 = vmatprep.mubr.msk.bf16.mxu0 %vm1278_vm0, %v2655_v62 }
 0x94f   : > { %v2657_v4 = vpack.c.bf16 %v5323_v19, %v5322_v63 }
 0x950   : > { %v2706_v6 = vpack.c.bf16 %v5318_v2, %v5317_v3 }
 0x951   : > { %v5326_v7 = vpop.permute.xlu1 %5325  ;;  %4950 = vmatprep.mubr.msk.bf16.mxu1 %vm1278_vm0, %v2657_v4 }
 0x952   : > { %4943 = vmatmul.mubr.msk.bf16.vlgmr.msra.gmra.mrb[32].mxu0 %vm1278_vm0, %v2656_v5  ;;  %5065 = vmatprep.subr.msk.bf16.mxu1 %vm1278_vm0, %v2706_v6  ;;  %v2948_v9 = vsel %vm1278_vm0, %v2706_v6, 0  ;;  %v5328_v17 = vunpack.i.h.bf16 %v5326_v7  ;;  %v5327_v27 = vunpack.i.l.bf16 %v5326_v7 }
 0x953   : > { %4949 = vmatpush3.bf16.xpose.msra.mxu1 %v2948_v9  ;;  %4955 = vmatpush3.bf16.msra.mxu0 %v6832_v50 }
 0x954   : > { %4956 = vmatprep.subr.bf16.mxu0 %v6840_v26  ;;  %v2658_v12 = vpack.c.bf16 %v5328_v17, %v5327_v27 }
 0x957   : > { %4957 = vmatpush3.bf16.msra.mxu0 %v6840_v26 }
 0x95a   : > { %4951 = vmatmul.mubr.msk.bf16.vlgmr.msra.gmra.mrb[36].mxu1 %vm1278_vm0, %v2658_v12 }
 0x9a3   : > { %v6877_v13 = vpop.f32.mrb[28].mxu1 }
 0x9a4   : > { %v6879_v15 = vpop.f32.mrb[29].mxu1  ;;  %v3005_v20 = vsel %vm1278_vm0, %v6877_v13, -inf }
 0x9a5   : > { %3006 = vmax.xlane.f32.xlu0 %v3005_v20  ;;  %v4929_v16 = vpop.f32.mrb[30].mxu1  ;;  %v2999_v39 = vsel %vm1278_vm0, %v6879_v15, -inf }
 0x9a6   : > { %v2804_v23 = vpop.f32.mrb[31].mxu1  ;;  %v3008_v26 = vsel %vm1278_vm0, %v4929_v16, -inf }
 0x9a7   : > { %v3002_v50 = vsel %vm1278_vm0, %v2804_v23, -inf }
 0x9a8   : > { %3003 = vmax.xlane.f32.xlu1 %v3002_v50 }
 0x9a9   : > { %3000 = vmax.xlane.f32.xlu0 %v2999_v39 }
 0x9ad   : > { %3009 = vmax.xlane.f32.xlu0 %v3008_v26 }
 0xa1a   : > { %v6887_v21 = vpop.f32.mrb[32].mxu1 }
 0xa1b   : > { %v6889_v8 = vpop.f32.mrb[33].mxu1  ;;  %v3017_v25 = vsel %vm1278_vm0, %v6887_v21, -inf }
 0xa1c   : > { %3018 = vmax.xlane.f32.xlu1 %v3017_v25  ;;  %v6893_v11 = vpop.f32.mrb[34].mxu1  ;;  %v3011_v42 = vsel %vm1278_vm0, %v6889_v8, -inf }
 0xa1d   : > { %v6895_v33 = vpop.f32.mrb[35].mxu1  ;;  %v3020_v14 = vsel %vm1278_vm0, %v6893_v11, -inf }
 0xa1e   : > { %3021 = vmax.xlane.f32.xlu0 %v3020_v14  ;;  %v3014_v28 = vsel %vm1278_vm0, %v6895_v33, -inf }
 0xa25   : > { %v6899_v35 = vpop.f32.mrb[32].mxu0 }
 0xa26   : > { %v6901_v38 = vpop.f32.mrb[33].mxu0  ;;  %v3029_v10 = vsel %vm1278_vm0, %v6899_v35, -inf }
 0xa27   : > { %v6905_v22 = vpop.f32.mrb[34].mxu0  ;;  %3030 = vmax.xlane.f32.xlu1 %v3029_v10  ;;  %v3023_v58 = vsel %vm1278_vm0, %v6901_v38, -inf }
 0xa28   : > { %v6907_v40 = vpop.f32.mrb[35].mxu0  ;;  %v3032_v41 = vsel %vm1278_vm0, %v6905_v22, -inf }
 0xa29   : > { %3033 = vmax.xlane.f32.xlu0 %v3032_v41  ;;  %v3026_v48 = vsel %vm1278_vm0, %v6907_v40, -inf }
 0xa2b   : > { %3012 = vmax.xlane.f32.xlu1 %v3011_v42 }
 0xa2d   : > { %3015 = vmax.xlane.f32.xlu0 %v3014_v28  ;;  %v6915_v53 = vpop.f32.mrb[36].mxu1 }
 0xa2e   : > { %v6917_v57 = vpop.f32.mrb[37].mxu1  ;;  %v3041_v60 = vsel %vm1278_vm0, %v6915_v53, -inf }
 0xa2f   : > { %v6919_v18 = vpop.f32.mrb[38].mxu1  ;;  %v3035_v61 = vsel %vm1278_vm0, %v6917_v57, -inf }
 0xa30   : > { %v6921_v54 = vpop.f32.mrb[39].mxu1  ;;  %v3044_v56 = vsel %vm1278_vm0, %v6919_v18, -inf }
 0xa31   : > { %3027 = vmax.xlane.f32.xlu0 %v3026_v48  ;;  %v3038_v46 = vsel %vm1278_vm0, %v6921_v54, -inf }
 0xa32   : > { %v3007_v30 = vpop.xlane.xlu0 %3006 }
 0xa33   : > { %v3049_v1 = vsub.f32 %v6877_v13, %v3007_v30 }
 0xa35   : > { %3045 = vmax.xlane.f32.xlu0 %v3044_v56  ;;  %v3004_v49 = vpop.xlane.xlu1 %3003  ;;  %v3067_v2 = vmul.f32 1.442695, %v3049_v1 }
 0xa36   : > { %v3001_v44 = vpop.xlane.xlu0 %3000  ;;  %v3048_v32 = vsub.f32 %v2804_v23, %v3004_v49 }
 0xa37   : > { %v3047_v3 = vsub.f32 %v6879_v15, %v3001_v44 }
 0xa38   : > { %v3065_v59 = vmul.f32 1.442695, %v3048_v32 }
 0xa39   : > { %3039 = vmax.xlane.f32.xlu0 %v3038_v46  ;;  %v3063_v4 = vmul.f32 1.442695, %v3047_v3 }
 0xa3a   : > { %v3010_v45 = vpop.xlane.xlu0 %3009 }
 0xa3b   : > { %v3050_v47 = vsub.f32 %v4929_v16, %v3010_v45 }
 0xa3c   : > { %5330 = vrot.lane.b32.xlu1 %v6834_v52, %s5963_s6 }
 0xa3d   : > { %v3069_v55 = vmul.f32 1.442695, %v3050_v47 }
 0xa3f   : > { %5557 = vpow2.f32 %v3069_v55 }
 0xa40   : > { %5559 = vpow2.f32 %v3065_v59 }
 0xa41   : > { %5561 = vpow2.f32 %v3067_v2 }
 0xa42   : > { %5563 = vpow2.f32 %v3063_v4 }
 0xa49   : > { %v6939_v62 = vpop.eup %5557 }
 0xa4a   : > { %v3104_v43 = vsel %vm1278_vm0, %v6939_v62, 0.0  ;;  %v6943_v19 = vpop.eup %5559 }
 0xa4b   : > { %v3098_v63 = vsel %vm1278_vm0, %v6943_v19, 0.0  ;;  %v6951_v5 = vpop.eup %5561 }
 0xa4c   : > { %v3101_v6 = vsel %vm1278_vm0, %v6951_v5, 0.0  ;;  %v6955_v7 = vpop.eup %5563 }
 0xa4d   : > { %v3095_v9 = vsel %vm1278_vm0, %v6955_v7, 0.0 }
 0xa4f   : > { %5335 = vrot.lane.b32.xlu0 %v6842_v24, %s5963_s6  ;;  %s7299_s6 = sld [smem:[#allocation33_spill]] }
 0xa60   : > { %3024 = vmax.xlane.f32.xlu1 %v3023_v58 }
 0xa64   : > { %3042 = vmax.xlane.f32.xlu1 %v3041_v60 }
 0xa68   : > { %3036 = vmax.xlane.f32.xlu1 %v3035_v61 }
 0xa6e   : > { %3105 = vadd.xlane.f32.xlu0 %v3104_v43 }
 0xa72   : > { %3099 = vadd.xlane.f32.xlu0 %v3098_v63 }
 0xa79   : > { %5340 = vrot.lane.b32.xlu1 %v6834_v52, %s5962_s28 }
 0xa9d   : > { %3102 = vadd.xlane.f32.xlu1 %v3101_v6 }
 0xaa1   : > { %3096 = vadd.xlane.f32.xlu1 %v3095_v9 }
 0xaa9   : > { %v3019_v17 = vpop.xlane.xlu1 %3018 }
 0xaaa   : > { %v3053_v27 = vsub.f32 %v6887_v21, %v3019_v17 }
 0xaab   : > { %v3022_v12 = vpop.xlane.xlu0 %3021 }
 0xaac   : > { %v3075_v13 = vmul.f32 1.442695, %v3053_v27  ;;  %v3054_v15 = vsub.f32 %v6893_v11, %v3022_v12 }
 0xaae   : > { %5565 = vpow2.f32 %v3075_v13  ;;  %v3077_v20 = vmul.f32 1.442695, %v3054_v15 }
 0xab0   : > { %5567 = vpow2.f32 %v3077_v20 }
 0xab4   : > { %v3031_v16 = vpop.xlane.xlu1 %3030 }
 0xab5   : > { %v3057_v23 = vsub.f32 %v6899_v35, %v3031_v16 }
 0xab6   : > { %v3034_v50 = vpop.xlane.xlu0 %3033 }
 0xab7   : > { %v3083_v39 = vmul.f32 1.442695, %v3057_v23  ;;  %v3058_v26 = vsub.f32 %v6905_v22, %v3034_v50 }
 0xab8   : > { %v6963_v25 = vpop.eup %5565  ;;  %v3013_v14 = vpop.xlane.xlu1 %3012 }
 0xab9   : > { %5569 = vpow2.f32 %v3083_v39  ;;  %v3085_v10 = vmul.f32 1.442695, %v3058_v26  ;;  %v3051_v21 = vsub.f32 %v6889_v8, %v3013_v14  ;;  %v3113_v11 = vsel %vm1278_vm0, %v6963_v25, 0.0 }
 0xaba   : > { %v6968_v41 = vpop.eup %5567  ;;  %v3016_v42 = vpop.xlane.xlu0 %3015  ;;  %3114 = vadd.xlane.f32.xlu1 %v3113_v11 }
 0xabb   : > { %5571 = vpow2.f32 %v3085_v10  ;;  %v3071_v35 = vmul.f32 1.442695, %v3051_v21  ;;  %v3052_v28 = vsub.f32 %v6895_v33, %v3016_v42  ;;  %v3116_v22 = vsel %vm1278_vm0, %v6968_v41, 0.0 }
 0xabc   : > { %v5331_v48 = vpop.permute.xlu1 %5330  ;;  %3117 = vadd.xlane.f32.xlu0 %v3116_v22 }
 0xabd   : > { %5573 = vpow2.f32 %v3071_v35  ;;  %v3073_v56 = vmul.f32 1.442695, %v3052_v28  ;;  %v5333_v46 = vunpack.i.h.bf16 %v5331_v48  ;;  %v5332_v8 = vunpack.i.l.bf16 %v5331_v48 }
 0xabe   : > { %v3028_v30 = vpop.xlane.xlu0 %3027 }
 0xabf   : > { %5575 = vpow2.f32 %v3073_v56  ;;  %v2749_v44 = vpack.c.bf16 %v5333_v46, %v5332_v8  ;;  %v3056_v45 = vsub.f32 %v6907_v40, %v3028_v30 }
 0xac1   : > { %v3081_v47 = vmul.f32 1.442695, %v3056_v45  ;;  %4962 = vmatprep.subr.bf16.mxu1 %v2749_v44 }
 0xac2   : > { %4963 = vmatpush3.bf16.msra.mxu1 %v2749_v44  ;;  %v3046_v49 = vpop.xlane.xlu0 %3045 }
 0xac3   : > { %v6974_v32 = vpop.eup %5569  ;;  %5577 = vpow2.f32 %v3081_v47  ;;  %v3062_v33 = vsub.f32 %v6919_v18, %v3046_v49 }
 0xac4   : > { %v3125_v55 = vsel %vm1278_vm0, %v6974_v32, 0.0 }
 0xac5   : > { %v6979_v58 = vpop.eup %5571  ;;  %v3093_v59 = vmul.f32 1.442695, %v3062_v33  ;;  %3126 = vadd.xlane.f32.xlu1 %v3125_v55 }
 0xac6   : > { %v3040_v60 = vpop.xlane.xlu0 %3039  ;;  %v3128_v40 = vsel %vm1278_vm0, %v6979_v58, 0.0 }
 0xac7   : > { %v6983_v61 = vpop.eup %5573  ;;  %5579 = vpow2.f32 %v3093_v59  ;;  %v3060_v43 = vsub.f32 %v6921_v54, %v3040_v60  ;;  %3129 = vadd.xlane.f32.xlu0 %v3128_v40 }
 0xac8   : > { %v3107_v18 = vsel %vm1278_vm0, %v6983_v61, 0.0 }
 0xac9   : > { %v6988_v63 = vpop.eup %5575  ;;  %v3089_v1 = vmul.f32 1.442695, %v3060_v43  ;;  %3108 = vadd.xlane.f32.xlu1 %v3107_v18 }
 0xaca   : > { %v5336_v2 = vpop.permute.xlu0 %5335  ;;  %v3110_v3 = vsel %vm1278_vm0, %v6988_v63, 0.0 }
 0xacb   : > { %5581 = vpow2.f32 %v3089_v1  ;;  %v5338_v4 = vunpack.i.h.bf16 %v5336_v2  ;;  %v5337_v6 = vunpack.i.l.bf16 %v5336_v2  ;;  %3111 = vadd.xlane.f32.xlu0 %v3110_v3 }
 0xacd   : > { %v6992_v9 = vpop.eup %5577  ;;  %v2750_v17 = vpack.c.bf16 %v5338_v4, %v5337_v6 }
 0xace   : > { %v3122_v54 = vsel %vm1278_vm0, %v6992_v9, 0.0 }
 0xacf   : > { %3123 = vadd.xlane.f32.xlu0 %v3122_v54  ;;  %4964 = vmatprep.subr.bf16.mxu1 %v2750_v17 }
 0xad0   : > { %4965 = vmatpush3.bf16.msra.mxu1 %v2750_v17 }
 0xad1   : > { %v6996_v27 = vpop.eup %5579 }
 0xad2   : > { %v3140_v12 = vsel %vm1278_vm0, %v6996_v27, 0.0 }
 0xad3   : > { %3141 = vadd.xlane.f32.xlu0 %v3140_v12 }
 0xad5   : > { %v7000_v13 = vpop.eup %5581 }
 0xad6   : > { %v3134_v15 = vsel %vm1278_vm0, %v7000_v13, 0.0 }
 0xad7   : > { %3135 = vadd.xlane.f32.xlu0 %v3134_v15 }
 0xaed   : > { %v3025_v20 = vpop.xlane.xlu1 %3024  ;;  %5345 = vrot.lane.b32.xlu0 %v6842_v24, %s5962_s28 }
 0xaee   : > { %v3055_v16 = vsub.f32 %v6901_v38, %v3025_v20 }
 0xaf0   : > { %v3079_v23 = vmul.f32 1.442695, %v3055_v16 }
 0xaf1   : > { %v3043_v50 = vpop.xlane.xlu1 %3042 }
 0xaf2   : > { %5583 = vpow2.f32 %v3079_v23  ;;  %v3061_v39 = vsub.f32 %v6915_v53, %v3043_v50 }
 0xaf4   : > { %v3091_v26 = vmul.f32 1.442695, %v3061_v39 }
 0xaf5   : > { %v3037_v14 = vpop.xlane.xlu1 %3036 }
 0xaf6   : > { %5585 = vpow2.f32 %v3091_v26  ;;  %v3059_v10 = vsub.f32 %v6917_v57, %v3037_v14 }
 0xaf8   : > { %v3087_v21 = vmul.f32 1.442695, %v3059_v10 }
 0xaf9   : > { %v5341_v11 = vpop.permute.xlu1 %5340 }
 0xafa   : > { %5587 = vpow2.f32 %v3087_v21  ;;  %v5343_v42 = vunpack.i.h.bf16 %v5341_v11  ;;  %v5342_v35 = vunpack.i.l.bf16 %v5341_v11 }
 0xafb   : > { %v3106_v46 = vpop.xlane.xlu0 %3105 }
 0xafc   : > { %v7009_v28 = vpop.eup %5583  ;;  %v2751_v22 = vpack.c.bf16 %v5343_v42, %v5342_v35 }
 0xafd   : > { %v3119_v38 = vsel %vm1278_vm0, %v7009_v28, 0.0 }
 0xafe   : > { %3120 = vadd.xlane.f32.xlu1 %v3119_v38  ;;  %4970 = vmatprep.subr.bf16.mxu0 %v2751_v22 }
 0xaff   : > { %v3100_v8 = vpop.xlane.xlu0 %3099 }
 0xb00   : > { %v7013_v48 = vpop.eup %5585 }
 0xb01   : > { %v3137_v53 = vsel %vm1278_vm0, %v7013_v48, 0.0 }
 0xb02   : > { %3138 = vadd.xlane.f32.xlu1 %v3137_v53 }
 0xb04   : > { %v7017_v57 = vpop.eup %5587 }
 0xb05   : > { %v3131_v56 = vsel %vm1278_vm0, %v7017_v57, 0.0 }
 0xb06   : > { %3132 = vadd.xlane.f32.xlu1 %v3131_v56 }
 0xb17   : > { %5350 = vrot.lane.b32.xlu1 %v6834_v52, %s5964_s4 }
 0xb1b   : > { %5355 = vrot.lane.b32.xlu1 %v6842_v24, %s5964_s4 }
 0xb2a   : > { %v3103_v30 = vpop.xlane.xlu1 %3102 }
 0xb2b   : > { %5589 = vrcp.f32 %v3103_v30 }
 0xb2c   : > { %5591 = vrcp.f32 %v3100_v8 }
 0xb2d   : > { %5593 = vrcp.f32 %v3106_v46 }
 0xb2e   : > { %v3097_v44 = vpop.xlane.xlu1 %3096 }
 0xb2f   : > { %5595 = vrcp.f32 %v3097_v44 }
 0xb35   : > { %v5590_v45 = vpop.eup %5589 }
 0xb36   : > { %v5592_v47 = vpop.eup %5591  ;;  %v3161_v55 = vmul.f32 %v5590_v45, %v6951_v5 }
 0xb37   : > { %v5594_v49 = vpop.eup %5593  ;;  %v3160_v52 = vmul.f32 %v5592_v47, %v6943_v19 }
 0xb38   : > { %v3162_v24 = vmul.f32 %v5594_v49, %v6939_v62  ;;  %v5436_v49 = vld [vmem:[%s7243_s12 + $0x8] sm:$0xff]  }
 0xb39   : > { %v5596_v33 = vpop.eup %5595 }
 0xb3a   : > { %v3159_v59 = vmul.f32 %v5596_v33, %v6955_v7  ;;  %v3176_v40 = vpack.c.bf16 %v3162_v24, %v3161_v55 }
 0xb3c   : > { %v3175_v60 = vpack.c.bf16 %v3160_v52, %v3159_v59 }
 0xb3e   : > { %4958 = vmatprep.mubr.msk.bf16.mxu0 %vm1278_vm0, %v3175_v60  ;;  %v5437_v60 = vld [vmem:[%s7243_s12 + $0x10] sm:$0xff]  }
 0xb3f   : > { %4959 = vmatmul.mubr.msk.bf16.vlgmr.msra.gmra.mrb[36].mxu0 %vm1278_vm0, %v3176_v40 }
 0xb40   : > { %4971 = vmatpush3.bf16.msra.mxu0 %v2751_v22 }
 0xb47   : > { %v3115_v43 = vpop.xlane.xlu1 %3114 }
 0xb49   : > { %v3118_v18 = vpop.xlane.xlu0 %3117 }
 0xb4a   : > { %5597 = vrcp.f32 %v3118_v18 }
 0xb52   : > { %v3127_v1 = vpop.xlane.xlu1 %3126 }
 0xb54   : > { %v3130_v2 = vpop.xlane.xlu0 %3129  ;;  %v5598_v7 = vpop.eup %5597 }
 0xb55   : > { %v3166_v54 = vmul.f32 %v5598_v7, %v6968_v41  ;;  %v5435_v41 = vld [vmem:[%s7243_s12] sm:$0xff]  }
 0xb56   : > { %v3109_v3 = vpop.xlane.xlu1 %3108  ;;  %v5439_v7 = vld [vmem:[%s7243_s12 + $0x20] sm:$0xff]  }
 0xb57   : > { %5599 = vrcp.f32 %v3109_v3 }
 0xb58   : > { %5601 = vrcp.f32 %v3115_v43  ;;  %v3112_v5 = vpop.xlane.xlu0 %3111 }
 0xb59   : > { %5603 = vrcp.f32 %v3112_v5 }
 0xb5a   : > { %5605 = vrcp.f32 %v3130_v2 }
 0xb5c   : > { %v3124_v19 = vpop.xlane.xlu0 %3123 }
 0xb5d   : > { %5607 = vrcp.f32 %v3124_v19 }
 0xb5e   : > { %5609 = vrcp.f32 %v3127_v1 }
 0xb60   : > { %v3142_v62 = vpop.xlane.xlu0 %3141 }
 0xb61   : > { %v5600_v4 = vpop.eup %5599 }
 0xb62   : > { %v5602_v6 = vpop.eup %5601  ;;  %v3163_v15 = vmul.f32 %v5600_v4, %v6983_v61 }
 0xb63   : > { %v5604_v17 = vpop.eup %5603  ;;  %v3165_v16 = vmul.f32 %v5602_v6, %v6963_v25 }
 0xb64   : > { %v3136_v12 = vpop.xlane.xlu0 %3135  ;;  %v3164_v20 = vmul.f32 %v5604_v17, %v6988_v63  ;;  %v5606_v63 = vpop.eup %5605 }
 0xb65   : > { %v3178_v50 = vpack.c.bf16 %v3166_v54, %v3165_v16  ;;  %v3170_v22 = vmul.f32 %v5606_v63, %v6979_v58 }
 0xb66   : > { %v3177_v23 = vpack.c.bf16 %v3164_v20, %v3163_v15  ;;  %v5440_v15 = vld [vmem:[%s7243_s12 + $0x28] sm:$0xff]   ;;  %v5441_v20 = vld [vmem:[%s7243_s12 + $0x30] sm:$0xff]  }
 0xb67   : > { %v5608_v11 = vpop.eup %5607 }
 0xb68   : > { %4966 = vmatprep.mubr.msk.bf16.mxu1 %vm1278_vm0, %v3177_v23  ;;  %v5346_v39 = vpop.permute.xlu0 %5345  ;;  %v5610_v42 = vpop.eup %5609  ;;  %v3168_v56 = vmul.f32 %v5608_v11, %v6992_v9 }
 0xb69   : > { %v5348_v26 = vunpack.i.h.bf16 %v5346_v39  ;;  %v5347_v14 = vunpack.i.l.bf16 %v5346_v39  ;;  %4967 = vmatmul.mubr.msk.bf16.vlgmr.msra.gmra.mrb[40].mxu1 %vm1278_vm0, %v3178_v50  ;;  %v3169_v46 = vmul.f32 %v5610_v42, %v6974_v32  ;;  %v4556_v42 = vld [vmem:[#allocation9] ss:$0 sm:$0xff] }
 0xb6b   : > { %v2752_v10 = vpack.c.bf16 %v5348_v26, %v5347_v14  ;;  %v3180_v47 = vpack.c.bf16 %v3170_v22, %v3169_v46 }
 0xb6d   : > { %4972 = vmatprep.subr.bf16.mxu0 %v2752_v10 }
 0xb6e   : > { %4973 = vmatpush3.bf16.msra.mxu0 %v2752_v10  ;;  %v5442_v10 = vld [vmem:[%s7243_s12 + $0x38] sm:$0xff]  }
 0xb6f   : > { %4986 = vmatprep.subr.bf16.mxu0 %v5435_v41 }
 0xb8b   : > { %v3121_v25 = vpop.xlane.xlu1 %3120 }
 0xb8c   : > { %5611 = vrcp.f32 %v3121_v25 }
 0xb8f   : > { %v3139_v61 = vpop.xlane.xlu1 %3138 }
 0xb90   : > { %5613 = vrcp.f32 %v3139_v61 }
 0xb91   : > { %5615 = vrcp.f32 %v3136_v12 }
 0xb92   : > { %5617 = vrcp.f32 %v3142_v62 }
 0xb93   : > { %v3133_v21 = vpop.xlane.xlu1 %3132 }
 0xb94   : > { %5619 = vrcp.f32 %v3133_v21 }
 0xb96   : > { %v5612_v35 = vpop.eup %5611 }
 0xb97   : > { %v5351_v38 = vpop.permute.xlu1 %5350  ;;  %v3167_v53 = vmul.f32 %v5612_v35, %v7009_v28 }
 0xb98   : > { %v5353_v8 = vunpack.i.h.bf16 %v5351_v38  ;;  %v5352_v30 = vunpack.i.l.bf16 %v5351_v38 }
 0xb99   : > { %v3179_v44 = vpack.c.bf16 %v3168_v56, %v3167_v53 }
 0xb9a   : > { %v2753_v45 = vpack.c.bf16 %v5353_v8, %v5352_v30  ;;  %v5614_v33 = vpop.eup %5613 }
 0xb9b   : > { %v5356_v55 = vpop.permute.xlu1 %5355  ;;  %4974 = vmatprep.mubr.msk.bf16.mxu0 %vm1278_vm0, %v3179_v44  ;;  %v5616_v58 = vpop.eup %5615  ;;  %v3173_v52 = vmul.f32 %v5614_v33, %v7013_v48  ;;  %v5443_v33 = vld [vmem:[%s7247_s16] ss:$8 sps:$4 sm:$0xff]  }
 0xb9c   : > { %v5358_v59 = vunpack.i.h.bf16 %v5356_v55  ;;  %v5357_v28 = vunpack.i.l.bf16 %v5356_v55  ;;  %4975 = vmatmul.mubr.msk.bf16.vlgmr.msra.gmra.mrb[40].mxu0 %vm1278_vm0, %v3180_v47  ;;  %4978 = vmatprep.subr.bf16.mxu1 %v2753_v45  ;;  %v5618_v32 = vpop.eup %5617  ;;  %v3172_v43 = vmul.f32 %v5616_v58, %v7000_v13 }
 0xb9d   : > { %4979 = vmatpush3.bf16.msra.mxu1 %v2753_v45  ;;  %4987 = vmatpush3.bf16.msra.mxu0 %v5435_v41  ;;  %v3174_v18 = vmul.f32 %v5618_v32, %v6996_v27  ;;  %v5438_v27 = vld [vmem:[%s7243_s12 + $0x18] sm:$0xff]  }
 0xb9e   : > { %v5620_v9 = vpop.eup %5619  ;;  %v2754_v24 = vpack.c.bf16 %v5358_v59, %v5357_v28  ;;  %4988 = vmatprep.subr.bf16.mxu0 %v5436_v49 }
 0xb9f   : > { %v3171_v40 = vmul.f32 %v5620_v9, %v7017_v57  ;;  %v3182_v2 = vpack.c.bf16 %v3174_v18, %v3173_v52 }
 0xba0   : > { %4980 = vmatprep.subr.bf16.mxu1 %v2754_v24 }
 0xba1   : > { %4981 = vmatpush3.bf16.msra.mxu1 %v2754_v24  ;;  %v3181_v1 = vpack.c.bf16 %v3172_v43, %v3171_v40  ;;  %4989 = vmatpush3.bf16.msra.mxu0 %v5436_v49 }
 0xba2   : > { %4994 = vmatprep.subr.bf16.mxu0 %v5437_v60 }
 0xba3   : > { %4982 = vmatprep.mubr.msk.bf16.mxu1 %vm1278_vm0, %v3181_v1 }
 0xba4   : > { %4983 = vmatmul.mubr.msk.bf16.vlgmr.msra.gmra.mrb[44].mxu1 %vm1278_vm0, %v3182_v2 }
 0xba5   : > { %3933 = vmatprep.mubr.bf16.mxu1 %v5961_v0 }
 0xc12   : > { %v4960_v48 = vpop.f32.mrb[36].mxu0 }
 0xc13   : > { %v3223_v3 = vpop.f32.mrb[37].mxu0 }
 0xc14   : > { %v4961_v5 = vpop.f32.mrb[38].mxu0 }
 0xc15   : > { %v3404_v57 = vpack.c.bf16 %v4961_v5, %v4960_v48  ;;  %v3226_v19 = vpop.f32.mrb[39].mxu0  ;;  %v5449_v5 = vld [vmem:[%s7247_s16 + $0x20] ss:$8 sps:$4 sm:$0xff]  }
 0xc16   : > { %v3403_v13 = vpack.c.bf16 %v3226_v19, %v3223_v3  ;;  %v5451_v3 = vld [vmem:[%s7247_s16 + $0x24] ss:$8 sps:$4 sm:$0xff]   ;;  %v5452_v19 = vld [vmem:[%s7247_s16 + $0x30] ss:$8 sps:$4 sm:$0xff]  }
 0xc18   : > { %4990 = vmatprep.mubr.msk.bf16.mxu0 %vm1278_vm0, %v3403_v13  ;;  %v5457_v13 = vld [vmem:[%s7247_s16 + $0x44] ss:$8 sps:$4 sm:$0xff]  }
 0xc19   : > { %4991 = vmatmul.mubr.msk.bf16.vlgmr.msra.gmra.mrb[44].mxu0 %vm1278_vm0, %v3404_v57  ;;  %v5454_v57 = vld [vmem:[%s7247_s16 + $0x34] ss:$8 sps:$4 sm:$0xff]  }
 0xc1a   : > { %4995 = vmatpush3.bf16.msra.mxu0 %v5437_v60 }
 0xc1b   : > { %4996 = vmatprep.subr.bf16.mxu0 %v5438_v27 }
 0xc1e   : > { %4997 = vmatpush3.bf16.msra.mxu0 %v5438_v27  ;;  %v5455_v27 = vld [vmem:[%s7247_s16 + $0x40] ss:$8 sps:$4 sm:$0xff]  }
 0xc1f   : > { %5002 = vmatprep.subr.bf16.mxu0 %v5439_v7 }
 0xc3c   : > { %v4968_v62 = vpop.f32.mrb[40].mxu1 }
 0xc3d   : > { %v3278_v4 = vpop.f32.mrb[41].mxu1 }
 0xc3e   : > { %v4969_v6 = vpop.f32.mrb[42].mxu1 }
 0xc3f   : > { %v3406_v17 = vpack.c.bf16 %v4969_v6, %v4968_v62  ;;  %v3281_v54 = vpop.f32.mrb[43].mxu1  ;;  %v5458_v62 = vld [vmem:[%s7247_s16 + $0x50] ss:$8 sps:$4 sm:$0xff]   ;;  %v5461_v6 = vld [vmem:[%s7247_s16 + $0x60] ss:$8 sps:$4 sm:$0xff]  }
 0xc40   : > { %v3405_v12 = vpack.c.bf16 %v3281_v54, %v3278_v4  ;;  %v5463_v4 = vld [vmem:[%s7247_s16 + $0x64] ss:$8 sps:$4 sm:$0xff]   ;;  %v5464_v54 = vld [vmem:[%s7247_s16 + $0x70] ss:$8 sps:$4 sm:$0xff]  }
 0xc42   : > { %4998 = vmatprep.mubr.msk.bf16.mxu0 %vm1278_vm0, %v3405_v12  ;;  %v5467_v12 = vld [vmem:[%s7298_s23 + $0x40] sm:$0xff]  }
 0xc43   : > { %4999 = vmatmul.mubr.msk.bf16.vlgmr.msra.gmra.mrb[44].mxu0 %vm1278_vm0, %v3406_v17  ;;  %v5466_v17 = vld [vmem:[%s7247_s16 + $0x74] ss:$8 sps:$4 sm:$0xff]  }
 0xc44   : > { %5003 = vmatpush3.bf16.msra.mxu0 %v5439_v7  ;;  %v5460_v7 = vld [vmem:[%s7247_s16 + $0x54] ss:$8 sps:$4 sm:$0xff]  }
 0xc45   : > { %5004 = vmatprep.subr.bf16.mxu0 %v5440_v15 }
 0xc48   : > { %5005 = vmatpush3.bf16.msra.mxu0 %v5440_v15  ;;  %v5468_v15 = vld [vmem:[%s7298_s23] sm:$0xff]  }
 0xc49   : > { %5010 = vmatprep.subr.bf16.mxu0 %v5441_v20 }
 0xc6f   : > { %v4976_v16 = vpop.f32.mrb[40].mxu0 }
 0xc70   : > { %v3333_v23 = vpop.f32.mrb[41].mxu0 }
 0xc71   : > { %v4977_v50 = vpop.f32.mrb[42].mxu0 }
 0xc72   : > { %v3408_v39 = vpack.c.bf16 %v4977_v50, %v4976_v16  ;;  %v3336_v26 = vpop.f32.mrb[43].mxu0  ;;  %v5470_v16 = vld [vmem:[%s7298_s23 + $0x8] sm:$0xff]   ;;  %v5472_v50 = vld [vmem:[%s7298_s23 + $0x10] sm:$0xff]  }
 0xc73   : > { %v3407_v14 = vpack.c.bf16 %v3336_v26, %v3333_v23  ;;  %v5471_v23 = vld [vmem:[%s7298_s23 + $0x50] sm:$0xff]   ;;  %v5474_v26 = vld [vmem:[%s7298_s23 + $0x18] sm:$0xff]  }
 0xc75   : > { %5006 = vmatprep.mubr.msk.bf16.mxu0 %vm1278_vm0, %v3407_v14  ;;  %v5475_v14 = vld [vmem:[%s7298_s23 + $0x60] sm:$0xff]  }
 0xc76   : > { %5007 = vmatmul.mubr.msk.bf16.vlgmr.msra.gmra.mrb[44].mxu0 %vm1278_vm0, %v3408_v39  ;;  %v5473_v39 = vld [vmem:[%s7298_s23 + $0x58] sm:$0xff]  }
 0xc77   : > { %v4984_v41 = vpop.f32.mrb[44].mxu1  ;;  %5011 = vmatpush3.bf16.msra.mxu0 %v5441_v20  ;;  %v5469_v20 = vld [vmem:[%s7298_s23 + $0x48] sm:$0xff]  }
 0xc78   : > { %v3388_v25 = vpop.f32.mrb[45].mxu1  ;;  %5012 = vmatprep.subr.bf16.mxu0 %v5442_v10 }
 0xc79   : > { %v4985_v61 = vpop.f32.mrb[46].mxu1 }
 0xc7a   : > { %v3410_v63 = vpack.c.bf16 %v4985_v61, %v4984_v41  ;;  %v3391_v21 = vpop.f32.mrb[47].mxu1  ;;  %v5477_v41 = vld [vmem:[%s7298_s23 + $0x68] sm:$0xff]  }
 0xc7b   : > { %v3409_v11 = vpack.c.bf16 %v3391_v21, %v3388_v25  ;;  %5013 = vmatpush3.bf16.msra.mxu0 %v5442_v10  ;;  %v5476_v10 = vld [vmem:[%s7298_s23 + $0x20] sm:$0xff]  }
 0xc7c   : > { %4758 = vmatprep.subr.bf16.mxu0 %v5467_v12 }
 0xc7d   : > { %5014 = vmatprep.mubr.msk.bf16.mxu0 %vm1278_vm0, %v3409_v11 }
 0xc82   : > { %5015 = vmatmul.mubr.msk.bf16.vlgmr.msra.gmra.mrb[44].mxu0 %vm1278_vm0, %v3410_v63 }
 0xc83   : > { %4759 = vmatpush3.bf16.msra.mxu0 %v5468_v15 }
 0xc84   : > { %4760 = vmatprep.subr.bf16.mxu0 %v5469_v20 }
 0xc87   : > { %4761 = vmatpush3.bf16.msra.mxu0 %v5470_v16 }
 0xc88   : > { %4762 = vmatprep.subr.bf16.mxu0 %v5471_v23 }
 0xc8b   : > { %4763 = vmatpush3.bf16.msra.mxu0 %v5472_v50 }
 0xc8c   : > { %4764 = vmatprep.subr.bf16.mxu0 %v5473_v39 }
 0xc8f   : > { %4765 = vmatpush3.bf16.msra.mxu0 %v5474_v26 }
 0xc90   : > { %4766 = vmatprep.subr.bf16.mxu0 %v5475_v14 }
 0xc93   : > { %4767 = vmatpush3.bf16.msra.mxu0 %v5476_v10 }
 0xc94   : > { %4768 = vmatprep.subr.bf16.mxu0 %v5477_v41 }
 0xd55   : > { %v5016_v35 = vpop.f32.mrb[44].mxu0 }
 0xd56   : > { %v3702_v22 = vpop.f32.mrb[45].mxu0  ;;  %v5022_v46 = vadd.f32 %v5016_v35, %v4556_v42 }
 0xd57   : > { %v5023_v38 = vadd.f32 %v4556_v42, %v3702_v22  ;;  %v5017_v53 = vpop.f32.mrb[46].mxu0 }
 0xd58   : > { %v3705_v56 = vpop.f32.mrb[47].mxu0  ;;  %v3723_v45 = vadd.f32 %v5022_v46, %v6818_v37  ;;  %v5024_v47 = vadd.f32 %v5017_v53, %v4556_v42  ;;  %v5446_v37 = vld [vmem:[%s7247_s16 + $0x10] ss:$8 sps:$4 sm:$0xff]  }
 0xd59   : > { %v3721_v8 = vadd.f32 %v5023_v38, %v6811_v36  ;;  %v5025_v30 = vadd.f32 %v4556_v42, %v3705_v56  ;;  %v5445_v36 = vld [vmem:[%s7247_s16 + $0x4] ss:$8 sps:$4 sm:$0xff]  }
 0xd5a   : > { %v3724_v49 = vadd.f32 %v5024_v47, %v6820_v34  ;;  %3901 = vmatprep.subr.bf16.mxu1 %v5445_v36  ;;  %v4582_v36 = vld [vmem:[#allocation12] ss:$0 sm:$0xff] }
 0xd5b   : > { %v3722_v44 = vadd.f32 %v5025_v30, %v6813_v51  ;;  %3725 = vadd.xlane.f32.xlu0 %v3721_v8  ;;  %v5448_v51 = vld [vmem:[%s7247_s16 + $0x14] ss:$8 sps:$4 sm:$0xff]   ;;  %3902 = vmatpush1.bf16.msra.mxu1 %v5443_v33  ;;  %v4581_v30 = vld [vmem:[#allocation10] ss:$0 sm:$0xff] }
 0xd5c   : > { %3903 = vmatprep.subr.bf16.mxu1 %v5448_v51 }
 0xd5d   : > { %3727 = vadd.xlane.f32.xlu1 %v3722_v44 }
 0xd5f   : > { %3729 = vadd.xlane.f32.xlu0 %v3723_v45  ;;  %3904 = vmatpush1.bf16.msra.mxu1 %v5446_v37 }
 0xd60   : > { %3905 = vmatprep.subr.bf16.mxu1 %v5451_v3 }
 0xd63   : > { %3731 = vadd.xlane.f32.xlu0 %v3724_v49  ;;  %3906 = vmatpush1.bf16.msra.mxu1 %v5449_v5 }
 0xd64   : > { %3907 = vmatprep.subr.bf16.mxu1 %v5454_v57 }
 0xd67   : > { %3908 = vmatpush1.bf16.msra.mxu1 %v5452_v19 }
 0xd68   : > { %3909 = vmatprep.subr.bf16.mxu1 %v5457_v13 }
 0xd6b   : > { %3910 = vmatpush1.bf16.msra.mxu1 %v5455_v27 }
 0xd6c   : > { %3911 = vmatprep.subr.bf16.mxu1 %v5460_v7 }
 0xd6f   : > { %3912 = vmatpush1.bf16.msra.mxu1 %v5458_v62 }
 0xd70   : > { %3913 = vmatprep.subr.bf16.mxu1 %v5463_v4 }
 0xd73   : > { %3914 = vmatpush1.bf16.msra.mxu1 %v5461_v6 }
 0xd74   : > { %3915 = vmatprep.subr.bf16.mxu1 %v5466_v17 }
 0xd77   : > { %3916 = vmatpush1.bf16.msra.mxu1 %v5464_v54 }
 0xde8   : > { %v3726_v34 = vpop.xlane.xlu0 %3725 }
 0xde9   : > { %v3733_v55 = vmul.f32 0.0078125, %v3726_v34 }
 0xdea   : > { %v3728_v58 = vpop.xlane.xlu1 %3727 }
 0xdeb   : > { %v7098_v59 = vsub.f32 %v3721_v8, %v3733_v55  ;;  %v3734_v28 = vmul.f32 0.0078125, %v3728_v58 }
 0xdec   : > { %v3730_v32 = vpop.xlane.xlu0 %3729 }
 0xded   : > { %v7100_v9 = vsub.f32 %v3722_v44, %v3734_v28  ;;  %v3735_v52 = vmul.f32 0.0078125, %v3730_v32  ;;  %v3741_v24 = vmul.f32 %v7098_v59, %v7098_v59 }
 0xdef   : > { %v7104_v60 = vsub.f32 %v3723_v45, %v3735_v52  ;;  %3745 = vadd.xlane.f32.xlu1 %v3741_v24  ;;  %v3742_v40 = vmul.f32 %v7100_v9, %v7100_v9 }
 0xdf0   : > { %v3732_v43 = vpop.xlane.xlu0 %3731 }
 0xdf1   : > { %v3736_v18 = vmul.f32 0.0078125, %v3732_v43  ;;  %3747 = vadd.xlane.f32.xlu0 %v3742_v40  ;;  %v3743_v1 = vmul.f32 %v7104_v60, %v7104_v60  ;;  %v5479_v43 = vld [vmem:[%s7298_s23 + $0x70] sm:$0xff]  }
 0xdf3   : > { %v7110_v2 = vsub.f32 %v3724_v49, %v3736_v18  ;;  %3749 = vadd.xlane.f32.xlu1 %v3743_v1  ;;  %v5481_v18 = vld [vmem:[%s7298_s23 + $0x78] sm:$0xff]  }
 0xdf4   : > { %v5482_v1 = vld [vmem:[%s7298_s23 + $0x38] sm:$0xff]  }
 0xdf5   : > { %v3744_v48 = vmul.f32 %v7110_v2, %v7110_v2 }
 0xdf7   : > { %3751 = vadd.xlane.f32.xlu0 %v3744_v48 }
 0xe7c   : > { %v3746_v25 = vpop.xlane.xlu1 %3745 }
 0xe7d   : > { %v3753_v61 = vmul.f32 0.0078125, %v3746_v25 }
 0xe7e   : > { %v3748_v63 = vpop.xlane.xlu0 %3747 }
 0xe7f   : > { %v3757_v21 = vadd.f32 1e-05, %v3753_v61  ;;  %v3754_v11 = vmul.f32 0.0078125, %v3748_v63 }
 0xe80   : > { %v3750_v42 = vpop.xlane.xlu1 %3749 }
 0xe81   : > { %5621 = vrsqrt.f32 %v3757_v21  ;;  %v3758_v35 = vadd.f32 1e-05, %v3754_v11  ;;  %v3755_v22 = vmul.f32 0.0078125, %v3750_v42  ;;  %v4599_v42 = vld [vmem:[#allocation13] ss:$0 sm:$0xff] }
 0xe83   : > { %5623 = vrsqrt.f32 %v3758_v35  ;;  %v3759_v38 = vadd.f32 1e-05, %v3755_v22 }
 0xe84   : > { %v3752_v53 = vpop.xlane.xlu0 %3751 }
 0xe85   : > { %5625 = vrsqrt.f32 %v3759_v38  ;;  %v3756_v56 = vmul.f32 0.0078125, %v3752_v53 }
 0xe87   : > { %v3760_v46 = vadd.f32 1e-05, %v3756_v56 }
 0xe89   : > { %5627 = vrsqrt.f32 %v3760_v46 }
 0xe8b   : > { %v5622_v8 = vpop.eup %5621 }
 0xe8c   : > { %v3765_v44 = vmul.f32 %v5622_v8, %v7098_v59 }
 0xe8d   : > { %v5624_v45 = vpop.eup %5623 }
 0xe8e   : > { %v3766_v47 = vmul.f32 %v5624_v45, %v7100_v9  ;;  %v3776_v49 = vmul.f32 %v4581_v30, %v3765_v44 }
 0xe8f   : > { %v5626_v33 = vpop.eup %5625 }
 0xe90   : > { %v3777_v51 = vmul.f32 %v4581_v30, %v3766_v47  ;;  %v7185_v37 = vadd.f32 %v4582_v36, %v3776_v49  ;;  %v3767_v55 = vmul.f32 %v5626_v33, %v7104_v60  ;;  %v5478_v60 = vld [vmem:[%s7298_s23 + $0x28] sm:$0xff]  }
 0xe91   : > { %4769 = vmatpush3.bf16.msra.mxu0 %v5478_v60 }
 0xe92   : > { %v7187_v34 = vadd.f32 %v4582_v36, %v3777_v51  ;;  %v3778_v59 = vmul.f32 %v4581_v30, %v3767_v55  ;;  %4770 = vmatprep.subr.bf16.mxu0 %v5479_v43 }
 0xe93   : > { %v5628_v58 = vpop.eup %5627 }
 0xe94   : > { %v3791_v28 = vpack.c.bf16 %v7187_v34, %v7185_v37  ;;  %v3768_v32 = vmul.f32 %v5628_v58, %v7110_v2  ;;  %v7196_v24 = vadd.f32 %v4582_v36, %v3778_v59  ;;  %v3809_v2 = vld [vmem:[%s7299_s6] sm:$0x3] }
 0xe95   : > { %v3814_v48 = vrot.slane %v3809_v2, %v6436_v29  ;;  %v3818_v3 = vrot.slane %v3809_v2, %v6444_v31 }
 0xe96   : > { %3934 = vmatmul.mubr.bf16.vlgmr.msra.gmra.mrb[48].mxu1 %v3791_v28  ;;  %v3779_v52 = vmul.f32 %v4581_v30, %v3768_v32 }
 0xe97   : > { %3943 = vmatprep.mubr.bf16.mxu1 %v5961_v0  ;;  %v5480_v0 = vld [vmem:[%s7298_s23 + $0x30] sm:$0xff]  }
 0xe98   : > { %v7194_v9 = vadd.f32 %v4582_v36, %v3779_v52  ;;  %4771 = vmatpush3.bf16.msra.mxu0 %v5480_v0 }
 0xe99   : > { %4772 = vmatprep.subr.bf16.mxu0 %v5481_v18 }
 0xe9a   : > { %v3792_v40 = vpack.c.bf16 %v7194_v9, %v7196_v24 }
 0xe9c   : > { %4773 = vmatpush3.bf16.msra.mxu0 %v5482_v1 }
 0xe9e   : > { %3944 = vmatmul.mubr.bf16.gmra.mrb[52].mxu1 %v3792_v40 }
 0xf69   : > { %v3935_v5 = vpop.f32.mrb[48].mxu1 }
 0xf6a   : > { %v3936_v57 = vadd.f32 %v3935_v5, %v3814_v48  ;;  %v3937_v19 = vpop.f32.mrb[49].mxu1 }
 0xf6b   : > { %v3938_v13 = vadd.f32 %v3937_v19, %v3818_v3  ;;  %v3939_v27 = vpop.f32.mrb[50].mxu1 }
 0xf6c   : > { %v3940_v7 = vadd.f32 %v3939_v27, %v3814_v48  ;;  %v3941_v62 = vpop.f32.mrb[51].mxu1  ;;  %v3954_v6 = vmax.f32 %v3936_v57, 0.0 }
 0xf6d   : > { %v3942_v4 = vadd.f32 %v3941_v62, %v3818_v3  ;;  %v3955_v54 = vmax.f32 %v3938_v13, 0.0 }
 0xf6e   : > { %v3956_v17 = vmax.f32 %v3940_v7, 0.0 }
 0xf6f   : > { %v3957_v12 = vmax.f32 %v3942_v4, 0.0 }
 0xf70   : > { %v3962_v15 = vpack.c.bf16 %v3956_v17, %v3954_v6 }
 0xf71   : > { %v3963_v20 = vpack.c.bf16 %v3957_v12, %v3955_v54  ;;  %v3945_v16 = vpop.f32.mrb[52].mxu1 }
 0xf72   : > { %v3946_v23 = vadd.f32 %v3945_v16, %v3814_v48  ;;  %v3947_v50 = vpop.f32.mrb[53].mxu1  ;;  %v4616_v16 = vld [vmem:[#allocation15] ss:$0 sm:$0xff] }
 0xf73   : > { %v3948_v29 = vadd.f32 %v3947_v50, %v3818_v3  ;;  %v3949_v39 = vpop.f32.mrb[54].mxu1  ;;  %4133 = vmatprep.mubr.bf16.mxu0 %v3963_v20 }
 0xf74   : > { %v3950_v31 = vadd.f32 %v3949_v39, %v3814_v48  ;;  %v3951_v26 = vpop.f32.mrb[55].mxu1  ;;  %4134 = vmatmul.mubr.bf16.vlgmr.msra.gmra.mrb[48].mxu0 %v3962_v15  ;;  %v3958_v10 = vmax.f32 %v3946_v23, 0.0 }
 0xf75   : > { %v3952_v14 = vadd.f32 %v3951_v26, %v3818_v3  ;;  %v3959_v25 = vmax.f32 %v3948_v29, 0.0 }
 0xf76   : > { %v3960_v41 = vmax.f32 %v3950_v31, 0.0  ;;  %v4617_v31 = vld [vmem:[#allocation16] ss:$0 sm:$0xff] }
 0xf77   : > { %v3961_v61 = vmax.f32 %v3952_v14, 0.0 }
 0xf78   : > { %v3964_v63 = vpack.c.bf16 %v3960_v41, %v3958_v10 }
 0xf79   : > { %v3965_v21 = vpack.c.bf16 %v3961_v61, %v3959_v25 }
 0xf7b   : > { %4141 = vmatprep.mubr.bf16.mxu0 %v3965_v21 }
 0xf7c   : > { %4142 = vmatmul.mubr.bf16.gmra.mrb[52].mxu0 %v3964_v63 }
0x1047   : > { %v4774_v11 = vpop.f32.mrb[48].mxu0 }
0x1048   : > { %v4775_v35 = vpop.f32.mrb[49].mxu0 }
0x1049   : > { %v4776_v22 = vadd.f32 %v4775_v35, %v4774_v11  ;;  %v4777_v38 = vpop.f32.mrb[50].mxu0 }
0x104a   : > { %v4778_v53 = vpop.f32.mrb[51].mxu0 }
0x104b   : > { %v4136_v56 = vadd.f32 %v4776_v22, %v4599_v42  ;;  %v4779_v46 = vadd.f32 %v4778_v53, %v4777_v38 }
0x104d   : > { %v4139_v8 = vadd.f32 %v4779_v46, %v4599_v42  ;;  %v4150_v30 = vadd.f32 %v4136_v56, %v7185_v37 }
0x104f   : > { %4154 = vadd.xlane.f32.xlu1 %v4150_v30  ;;  %v4780_v44 = vpop.f32.mrb[52].mxu0  ;;  %v4151_v45 = vadd.f32 %v4139_v8, %v7187_v34 }
0x1050   : > { %v4781_v47 = vpop.f32.mrb[53].mxu0 }
0x1051   : > { %v4782_v49 = vadd.f32 %v4781_v47, %v4780_v44  ;;  %4156 = vadd.xlane.f32.xlu0 %v4151_v45  ;;  %v4783_v33 = vpop.f32.mrb[54].mxu0 }
0x1052   : > { %v4784_v36 = vpop.f32.mrb[55].mxu0 }
0x1053   : > { %v4144_v51 = vadd.f32 %v4782_v49, %v4599_v42  ;;  %v4785_v55 = vadd.f32 %v4784_v36, %v4783_v33 }
0x1055   : > { %v4147_v58 = vadd.f32 %v4785_v55, %v4599_v42  ;;  %v4152_v28 = vadd.f32 %v4144_v51, %v7196_v24 }
0x1057   : > { %4158 = vadd.xlane.f32.xlu1 %v4152_v28  ;;  %v4153_v32 = vadd.f32 %v4147_v58, %v7194_v9 }
0x1059   : > { %4160 = vadd.xlane.f32.xlu0 %v4153_v32 }
0x10dc   : > { %v4155_v59 = vpop.xlane.xlu1 %4154 }
0x10dd   : > { %v4162_v37 = vmul.f32 0.0078125, %v4155_v59 }
0x10de   : > { %v4157_v52 = vpop.xlane.xlu0 %4156 }
0x10df   : > { %v4166_v40 = vsub.f32 %v4150_v30, %v4162_v37  ;;  %v4163_v60 = vmul.f32 0.0078125, %v4157_v52 }
0x10e1   : > { %v4167_v34 = vsub.f32 %v4151_v45, %v4163_v60  ;;  %v4170_v43 = vmul.f32 %v4166_v40, %v4166_v40 }
0x10e3   : > { %4174 = vadd.xlane.f32.xlu1 %v4170_v43  ;;  %v4171_v0 = vmul.f32 %v4167_v34, %v4167_v34 }
0x10e4   : > { %v4159_v18 = vpop.xlane.xlu1 %4158 }
0x10e5   : > { %v4164_v1 = vmul.f32 0.0078125, %v4159_v18  ;;  %4176 = vadd.xlane.f32.xlu0 %v4171_v0 }
0x10e6   : > { %v4161_v2 = vpop.xlane.xlu0 %4160 }
0x10e7   : > { %v4168_v48 = vsub.f32 %v4152_v28, %v4164_v1  ;;  %v4165_v3 = vmul.f32 0.0078125, %v4161_v2 }
0x10e9   : > { %v4169_v24 = vsub.f32 %v4153_v32, %v4165_v3  ;;  %v4172_v5 = vmul.f32 %v4168_v48, %v4168_v48 }
0x10eb   : > { %4178 = vadd.xlane.f32.xlu1 %v4172_v5  ;;  %v4173_v9 = vmul.f32 %v4169_v24, %v4169_v24 }
0x10ed   : > { %4180 = vadd.xlane.f32.xlu0 %v4173_v9 }
0x1170   : > { %v4175_v57 = vpop.xlane.xlu1 %4174 }
0x1171   : > { %v4182_v19 = vmul.f32 0.0078125, %v4175_v57 }
0x1172   : > { %v4177_v13 = vpop.xlane.xlu0 %4176 }
0x1173   : > { %v4186_v27 = vadd.f32 1e-05, %v4182_v19  ;;  %v4183_v7 = vmul.f32 0.0078125, %v4177_v13 }
0x1175   : > { %5629 = vrsqrt.f32 %v4186_v27  ;;  %v4187_v62 = vadd.f32 1e-05, %v4183_v7 }
0x1177   : > { %5631 = vrsqrt.f32 %v4187_v62 }
0x1178   : > { %v4179_v4 = vpop.xlane.xlu1 %4178 }
0x1179   : > { %v4184_v6 = vmul.f32 0.0078125, %v4179_v4 }
0x117a   : > { %v4181_v17 = vpop.xlane.xlu0 %4180 }
0x117b   : > { %v4188_v54 = vadd.f32 1e-05, %v4184_v6  ;;  %v4185_v12 = vmul.f32 0.0078125, %v4181_v17 }
0x117d   : > { %5633 = vrsqrt.f32 %v4188_v54  ;;  %v4189_v15 = vadd.f32 1e-05, %v4185_v12 }
0x117f   : > { %v5630_v20 = vpop.eup %5629  ;;  %5635 = vrsqrt.f32 %v4189_v15 }
0x1180   : > { %v4194_v23 = vmul.f32 %v5630_v20, %v4166_v40 }
0x1181   : > { %v5632_v50 = vpop.eup %5631 }
0x1182   : > { %v4205_v29 = vmul.f32 %v4616_v16, %v4194_v23  ;;  %v4195_v39 = vmul.f32 %v5632_v50, %v4167_v34 }
0x1184   : > { %v4206_v26 = vmul.f32 %v4616_v16, %v4195_v39  ;;  %v4216_v14 = vadd.f32 %v4617_v31, %v4205_v29 }
0x1186   : > { %v4217_v10 = vadd.f32 %v4617_v31, %v4206_v26 }
0x1187   : > { %v5634_v41 = vpop.eup %5633 }
0x1188   : > { %v4634_v25 = vpack.c.bf16 %v4217_v10, %v4216_v14  ;;  %v4196_v61 = vmul.f32 %v5634_v41, %v4168_v48 }
0x1189   : > { %v5636_v63 = vpop.eup %5635 }
0x118a   : > { %4635 = vst [vmem:[%s829_s9] sm:$0xff] %v4634_v25   ;;  %v4207_v21 = vmul.f32 %v4616_v16, %v4196_v61  ;;  %v4197_v11 = vmul.f32 %v5636_v63, %v4169_v24 }
0x118c   : > { %v4208_v42 = vmul.f32 %v4616_v16, %v4197_v11  ;;  %v4218_v35 = vadd.f32 %v4617_v31, %v4207_v21 }
0x118e   : > { %v4219_v22 = vadd.f32 %v4617_v31, %v4208_v42 }
0x1190   : > { %v4639_v38 = vpack.c.bf16 %v4219_v22, %v4218_v35 }
0x1192   : > { %4641 = vst [vmem:[%s829_s9 + $0x8] sm:$0xff] %v4639_v38  }
0x1193 PF: > { %s7301_s3 = sld [smem:[#allocation24_spill]] }
0x1199   : > { %s38_s3 = sadd.s32 1, %s7301_s3  }
0x119a   : > { %p35_p1 = scmp.ge.s32.totalorder %s38_s3, 4  }
0x119c   :  { %37 = sbr.rel (!%p35_p1) target bundleno = 18 (0x12), region = 188 }
0x11a3   :  { %4261 = vsyncpa [#allocation3], 1 }
0x11a4   :  { %4263 = vsyncpa [#allocation3 + $0x1], 1 }
0x11a5   :  { %4264 = vsyncpa [#allocation5], 1 }
0x11a6   :  { %4265 = vsyncpa [#allocation8], 1 }
0x11a7   :  { %4266 = vsyncpa [#allocation11], 1 }
0x11a8   :  { %4267 = vsyncpa [#allocation14], 1 }
0x11a9   :  { %4268 = vsyncpa [#allocation17], 1 }

</bundles_post_ra>
